<compile_context>
chip_gen: v7x
topology: tpu7x:2x2x1
jax: 0.10.0
libtpu: 0.0.40
codegen_flags: <defaults>
</compile_context>

<pallas_src>
import functools

import numpy as np
import jax
import jax.numpy as jnp
from jax.experimental import pallas as pl
from jax.experimental.pallas import tpu as pltpu

# ----------------------------- config (synthetic, DFormer-Tiny-like) -------------------------
CHANNELS = [32, 64, 128, 256]   # DFormer-Tiny channel contract
EMBED_DIM = 64                  # cfg.decoder_embed_dim
NUM_CLASSES = 4                 # cfg.num_classes
BN_EPS = 1e-5
LANE_TILE = 2048                # tile of the H*W lane axis for the final upsample / store


# ----------------------------- trace-time constant operators (numpy) -------------------------
def _interp_matrix_np(n_in, n_out):
    """Row-interpolation matrix matching F.interpolate(mode='bilinear', align_corners=False)."""
    R = np.zeros((n_out, n_in), np.float32)
    scale = n_in / n_out
    for d in range(n_out):
        src = (d + 0.5) * scale - 0.5
        src = max(src, 0.0)
        i0 = min(int(np.floor(src)), n_in - 1)
        i1 = min(i0 + 1, n_in - 1)
        l1 = src - i0
        R[d, i0] += 1.0 - l1
        R[d, i1] += l1
    return R


@functools.lru_cache(maxsize=None)
def _kron_resize_matrix_T(h, w, H, W):
    """Transposed 2-D bilinear resize operator: (h*w, H*W), f32.  Columns of the untransposed
    operator (rows here) sum to exactly 1.0."""
    return np.ascontiguousarray(np.kron(_interp_matrix_np(h, H), _interp_matrix_np(w, W)).T)


@functools.lru_cache(maxsize=None)
def _s2d_select_matrices_T(h, w, r=2):
    """Transposed 0/1 selection operators implementing space_to_depth(r) as matmuls.
    g[k] has shape (h*w, (h//r)*(w//r)); column o of block k = di*r+dj selects input pixel
    (oi*r+di, oj*r+dj) for output pixel o = oi*(w//r)+oj."""
    ho, wo = h // r, w // r
    g = np.zeros((r * r, h * w, ho * wo), np.float32)
    for di in range(r):
        for dj in range(r):
            k = di * r + dj
            for oi in range(ho):
                for oj in range(wo):
                    g[k, (oi * r + di) * w + (oj * r + dj), oi * wo + oj] = 1.0
    return g


# ----------------------------- the fused forward kernel --------------------------------------
def _fused_forward_kernel(
    x0_ref,                                   # (1, 96, hw1) bf16  stage-0 patches, channel-major
    w0_ref, b0_ref,                           # (32, 96) bf16, (32, 1) f32
    g1_ref, w1_ref, b1_ref,                   # (4, hw1, hw1/4) bf16, (4, 64, 32) bf16, (64, 1)
    g2_ref, w2_ref, b2_ref,                   # (4, hw1/4, hw1/16), (4, 128, 64), (128, 1)
    g3_ref, w3_ref, b3_ref,                   # (4, hw1/16, hw1/64), (4, 256, 128), (256, 1)
    l1_ref, lb1_ref, l2_ref, lb2_ref,         # per-scale decoder linears (E, C_i) f32 + (E, 1)
    l3_ref, lb3_ref, l4_ref, lb4_ref,
    mk2_ref, mk3_ref, mk4_ref,                # transposed bilinear resize ops to 1/4 res, f32
    wf_ref, bf_ref,                           # (E, 4E) f32 (BN folded), (E, 1) f32
    wp_ref, bp_ref,                           # (num_classes, E) f32, (num_classes, 1) f32
    mkf_ref,                                  # (hw1, lane_tile) f32  final-resize tile
    out_ref,                                  # (1, num_classes, lane_tile) f32
    logits_sc,                                # scratch (num_classes, hw1) f32
    cat_sc,                                   # scratch (4E, hw1) f32
):
    t = pl.program_id(1)

    @pl.when(t == 0)
    def _compute_logits():
        # ---------- encoder (channel-major: activations are (C, pixels)) ----------
        x0 = x0_ref[0]                                                      # (96, hw1) bf16
        y = jnp.dot(w0_ref[...], x0, preferred_element_type=jnp.float32)
        c1 = jnp.maximum(y + b0_ref[...], 0.0).astype(jnp.bfloat16)         # (32, hw1)

        def stage(prev, g_ref, w_ref, b_ref):
            # space_to_depth(2) as 4 selection matmuls (VMEM/vreg resident, no reshape /
            # transpose), fused with the stage linear + folded-BN + ReLU.
            acc = None
            for k in range(4):
                sel = jnp.dot(prev, g_ref[k],
                              preferred_element_type=jnp.float32).astype(jnp.bfloat16)
                part = jnp.dot(w_ref[k], sel, preferred_element_type=jnp.float32)
                acc = part if acc is None else acc + part
            return jnp.maximum(acc + b_ref[...], 0.0).astype(jnp.bfloat16)

        c2 = stage(c1, g1_ref, w1_ref, b1_ref)                              # (64,  hw1/4)
        c3 = stage(c2, g2_ref, w2_ref, b2_ref)                              # (128, hw1/16)
        c4 = stage(c3, g3_ref, w3_ref, b3_ref)                              # (256, hw1/64)

        # ---------- MLPDecoder: per-scale linear + bilinear resize to 1/4 res ----------
        def proj(c, l_ref, lb_ref):
            return jnp.dot(l_ref[...], c.astype(jnp.float32),
                           preferred_element_type=jnp.float32) + lb_ref[...]

        p1 = proj(c1, l1_ref, lb1_ref)                                      # (E, hw1)
        p2 = jnp.dot(proj(c2, l2_ref, lb2_ref), mk2_ref[...],
                     preferred_element_type=jnp.float32)                    # (E, hw1)
        p3 = jnp.dot(proj(c3, l3_ref, lb3_ref), mk3_ref[...],
                     preferred_element_type=jnp.float32)
        p4 = jnp.dot(proj(c4, l4_ref, lb4_ref), mk4_ref[...],
                     preferred_element_type=jnp.float32)

        # fuse: torch.cat([_c4,_c3,_c2,_c1], dim=1) -> 1x1 conv (BN folded) + ReLU.  The
        # channel concat is 4 row-offset stores into VMEM scratch -> a single K=4E MXU dot.
        E = p4.shape[0]
        cat_sc[pl.ds(0 * E, E), :] = p4
        cat_sc[pl.ds(1 * E, E), :] = p3
        cat_sc[pl.ds(2 * E, E), :] = p2
        cat_sc[pl.ds(3 * E, E), :] = p1
        fused = jnp.maximum(
            jnp.dot(wf_ref[...], cat_sc[...], preferred_element_type=jnp.float32)
            + bf_ref[...], 0.0)
        # dropout(p=0.1) is identity in eval mode.
        logits_sc[...] = (jnp.dot(wp_ref[...], fused, preferred_element_type=jnp.float32)
                          + bp_ref[...])                                    # (num_classes, hw1)

    # ---------- final bilinear upsample to input resolution, lane-dense (C, H*W) tile ----------
    out_ref[0] = jnp.dot(logits_sc[...], mkf_ref[...], preferred_element_type=jnp.float32)


# ----------------------------- param helpers --------------------------------------------------
def fold_bn(w, b, bn, eps=BN_EPS):
    """Fold eval-mode BatchNorm into a preceding (in, out) linear."""
    scale = bn["gamma"] / jnp.sqrt(bn["var"] + eps)
    return w * scale[None, :], (b - bn["mean"]) * scale + bn["beta"]


def _bn_params(c):
    return dict(gamma=jnp.ones((c,), jnp.float32), beta=jnp.zeros((c,), jnp.float32),
                mean=jnp.zeros((c,), jnp.float32), var=jnp.ones((c,), jnp.float32))


def _kaiming(key, fan_in, fan_out):
    # kaiming_normal_, mode='fan_in', nonlinearity='relu' (as in init_weight)
    std = np.sqrt(2.0 / fan_in)
    return jax.random.normal(key, (fan_in, fan_out), jnp.float32) * std


def init_params(key):
    params = {}
    keys = iter(jax.random.split(key, 12))
    enc_in = [6 * 16, CHANNELS[0] * 4, CHANNELS[1] * 4, CHANNELS[2] * 4]
    for i in range(4):
        params[f"enc{i}_w"] = _kaiming(next(keys), enc_in[i], CHANNELS[i])
        params[f"enc{i}_b"] = jnp.zeros((CHANNELS[i],), jnp.float32)
        params[f"enc{i}_bn"] = _bn_params(CHANNELS[i])
    for name, cin in zip(["c1", "c2", "c3", "c4"], CHANNELS):
        params[f"lin_{name}_w"] = _kaiming(next(keys), cin, EMBED_DIM)
        params[f"lin_{name}_b"] = jnp.zeros((EMBED_DIM,), jnp.float32)
    params["fuse_w"] = _kaiming(next(keys), 4 * EMBED_DIM, EMBED_DIM)
    params["fuse_bn"] = _bn_params(EMBED_DIM)
    params["pred_w"] = _kaiming(next(keys), EMBED_DIM, NUM_CLASSES)
    params["pred_b"] = jnp.zeros((NUM_CLASSES,), jnp.float32)
    return params


# ----------------------------- EncoderDecoder.forward (label=None path) ----------------------
def _encoder_decoder_forward(params, rgb_nchw, modal_nchw):
    N, _, H, W = rgb_nchw.shape
    assert H % 32 == 0 and W % 32 == 0
    h1, w1 = H // 4, W // 4                       # 1/4 resolution (= c1 / decoder resolution)
    hw1 = h1 * w1
    HW = H * W
    lane_tile = LANE_TILE if (HW >= LANE_TILE and HW % LANE_TILE == 0) else HW
    n_tiles = HW // lane_tile
    E, C = EMBED_DIM, NUM_CLASSES

    # ---- RGB-D fusion + stage-0 space_to_depth(4), channel-major (one fused XLA pass) ----
    x = jnp.concatenate([rgb_nchw, modal_nchw], axis=1)                     # (N, 6, H, W)
    x0 = x.reshape(N, 6, h1, 4, w1, 4)
    x0 = jnp.transpose(x0, (0, 1, 3, 5, 2, 4)).reshape(N, 6 * 16, hw1).astype(jnp.bfloat16)

    # ---- encoder weights: fold BN, transpose to (out, in), split space_to_depth blocks ----
    w0, b0 = fold_bn(params["enc0_w"], params["enc0_b"], params["enc0_bn"])
    w0T = w0.T.astype(jnp.bfloat16)                                         # (32, 96)
    b0c = b0.reshape(-1, 1).astype(jnp.float32)
    enc_wT, enc_bc = [], []
    for i in range(1, 4):
        wi, bi = fold_bn(params[f"enc{i}_w"], params[f"enc{i}_b"], params[f"enc{i}_bn"])
        wi = jnp.transpose(wi.reshape(4, CHANNELS[i - 1], CHANNELS[i]), (0, 2, 1))
        enc_wT.append(wi.astype(jnp.bfloat16))                              # (4, C_i, C_{i-1})
        enc_bc.append(bi.reshape(-1, 1).astype(jnp.float32))
    # space_to_depth(2) selection operators for stages 1..3 (trace-time constants)
    g1 = jnp.asarray(_s2d_select_matrices_T(h1, w1), jnp.bfloat16)
    g2 = jnp.asarray(_s2d_select_matrices_T(h1 // 2, w1 // 2), jnp.bfloat16)
    g3 = jnp.asarray(_s2d_select_matrices_T(h1 // 4, w1 // 4), jnp.bfloat16)

    # ---- decoder weights (all f32; matmul cost negligible at these sizes) ----
    lin = []
    for name in ["c1", "c2", "c3", "c4"]:
        lin.append((params[f"lin_{name}_w"].T.astype(jnp.float32),
                    params[f"lin_{name}_b"].reshape(-1, 1).astype(jnp.float32)))
    mk2 = jnp.asarray(_kron_resize_matrix_T(h1 // 2, w1 // 2, h1, w1), jnp.float32)
    mk3 = jnp.asarray(_kron_resize_matrix_T(h1 // 4, w1 // 4, h1, w1), jnp.float32)
    mk4 = jnp.asarray(_kron_resize_matrix_T(h1 // 8, w1 // 8, h1, w1), jnp.float32)
    mkf = jnp.asarray(_kron_resize_matrix_T(h1, w1, H, W), jnp.float32)     # (hw1, H*W)

    wf, bf = fold_bn(params["fuse_w"], jnp.zeros((E,), jnp.float32), params["fuse_bn"])
    wfT = wf.T.astype(jnp.float32)                                          # (E, 4E): [c4,c3,c2,c1]
    bfc = bf.reshape(-1, 1).astype(jnp.float32)
    wpT = params["pred_w"].T.astype(jnp.float32)                            # (C, E)
    bpc = params["pred_b"].reshape(-1, 1).astype(jnp.float32)

    # ---- single fused pallas_call over (batch, HW lane tiles) ----
    def _bcast_spec(shape):
        rank = len(shape)
        return pl.BlockSpec(tuple(shape), lambda n, t, _r=rank: (0,) * _r)

    weight_ops = [
        w0T, b0c,
        g1, enc_wT[0], enc_bc[0],
        g2, enc_wT[1], enc_bc[1],
        g3, enc_wT[2], enc_bc[2],
        lin[0][0], lin[0][1], lin[1][0], lin[1][1], lin[2][0], lin[2][1], lin[3][0], lin[3][1],
        mk2, mk3, mk4,
        wfT, bfc, wpT, bpc,
    ]
    in_specs = ([pl.BlockSpec((1, 6 * 16, hw1), lambda n, t: (n, 0, 0))]
                + [_bcast_spec(a.shape) for a in weight_ops]
                + [pl.BlockSpec((hw1, lane_tile), lambda n, t: (0, t))])
    operands = [x0] + weight_ops + [mkf]

    out = pl.pallas_call(
        _fused_forward_kernel,
        out_shape=jax.ShapeDtypeStruct((N, C, HW), jnp.float32),
        grid_spec=pltpu.PrefetchScalarGridSpec(
            num_scalar_prefetch=0,
            grid=(N, n_tiles),
            in_specs=in_specs,
            out_specs=pl.BlockSpec((1, C, lane_tile), lambda n, t: (n, 0, t)),
            scratch_shapes=[
                pltpu.VMEM((C, hw1), jnp.float32),        # logits at 1/4 res
                pltpu.VMEM((4 * E, hw1), jnp.float32),    # channel-concat buffer
            ],
        ),
        compiler_params=pltpu.CompilerParams(
            dimension_semantics=("parallel", "arbitrary")),
    )(*operands)

    # (N, C, H*W) is already NCHW-major: a free metadata reshape, no transpose.
    return out.reshape(N, C, H, W)


encoder_decoder_forward = jax.jit(_encoder_decoder_forward)


# ----------------------------- main ----------------------------------------------------------
if __name__ == "__main__":
    key = jax.random.PRNGKey(0)
    k_rgb, k_modal, k_params = jax.random.split(key, 3)

    N, H, W = 2, 64, 64
    rgb = jax.random.normal(k_rgb, (N, 3, H, W), jnp.float32)       # NCHW like PyTorch
    modal_x = jax.random.normal(k_modal, (N, 3, H, W), jnp.float32)

    params = init_params(k_params)
    out = encoder_decoder_forward(params, rgb, modal_x)
    out = jax.block_until_ready(out)

    assert out.shape == (N, NUM_CLASSES, H, W), out.shape
    assert bool(jnp.all(jnp.isfinite(out)))
    print("KERNEL_OK")
</pallas_src>

<mosaic_0001>
module attributes {stable_mosaic.version = 11 : i64} {
  func.func @_fused_forward_kernel(%arg0: i32, %arg1: i32, %arg2: memref<1x96x256xbf16, #tpu.memory_space<vmem>>, %arg3: memref<32x96xbf16, #tpu.memory_space<vmem>>, %arg4: memref<32x1xf32, #tpu.memory_space<vmem>>, %arg5: memref<4x256x64xbf16, #tpu.memory_space<vmem>>, %arg6: memref<4x64x32xbf16, #tpu.memory_space<vmem>>, %arg7: memref<64x1xf32, #tpu.memory_space<vmem>>, %arg8: memref<4x64x16xbf16, #tpu.memory_space<vmem>>, %arg9: memref<4x128x64xbf16, #tpu.memory_space<vmem>>, %arg10: memref<128x1xf32, #tpu.memory_space<vmem>>, %arg11: memref<4x16x4xbf16, #tpu.memory_space<vmem>>, %arg12: memref<4x256x128xbf16, #tpu.memory_space<vmem>>, %arg13: memref<256x1xf32, #tpu.memory_space<vmem>>, %arg14: memref<64x32xf32, #tpu.memory_space<vmem>>, %arg15: memref<64x1xf32, #tpu.memory_space<vmem>>, %arg16: memref<64x64xf32, #tpu.memory_space<vmem>>, %arg17: memref<64x1xf32, #tpu.memory_space<vmem>>, %arg18: memref<64x128xf32, #tpu.memory_space<vmem>>, %arg19: memref<64x1xf32, #tpu.memory_space<vmem>>, %arg20: memref<64x256xf32, #tpu.memory_space<vmem>>, %arg21: memref<64x1xf32, #tpu.memory_space<vmem>>, %arg22: memref<64x256xf32, #tpu.memory_space<vmem>>, %arg23: memref<16x256xf32, #tpu.memory_space<vmem>>, %arg24: memref<4x256xf32, #tpu.memory_space<vmem>>, %arg25: memref<64x256xf32, #tpu.memory_space<vmem>>, %arg26: memref<64x1xf32, #tpu.memory_space<vmem>>, %arg27: memref<4x64xf32, #tpu.memory_space<vmem>>, %arg28: memref<4x1xf32, #tpu.memory_space<vmem>>, %arg29: memref<256x2048xf32, #tpu.memory_space<vmem>>, %arg30: memref<1x4x2048xf32, #tpu.memory_space<vmem>>, %arg31: memref<4x256xf32, #tpu.memory_space<vmem>>, %arg32: memref<256x256xf32, #tpu.memory_space<vmem>>) attributes {dimension_semantics = [#tpu.dimension_semantics<parallel>, #tpu.dimension_semantics<arbitrary>], iteration_bounds = array<i64: 2, 2>, scalar_prefetch = 0 : i64, scratch_operands = 2 : i64, tpu.core_type = #tpu.core_type<tc>, window_params = [{transform_indices = @transform_0, window_bounds = array<i64: 1, 96, 256>}, {pipeline_mode = #tpu.pipeline_mode<synchronous>, transform_indices = @transform_1, window_bounds = array<i64: 32, 96>}, {pipeline_mode = #tpu.pipeline_mode<synchronous>, transform_indices = @transform_2, window_bounds = array<i64: 32, 1>}, {pipeline_mode = #tpu.pipeline_mode<synchronous>, transform_indices = @transform_3, window_bounds = array<i64: 4, 256, 64>}, {pipeline_mode = #tpu.pipeline_mode<synchronous>, transform_indices = @transform_4, window_bounds = array<i64: 4, 64, 32>}, {pipeline_mode = #tpu.pipeline_mode<synchronous>, transform_indices = @transform_5, window_bounds = array<i64: 64, 1>}, {pipeline_mode = #tpu.pipeline_mode<synchronous>, transform_indices = @transform_6, window_bounds = array<i64: 4, 64, 16>}, {pipeline_mode = #tpu.pipeline_mode<synchronous>, transform_indices = @transform_7, window_bounds = array<i64: 4, 128, 64>}, {pipeline_mode = #tpu.pipeline_mode<synchronous>, transform_indices = @transform_8, window_bounds = array<i64: 128, 1>}, {pipeline_mode = #tpu.pipeline_mode<synchronous>, transform_indices = @transform_9, window_bounds = array<i64: 4, 16, 4>}, {pipeline_mode = #tpu.pipeline_mode<synchronous>, transform_indices = @transform_10, window_bounds = array<i64: 4, 256, 128>}, {pipeline_mode = #tpu.pipeline_mode<synchronous>, transform_indices = @transform_11, window_bounds = array<i64: 256, 1>}, {pipeline_mode = #tpu.pipeline_mode<synchronous>, transform_indices = @transform_12, window_bounds = array<i64: 64, 32>}, {pipeline_mode = #tpu.pipeline_mode<synchronous>, transform_indices = @transform_13, window_bounds = array<i64: 64, 1>}, {pipeline_mode = #tpu.pipeline_mode<synchronous>, transform_indices = @transform_14, window_bounds = array<i64: 64, 64>}, {pipeline_mode = #tpu.pipeline_mode<synchronous>, transform_indices = @transform_15, window_bounds = array<i64: 64, 1>}, {pipeline_mode = #tpu.pipeline_mode<synchronous>, transform_indices = @transform_16, window_bounds = array<i64: 64, 128>}, {pipeline_mode = #tpu.pipeline_mode<synchronous>, transform_indices = @transform_17, window_bounds = array<i64: 64, 1>}, {pipeline_mode = #tpu.pipeline_mode<synchronous>, transform_indices = @transform_18, window_bounds = array<i64: 64, 256>}, {pipeline_mode = #tpu.pipeline_mode<synchronous>, transform_indices = @transform_19, window_bounds = array<i64: 64, 1>}, {pipeline_mode = #tpu.pipeline_mode<synchronous>, transform_indices = @transform_20, window_bounds = array<i64: 64, 256>}, {pipeline_mode = #tpu.pipeline_mode<synchronous>, transform_indices = @transform_21, window_bounds = array<i64: 16, 256>}, {pipeline_mode = #tpu.pipeline_mode<synchronous>, transform_indices = @transform_22, window_bounds = array<i64: 4, 256>}, {pipeline_mode = #tpu.pipeline_mode<synchronous>, transform_indices = @transform_23, window_bounds = array<i64: 64, 256>}, {pipeline_mode = #tpu.pipeline_mode<synchronous>, transform_indices = @transform_24, window_bounds = array<i64: 64, 1>}, {pipeline_mode = #tpu.pipeline_mode<synchronous>, transform_indices = @transform_25, window_bounds = array<i64: 4, 64>}, {pipeline_mode = #tpu.pipeline_mode<synchronous>, transform_indices = @transform_26, window_bounds = array<i64: 4, 1>}, {transform_indices = @transform_27, window_bounds = array<i64: 256, 2048>}, {transform_indices = @transform_28, window_bounds = array<i64: 1, 4, 2048>}]} {
    %c0_i32 = arith.constant 0 : i32
    %0 = arith.cmpi eq, %arg1, %c0_i32 : i32
    %1 = arith.extui %0 : i1 to i32
    %c0_i32_0 = arith.constant 0 : i32
    %2 = arith.cmpi ne, %1, %c0_i32_0 : i32
    scf.if %2 {
      %c0_7 = arith.constant 0 : index
      %c0_8 = arith.constant 0 : index
      %c0_9 = arith.constant 0 : index
      %9 = vector.load %arg2[%c0_7, %c0_8, %c0_9] : memref<1x96x256xbf16, #tpu.memory_space<vmem>>, vector<1x96x256xbf16>
      %10 = vector.shape_cast %9 : vector<1x96x256xbf16> to vector<96x256xbf16>
      %c0_10 = arith.constant 0 : index
      %c0_11 = arith.constant 0 : index
      %11 = vector.load %arg3[%c0_10, %c0_11] : memref<32x96xbf16, #tpu.memory_space<vmem>>, vector<32x96xbf16>
      %cst_12 = arith.constant dense<0.000000e+00> : vector<32x256xf32>
      %12 = tpu.matmul %11, %10, %cst_12 {dimension_numbers = #tpu.dot_dimension_numbers<[1], [0], [0], [1], [0, 0, 1, 1], [], []>} : vector<32x96xbf16>, vector<96x256xbf16>, vector<32x256xf32> -> vector<32x256xf32>
      %c0_13 = arith.constant 0 : index
      %c0_14 = arith.constant 0 : index
      %13 = vector.load %arg4[%c0_13, %c0_14] : memref<32x1xf32, #tpu.memory_space<vmem>>, vector<32x1xf32>
      %14 = vector.broadcast %13 : vector<32x1xf32> to vector<32x256xf32>
      %15 = arith.addf %12, %14 : vector<32x256xf32>
      %cst_15 = arith.constant 0.000000e+00 : f32
      %16 = vector.broadcast %cst_15 : f32 to vector<32x256xf32>
      %17 = arith.maximumf %15, %16 : vector<32x256xf32>
      %18 = arith.truncf %17 : vector<32x256xf32> to vector<32x256xbf16>
      %c0_16 = arith.constant 0 : index
      %c0_17 = arith.constant 0 : index
      %c0_18 = arith.constant 0 : index
      %19 = vector.load %arg5[%c0_16, %c0_17, %c0_18] : memref<4x256x64xbf16, #tpu.memory_space<vmem>>, vector<1x256x64xbf16>
      %20 = vector.shape_cast %19 : vector<1x256x64xbf16> to vector<256x64xbf16>
      %cst_19 = arith.constant dense<0.000000e+00> : vector<32x64xf32>
      %21 = tpu.matmul %18, %20, %cst_19 {dimension_numbers = #tpu.dot_dimension_numbers<[1], [0], [0], [1], [0, 0, 1, 1], [], []>} : vector<32x256xbf16>, vector<256x64xbf16>, vector<32x64xf32> -> vector<32x64xf32>
      %22 = arith.truncf %21 : vector<32x64xf32> to vector<32x64xbf16>
      %c0_20 = arith.constant 0 : index
      %c0_21 = arith.constant 0 : index
      %c0_22 = arith.constant 0 : index
      %23 = vector.load %arg6[%c0_20, %c0_21, %c0_22] : memref<4x64x32xbf16, #tpu.memory_space<vmem>>, vector<1x64x32xbf16>
      %24 = vector.shape_cast %23 : vector<1x64x32xbf16> to vector<64x32xbf16>
      %cst_23 = arith.constant dense<0.000000e+00> : vector<64x64xf32>
      %25 = tpu.matmul %24, %22, %cst_23 {dimension_numbers = #tpu.dot_dimension_numbers<[1], [0], [0], [1], [0, 0, 1, 1], [], []>} : vector<64x32xbf16>, vector<32x64xbf16>, vector<64x64xf32> -> vector<64x64xf32>
      %c1 = arith.constant 1 : index
      %c0_24 = arith.constant 0 : index
      %c0_25 = arith.constant 0 : index
      %26 = vector.load %arg5[%c1, %c0_24, %c0_25] : memref<4x256x64xbf16, #tpu.memory_space<vmem>>, vector<1x256x64xbf16>
      %27 = vector.shape_cast %26 : vector<1x256x64xbf16> to vector<256x64xbf16>
      %cst_26 = arith.constant dense<0.000000e+00> : vector<32x64xf32>
      %28 = tpu.matmul %18, %27, %cst_26 {dimension_numbers = #tpu.dot_dimension_numbers<[1], [0], [0], [1], [0, 0, 1, 1], [], []>} : vector<32x256xbf16>, vector<256x64xbf16>, vector<32x64xf32> -> vector<32x64xf32>
      %29 = arith.truncf %28 : vector<32x64xf32> to vector<32x64xbf16>
      %c1_27 = arith.constant 1 : index
      %c0_28 = arith.constant 0 : index
      %c0_29 = arith.constant 0 : index
      %30 = vector.load %arg6[%c1_27, %c0_28, %c0_29] : memref<4x64x32xbf16, #tpu.memory_space<vmem>>, vector<1x64x32xbf16>
      %31 = vector.shape_cast %30 : vector<1x64x32xbf16> to vector<64x32xbf16>
      %cst_30 = arith.constant dense<0.000000e+00> : vector<64x64xf32>
      %32 = tpu.matmul %31, %29, %cst_30 {dimension_numbers = #tpu.dot_dimension_numbers<[1], [0], [0], [1], [0, 0, 1, 1], [], []>} : vector<64x32xbf16>, vector<32x64xbf16>, vector<64x64xf32> -> vector<64x64xf32>
      %33 = arith.addf %25, %32 : vector<64x64xf32>
      %c2 = arith.constant 2 : index
      %c0_31 = arith.constant 0 : index
      %c0_32 = arith.constant 0 : index
      %34 = vector.load %arg5[%c2, %c0_31, %c0_32] : memref<4x256x64xbf16, #tpu.memory_space<vmem>>, vector<1x256x64xbf16>
      %35 = vector.shape_cast %34 : vector<1x256x64xbf16> to vector<256x64xbf16>
      %cst_33 = arith.constant dense<0.000000e+00> : vector<32x64xf32>
      %36 = tpu.matmul %18, %35, %cst_33 {dimension_numbers = #tpu.dot_dimension_numbers<[1], [0], [0], [1], [0, 0, 1, 1], [], []>} : vector<32x256xbf16>, vector<256x64xbf16>, vector<32x64xf32> -> vector<32x64xf32>
      %37 = arith.truncf %36 : vector<32x64xf32> to vector<32x64xbf16>
      %c2_34 = arith.constant 2 : index
      %c0_35 = arith.constant 0 : index
      %c0_36 = arith.constant 0 : index
      %38 = vector.load %arg6[%c2_34, %c0_35, %c0_36] : memref<4x64x32xbf16, #tpu.memory_space<vmem>>, vector<1x64x32xbf16>
      %39 = vector.shape_cast %38 : vector<1x64x32xbf16> to vector<64x32xbf16>
      %cst_37 = arith.constant dense<0.000000e+00> : vector<64x64xf32>
      %40 = tpu.matmul %39, %37, %cst_37 {dimension_numbers = #tpu.dot_dimension_numbers<[1], [0], [0], [1], [0, 0, 1, 1], [], []>} : vector<64x32xbf16>, vector<32x64xbf16>, vector<64x64xf32> -> vector<64x64xf32>
      %41 = arith.addf %33, %40 : vector<64x64xf32>
      %c3 = arith.constant 3 : index
      %c0_38 = arith.constant 0 : index
      %c0_39 = arith.constant 0 : index
      %42 = vector.load %arg5[%c3, %c0_38, %c0_39] : memref<4x256x64xbf16, #tpu.memory_space<vmem>>, vector<1x256x64xbf16>
      %43 = vector.shape_cast %42 : vector<1x256x64xbf16> to vector<256x64xbf16>
      %cst_40 = arith.constant dense<0.000000e+00> : vector<32x64xf32>
      %44 = tpu.matmul %18, %43, %cst_40 {dimension_numbers = #tpu.dot_dimension_numbers<[1], [0], [0], [1], [0, 0, 1, 1], [], []>} : vector<32x256xbf16>, vector<256x64xbf16>, vector<32x64xf32> -> vector<32x64xf32>
      %45 = arith.truncf %44 : vector<32x64xf32> to vector<32x64xbf16>
      %c3_41 = arith.constant 3 : index
      %c0_42 = arith.constant 0 : index
      %c0_43 = arith.constant 0 : index
      %46 = vector.load %arg6[%c3_41, %c0_42, %c0_43] : memref<4x64x32xbf16, #tpu.memory_space<vmem>>, vector<1x64x32xbf16>
      %47 = vector.shape_cast %46 : vector<1x64x32xbf16> to vector<64x32xbf16>
      %cst_44 = arith.constant dense<0.000000e+00> : vector<64x64xf32>
      %48 = tpu.matmul %47, %45, %cst_44 {dimension_numbers = #tpu.dot_dimension_numbers<[1], [0], [0], [1], [0, 0, 1, 1], [], []>} : vector<64x32xbf16>, vector<32x64xbf16>, vector<64x64xf32> -> vector<64x64xf32>
      %49 = arith.addf %41, %48 : vector<64x64xf32>
      %c0_45 = arith.constant 0 : index
      %c0_46 = arith.constant 0 : index
      %50 = vector.load %arg7[%c0_45, %c0_46] : memref<64x1xf32, #tpu.memory_space<vmem>>, vector<64x1xf32>
      %51 = vector.broadcast %50 : vector<64x1xf32> to vector<64x64xf32>
      %52 = arith.addf %49, %51 : vector<64x64xf32>
      %cst_47 = arith.constant 0.000000e+00 : f32
      %53 = vector.broadcast %cst_47 : f32 to vector<64x64xf32>
      %54 = arith.maximumf %52, %53 : vector<64x64xf32>
      %55 = arith.truncf %54 : vector<64x64xf32> to vector<64x64xbf16>
      %c0_48 = arith.constant 0 : index
      %c0_49 = arith.constant 0 : index
      %c0_50 = arith.constant 0 : index
      %56 = vector.load %arg8[%c0_48, %c0_49, %c0_50] : memref<4x64x16xbf16, #tpu.memory_space<vmem>>, vector<1x64x16xbf16>
      %57 = vector.shape_cast %56 : vector<1x64x16xbf16> to vector<64x16xbf16>
      %cst_51 = arith.constant dense<0.000000e+00> : vector<64x16xf32>
      %58 = tpu.matmul %55, %57, %cst_51 {dimension_numbers = #tpu.dot_dimension_numbers<[1], [0], [0], [1], [0, 0, 1, 1], [], []>} : vector<64x64xbf16>, vector<64x16xbf16>, vector<64x16xf32> -> vector<64x16xf32>
      %59 = arith.truncf %58 : vector<64x16xf32> to vector<64x16xbf16>
      %c0_52 = arith.constant 0 : index
      %c0_53 = arith.constant 0 : index
      %c0_54 = arith.constant 0 : index
      %60 = vector.load %arg9[%c0_52, %c0_53, %c0_54] : memref<4x128x64xbf16, #tpu.memory_space<vmem>>, vector<1x128x64xbf16>
      %61 = vector.shape_cast %60 : vector<1x128x64xbf16> to vector<128x64xbf16>
      %cst_55 = arith.constant dense<0.000000e+00> : vector<128x16xf32>
      %62 = tpu.matmul %61, %59, %cst_55 {dimension_numbers = #tpu.dot_dimension_numbers<[1], [0], [0], [1], [0, 0, 1, 1], [], []>} : vector<128x64xbf16>, vector<64x16xbf16>, vector<128x16xf32> -> vector<128x16xf32>
      %c1_56 = arith.constant 1 : index
      %c0_57 = arith.constant 0 : index
      %c0_58 = arith.constant 0 : index
      %63 = vector.load %arg8[%c1_56, %c0_57, %c0_58] : memref<4x64x16xbf16, #tpu.memory_space<vmem>>, vector<1x64x16xbf16>
      %64 = vector.shape_cast %63 : vector<1x64x16xbf16> to vector<64x16xbf16>
      %cst_59 = arith.constant dense<0.000000e+00> : vector<64x16xf32>
      %65 = tpu.matmul %55, %64, %cst_59 {dimension_numbers = #tpu.dot_dimension_numbers<[1], [0], [0], [1], [0, 0, 1, 1], [], []>} : vector<64x64xbf16>, vector<64x16xbf16>, vector<64x16xf32> -> vector<64x16xf32>
      %66 = arith.truncf %65 : vector<64x16xf32> to vector<64x16xbf16>
      %c1_60 = arith.constant 1 : index
      %c0_61 = arith.constant 0 : index
      %c0_62 = arith.constant 0 : index
      %67 = vector.load %arg9[%c1_60, %c0_61, %c0_62] : memref<4x128x64xbf16, #tpu.memory_space<vmem>>, vector<1x128x64xbf16>
      %68 = vector.shape_cast %67 : vector<1x128x64xbf16> to vector<128x64xbf16>
      %cst_63 = arith.constant dense<0.000000e+00> : vector<128x16xf32>
      %69 = tpu.matmul %68, %66, %cst_63 {dimension_numbers = #tpu.dot_dimension_numbers<[1], [0], [0], [1], [0, 0, 1, 1], [], []>} : vector<128x64xbf16>, vector<64x16xbf16>, vector<128x16xf32> -> vector<128x16xf32>
      %70 = arith.addf %62, %69 : vector<128x16xf32>
      %c2_64 = arith.constant 2 : index
      %c0_65 = arith.constant 0 : index
      %c0_66 = arith.constant 0 : index
      %71 = vector.load %arg8[%c2_64, %c0_65, %c0_66] : memref<4x64x16xbf16, #tpu.memory_space<vmem>>, vector<1x64x16xbf16>
      %72 = vector.shape_cast %71 : vector<1x64x16xbf16> to vector<64x16xbf16>
      %cst_67 = arith.constant dense<0.000000e+00> : vector<64x16xf32>
      %73 = tpu.matmul %55, %72, %cst_67 {dimension_numbers = #tpu.dot_dimension_numbers<[1], [0], [0], [1], [0, 0, 1, 1], [], []>} : vector<64x64xbf16>, vector<64x16xbf16>, vector<64x16xf32> -> vector<64x16xf32>
      %74 = arith.truncf %73 : vector<64x16xf32> to vector<64x16xbf16>
      %c2_68 = arith.constant 2 : index
      %c0_69 = arith.constant 0 : index
      %c0_70 = arith.constant 0 : index
      %75 = vector.load %arg9[%c2_68, %c0_69, %c0_70] : memref<4x128x64xbf16, #tpu.memory_space<vmem>>, vector<1x128x64xbf16>
      %76 = vector.shape_cast %75 : vector<1x128x64xbf16> to vector<128x64xbf16>
      %cst_71 = arith.constant dense<0.000000e+00> : vector<128x16xf32>
      %77 = tpu.matmul %76, %74, %cst_71 {dimension_numbers = #tpu.dot_dimension_numbers<[1], [0], [0], [1], [0, 0, 1, 1], [], []>} : vector<128x64xbf16>, vector<64x16xbf16>, vector<128x16xf32> -> vector<128x16xf32>
      %78 = arith.addf %70, %77 : vector<128x16xf32>
      %c3_72 = arith.constant 3 : index
      %c0_73 = arith.constant 0 : index
      %c0_74 = arith.constant 0 : index
      %79 = vector.load %arg8[%c3_72, %c0_73, %c0_74] : memref<4x64x16xbf16, #tpu.memory_space<vmem>>, vector<1x64x16xbf16>
      %80 = vector.shape_cast %79 : vector<1x64x16xbf16> to vector<64x16xbf16>
      %cst_75 = arith.constant dense<0.000000e+00> : vector<64x16xf32>
      %81 = tpu.matmul %55, %80, %cst_75 {dimension_numbers = #tpu.dot_dimension_numbers<[1], [0], [0], [1], [0, 0, 1, 1], [], []>} : vector<64x64xbf16>, vector<64x16xbf16>, vector<64x16xf32> -> vector<64x16xf32>
      %82 = arith.truncf %81 : vector<64x16xf32> to vector<64x16xbf16>
      %c3_76 = arith.constant 3 : index
      %c0_77 = arith.constant 0 : index
      %c0_78 = arith.constant 0 : index
      %83 = vector.load %arg9[%c3_76, %c0_77, %c0_78] : memref<4x128x64xbf16, #tpu.memory_space<vmem>>, vector<1x128x64xbf16>
      %84 = vector.shape_cast %83 : vector<1x128x64xbf16> to vector<128x64xbf16>
      %cst_79 = arith.constant dense<0.000000e+00> : vector<128x16xf32>
      %85 = tpu.matmul %84, %82, %cst_79 {dimension_numbers = #tpu.dot_dimension_numbers<[1], [0], [0], [1], [0, 0, 1, 1], [], []>} : vector<128x64xbf16>, vector<64x16xbf16>, vector<128x16xf32> -> vector<128x16xf32>
      %86 = arith.addf %78, %85 : vector<128x16xf32>
      %c0_80 = arith.constant 0 : index
      %c0_81 = arith.constant 0 : index
      %87 = vector.load %arg10[%c0_80, %c0_81] : memref<128x1xf32, #tpu.memory_space<vmem>>, vector<128x1xf32>
      %88 = vector.broadcast %87 : vector<128x1xf32> to vector<128x16xf32>
      %89 = arith.addf %86, %88 : vector<128x16xf32>
      %cst_82 = arith.constant 0.000000e+00 : f32
      %90 = vector.broadcast %cst_82 : f32 to vector<128x16xf32>
      %91 = arith.maximumf %89, %90 : vector<128x16xf32>
      %92 = arith.truncf %91 : vector<128x16xf32> to vector<128x16xbf16>
      %c0_83 = arith.constant 0 : index
      %c0_84 = arith.constant 0 : index
      %c0_85 = arith.constant 0 : index
      %93 = vector.load %arg11[%c0_83, %c0_84, %c0_85] : memref<4x16x4xbf16, #tpu.memory_space<vmem>>, vector<1x16x4xbf16>
      %94 = vector.shape_cast %93 : vector<1x16x4xbf16> to vector<16x4xbf16>
      %cst_86 = arith.constant dense<0.000000e+00> : vector<128x4xf32>
      %95 = tpu.matmul %92, %94, %cst_86 {dimension_numbers = #tpu.dot_dimension_numbers<[1], [0], [0], [1], [0, 0, 1, 1], [], []>} : vector<128x16xbf16>, vector<16x4xbf16>, vector<128x4xf32> -> vector<128x4xf32>
      %96 = arith.truncf %95 : vector<128x4xf32> to vector<128x4xbf16>
      %c0_87 = arith.constant 0 : index
      %c0_88 = arith.constant 0 : index
      %c0_89 = arith.constant 0 : index
      %97 = vector.load %arg12[%c0_87, %c0_88, %c0_89] : memref<4x256x128xbf16, #tpu.memory_space<vmem>>, vector<1x256x128xbf16>
      %98 = vector.shape_cast %97 : vector<1x256x128xbf16> to vector<256x128xbf16>
      %cst_90 = arith.constant dense<0.000000e+00> : vector<256x4xf32>
      %99 = tpu.matmul %98, %96, %cst_90 {dimension_numbers = #tpu.dot_dimension_numbers<[1], [0], [0], [1], [0, 0, 1, 1], [], []>} : vector<256x128xbf16>, vector<128x4xbf16>, vector<256x4xf32> -> vector<256x4xf32>
      %c1_91 = arith.constant 1 : index
      %c0_92 = arith.constant 0 : index
      %c0_93 = arith.constant 0 : index
      %100 = vector.load %arg11[%c1_91, %c0_92, %c0_93] : memref<4x16x4xbf16, #tpu.memory_space<vmem>>, vector<1x16x4xbf16>
      %101 = vector.shape_cast %100 : vector<1x16x4xbf16> to vector<16x4xbf16>
      %cst_94 = arith.constant dense<0.000000e+00> : vector<128x4xf32>
      %102 = tpu.matmul %92, %101, %cst_94 {dimension_numbers = #tpu.dot_dimension_numbers<[1], [0], [0], [1], [0, 0, 1, 1], [], []>} : vector<128x16xbf16>, vector<16x4xbf16>, vector<128x4xf32> -> vector<128x4xf32>
      %103 = arith.truncf %102 : vector<128x4xf32> to vector<128x4xbf16>
      %c1_95 = arith.constant 1 : index
      %c0_96 = arith.constant 0 : index
      %c0_97 = arith.constant 0 : index
      %104 = vector.load %arg12[%c1_95, %c0_96, %c0_97] : memref<4x256x128xbf16, #tpu.memory_space<vmem>>, vector<1x256x128xbf16>
      %105 = vector.shape_cast %104 : vector<1x256x128xbf16> to vector<256x128xbf16>
      %cst_98 = arith.constant dense<0.000000e+00> : vector<256x4xf32>
      %106 = tpu.matmul %105, %103, %cst_98 {dimension_numbers = #tpu.dot_dimension_numbers<[1], [0], [0], [1], [0, 0, 1, 1], [], []>} : vector<256x128xbf16>, vector<128x4xbf16>, vector<256x4xf32> -> vector<256x4xf32>
      %107 = arith.addf %99, %106 : vector<256x4xf32>
      %c2_99 = arith.constant 2 : index
      %c0_100 = arith.constant 0 : index
      %c0_101 = arith.constant 0 : index
      %108 = vector.load %arg11[%c2_99, %c0_100, %c0_101] : memref<4x16x4xbf16, #tpu.memory_space<vmem>>, vector<1x16x4xbf16>
      %109 = vector.shape_cast %108 : vector<1x16x4xbf16> to vector<16x4xbf16>
      %cst_102 = arith.constant dense<0.000000e+00> : vector<128x4xf32>
      %110 = tpu.matmul %92, %109, %cst_102 {dimension_numbers = #tpu.dot_dimension_numbers<[1], [0], [0], [1], [0, 0, 1, 1], [], []>} : vector<128x16xbf16>, vector<16x4xbf16>, vector<128x4xf32> -> vector<128x4xf32>
      %111 = arith.truncf %110 : vector<128x4xf32> to vector<128x4xbf16>
      %c2_103 = arith.constant 2 : index
      %c0_104 = arith.constant 0 : index
      %c0_105 = arith.constant 0 : index
      %112 = vector.load %arg12[%c2_103, %c0_104, %c0_105] : memref<4x256x128xbf16, #tpu.memory_space<vmem>>, vector<1x256x128xbf16>
      %113 = vector.shape_cast %112 : vector<1x256x128xbf16> to vector<256x128xbf16>
      %cst_106 = arith.constant dense<0.000000e+00> : vector<256x4xf32>
      %114 = tpu.matmul %113, %111, %cst_106 {dimension_numbers = #tpu.dot_dimension_numbers<[1], [0], [0], [1], [0, 0, 1, 1], [], []>} : vector<256x128xbf16>, vector<128x4xbf16>, vector<256x4xf32> -> vector<256x4xf32>
      %115 = arith.addf %107, %114 : vector<256x4xf32>
      %c3_107 = arith.constant 3 : index
      %c0_108 = arith.constant 0 : index
      %c0_109 = arith.constant 0 : index
      %116 = vector.load %arg11[%c3_107, %c0_108, %c0_109] : memref<4x16x4xbf16, #tpu.memory_space<vmem>>, vector<1x16x4xbf16>
      %117 = vector.shape_cast %116 : vector<1x16x4xbf16> to vector<16x4xbf16>
      %cst_110 = arith.constant dense<0.000000e+00> : vector<128x4xf32>
      %118 = tpu.matmul %92, %117, %cst_110 {dimension_numbers = #tpu.dot_dimension_numbers<[1], [0], [0], [1], [0, 0, 1, 1], [], []>} : vector<128x16xbf16>, vector<16x4xbf16>, vector<128x4xf32> -> vector<128x4xf32>
      %119 = arith.truncf %118 : vector<128x4xf32> to vector<128x4xbf16>
      %c3_111 = arith.constant 3 : index
      %c0_112 = arith.constant 0 : index
      %c0_113 = arith.constant 0 : index
      %120 = vector.load %arg12[%c3_111, %c0_112, %c0_113] : memref<4x256x128xbf16, #tpu.memory_space<vmem>>, vector<1x256x128xbf16>
      %121 = vector.shape_cast %120 : vector<1x256x128xbf16> to vector<256x128xbf16>
      %cst_114 = arith.constant dense<0.000000e+00> : vector<256x4xf32>
      %122 = tpu.matmul %121, %119, %cst_114 {dimension_numbers = #tpu.dot_dimension_numbers<[1], [0], [0], [1], [0, 0, 1, 1], [], []>} : vector<256x128xbf16>, vector<128x4xbf16>, vector<256x4xf32> -> vector<256x4xf32>
      %123 = arith.addf %115, %122 : vector<256x4xf32>
      %c0_115 = arith.constant 0 : index
      %c0_116 = arith.constant 0 : index
      %124 = vector.load %arg13[%c0_115, %c0_116] : memref<256x1xf32, #tpu.memory_space<vmem>>, vector<256x1xf32>
      %125 = vector.broadcast %124 : vector<256x1xf32> to vector<256x4xf32>
      %126 = arith.addf %123, %125 : vector<256x4xf32>
      %cst_117 = arith.constant 0.000000e+00 : f32
      %127 = vector.broadcast %cst_117 : f32 to vector<256x4xf32>
      %128 = arith.maximumf %126, %127 : vector<256x4xf32>
      %129 = arith.truncf %128 : vector<256x4xf32> to vector<256x4xbf16>
      %c0_118 = arith.constant 0 : index
      %c0_119 = arith.constant 0 : index
      %130 = vector.load %arg14[%c0_118, %c0_119] : memref<64x32xf32, #tpu.memory_space<vmem>>, vector<64x32xf32>
      %131 = arith.extf %18 : vector<32x256xbf16> to vector<32x256xf32>
      %cst_120 = arith.constant dense<0.000000e+00> : vector<64x256xf32>
      %132 = tpu.matmul %130, %131, %cst_120 {dimension_numbers = #tpu.dot_dimension_numbers<[1], [0], [0], [1], [0, 0, 1, 1], [], []>} : vector<64x32xf32>, vector<32x256xf32>, vector<64x256xf32> -> vector<64x256xf32>
      %c0_121 = arith.constant 0 : index
      %c0_122 = arith.constant 0 : index
      %133 = vector.load %arg15[%c0_121, %c0_122] : memref<64x1xf32, #tpu.memory_space<vmem>>, vector<64x1xf32>
      %134 = vector.broadcast %133 : vector<64x1xf32> to vector<64x256xf32>
      %135 = arith.addf %132, %134 : vector<64x256xf32>
      %c0_123 = arith.constant 0 : index
      %c0_124 = arith.constant 0 : index
      %136 = vector.load %arg16[%c0_123, %c0_124] : memref<64x64xf32, #tpu.memory_space<vmem>>, vector<64x64xf32>
      %137 = arith.extf %55 : vector<64x64xbf16> to vector<64x64xf32>
      %cst_125 = arith.constant dense<0.000000e+00> : vector<64x64xf32>
      %138 = tpu.matmul %136, %137, %cst_125 {dimension_numbers = #tpu.dot_dimension_numbers<[1], [0], [0], [1], [0, 0, 1, 1], [], []>} : vector<64x64xf32>, vector<64x64xf32>, vector<64x64xf32> -> vector<64x64xf32>
      %c0_126 = arith.constant 0 : index
      %c0_127 = arith.constant 0 : index
      %139 = vector.load %arg17[%c0_126, %c0_127] : memref<64x1xf32, #tpu.memory_space<vmem>>, vector<64x1xf32>
      %140 = vector.broadcast %139 : vector<64x1xf32> to vector<64x64xf32>
      %141 = arith.addf %138, %140 : vector<64x64xf32>
      %c0_128 = arith.constant 0 : index
      %c0_129 = arith.constant 0 : index
      %142 = vector.load %arg22[%c0_128, %c0_129] : memref<64x256xf32, #tpu.memory_space<vmem>>, vector<64x256xf32>
      %cst_130 = arith.constant dense<0.000000e+00> : vector<64x256xf32>
      %143 = tpu.matmul %141, %142, %cst_130 {dimension_numbers = #tpu.dot_dimension_numbers<[1], [0], [0], [1], [0, 0, 1, 1], [], []>} : vector<64x64xf32>, vector<64x256xf32>, vector<64x256xf32> -> vector<64x256xf32>
      %c0_131 = arith.constant 0 : index
      %c0_132 = arith.constant 0 : index
      %144 = vector.load %arg18[%c0_131, %c0_132] : memref<64x128xf32, #tpu.memory_space<vmem>>, vector<64x128xf32>
      %145 = arith.extf %92 : vector<128x16xbf16> to vector<128x16xf32>
      %cst_133 = arith.constant dense<0.000000e+00> : vector<64x16xf32>
      %146 = tpu.matmul %144, %145, %cst_133 {dimension_numbers = #tpu.dot_dimension_numbers<[1], [0], [0], [1], [0, 0, 1, 1], [], []>} : vector<64x128xf32>, vector<128x16xf32>, vector<64x16xf32> -> vector<64x16xf32>
      %c0_134 = arith.constant 0 : index
      %c0_135 = arith.constant 0 : index
      %147 = vector.load %arg19[%c0_134, %c0_135] : memref<64x1xf32, #tpu.memory_space<vmem>>, vector<64x1xf32>
      %148 = vector.broadcast %147 : vector<64x1xf32> to vector<64x16xf32>
      %149 = arith.addf %146, %148 : vector<64x16xf32>
      %c0_136 = arith.constant 0 : index
      %c0_137 = arith.constant 0 : index
      %150 = vector.load %arg23[%c0_136, %c0_137] : memref<16x256xf32, #tpu.memory_space<vmem>>, vector<16x256xf32>
      %cst_138 = arith.constant dense<0.000000e+00> : vector<64x256xf32>
      %151 = tpu.matmul %149, %150, %cst_138 {dimension_numbers = #tpu.dot_dimension_numbers<[1], [0], [0], [1], [0, 0, 1, 1], [], []>} : vector<64x16xf32>, vector<16x256xf32>, vector<64x256xf32> -> vector<64x256xf32>
      %c0_139 = arith.constant 0 : index
      %c0_140 = arith.constant 0 : index
      %152 = vector.load %arg20[%c0_139, %c0_140] : memref<64x256xf32, #tpu.memory_space<vmem>>, vector<64x256xf32>
      %153 = arith.extf %129 : vector<256x4xbf16> to vector<256x4xf32>
      %cst_141 = arith.constant dense<0.000000e+00> : vector<64x4xf32>
      %154 = tpu.matmul %152, %153, %cst_141 {dimension_numbers = #tpu.dot_dimension_numbers<[1], [0], [0], [1], [0, 0, 1, 1], [], []>} : vector<64x256xf32>, vector<256x4xf32>, vector<64x4xf32> -> vector<64x4xf32>
      %c0_142 = arith.constant 0 : index
      %c0_143 = arith.constant 0 : index
      %155 = vector.load %arg21[%c0_142, %c0_143] : memref<64x1xf32, #tpu.memory_space<vmem>>, vector<64x1xf32>
      %156 = vector.broadcast %155 : vector<64x1xf32> to vector<64x4xf32>
      %157 = arith.addf %154, %156 : vector<64x4xf32>
      %c0_144 = arith.constant 0 : index
      %c0_145 = arith.constant 0 : index
      %158 = vector.load %arg24[%c0_144, %c0_145] : memref<4x256xf32, #tpu.memory_space<vmem>>, vector<4x256xf32>
      %cst_146 = arith.constant dense<0.000000e+00> : vector<64x256xf32>
      %159 = tpu.matmul %157, %158, %cst_146 {dimension_numbers = #tpu.dot_dimension_numbers<[1], [0], [0], [1], [0, 0, 1, 1], [], []>} : vector<64x4xf32>, vector<4x256xf32>, vector<64x256xf32> -> vector<64x256xf32>
      %c0_147 = arith.constant 0 : index
      %c0_148 = arith.constant 0 : index
      %160 = vector.load %arg32[%c0_147, %c0_148] : memref<256x256xf32, #tpu.memory_space<vmem>>, vector<64x256xf32>
      tpu.vector_store %arg32[%c0_147, %c0_148], %159 {strides = array<i32>} : memref<256x256xf32, #tpu.memory_space<vmem>>, vector<64x256xf32>,
      %c64 = arith.constant 64 : index
      %c0_149 = arith.constant 0 : index
      %161 = vector.load %arg32[%c64, %c0_149] : memref<256x256xf32, #tpu.memory_space<vmem>>, vector<64x256xf32>
      tpu.vector_store %arg32[%c64, %c0_149], %151 {strides = array<i32>} : memref<256x256xf32, #tpu.memory_space<vmem>>, vector<64x256xf32>,
      %c128 = arith.constant 128 : index
      %c0_150 = arith.constant 0 : index
      %162 = vector.load %arg32[%c128, %c0_150] : memref<256x256xf32, #tpu.memory_space<vmem>>, vector<64x256xf32>
      tpu.vector_store %arg32[%c128, %c0_150], %143 {strides = array<i32>} : memref<256x256xf32, #tpu.memory_space<vmem>>, vector<64x256xf32>,
      %c192 = arith.constant 192 : index
      %c0_151 = arith.constant 0 : index
      %163 = vector.load %arg32[%c192, %c0_151] : memref<256x256xf32, #tpu.memory_space<vmem>>, vector<64x256xf32>
      tpu.vector_store %arg32[%c192, %c0_151], %135 {strides = array<i32>} : memref<256x256xf32, #tpu.memory_space<vmem>>, vector<64x256xf32>,
      %c0_152 = arith.constant 0 : index
      %c0_153 = arith.constant 0 : index
      %164 = vector.load %arg25[%c0_152, %c0_153] : memref<64x256xf32, #tpu.memory_space<vmem>>, vector<64x256xf32>
      %c0_154 = arith.constant 0 : index
      %c0_155 = arith.constant 0 : index
      %165 = vector.load %arg32[%c0_154, %c0_155] : memref<256x256xf32, #tpu.memory_space<vmem>>, vector<256x256xf32>
      %cst_156 = arith.constant dense<0.000000e+00> : vector<64x256xf32>
      %166 = tpu.matmul %164, %165, %cst_156 {dimension_numbers = #tpu.dot_dimension_numbers<[1], [0], [0], [1], [0, 0, 1, 1], [], []>} : vector<64x256xf32>, vector<256x256xf32>, vector<64x256xf32> -> vector<64x256xf32>
      %c0_157 = arith.constant 0 : index
      %c0_158 = arith.constant 0 : index
      %167 = vector.load %arg26[%c0_157, %c0_158] : memref<64x1xf32, #tpu.memory_space<vmem>>, vector<64x1xf32>
      %168 = vector.broadcast %167 : vector<64x1xf32> to vector<64x256xf32>
      %169 = arith.addf %166, %168 : vector<64x256xf32>
      %cst_159 = arith.constant 0.000000e+00 : f32
      %170 = vector.broadcast %cst_159 : f32 to vector<64x256xf32>
      %171 = arith.maximumf %169, %170 : vector<64x256xf32>
      %c0_160 = arith.constant 0 : index
      %c0_161 = arith.constant 0 : index
      %172 = vector.load %arg27[%c0_160, %c0_161] : memref<4x64xf32, #tpu.memory_space<vmem>>, vector<4x64xf32>
      %cst_162 = arith.constant dense<0.000000e+00> : vector<4x256xf32>
      %173 = tpu.matmul %172, %171, %cst_162 {dimension_numbers = #tpu.dot_dimension_numbers<[1], [0], [0], [1], [0, 0, 1, 1], [], []>} : vector<4x64xf32>, vector<64x256xf32>, vector<4x256xf32> -> vector<4x256xf32>
      %c0_163 = arith.constant 0 : index
      %c0_164 = arith.constant 0 : index
      %174 = vector.load %arg28[%c0_163, %c0_164] : memref<4x1xf32, #tpu.memory_space<vmem>>, vector<4x1xf32>
      %175 = vector.broadcast %174 : vector<4x1xf32> to vector<4x256xf32>
      %176 = arith.addf %173, %175 : vector<4x256xf32>
      %c0_165 = arith.constant 0 : index
      %c0_166 = arith.constant 0 : index
      %177 = vector.load %arg31[%c0_165, %c0_166] : memref<4x256xf32, #tpu.memory_space<vmem>>, vector<4x256xf32>
      tpu.vector_store %arg31[%c0_165, %c0_166], %176 {strides = array<i32>} : memref<4x256xf32, #tpu.memory_space<vmem>>, vector<4x256xf32>,
    } else {
    }
    %c0 = arith.constant 0 : index
    %c0_1 = arith.constant 0 : index
    %3 = vector.load %arg31[%c0, %c0_1] : memref<4x256xf32, #tpu.memory_space<vmem>>, vector<4x256xf32>
    %c0_2 = arith.constant 0 : index
    %c0_3 = arith.constant 0 : index
    %4 = vector.load %arg29[%c0_2, %c0_3] : memref<256x2048xf32, #tpu.memory_space<vmem>>, vector<256x2048xf32>
    %cst = arith.constant dense<0.000000e+00> : vector<4x2048xf32>
    %5 = tpu.matmul %3, %4, %cst {dimension_numbers = #tpu.dot_dimension_numbers<[1], [0], [0], [1], [0, 0, 1, 1], [], []>} : vector<4x256xf32>, vector<256x2048xf32>, vector<4x2048xf32> -> vector<4x2048xf32>
    %c0_4 = arith.constant 0 : index
    %c0_5 = arith.constant 0 : index
    %c0_6 = arith.constant 0 : index
    %6 = vector.load %arg30[%c0_4, %c0_5, %c0_6] : memref<1x4x2048xf32, #tpu.memory_space<vmem>>, vector<1x4x2048xf32>
    %7 = vector.shape_cast %6 : vector<1x4x2048xf32> to vector<4x2048xf32>
    %8 = vector.shape_cast %5 : vector<4x2048xf32> to vector<1x4x2048xf32>
    tpu.vector_store %arg30[%c0_4, %c0_5, %c0_6], %8 {strides = array<i32>} : memref<1x4x2048xf32, #tpu.memory_space<vmem>>, vector<1x4x2048xf32>,
    return
  }
  func.func @transform_0(%arg0: i32, %arg1: i32) -> (i32, i32, i32) {
    %c0_i32 = arith.constant 0 : i32
    %c0_i32_0 = arith.constant 0 : i32
    %c0_i32_1 = arith.constant 0 : i32
    return %arg0, %c0_i32, %c0_i32_0 : i32, i32, i32
  }
  func.func @transform_1(%arg0: i32, %arg1: i32) -> (i32, i32) {
    %c0_i32 = arith.constant 0 : i32
    %c0_i32_0 = arith.constant 0 : i32
    %c0_i32_1 = arith.constant 0 : i32
    return %c0_i32, %c0_i32_0 : i32, i32
  }
  func.func @transform_2(%arg0: i32, %arg1: i32) -> (i32, i32) {
    %c0_i32 = arith.constant 0 : i32
    %c0_i32_0 = arith.constant 0 : i32
    %c0_i32_1 = arith.constant 0 : i32
    return %c0_i32, %c0_i32_0 : i32, i32
  }
  func.func @transform_3(%arg0: i32, %arg1: i32) -> (i32, i32, i32) {
    %c0_i32 = arith.constant 0 : i32
    %c0_i32_0 = arith.constant 0 : i32
    %c0_i32_1 = arith.constant 0 : i32
    %c0_i32_2 = arith.constant 0 : i32
    return %c0_i32, %c0_i32_0, %c0_i32_1 : i32, i32, i32
  }
  func.func @transform_4(%arg0: i32, %arg1: i32) -> (i32, i32, i32) {
    %c0_i32 = arith.constant 0 : i32
    %c0_i32_0 = arith.constant 0 : i32
    %c0_i32_1 = arith.constant 0 : i32
    %c0_i32_2 = arith.constant 0 : i32
    return %c0_i32, %c0_i32_0, %c0_i32_1 : i32, i32, i32
  }
  func.func @transform_5(%arg0: i32, %arg1: i32) -> (i32, i32) {
    %c0_i32 = arith.constant 0 : i32
    %c0_i32_0 = arith.constant 0 : i32
    %c0_i32_1 = arith.constant 0 : i32
    return %c0_i32, %c0_i32_0 : i32, i32
  }
  func.func @transform_6(%arg0: i32, %arg1: i32) -> (i32, i32, i32) {
    %c0_i32 = arith.constant 0 : i32
    %c0_i32_0 = arith.constant 0 : i32
    %c0_i32_1 = arith.constant 0 : i32
    %c0_i32_2 = arith.constant 0 : i32
    return %c0_i32, %c0_i32_0, %c0_i32_1 : i32, i32, i32
  }
  func.func @transform_7(%arg0: i32, %arg1: i32) -> (i32, i32, i32) {
    %c0_i32 = arith.constant 0 : i32
    %c0_i32_0 = arith.constant 0 : i32
    %c0_i32_1 = arith.constant 0 : i32
    %c0_i32_2 = arith.constant 0 : i32
    return %c0_i32, %c0_i32_0, %c0_i32_1 : i32, i32, i32
  }
  func.func @transform_8(%arg0: i32, %arg1: i32) -> (i32, i32) {
    %c0_i32 = arith.constant 0 : i32
    %c0_i32_0 = arith.constant 0 : i32
    %c0_i32_1 = arith.constant 0 : i32
    return %c0_i32, %c0_i32_0 : i32, i32
  }
  func.func @transform_9(%arg0: i32, %arg1: i32) -> (i32, i32, i32) {
    %c0_i32 = arith.constant 0 : i32
    %c0_i32_0 = arith.constant 0 : i32
    %c0_i32_1 = arith.constant 0 : i32
    %c0_i32_2 = arith.constant 0 : i32
    return %c0_i32, %c0_i32_0, %c0_i32_1 : i32, i32, i32
  }
  func.func @transform_10(%arg0: i32, %arg1: i32) -> (i32, i32, i32) {
    %c0_i32 = arith.constant 0 : i32
    %c0_i32_0 = arith.constant 0 : i32
    %c0_i32_1 = arith.constant 0 : i32
    %c0_i32_2 = arith.constant 0 : i32
    return %c0_i32, %c0_i32_0, %c0_i32_1 : i32, i32, i32
  }
  func.func @transform_11(%arg0: i32, %arg1: i32) -> (i32, i32) {
    %c0_i32 = arith.constant 0 : i32
    %c0_i32_0 = arith.constant 0 : i32
    %c0_i32_1 = arith.constant 0 : i32
    return %c0_i32, %c0_i32_0 : i32, i32
  }
  func.func @transform_12(%arg0: i32, %arg1: i32) -> (i32, i32) {
    %c0_i32 = arith.constant 0 : i32
    %c0_i32_0 = arith.constant 0 : i32
    %c0_i32_1 = arith.constant 0 : i32
    return %c0_i32, %c0_i32_0 : i32, i32
  }
  func.func @transform_13(%arg0: i32, %arg1: i32) -> (i32, i32) {
    %c0_i32 = arith.constant 0 : i32
    %c0_i32_0 = arith.constant 0 : i32
    %c0_i32_1 = arith.constant 0 : i32
    return %c0_i32, %c0_i32_0 : i32, i32
  }
  func.func @transform_14(%arg0: i32, %arg1: i32) -> (i32, i32) {
    %c0_i32 = arith.constant 0 : i32
    %c0_i32_0 = arith.constant 0 : i32
    %c0_i32_1 = arith.constant 0 : i32
    return %c0_i32, %c0_i32_0 : i32, i32
  }
  func.func @transform_15(%arg0: i32, %arg1: i32) -> (i32, i32) {
    %c0_i32 = arith.constant 0 : i32
    %c0_i32_0 = arith.constant 0 : i32
    %c0_i32_1 = arith.constant 0 : i32
    return %c0_i32, %c0_i32_0 : i32, i32
  }
  func.func @transform_16(%arg0: i32, %arg1: i32) -> (i32, i32) {
    %c0_i32 = arith.constant 0 : i32
    %c0_i32_0 = arith.constant 0 : i32
    %c0_i32_1 = arith.constant 0 : i32
    return %c0_i32, %c0_i32_0 : i32, i32
  }
  func.func @transform_17(%arg0: i32, %arg1: i32) -> (i32, i32) {
    %c0_i32 = arith.constant 0 : i32
    %c0_i32_0 = arith.constant 0 : i32
    %c0_i32_1 = arith.constant 0 : i32
    return %c0_i32, %c0_i32_0 : i32, i32
  }
  func.func @transform_18(%arg0: i32, %arg1: i32) -> (i32, i32) {
    %c0_i32 = arith.constant 0 : i32
    %c0_i32_0 = arith.constant 0 : i32
    %c0_i32_1 = arith.constant 0 : i32
    return %c0_i32, %c0_i32_0 : i32, i32
  }
  func.func @transform_19(%arg0: i32, %arg1: i32) -> (i32, i32) {
    %c0_i32 = arith.constant 0 : i32
    %c0_i32_0 = arith.constant 0 : i32
    %c0_i32_1 = arith.constant 0 : i32
    return %c0_i32, %c0_i32_0 : i32, i32
  }
  func.func @transform_20(%arg0: i32, %arg1: i32) -> (i32, i32) {
    %c0_i32 = arith.constant 0 : i32
    %c0_i32_0 = arith.constant 0 : i32
    %c0_i32_1 = arith.constant 0 : i32
    return %c0_i32, %c0_i32_0 : i32, i32
  }
  func.func @transform_21(%arg0: i32, %arg1: i32) -> (i32, i32) {
    %c0_i32 = arith.constant 0 : i32
    %c0_i32_0 = arith.constant 0 : i32
    %c0_i32_1 = arith.constant 0 : i32
    return %c0_i32, %c0_i32_0 : i32, i32
  }
  func.func @transform_22(%arg0: i32, %arg1: i32) -> (i32, i32) {
    %c0_i32 = arith.constant 0 : i32
    %c0_i32_0 = arith.constant 0 : i32
    %c0_i32_1 = arith.constant 0 : i32
    return %c0_i32, %c0_i32_0 : i32, i32
  }
  func.func @transform_23(%arg0: i32, %arg1: i32) -> (i32, i32) {
    %c0_i32 = arith.constant 0 : i32
    %c0_i32_0 = arith.constant 0 : i32
    %c0_i32_1 = arith.constant 0 : i32
    return %c0_i32, %c0_i32_0 : i32, i32
  }
  func.func @transform_24(%arg0: i32, %arg1: i32) -> (i32, i32) {
    %c0_i32 = arith.constant 0 : i32
    %c0_i32_0 = arith.constant 0 : i32
    %c0_i32_1 = arith.constant 0 : i32
    return %c0_i32, %c0_i32_0 : i32, i32
  }
  func.func @transform_25(%arg0: i32, %arg1: i32) -> (i32, i32) {
    %c0_i32 = arith.constant 0 : i32
    %c0_i32_0 = arith.constant 0 : i32
    %c0_i32_1 = arith.constant 0 : i32
    return %c0_i32, %c0_i32_0 : i32, i32
  }
  func.func @transform_26(%arg0: i32, %arg1: i32) -> (i32, i32) {
    %c0_i32 = arith.constant 0 : i32
    %c0_i32_0 = arith.constant 0 : i32
    %c0_i32_1 = arith.constant 0 : i32
    return %c0_i32, %c0_i32_0 : i32, i32
  }
  func.func @transform_27(%arg0: i32, %arg1: i32) -> (i32, i32) {
    %c0_i32 = arith.constant 0 : i32
    %c0_i32_0 = arith.constant 0 : i32
    return %c0_i32, %arg1 : i32, i32
  }
  func.func @transform_28(%arg0: i32, %arg1: i32) -> (i32, i32, i32) {
    %c0_i32 = arith.constant 0 : i32
    %c0_i32_0 = arith.constant 0 : i32
    return %arg0, %c0_i32, %arg1 : i32, i32, i32
  }
}

</mosaic_0001>

<bundles_post_ra>
// kernel: _encoder_decoder_forward.1
= control target key start
LH: loop header
LB: loop body
LE: loop exit
PB: predicated region body
PF: predicated region fallthrough
CT: control target
= control target key end

     0   :  { %s16108_s0 = inlined_call_operand.vmem [shape: bf16[2,96,256], index: 0, kind: input, shape index: {}]   ;;  %s16109_s1 = inlined_call_operand.vmem [shape: bf16[32,96], index: 1, kind: input, shape index: {}]   ;;  %s16110_s2 = inlined_call_operand.vmem [shape: f32[32,1], index: 2, kind: input, shape index: {}]   ;;  %s16111_s3 = inlined_call_operand.vmem [shape: bf16[4,256,64], index: 3, kind: input, shape index: {}]   ;;  %s16112_s4 = inlined_call_operand.vmem [shape: bf16[4,64,32], index: 4, kind: input, shape index: {}]   ;;  %s16113_s5 = inlined_call_operand.vmem [shape: f32[64,1], index: 5, kind: input, shape index: {}]   ;;  %s16114_s6 = inlined_call_operand.vmem [shape: bf16[4,64,16], index: 6, kind: input, shape index: {}]   ;;  %s16115_s7 = inlined_call_operand.vmem [shape: bf16[4,128,64], index: 7, kind: input, shape index: {}]   ;;  %s16116_s8 = inlined_call_operand.vmem [shape: f32[128,1], index: 8, kind: input, shape index: {}]   ;;  %s16117_s9 = inlined_call_operand.vmem [shape: bf16[4,16,4], index: 9, kind: input, shape index: {}]   ;;  %s16118_s10 = inlined_call_operand.vmem [shape: bf16[4,256,128], index: 10, kind: input, shape index: {}]   ;;  %s16119_s11 = inlined_call_operand.vmem [shape: f32[256,1], index: 11, kind: input, shape index: {}]   ;;  %s16120_s12 = inlined_call_operand.vmem [shape: f32[64,32], index: 12, kind: input, shape index: {}]   ;;  %s16121_s13 = inlined_call_operand.vmem [shape: f32[64,1], index: 13, kind: input, shape index: {}]   ;;  %s16122_s14 = inlined_call_operand.vmem [shape: f32[64,64], index: 14, kind: input, shape index: {}]   ;;  %s16123_s15 = inlined_call_operand.vmem [shape: f32[64,1], index: 15, kind: input, shape index: {}]   ;;  %s16124_s16 = inlined_call_operand.vmem [shape: f32[64,128], index: 16, kind: input, shape index: {}]   ;;  %s16125_s17 = inlined_call_operand.vmem [shape: f32[64,1], index: 17, kind: input, shape index: {}]   ;;  %s16126_s18 = inlined_call_operand.vmem [shape: f32[64,256], index: 18, kind: input, shape index: {}]   ;;  %s16127_s19 = inlined_call_operand.vmem [shape: f32[64,1], index: 19, kind: input, shape index: {}]   ;;  %s16128_s20 = inlined_call_operand.vmem [shape: f32[64,256], index: 20, kind: input, shape index: {}]   ;;  %s16129_s21 = inlined_call_operand.vmem [shape: f32[16,256], index: 21, kind: input, shape index: {}]   ;;  %s16130_s22 = inlined_call_operand.vmem [shape: f32[4,256], index: 22, kind: input, shape index: {}]   ;;  %s16131_s23 = inlined_call_operand.vmem [shape: f32[64,256], index: 23, kind: input, shape index: {}]   ;;  %s16132_s24 = inlined_call_operand.vmem [shape: f32[64,1], index: 24, kind: input, shape index: {}]   ;;  %s16133_s25 = inlined_call_operand.vmem [shape: f32[4,64], index: 25, kind: input, shape index: {}]   ;;  %s16134_s26 = inlined_call_operand.vmem [shape: f32[4,1], index: 26, kind: input, shape index: {}]   ;;  %s16135_s27 = inlined_call_operand.vmem [shape: f32[256,4096], index: 27, kind: input, shape index: {}]   ;;  %s16136_s28 = inlined_call_operand.vmem [shape: f32[2,4,4096], index: 28, kind: output, shape index: {}]  }
   0x1   :  { %16170 = sst [smem:[#allocation57_spill]] %s16108_s0 }
   0x2   :  { %16171 = sst [smem:[#allocation58_spill]] %s16109_s1 }
   0x3   :  { %16172 = sst [smem:[#allocation59_spill]] %s16110_s2 }
   0x4   :  { %16173 = sst [smem:[#allocation60_spill]] %s16111_s3 }
   0x5   :  { %16174 = sst [smem:[#allocation61_spill]] %s16112_s4 }
   0x6   :  { %16175 = sst [smem:[#allocation62_spill]] %s16113_s5 }
   0x7   :  { %16176 = sst [smem:[#allocation63_spill]] %s16114_s6 }
   0x8   :  { %16177 = sst [smem:[#allocation64_spill]] %s16115_s7 }
   0x9   :  { %16178 = sst [smem:[#allocation65_spill]] %s16116_s8 }
   0xa   :  { %16179 = sst [smem:[#allocation66_spill]] %s16117_s9 }
   0xb   :  { %16180 = sst [smem:[#allocation67_spill]] %s16118_s10 }
   0xc   :  { %16181 = sst [smem:[#allocation68_spill]] %s16119_s11 }
   0xd   :  { %16182 = sst [smem:[#allocation69_spill]] %s16120_s12 }
   0xe   :  { %16183 = sst [smem:[#allocation70_spill]] %s16130_s22 }
   0xf   :  { %16184 = sst [smem:[#allocation71_spill]] %s16131_s23 }
  0x10   :  { %16185 = sst [smem:[#allocation72_spill]] %s16133_s25 }
  0x11   :  { %16186 = sst [smem:[#allocation73_spill]] %s16135_s27 }
  0x12   :  { %s12466_s8 = smov 0   ;;  %s12468_s5 = smov 0  }
  0x13   :  { %s12470_s9 = smov 0   ;;  %s12472_s30 = smov 0  }
  0x14   :  { %s12474_s3 = smov 0   ;;  %s12476_s6 = smov 0  }
  0x15   :  { %s12478_s10 = smov 0  }
  0x16 LB: > { %16187 = sst [smem:[#allocation5_spill]] %s12297_s5  ;;  %s47_s0 = sadd.s32 1, %s12309_s3  ;;  %s12317_s10 = sphi %s12478_s10, %s38_s10   ;;  %s12313_s6 = sphi %s12476_s6, %s16335_s6   ;;  %s12309_s3 = sphi %s12474_s3, %s16334_s3   ;;  %s12305_s30 = sphi %s12472_s30, %s16333_s30   ;;  %s12301_s9 = sphi %s12470_s9, %s16332_s9   ;;  %s12297_s5 = sphi %s12468_s5, %s16331_s5   ;;  %s12293_s8 = sphi %s12466_s8, %s16330_s8  }
  0x17   : > { %16188 = sst [smem:[#allocation6_spill]] %s12309_s3  ;;  %s50_s11 = sadd.s32 1, %s12313_s6 }
  0x18   : > { %16189 = sst [smem:[#allocation7_spill]] %s12313_s6  ;;  %p48_p0 = scmp.ge.s32.totalorder %s47_s0, 2 }
  0x19   : > { %16190 = sst [smem:[#allocation8_spill]] %s12317_s10  ;;  %s629_s29 = sadd.s32 1, %s12297_s5 }
  0x1a   : > { %p636_p1 = scmp.ne.s32.totalorder %s12297_s5, %s12293_s8  ;;  %p637_p2 = scmp.eq.s32.totalorder %s12317_s10, 0 }
  0x1b   : > { %s16337_s0 = smov (%p48_p0, %s47_s0), 0  ;;  %s16339_s11 = smov (!%p48_p0, %s50_s11), %s12313_s6 }
  0x1c   : > { %16191 = sst [smem:[#allocation9_spill]] %s16337_s0  ;;  %s626_s2 = ssub.s32 %s12309_s3, %s16337_s0 }
  0x1d   : > { %p638_p3 = por %p637_p2, %p636_p1  ;;  %p52_p4 = scmp.ge.s32.totalorder %s16339_s11, 2 }
  0x1e   : > { %p627_p5 = scmp.eq.s32.totalorder %s626_s2, 0  ;;  %p9468_p6 = scmp.ge.s32.totalorder %s12317_s10, 4 }
  0x1f   : > { %s16341_s11 = smov (%p52_p4, %s16339_s11), 0 }
  0x20   : > { %16192 = sst [smem:[#allocation10_spill]] %s16341_s11  ;;  %768 = sbr.rel (%p9468_p6) target bundleno = 305 (0x131), region = 120 }
  0x21   : > { %s12515_s7 = scalar_select %p627_p5, %s12297_s5, %s629_s29  }
  0x23   : > { %16193 = sst [smem:[#allocation11_spill]] %s12515_s7 }
  0x27   : > { %779 = sbr.rel (!%p638_p3) target bundleno = 305 (0x131), region = 128  ;;  %s781_s12 = sand.u32 (%p638_p3), 1, %s12297_s5  }
  0x28   : > { %s10126_s1 = sshll.u32 (%p638_p3), %s12309_s3, 7  ;;  %s9469_s4 = sshll.u32 (%p638_p3), %s781_s12, 12 }
  0x29   : > { %s16194_s27 = sld [smem:[#allocation73_spill]] (%p638_p3)  ;;  %s12528_s29 = scalar_lea.vmem (%p638_p3), [#allocation4], %s9469_s4 }
  0x2f   : > { %s12523_s0 = scalar_lea.vmem %s16194_s27, %s10126_s1 }
  0x30   : > { %v799_v0 = vld [vmem:[%s12523_s0] sm:$0xff]  ;;  %v801_v1 = vld [vmem:[%s12523_s0 + $0x8] sm:$0xff]  ;;  %v803_v2 = vld [vmem:[%s12523_s0 + $0x10] sm:$0xff] }
  0x31   : > { %800 = vst [vmem:[%s12528_s29] sm:$0xff] %v799_v0  ;;  %802 = vst [vmem:[%s12528_s29 + $0x8] sm:$0xff] %v801_v1  ;;  %v805_v3 = vld [vmem:[%s12523_s0 + $0x18] sm:$0xff]  ;;  %v807_v4 = vld [vmem:[%s12523_s0 + $0x20] sm:$0xff] }
  0x32   : > { %804 = vst [vmem:[%s12528_s29 + $0x10] sm:$0xff] %v803_v2  ;;  %v809_v5 = vld [vmem:[%s12523_s0 + $0x28] sm:$0xff]  ;;  %806 = vst [vmem:[%s12528_s29 + $0x18] sm:$0xff] %v805_v3  ;;  %v811_v6 = vld [vmem:[%s12523_s0 + $0x30] sm:$0xff] }
  0x33   : > { %808 = vst [vmem:[%s12528_s29 + $0x20] sm:$0xff] %v807_v4  ;;  %810 = vst [vmem:[%s12528_s29 + $0x28] sm:$0xff] %v809_v5  ;;  %v813_v7 = vld [vmem:[%s12523_s0 + $0x38] sm:$0xff]  ;;  %v815_v8 = vld [vmem:[%s12523_s0 + $0x40] sm:$0xff] }
  0x34   : > { %812 = vst [vmem:[%s12528_s29 + $0x30] sm:$0xff] %v811_v6  ;;  %814 = vst [vmem:[%s12528_s29 + $0x38] sm:$0xff] %v813_v7  ;;  %v817_v9 = vld [vmem:[%s12523_s0 + $0x48] sm:$0xff]  ;;  %v819_v10 = vld [vmem:[%s12523_s0 + $0x50] sm:$0xff] }
  0x35   : > { %816 = vst [vmem:[%s12528_s29 + $0x40] sm:$0xff] %v815_v8  ;;  %v821_v11 = vld [vmem:[%s12523_s0 + $0x58] sm:$0xff]  ;;  %818 = vst [vmem:[%s12528_s29 + $0x48] sm:$0xff] %v817_v9  ;;  %v823_v12 = vld [vmem:[%s12523_s0 + $0x60] sm:$0xff] }
  0x36   : > { %820 = vst [vmem:[%s12528_s29 + $0x50] sm:$0xff] %v819_v10  ;;  %822 = vst [vmem:[%s12528_s29 + $0x58] sm:$0xff] %v821_v11  ;;  %v825_v13 = vld [vmem:[%s12523_s0 + $0x68] sm:$0xff]  ;;  %v827_v14 = vld [vmem:[%s12523_s0 + $0x70] sm:$0xff] }
  0x37   : > { %824 = vst [vmem:[%s12528_s29 + $0x60] sm:$0xff] %v823_v12  ;;  %826 = vst [vmem:[%s12528_s29 + $0x68] sm:$0xff] %v825_v13  ;;  %v829_v15 = vld [vmem:[%s12523_s0 + $0x78] sm:$0xff]  ;;  %v831_v16 = vld [vmem:[%s12523_s0 + $0x100] sm:$0xff] }
  0x38   : > { %828 = vst [vmem:[%s12528_s29 + $0x70] sm:$0xff] %v827_v14  ;;  %v833_v17 = vld [vmem:[%s12523_s0 + $0x108] sm:$0xff]  ;;  %830 = vst [vmem:[%s12528_s29 + $0x78] sm:$0xff] %v829_v15  ;;  %v835_v18 = vld [vmem:[%s12523_s0 + $0x110] sm:$0xff] }
  0x39   : > { %832 = vst [vmem:[%s12528_s29 + $0x80] sm:$0xff] %v831_v16  ;;  %834 = vst [vmem:[%s12528_s29 + $0x88] sm:$0xff] %v833_v17  ;;  %v837_v19 = vld [vmem:[%s12523_s0 + $0x118] sm:$0xff]  ;;  %v839_v20 = vld [vmem:[%s12523_s0 + $0x120] sm:$0xff] }
  0x3a   : > { %836 = vst [vmem:[%s12528_s29 + $0x90] sm:$0xff] %v835_v18  ;;  %838 = vst [vmem:[%s12528_s29 + $0x98] sm:$0xff] %v837_v19  ;;  %v841_v21 = vld [vmem:[%s12523_s0 + $0x128] sm:$0xff]  ;;  %v843_v22 = vld [vmem:[%s12523_s0 + $0x130] sm:$0xff] }
  0x3b   : > { %840 = vst [vmem:[%s12528_s29 + $0xa0] sm:$0xff] %v839_v20  ;;  %v845_v23 = vld [vmem:[%s12523_s0 + $0x138] sm:$0xff]  ;;  %842 = vst [vmem:[%s12528_s29 + $0xa8] sm:$0xff] %v841_v21  ;;  %v847_v24 = vld [vmem:[%s12523_s0 + $0x140] sm:$0xff] }
  0x3c   : > { %844 = vst [vmem:[%s12528_s29 + $0xb0] sm:$0xff] %v843_v22  ;;  %846 = vst [vmem:[%s12528_s29 + $0xb8] sm:$0xff] %v845_v23  ;;  %v849_v25 = vld [vmem:[%s12523_s0 + $0x148] sm:$0xff]  ;;  %v851_v26 = vld [vmem:[%s12523_s0 + $0x150] sm:$0xff] }
  0x3d   : > { %848 = vst [vmem:[%s12528_s29 + $0xc0] sm:$0xff] %v847_v24  ;;  %850 = vst [vmem:[%s12528_s29 + $0xc8] sm:$0xff] %v849_v25  ;;  %v853_v27 = vld [vmem:[%s12523_s0 + $0x158] sm:$0xff]  ;;  %v855_v28 = vld [vmem:[%s12523_s0 + $0x160] sm:$0xff] }
  0x3e   : > { %852 = vst [vmem:[%s12528_s29 + $0xd0] sm:$0xff] %v851_v26  ;;  %v857_v29 = vld [vmem:[%s12523_s0 + $0x168] sm:$0xff]  ;;  %854 = vst [vmem:[%s12528_s29 + $0xd8] sm:$0xff] %v853_v27  ;;  %v859_v30 = vld [vmem:[%s12523_s0 + $0x170] sm:$0xff] }
  0x3f   : > { %856 = vst [vmem:[%s12528_s29 + $0xe0] sm:$0xff] %v855_v28  ;;  %858 = vst [vmem:[%s12528_s29 + $0xe8] sm:$0xff] %v857_v29  ;;  %v861_v31 = vld [vmem:[%s12523_s0 + $0x178] sm:$0xff]  ;;  %v863_v32 = vld [vmem:[%s12523_s0 + $0x200] sm:$0xff] }
  0x40   : > { %860 = vst [vmem:[%s12528_s29 + $0xf0] sm:$0xff] %v859_v30  ;;  %862 = vst [vmem:[%s12528_s29 + $0xf8] sm:$0xff] %v861_v31  ;;  %v865_v33 = vld [vmem:[%s12523_s0 + $0x208] sm:$0xff]  ;;  %v867_v34 = vld [vmem:[%s12523_s0 + $0x210] sm:$0xff] }
  0x41   : > { %864 = vst [vmem:[%s12528_s29 + $0x100] sm:$0xff] %v863_v32  ;;  %v869_v35 = vld [vmem:[%s12523_s0 + $0x218] sm:$0xff]  ;;  %866 = vst [vmem:[%s12528_s29 + $0x108] sm:$0xff] %v865_v33  ;;  %v871_v36 = vld [vmem:[%s12523_s0 + $0x220] sm:$0xff] }
  0x42   : > { %868 = vst [vmem:[%s12528_s29 + $0x110] sm:$0xff] %v867_v34  ;;  %870 = vst [vmem:[%s12528_s29 + $0x118] sm:$0xff] %v869_v35  ;;  %v873_v37 = vld [vmem:[%s12523_s0 + $0x228] sm:$0xff]  ;;  %v875_v38 = vld [vmem:[%s12523_s0 + $0x230] sm:$0xff] }
  0x43   : > { %872 = vst [vmem:[%s12528_s29 + $0x120] sm:$0xff] %v871_v36  ;;  %874 = vst [vmem:[%s12528_s29 + $0x128] sm:$0xff] %v873_v37  ;;  %v877_v39 = vld [vmem:[%s12523_s0 + $0x238] sm:$0xff]  ;;  %v879_v40 = vld [vmem:[%s12523_s0 + $0x240] sm:$0xff] }
  0x44   : > { %876 = vst [vmem:[%s12528_s29 + $0x130] sm:$0xff] %v875_v38  ;;  %v881_v41 = vld [vmem:[%s12523_s0 + $0x248] sm:$0xff]  ;;  %878 = vst [vmem:[%s12528_s29 + $0x138] sm:$0xff] %v877_v39  ;;  %v883_v42 = vld [vmem:[%s12523_s0 + $0x250] sm:$0xff] }
  0x45   : > { %880 = vst [vmem:[%s12528_s29 + $0x140] sm:$0xff] %v879_v40  ;;  %882 = vst [vmem:[%s12528_s29 + $0x148] sm:$0xff] %v881_v41  ;;  %v885_v43 = vld [vmem:[%s12523_s0 + $0x258] sm:$0xff]  ;;  %v887_v44 = vld [vmem:[%s12523_s0 + $0x260] sm:$0xff] }
  0x46   : > { %884 = vst [vmem:[%s12528_s29 + $0x150] sm:$0xff] %v883_v42  ;;  %886 = vst [vmem:[%s12528_s29 + $0x158] sm:$0xff] %v885_v43  ;;  %v889_v45 = vld [vmem:[%s12523_s0 + $0x268] sm:$0xff]  ;;  %v891_v46 = vld [vmem:[%s12523_s0 + $0x270] sm:$0xff] }
  0x47   : > { %888 = vst [vmem:[%s12528_s29 + $0x160] sm:$0xff] %v887_v44  ;;  %v893_v47 = vld [vmem:[%s12523_s0 + $0x278] sm:$0xff]  ;;  %890 = vst [vmem:[%s12528_s29 + $0x168] sm:$0xff] %v889_v45  ;;  %v895_v48 = vld [vmem:[%s12523_s0 + $0x300] sm:$0xff] }
  0x48   : > { %892 = vst [vmem:[%s12528_s29 + $0x170] sm:$0xff] %v891_v46  ;;  %894 = vst [vmem:[%s12528_s29 + $0x178] sm:$0xff] %v893_v47  ;;  %v897_v49 = vld [vmem:[%s12523_s0 + $0x308] sm:$0xff]  ;;  %v899_v50 = vld [vmem:[%s12523_s0 + $0x310] sm:$0xff] }
  0x49   : > { %896 = vst [vmem:[%s12528_s29 + $0x180] sm:$0xff] %v895_v48  ;;  %898 = vst [vmem:[%s12528_s29 + $0x188] sm:$0xff] %v897_v49  ;;  %v901_v51 = vld [vmem:[%s12523_s0 + $0x318] sm:$0xff]  ;;  %v903_v52 = vld [vmem:[%s12523_s0 + $0x320] sm:$0xff] }
  0x4a   : > { %900 = vst [vmem:[%s12528_s29 + $0x190] sm:$0xff] %v899_v50  ;;  %v905_v53 = vld [vmem:[%s12523_s0 + $0x328] sm:$0xff]  ;;  %902 = vst [vmem:[%s12528_s29 + $0x198] sm:$0xff] %v901_v51  ;;  %v907_v54 = vld [vmem:[%s12523_s0 + $0x330] sm:$0xff] }
  0x4b   : > { %904 = vst [vmem:[%s12528_s29 + $0x1a0] sm:$0xff] %v903_v52  ;;  %906 = vst [vmem:[%s12528_s29 + $0x1a8] sm:$0xff] %v905_v53  ;;  %v909_v55 = vld [vmem:[%s12523_s0 + $0x338] sm:$0xff]  ;;  %v911_v56 = vld [vmem:[%s12523_s0 + $0x340] sm:$0xff] }
  0x4c   : > { %908 = vst [vmem:[%s12528_s29 + $0x1b0] sm:$0xff] %v907_v54  ;;  %910 = vst [vmem:[%s12528_s29 + $0x1b8] sm:$0xff] %v909_v55  ;;  %v913_v57 = vld [vmem:[%s12523_s0 + $0x348] sm:$0xff]  ;;  %v915_v58 = vld [vmem:[%s12523_s0 + $0x350] sm:$0xff] }
  0x4d   : > { %912 = vst [vmem:[%s12528_s29 + $0x1c0] sm:$0xff] %v911_v56  ;;  %v917_v59 = vld [vmem:[%s12523_s0 + $0x358] sm:$0xff]  ;;  %914 = vst [vmem:[%s12528_s29 + $0x1c8] sm:$0xff] %v913_v57  ;;  %v919_v60 = vld [vmem:[%s12523_s0 + $0x360] sm:$0xff] }
  0x4e   : > { %916 = vst [vmem:[%s12528_s29 + $0x1d0] sm:$0xff] %v915_v58  ;;  %918 = vst [vmem:[%s12528_s29 + $0x1d8] sm:$0xff] %v917_v59  ;;  %v921_v61 = vld [vmem:[%s12523_s0 + $0x368] sm:$0xff]  ;;  %v923_v62 = vld [vmem:[%s12523_s0 + $0x370] sm:$0xff] }
  0x4f   : > { %920 = vst [vmem:[%s12528_s29 + $0x1e0] sm:$0xff] %v919_v60  ;;  %922 = vst [vmem:[%s12528_s29 + $0x1e8] sm:$0xff] %v921_v61  ;;  %v925_v63 = vld [vmem:[%s12523_s0 + $0x378] sm:$0xff]  ;;  %v927_v0 = vld [vmem:[%s12523_s0 + $0x400] sm:$0xff] }
  0x50   : > { %924 = vst [vmem:[%s12528_s29 + $0x1f0] sm:$0xff] %v923_v62  ;;  %v929_v1 = vld [vmem:[%s12523_s0 + $0x408] sm:$0xff]  ;;  %926 = vst [vmem:[%s12528_s29 + $0x1f8] sm:$0xff] %v925_v63  ;;  %v931_v2 = vld [vmem:[%s12523_s0 + $0x410] sm:$0xff] }
  0x51   : > { %928 = vst [vmem:[%s12528_s29 + $0x200] sm:$0xff] %v927_v0  ;;  %930 = vst [vmem:[%s12528_s29 + $0x208] sm:$0xff] %v929_v1  ;;  %v933_v3 = vld [vmem:[%s12523_s0 + $0x418] sm:$0xff]  ;;  %v935_v4 = vld [vmem:[%s12523_s0 + $0x420] sm:$0xff] }
  0x52   : > { %932 = vst [vmem:[%s12528_s29 + $0x210] sm:$0xff] %v931_v2  ;;  %934 = vst [vmem:[%s12528_s29 + $0x218] sm:$0xff] %v933_v3  ;;  %v937_v5 = vld [vmem:[%s12523_s0 + $0x428] sm:$0xff]  ;;  %v939_v6 = vld [vmem:[%s12523_s0 + $0x430] sm:$0xff] }
  0x53   : > { %936 = vst [vmem:[%s12528_s29 + $0x220] sm:$0xff] %v935_v4  ;;  %v941_v7 = vld [vmem:[%s12523_s0 + $0x438] sm:$0xff]  ;;  %938 = vst [vmem:[%s12528_s29 + $0x228] sm:$0xff] %v937_v5  ;;  %v943_v8 = vld [vmem:[%s12523_s0 + $0x440] sm:$0xff] }
  0x54   : > { %940 = vst [vmem:[%s12528_s29 + $0x230] sm:$0xff] %v939_v6  ;;  %942 = vst [vmem:[%s12528_s29 + $0x238] sm:$0xff] %v941_v7  ;;  %v945_v9 = vld [vmem:[%s12523_s0 + $0x448] sm:$0xff]  ;;  %v947_v10 = vld [vmem:[%s12523_s0 + $0x450] sm:$0xff] }
  0x55   : > { %944 = vst [vmem:[%s12528_s29 + $0x240] sm:$0xff] %v943_v8  ;;  %946 = vst [vmem:[%s12528_s29 + $0x248] sm:$0xff] %v945_v9  ;;  %v949_v11 = vld [vmem:[%s12523_s0 + $0x458] sm:$0xff]  ;;  %v951_v12 = vld [vmem:[%s12523_s0 + $0x460] sm:$0xff] }
  0x56   : > { %948 = vst [vmem:[%s12528_s29 + $0x250] sm:$0xff] %v947_v10  ;;  %v953_v13 = vld [vmem:[%s12523_s0 + $0x468] sm:$0xff]  ;;  %950 = vst [vmem:[%s12528_s29 + $0x258] sm:$0xff] %v949_v11  ;;  %v955_v14 = vld [vmem:[%s12523_s0 + $0x470] sm:$0xff] }
  0x57   : > { %952 = vst [vmem:[%s12528_s29 + $0x260] sm:$0xff] %v951_v12  ;;  %954 = vst [vmem:[%s12528_s29 + $0x268] sm:$0xff] %v953_v13  ;;  %v957_v15 = vld [vmem:[%s12523_s0 + $0x478] sm:$0xff]  ;;  %v959_v16 = vld [vmem:[%s12523_s0 + $0x500] sm:$0xff] }
  0x58   : > { %956 = vst [vmem:[%s12528_s29 + $0x270] sm:$0xff] %v955_v14  ;;  %958 = vst [vmem:[%s12528_s29 + $0x278] sm:$0xff] %v957_v15  ;;  %v961_v17 = vld [vmem:[%s12523_s0 + $0x508] sm:$0xff]  ;;  %v963_v18 = vld [vmem:[%s12523_s0 + $0x510] sm:$0xff] }
  0x59   : > { %960 = vst [vmem:[%s12528_s29 + $0x280] sm:$0xff] %v959_v16  ;;  %v965_v19 = vld [vmem:[%s12523_s0 + $0x518] sm:$0xff]  ;;  %962 = vst [vmem:[%s12528_s29 + $0x288] sm:$0xff] %v961_v17  ;;  %v967_v20 = vld [vmem:[%s12523_s0 + $0x520] sm:$0xff] }
  0x5a   : > { %964 = vst [vmem:[%s12528_s29 + $0x290] sm:$0xff] %v963_v18  ;;  %966 = vst [vmem:[%s12528_s29 + $0x298] sm:$0xff] %v965_v19  ;;  %v969_v21 = vld [vmem:[%s12523_s0 + $0x528] sm:$0xff]  ;;  %v971_v22 = vld [vmem:[%s12523_s0 + $0x530] sm:$0xff] }
  0x5b   : > { %968 = vst [vmem:[%s12528_s29 + $0x2a0] sm:$0xff] %v967_v20  ;;  %970 = vst [vmem:[%s12528_s29 + $0x2a8] sm:$0xff] %v969_v21  ;;  %v973_v23 = vld [vmem:[%s12523_s0 + $0x538] sm:$0xff]  ;;  %v975_v24 = vld [vmem:[%s12523_s0 + $0x540] sm:$0xff] }
  0x5c   : > { %972 = vst [vmem:[%s12528_s29 + $0x2b0] sm:$0xff] %v971_v22  ;;  %v977_v25 = vld [vmem:[%s12523_s0 + $0x548] sm:$0xff]  ;;  %974 = vst [vmem:[%s12528_s29 + $0x2b8] sm:$0xff] %v973_v23  ;;  %v979_v26 = vld [vmem:[%s12523_s0 + $0x550] sm:$0xff] }
  0x5d   : > { %976 = vst [vmem:[%s12528_s29 + $0x2c0] sm:$0xff] %v975_v24  ;;  %978 = vst [vmem:[%s12528_s29 + $0x2c8] sm:$0xff] %v977_v25  ;;  %v981_v27 = vld [vmem:[%s12523_s0 + $0x558] sm:$0xff]  ;;  %v983_v28 = vld [vmem:[%s12523_s0 + $0x560] sm:$0xff] }
  0x5e   : > { %980 = vst [vmem:[%s12528_s29 + $0x2d0] sm:$0xff] %v979_v26  ;;  %982 = vst [vmem:[%s12528_s29 + $0x2d8] sm:$0xff] %v981_v27  ;;  %v985_v29 = vld [vmem:[%s12523_s0 + $0x568] sm:$0xff]  ;;  %v987_v30 = vld [vmem:[%s12523_s0 + $0x570] sm:$0xff] }
  0x5f   : > { %984 = vst [vmem:[%s12528_s29 + $0x2e0] sm:$0xff] %v983_v28  ;;  %v989_v31 = vld [vmem:[%s12523_s0 + $0x578] sm:$0xff]  ;;  %986 = vst [vmem:[%s12528_s29 + $0x2e8] sm:$0xff] %v985_v29  ;;  %v991_v32 = vld [vmem:[%s12523_s0 + $0x600] sm:$0xff] }
  0x60   : > { %988 = vst [vmem:[%s12528_s29 + $0x2f0] sm:$0xff] %v987_v30  ;;  %990 = vst [vmem:[%s12528_s29 + $0x2f8] sm:$0xff] %v989_v31  ;;  %v993_v33 = vld [vmem:[%s12523_s0 + $0x608] sm:$0xff]  ;;  %v995_v34 = vld [vmem:[%s12523_s0 + $0x610] sm:$0xff] }
  0x61   : > { %992 = vst [vmem:[%s12528_s29 + $0x300] sm:$0xff] %v991_v32  ;;  %994 = vst [vmem:[%s12528_s29 + $0x308] sm:$0xff] %v993_v33  ;;  %v997_v35 = vld [vmem:[%s12523_s0 + $0x618] sm:$0xff]  ;;  %v999_v36 = vld [vmem:[%s12523_s0 + $0x620] sm:$0xff] }
  0x62   : > { %996 = vst [vmem:[%s12528_s29 + $0x310] sm:$0xff] %v995_v34  ;;  %v1001_v37 = vld [vmem:[%s12523_s0 + $0x628] sm:$0xff]  ;;  %998 = vst [vmem:[%s12528_s29 + $0x318] sm:$0xff] %v997_v35  ;;  %v1003_v38 = vld [vmem:[%s12523_s0 + $0x630] sm:$0xff] }
  0x63   : > { %1000 = vst [vmem:[%s12528_s29 + $0x320] sm:$0xff] %v999_v36  ;;  %1002 = vst [vmem:[%s12528_s29 + $0x328] sm:$0xff] %v1001_v37  ;;  %v1005_v39 = vld [vmem:[%s12523_s0 + $0x638] sm:$0xff]  ;;  %v1007_v40 = vld [vmem:[%s12523_s0 + $0x640] sm:$0xff] }
  0x64   : > { %1004 = vst [vmem:[%s12528_s29 + $0x330] sm:$0xff] %v1003_v38  ;;  %1006 = vst [vmem:[%s12528_s29 + $0x338] sm:$0xff] %v1005_v39  ;;  %v1009_v41 = vld [vmem:[%s12523_s0 + $0x648] sm:$0xff]  ;;  %v1011_v42 = vld [vmem:[%s12523_s0 + $0x650] sm:$0xff] }
  0x65   : > { %1008 = vst [vmem:[%s12528_s29 + $0x340] sm:$0xff] %v1007_v40  ;;  %v1013_v43 = vld [vmem:[%s12523_s0 + $0x658] sm:$0xff]  ;;  %1010 = vst [vmem:[%s12528_s29 + $0x348] sm:$0xff] %v1009_v41  ;;  %v1015_v44 = vld [vmem:[%s12523_s0 + $0x660] sm:$0xff] }
  0x66   : > { %1012 = vst [vmem:[%s12528_s29 + $0x350] sm:$0xff] %v1011_v42  ;;  %1014 = vst [vmem:[%s12528_s29 + $0x358] sm:$0xff] %v1013_v43  ;;  %v1017_v45 = vld [vmem:[%s12523_s0 + $0x668] sm:$0xff]  ;;  %v1019_v46 = vld [vmem:[%s12523_s0 + $0x670] sm:$0xff] }
  0x67   : > { %1016 = vst [vmem:[%s12528_s29 + $0x360] sm:$0xff] %v1015_v44  ;;  %1018 = vst [vmem:[%s12528_s29 + $0x368] sm:$0xff] %v1017_v45  ;;  %v1021_v47 = vld [vmem:[%s12523_s0 + $0x678] sm:$0xff]  ;;  %v1023_v48 = vld [vmem:[%s12523_s0 + $0x700] sm:$0xff] }
  0x68   : > { %1020 = vst [vmem:[%s12528_s29 + $0x370] sm:$0xff] %v1019_v46  ;;  %v1025_v49 = vld [vmem:[%s12523_s0 + $0x708] sm:$0xff]  ;;  %1022 = vst [vmem:[%s12528_s29 + $0x378] sm:$0xff] %v1021_v47  ;;  %v1027_v50 = vld [vmem:[%s12523_s0 + $0x710] sm:$0xff] }
  0x69   : > { %1024 = vst [vmem:[%s12528_s29 + $0x380] sm:$0xff] %v1023_v48  ;;  %1026 = vst [vmem:[%s12528_s29 + $0x388] sm:$0xff] %v1025_v49  ;;  %v1029_v51 = vld [vmem:[%s12523_s0 + $0x718] sm:$0xff]  ;;  %v1031_v52 = vld [vmem:[%s12523_s0 + $0x720] sm:$0xff] }
  0x6a   : > { %1028 = vst [vmem:[%s12528_s29 + $0x390] sm:$0xff] %v1027_v50  ;;  %1030 = vst [vmem:[%s12528_s29 + $0x398] sm:$0xff] %v1029_v51  ;;  %v1033_v53 = vld [vmem:[%s12523_s0 + $0x728] sm:$0xff]  ;;  %v1035_v54 = vld [vmem:[%s12523_s0 + $0x730] sm:$0xff] }
  0x6b   : > { %1032 = vst [vmem:[%s12528_s29 + $0x3a0] sm:$0xff] %v1031_v52  ;;  %v1037_v55 = vld [vmem:[%s12523_s0 + $0x738] sm:$0xff]  ;;  %1034 = vst [vmem:[%s12528_s29 + $0x3a8] sm:$0xff] %v1033_v53  ;;  %v1039_v56 = vld [vmem:[%s12523_s0 + $0x740] sm:$0xff] }
  0x6c   : > { %1036 = vst [vmem:[%s12528_s29 + $0x3b0] sm:$0xff] %v1035_v54  ;;  %1038 = vst [vmem:[%s12528_s29 + $0x3b8] sm:$0xff] %v1037_v55  ;;  %v1041_v57 = vld [vmem:[%s12523_s0 + $0x748] sm:$0xff]  ;;  %v1043_v58 = vld [vmem:[%s12523_s0 + $0x750] sm:$0xff] }
  0x6d   : > { %1040 = vst [vmem:[%s12528_s29 + $0x3c0] sm:$0xff] %v1039_v56  ;;  %1042 = vst [vmem:[%s12528_s29 + $0x3c8] sm:$0xff] %v1041_v57  ;;  %v1045_v59 = vld [vmem:[%s12523_s0 + $0x758] sm:$0xff]  ;;  %v1047_v60 = vld [vmem:[%s12523_s0 + $0x760] sm:$0xff] }
  0x6e   : > { %1044 = vst [vmem:[%s12528_s29 + $0x3d0] sm:$0xff] %v1043_v58  ;;  %v1049_v61 = vld [vmem:[%s12523_s0 + $0x768] sm:$0xff]  ;;  %1046 = vst [vmem:[%s12528_s29 + $0x3d8] sm:$0xff] %v1045_v59  ;;  %v1051_v62 = vld [vmem:[%s12523_s0 + $0x770] sm:$0xff] }
  0x6f   : > { %1048 = vst [vmem:[%s12528_s29 + $0x3e0] sm:$0xff] %v1047_v60  ;;  %1050 = vst [vmem:[%s12528_s29 + $0x3e8] sm:$0xff] %v1049_v61  ;;  %v1053_v63 = vld [vmem:[%s12523_s0 + $0x778] sm:$0xff]  ;;  %v1055_v0 = vld [vmem:[%s12523_s0 + $0x800] sm:$0xff] }
  0x70   : > { %1052 = vst [vmem:[%s12528_s29 + $0x3f0] sm:$0xff] %v1051_v62  ;;  %1054 = vst [vmem:[%s12528_s29 + $0x3f8] sm:$0xff] %v1053_v63  ;;  %v1057_v1 = vld [vmem:[%s12523_s0 + $0x808] sm:$0xff]  ;;  %v1059_v2 = vld [vmem:[%s12523_s0 + $0x810] sm:$0xff] }
  0x71   : > { %1056 = vst [vmem:[%s12528_s29 + $0x400] sm:$0xff] %v1055_v0  ;;  %v1061_v3 = vld [vmem:[%s12523_s0 + $0x818] sm:$0xff]  ;;  %1058 = vst [vmem:[%s12528_s29 + $0x408] sm:$0xff] %v1057_v1  ;;  %v1063_v4 = vld [vmem:[%s12523_s0 + $0x820] sm:$0xff] }
  0x72   : > { %1060 = vst [vmem:[%s12528_s29 + $0x410] sm:$0xff] %v1059_v2  ;;  %1062 = vst [vmem:[%s12528_s29 + $0x418] sm:$0xff] %v1061_v3  ;;  %v1065_v5 = vld [vmem:[%s12523_s0 + $0x828] sm:$0xff]  ;;  %v1067_v6 = vld [vmem:[%s12523_s0 + $0x830] sm:$0xff] }
  0x73   : > { %1064 = vst [vmem:[%s12528_s29 + $0x420] sm:$0xff] %v1063_v4  ;;  %1066 = vst [vmem:[%s12528_s29 + $0x428] sm:$0xff] %v1065_v5  ;;  %v1069_v7 = vld [vmem:[%s12523_s0 + $0x838] sm:$0xff]  ;;  %v1071_v8 = vld [vmem:[%s12523_s0 + $0x840] sm:$0xff] }
  0x74   : > { %1068 = vst [vmem:[%s12528_s29 + $0x430] sm:$0xff] %v1067_v6  ;;  %v1073_v9 = vld [vmem:[%s12523_s0 + $0x848] sm:$0xff]  ;;  %1070 = vst [vmem:[%s12528_s29 + $0x438] sm:$0xff] %v1069_v7  ;;  %v1075_v10 = vld [vmem:[%s12523_s0 + $0x850] sm:$0xff] }
  0x75   : > { %1072 = vst [vmem:[%s12528_s29 + $0x440] sm:$0xff] %v1071_v8  ;;  %1074 = vst [vmem:[%s12528_s29 + $0x448] sm:$0xff] %v1073_v9  ;;  %v1077_v11 = vld [vmem:[%s12523_s0 + $0x858] sm:$0xff]  ;;  %v1079_v12 = vld [vmem:[%s12523_s0 + $0x860] sm:$0xff] }
  0x76   : > { %1076 = vst [vmem:[%s12528_s29 + $0x450] sm:$0xff] %v1075_v10  ;;  %1078 = vst [vmem:[%s12528_s29 + $0x458] sm:$0xff] %v1077_v11  ;;  %v1081_v13 = vld [vmem:[%s12523_s0 + $0x868] sm:$0xff]  ;;  %v1083_v14 = vld [vmem:[%s12523_s0 + $0x870] sm:$0xff] }
  0x77   : > { %1080 = vst [vmem:[%s12528_s29 + $0x460] sm:$0xff] %v1079_v12  ;;  %v1085_v15 = vld [vmem:[%s12523_s0 + $0x878] sm:$0xff]  ;;  %1082 = vst [vmem:[%s12528_s29 + $0x468] sm:$0xff] %v1081_v13  ;;  %v1087_v16 = vld [vmem:[%s12523_s0 + $0x900] sm:$0xff] }
  0x78   : > { %1084 = vst [vmem:[%s12528_s29 + $0x470] sm:$0xff] %v1083_v14  ;;  %1086 = vst [vmem:[%s12528_s29 + $0x478] sm:$0xff] %v1085_v15  ;;  %v1089_v17 = vld [vmem:[%s12523_s0 + $0x908] sm:$0xff]  ;;  %v1091_v18 = vld [vmem:[%s12523_s0 + $0x910] sm:$0xff] }
  0x79   : > { %1088 = vst [vmem:[%s12528_s29 + $0x480] sm:$0xff] %v1087_v16  ;;  %1090 = vst [vmem:[%s12528_s29 + $0x488] sm:$0xff] %v1089_v17  ;;  %v1093_v19 = vld [vmem:[%s12523_s0 + $0x918] sm:$0xff]  ;;  %v1095_v20 = vld [vmem:[%s12523_s0 + $0x920] sm:$0xff] }
  0x7a   : > { %1092 = vst [vmem:[%s12528_s29 + $0x490] sm:$0xff] %v1091_v18  ;;  %v1097_v21 = vld [vmem:[%s12523_s0 + $0x928] sm:$0xff]  ;;  %1094 = vst [vmem:[%s12528_s29 + $0x498] sm:$0xff] %v1093_v19  ;;  %v1099_v22 = vld [vmem:[%s12523_s0 + $0x930] sm:$0xff] }
  0x7b   : > { %1096 = vst [vmem:[%s12528_s29 + $0x4a0] sm:$0xff] %v1095_v20  ;;  %1098 = vst [vmem:[%s12528_s29 + $0x4a8] sm:$0xff] %v1097_v21  ;;  %v1101_v23 = vld [vmem:[%s12523_s0 + $0x938] sm:$0xff]  ;;  %v1103_v24 = vld [vmem:[%s12523_s0 + $0x940] sm:$0xff] }
  0x7c   : > { %1100 = vst [vmem:[%s12528_s29 + $0x4b0] sm:$0xff] %v1099_v22  ;;  %1102 = vst [vmem:[%s12528_s29 + $0x4b8] sm:$0xff] %v1101_v23  ;;  %v1105_v25 = vld [vmem:[%s12523_s0 + $0x948] sm:$0xff]  ;;  %v1107_v26 = vld [vmem:[%s12523_s0 + $0x950] sm:$0xff] }
  0x7d   : > { %1104 = vst [vmem:[%s12528_s29 + $0x4c0] sm:$0xff] %v1103_v24  ;;  %v1109_v27 = vld [vmem:[%s12523_s0 + $0x958] sm:$0xff]  ;;  %1106 = vst [vmem:[%s12528_s29 + $0x4c8] sm:$0xff] %v1105_v25  ;;  %v1111_v28 = vld [vmem:[%s12523_s0 + $0x960] sm:$0xff] }
  0x7e   : > { %1108 = vst [vmem:[%s12528_s29 + $0x4d0] sm:$0xff] %v1107_v26  ;;  %1110 = vst [vmem:[%s12528_s29 + $0x4d8] sm:$0xff] %v1109_v27  ;;  %v1113_v29 = vld [vmem:[%s12523_s0 + $0x968] sm:$0xff]  ;;  %v1115_v30 = vld [vmem:[%s12523_s0 + $0x970] sm:$0xff] }
  0x7f   : > { %1112 = vst [vmem:[%s12528_s29 + $0x4e0] sm:$0xff] %v1111_v28  ;;  %1114 = vst [vmem:[%s12528_s29 + $0x4e8] sm:$0xff] %v1113_v29  ;;  %v1117_v31 = vld [vmem:[%s12523_s0 + $0x978] sm:$0xff]  ;;  %v1119_v32 = vld [vmem:[%s12523_s0 + $0xa00] sm:$0xff] }
  0x80   : > { %1116 = vst [vmem:[%s12528_s29 + $0x4f0] sm:$0xff] %v1115_v30  ;;  %v1121_v33 = vld [vmem:[%s12523_s0 + $0xa08] sm:$0xff]  ;;  %1118 = vst [vmem:[%s12528_s29 + $0x4f8] sm:$0xff] %v1117_v31  ;;  %v1123_v34 = vld [vmem:[%s12523_s0 + $0xa10] sm:$0xff] }
  0x81   : > { %1120 = vst [vmem:[%s12528_s29 + $0x500] sm:$0xff] %v1119_v32  ;;  %1122 = vst [vmem:[%s12528_s29 + $0x508] sm:$0xff] %v1121_v33  ;;  %v1125_v35 = vld [vmem:[%s12523_s0 + $0xa18] sm:$0xff]  ;;  %v1127_v36 = vld [vmem:[%s12523_s0 + $0xa20] sm:$0xff] }
  0x82   : > { %1124 = vst [vmem:[%s12528_s29 + $0x510] sm:$0xff] %v1123_v34  ;;  %1126 = vst [vmem:[%s12528_s29 + $0x518] sm:$0xff] %v1125_v35  ;;  %v1129_v37 = vld [vmem:[%s12523_s0 + $0xa28] sm:$0xff]  ;;  %v1131_v38 = vld [vmem:[%s12523_s0 + $0xa30] sm:$0xff] }
  0x83   : > { %1128 = vst [vmem:[%s12528_s29 + $0x520] sm:$0xff] %v1127_v36  ;;  %v1133_v39 = vld [vmem:[%s12523_s0 + $0xa38] sm:$0xff]  ;;  %1130 = vst [vmem:[%s12528_s29 + $0x528] sm:$0xff] %v1129_v37  ;;  %v1135_v40 = vld [vmem:[%s12523_s0 + $0xa40] sm:$0xff] }
  0x84   : > { %1132 = vst [vmem:[%s12528_s29 + $0x530] sm:$0xff] %v1131_v38  ;;  %1134 = vst [vmem:[%s12528_s29 + $0x538] sm:$0xff] %v1133_v39  ;;  %v1137_v41 = vld [vmem:[%s12523_s0 + $0xa48] sm:$0xff]  ;;  %v1139_v42 = vld [vmem:[%s12523_s0 + $0xa50] sm:$0xff] }
  0x85   : > { %1136 = vst [vmem:[%s12528_s29 + $0x540] sm:$0xff] %v1135_v40  ;;  %1138 = vst [vmem:[%s12528_s29 + $0x548] sm:$0xff] %v1137_v41  ;;  %v1141_v43 = vld [vmem:[%s12523_s0 + $0xa58] sm:$0xff]  ;;  %v1143_v44 = vld [vmem:[%s12523_s0 + $0xa60] sm:$0xff] }
  0x86   : > { %1140 = vst [vmem:[%s12528_s29 + $0x550] sm:$0xff] %v1139_v42  ;;  %v1145_v45 = vld [vmem:[%s12523_s0 + $0xa68] sm:$0xff]  ;;  %1142 = vst [vmem:[%s12528_s29 + $0x558] sm:$0xff] %v1141_v43  ;;  %v1147_v46 = vld [vmem:[%s12523_s0 + $0xa70] sm:$0xff] }
  0x87   : > { %1144 = vst [vmem:[%s12528_s29 + $0x560] sm:$0xff] %v1143_v44  ;;  %1146 = vst [vmem:[%s12528_s29 + $0x568] sm:$0xff] %v1145_v45  ;;  %v1149_v47 = vld [vmem:[%s12523_s0 + $0xa78] sm:$0xff]  ;;  %v1151_v48 = vld [vmem:[%s12523_s0 + $0xb00] sm:$0xff] }
  0x88   : > { %1148 = vst [vmem:[%s12528_s29 + $0x570] sm:$0xff] %v1147_v46  ;;  %1150 = vst [vmem:[%s12528_s29 + $0x578] sm:$0xff] %v1149_v47  ;;  %v1153_v49 = vld [vmem:[%s12523_s0 + $0xb08] sm:$0xff]  ;;  %v1155_v50 = vld [vmem:[%s12523_s0 + $0xb10] sm:$0xff] }
  0x89   : > { %1152 = vst [vmem:[%s12528_s29 + $0x580] sm:$0xff] %v1151_v48  ;;  %v1157_v51 = vld [vmem:[%s12523_s0 + $0xb18] sm:$0xff]  ;;  %1154 = vst [vmem:[%s12528_s29 + $0x588] sm:$0xff] %v1153_v49  ;;  %v1159_v52 = vld [vmem:[%s12523_s0 + $0xb20] sm:$0xff] }
  0x8a   : > { %1156 = vst [vmem:[%s12528_s29 + $0x590] sm:$0xff] %v1155_v50  ;;  %1158 = vst [vmem:[%s12528_s29 + $0x598] sm:$0xff] %v1157_v51  ;;  %v1161_v53 = vld [vmem:[%s12523_s0 + $0xb28] sm:$0xff]  ;;  %v1163_v54 = vld [vmem:[%s12523_s0 + $0xb30] sm:$0xff] }
  0x8b   : > { %1160 = vst [vmem:[%s12528_s29 + $0x5a0] sm:$0xff] %v1159_v52  ;;  %1162 = vst [vmem:[%s12528_s29 + $0x5a8] sm:$0xff] %v1161_v53  ;;  %v1165_v55 = vld [vmem:[%s12523_s0 + $0xb38] sm:$0xff]  ;;  %v1167_v56 = vld [vmem:[%s12523_s0 + $0xb40] sm:$0xff] }
  0x8c   : > { %1164 = vst [vmem:[%s12528_s29 + $0x5b0] sm:$0xff] %v1163_v54  ;;  %v1169_v57 = vld [vmem:[%s12523_s0 + $0xb48] sm:$0xff]  ;;  %1166 = vst [vmem:[%s12528_s29 + $0x5b8] sm:$0xff] %v1165_v55  ;;  %v1171_v58 = vld [vmem:[%s12523_s0 + $0xb50] sm:$0xff] }
  0x8d   : > { %1168 = vst [vmem:[%s12528_s29 + $0x5c0] sm:$0xff] %v1167_v56  ;;  %1170 = vst [vmem:[%s12528_s29 + $0x5c8] sm:$0xff] %v1169_v57  ;;  %v1173_v59 = vld [vmem:[%s12523_s0 + $0xb58] sm:$0xff]  ;;  %v1175_v60 = vld [vmem:[%s12523_s0 + $0xb60] sm:$0xff] }
  0x8e   : > { %1172 = vst [vmem:[%s12528_s29 + $0x5d0] sm:$0xff] %v1171_v58  ;;  %1174 = vst [vmem:[%s12528_s29 + $0x5d8] sm:$0xff] %v1173_v59  ;;  %v1177_v61 = vld [vmem:[%s12523_s0 + $0xb68] sm:$0xff]  ;;  %v1179_v62 = vld [vmem:[%s12523_s0 + $0xb70] sm:$0xff] }
  0x8f   : > { %1176 = vst [vmem:[%s12528_s29 + $0x5e0] sm:$0xff] %v1175_v60  ;;  %v1181_v63 = vld [vmem:[%s12523_s0 + $0xb78] sm:$0xff]  ;;  %1178 = vst [vmem:[%s12528_s29 + $0x5e8] sm:$0xff] %v1177_v61  ;;  %v1183_v0 = vld [vmem:[%s12523_s0 + $0xc00] sm:$0xff] }
  0x90   : > { %1180 = vst [vmem:[%s12528_s29 + $0x5f0] sm:$0xff] %v1179_v62  ;;  %1182 = vst [vmem:[%s12528_s29 + $0x5f8] sm:$0xff] %v1181_v63  ;;  %v1185_v1 = vld [vmem:[%s12523_s0 + $0xc08] sm:$0xff]  ;;  %v1187_v2 = vld [vmem:[%s12523_s0 + $0xc10] sm:$0xff] }
  0x91   : > { %1184 = vst [vmem:[%s12528_s29 + $0x600] sm:$0xff] %v1183_v0  ;;  %1186 = vst [vmem:[%s12528_s29 + $0x608] sm:$0xff] %v1185_v1  ;;  %v1189_v3 = vld [vmem:[%s12523_s0 + $0xc18] sm:$0xff]  ;;  %v1191_v4 = vld [vmem:[%s12523_s0 + $0xc20] sm:$0xff] }
  0x92   : > { %1188 = vst [vmem:[%s12528_s29 + $0x610] sm:$0xff] %v1187_v2  ;;  %v1193_v5 = vld [vmem:[%s12523_s0 + $0xc28] sm:$0xff]  ;;  %1190 = vst [vmem:[%s12528_s29 + $0x618] sm:$0xff] %v1189_v3  ;;  %v1195_v6 = vld [vmem:[%s12523_s0 + $0xc30] sm:$0xff] }
  0x93   : > { %1192 = vst [vmem:[%s12528_s29 + $0x620] sm:$0xff] %v1191_v4  ;;  %1194 = vst [vmem:[%s12528_s29 + $0x628] sm:$0xff] %v1193_v5  ;;  %v1197_v7 = vld [vmem:[%s12523_s0 + $0xc38] sm:$0xff]  ;;  %v1199_v8 = vld [vmem:[%s12523_s0 + $0xc40] sm:$0xff] }
  0x94   : > { %1196 = vst [vmem:[%s12528_s29 + $0x630] sm:$0xff] %v1195_v6  ;;  %1198 = vst [vmem:[%s12528_s29 + $0x638] sm:$0xff] %v1197_v7  ;;  %v1201_v9 = vld [vmem:[%s12523_s0 + $0xc48] sm:$0xff]  ;;  %v1203_v10 = vld [vmem:[%s12523_s0 + $0xc50] sm:$0xff] }
  0x95   : > { %1200 = vst [vmem:[%s12528_s29 + $0x640] sm:$0xff] %v1199_v8  ;;  %v1205_v11 = vld [vmem:[%s12523_s0 + $0xc58] sm:$0xff]  ;;  %1202 = vst [vmem:[%s12528_s29 + $0x648] sm:$0xff] %v1201_v9  ;;  %v1207_v12 = vld [vmem:[%s12523_s0 + $0xc60] sm:$0xff] }
  0x96   : > { %1204 = vst [vmem:[%s12528_s29 + $0x650] sm:$0xff] %v1203_v10  ;;  %1206 = vst [vmem:[%s12528_s29 + $0x658] sm:$0xff] %v1205_v11  ;;  %v1209_v13 = vld [vmem:[%s12523_s0 + $0xc68] sm:$0xff]  ;;  %v1211_v14 = vld [vmem:[%s12523_s0 + $0xc70] sm:$0xff] }
  0x97   : > { %1208 = vst [vmem:[%s12528_s29 + $0x660] sm:$0xff] %v1207_v12  ;;  %1210 = vst [vmem:[%s12528_s29 + $0x668] sm:$0xff] %v1209_v13  ;;  %v1213_v15 = vld [vmem:[%s12523_s0 + $0xc78] sm:$0xff]  ;;  %v1215_v16 = vld [vmem:[%s12523_s0 + $0xd00] sm:$0xff] }
  0x98   : > { %1212 = vst [vmem:[%s12528_s29 + $0x670] sm:$0xff] %v1211_v14  ;;  %v1217_v17 = vld [vmem:[%s12523_s0 + $0xd08] sm:$0xff]  ;;  %1214 = vst [vmem:[%s12528_s29 + $0x678] sm:$0xff] %v1213_v15  ;;  %v1219_v18 = vld [vmem:[%s12523_s0 + $0xd10] sm:$0xff] }
  0x99   : > { %1216 = vst [vmem:[%s12528_s29 + $0x680] sm:$0xff] %v1215_v16  ;;  %1218 = vst [vmem:[%s12528_s29 + $0x688] sm:$0xff] %v1217_v17  ;;  %v1221_v19 = vld [vmem:[%s12523_s0 + $0xd18] sm:$0xff]  ;;  %v1223_v20 = vld [vmem:[%s12523_s0 + $0xd20] sm:$0xff] }
  0x9a   : > { %1220 = vst [vmem:[%s12528_s29 + $0x690] sm:$0xff] %v1219_v18  ;;  %1222 = vst [vmem:[%s12528_s29 + $0x698] sm:$0xff] %v1221_v19  ;;  %v1225_v21 = vld [vmem:[%s12523_s0 + $0xd28] sm:$0xff]  ;;  %v1227_v22 = vld [vmem:[%s12523_s0 + $0xd30] sm:$0xff] }
  0x9b   : > { %1224 = vst [vmem:[%s12528_s29 + $0x6a0] sm:$0xff] %v1223_v20  ;;  %v1229_v23 = vld [vmem:[%s12523_s0 + $0xd38] sm:$0xff]  ;;  %1226 = vst [vmem:[%s12528_s29 + $0x6a8] sm:$0xff] %v1225_v21  ;;  %v1231_v24 = vld [vmem:[%s12523_s0 + $0xd40] sm:$0xff] }
  0x9c   : > { %1228 = vst [vmem:[%s12528_s29 + $0x6b0] sm:$0xff] %v1227_v22  ;;  %1230 = vst [vmem:[%s12528_s29 + $0x6b8] sm:$0xff] %v1229_v23  ;;  %v1233_v25 = vld [vmem:[%s12523_s0 + $0xd48] sm:$0xff]  ;;  %v1235_v26 = vld [vmem:[%s12523_s0 + $0xd50] sm:$0xff] }
  0x9d   : > { %1232 = vst [vmem:[%s12528_s29 + $0x6c0] sm:$0xff] %v1231_v24  ;;  %1234 = vst [vmem:[%s12528_s29 + $0x6c8] sm:$0xff] %v1233_v25  ;;  %v1237_v27 = vld [vmem:[%s12523_s0 + $0xd58] sm:$0xff]  ;;  %v1239_v28 = vld [vmem:[%s12523_s0 + $0xd60] sm:$0xff] }
  0x9e   : > { %1236 = vst [vmem:[%s12528_s29 + $0x6d0] sm:$0xff] %v1235_v26  ;;  %v1241_v29 = vld [vmem:[%s12523_s0 + $0xd68] sm:$0xff]  ;;  %1238 = vst [vmem:[%s12528_s29 + $0x6d8] sm:$0xff] %v1237_v27  ;;  %v1243_v30 = vld [vmem:[%s12523_s0 + $0xd70] sm:$0xff] }
  0x9f   : > { %1240 = vst [vmem:[%s12528_s29 + $0x6e0] sm:$0xff] %v1239_v28  ;;  %1242 = vst [vmem:[%s12528_s29 + $0x6e8] sm:$0xff] %v1241_v29  ;;  %v1245_v31 = vld [vmem:[%s12523_s0 + $0xd78] sm:$0xff]  ;;  %v1247_v32 = vld [vmem:[%s12523_s0 + $0xe00] sm:$0xff] }
  0xa0   : > { %1244 = vst [vmem:[%s12528_s29 + $0x6f0] sm:$0xff] %v1243_v30  ;;  %1246 = vst [vmem:[%s12528_s29 + $0x6f8] sm:$0xff] %v1245_v31  ;;  %v1249_v33 = vld [vmem:[%s12523_s0 + $0xe08] sm:$0xff]  ;;  %v1251_v34 = vld [vmem:[%s12523_s0 + $0xe10] sm:$0xff] }
  0xa1   : > { %1248 = vst [vmem:[%s12528_s29 + $0x700] sm:$0xff] %v1247_v32  ;;  %v1253_v35 = vld [vmem:[%s12523_s0 + $0xe18] sm:$0xff]  ;;  %1250 = vst [vmem:[%s12528_s29 + $0x708] sm:$0xff] %v1249_v33  ;;  %v1255_v36 = vld [vmem:[%s12523_s0 + $0xe20] sm:$0xff] }
  0xa2   : > { %1252 = vst [vmem:[%s12528_s29 + $0x710] sm:$0xff] %v1251_v34  ;;  %1254 = vst [vmem:[%s12528_s29 + $0x718] sm:$0xff] %v1253_v35  ;;  %v1257_v37 = vld [vmem:[%s12523_s0 + $0xe28] sm:$0xff]  ;;  %v1259_v38 = vld [vmem:[%s12523_s0 + $0xe30] sm:$0xff] }
  0xa3   : > { %1256 = vst [vmem:[%s12528_s29 + $0x720] sm:$0xff] %v1255_v36  ;;  %1258 = vst [vmem:[%s12528_s29 + $0x728] sm:$0xff] %v1257_v37  ;;  %v1261_v39 = vld [vmem:[%s12523_s0 + $0xe38] sm:$0xff]  ;;  %v1263_v40 = vld [vmem:[%s12523_s0 + $0xe40] sm:$0xff] }
  0xa4   : > { %1260 = vst [vmem:[%s12528_s29 + $0x730] sm:$0xff] %v1259_v38  ;;  %v1265_v41 = vld [vmem:[%s12523_s0 + $0xe48] sm:$0xff]  ;;  %1262 = vst [vmem:[%s12528_s29 + $0x738] sm:$0xff] %v1261_v39  ;;  %v1267_v42 = vld [vmem:[%s12523_s0 + $0xe50] sm:$0xff] }
  0xa5   : > { %1264 = vst [vmem:[%s12528_s29 + $0x740] sm:$0xff] %v1263_v40  ;;  %1266 = vst [vmem:[%s12528_s29 + $0x748] sm:$0xff] %v1265_v41  ;;  %v1269_v43 = vld [vmem:[%s12523_s0 + $0xe58] sm:$0xff]  ;;  %v1271_v44 = vld [vmem:[%s12523_s0 + $0xe60] sm:$0xff] }
  0xa6   : > { %1268 = vst [vmem:[%s12528_s29 + $0x750] sm:$0xff] %v1267_v42  ;;  %1270 = vst [vmem:[%s12528_s29 + $0x758] sm:$0xff] %v1269_v43  ;;  %v1273_v45 = vld [vmem:[%s12523_s0 + $0xe68] sm:$0xff]  ;;  %v1275_v46 = vld [vmem:[%s12523_s0 + $0xe70] sm:$0xff] }
  0xa7   : > { %1272 = vst [vmem:[%s12528_s29 + $0x760] sm:$0xff] %v1271_v44  ;;  %v1277_v47 = vld [vmem:[%s12523_s0 + $0xe78] sm:$0xff]  ;;  %1274 = vst [vmem:[%s12528_s29 + $0x768] sm:$0xff] %v1273_v45  ;;  %v1279_v48 = vld [vmem:[%s12523_s0 + $0xf00] sm:$0xff] }
  0xa8   : > { %1276 = vst [vmem:[%s12528_s29 + $0x770] sm:$0xff] %v1275_v46  ;;  %1278 = vst [vmem:[%s12528_s29 + $0x778] sm:$0xff] %v1277_v47  ;;  %v1281_v49 = vld [vmem:[%s12523_s0 + $0xf08] sm:$0xff]  ;;  %v1283_v50 = vld [vmem:[%s12523_s0 + $0xf10] sm:$0xff] }
  0xa9   : > { %1280 = vst [vmem:[%s12528_s29 + $0x780] sm:$0xff] %v1279_v48  ;;  %1282 = vst [vmem:[%s12528_s29 + $0x788] sm:$0xff] %v1281_v49  ;;  %v1285_v51 = vld [vmem:[%s12523_s0 + $0xf18] sm:$0xff]  ;;  %v1287_v52 = vld [vmem:[%s12523_s0 + $0xf20] sm:$0xff] }
  0xaa   : > { %1284 = vst [vmem:[%s12528_s29 + $0x790] sm:$0xff] %v1283_v50  ;;  %v1289_v53 = vld [vmem:[%s12523_s0 + $0xf28] sm:$0xff]  ;;  %1286 = vst [vmem:[%s12528_s29 + $0x798] sm:$0xff] %v1285_v51  ;;  %v1291_v54 = vld [vmem:[%s12523_s0 + $0xf30] sm:$0xff] }
  0xab   : > { %1288 = vst [vmem:[%s12528_s29 + $0x7a0] sm:$0xff] %v1287_v52  ;;  %1290 = vst [vmem:[%s12528_s29 + $0x7a8] sm:$0xff] %v1289_v53  ;;  %v1293_v55 = vld [vmem:[%s12523_s0 + $0xf38] sm:$0xff]  ;;  %v1295_v56 = vld [vmem:[%s12523_s0 + $0xf40] sm:$0xff] }
  0xac   : > { %1292 = vst [vmem:[%s12528_s29 + $0x7b0] sm:$0xff] %v1291_v54  ;;  %1294 = vst [vmem:[%s12528_s29 + $0x7b8] sm:$0xff] %v1293_v55  ;;  %v1297_v57 = vld [vmem:[%s12523_s0 + $0xf48] sm:$0xff]  ;;  %v1299_v58 = vld [vmem:[%s12523_s0 + $0xf50] sm:$0xff] }
  0xad   : > { %1296 = vst [vmem:[%s12528_s29 + $0x7c0] sm:$0xff] %v1295_v56  ;;  %v1301_v59 = vld [vmem:[%s12523_s0 + $0xf58] sm:$0xff]  ;;  %1298 = vst [vmem:[%s12528_s29 + $0x7c8] sm:$0xff] %v1297_v57  ;;  %v1303_v60 = vld [vmem:[%s12523_s0 + $0xf60] sm:$0xff] }
  0xae   : > { %1300 = vst [vmem:[%s12528_s29 + $0x7d0] sm:$0xff] %v1299_v58  ;;  %1302 = vst [vmem:[%s12528_s29 + $0x7d8] sm:$0xff] %v1301_v59  ;;  %v1305_v61 = vld [vmem:[%s12523_s0 + $0xf68] sm:$0xff]  ;;  %v1307_v62 = vld [vmem:[%s12523_s0 + $0xf70] sm:$0xff] }
  0xaf   : > { %1304 = vst [vmem:[%s12528_s29 + $0x7e0] sm:$0xff] %v1303_v60  ;;  %1306 = vst [vmem:[%s12528_s29 + $0x7e8] sm:$0xff] %v1305_v61  ;;  %v1309_v63 = vld [vmem:[%s12523_s0 + $0xf78] sm:$0xff]  ;;  %v1311_v0 = vld [vmem:[%s12523_s0 + $0x1000] sm:$0xff] }
  0xb0   : > { %1308 = vst [vmem:[%s12528_s29 + $0x7f0] sm:$0xff] %v1307_v62  ;;  %v1313_v1 = vld [vmem:[%s12523_s0 + $0x1008] sm:$0xff]  ;;  %1310 = vst [vmem:[%s12528_s29 + $0x7f8] sm:$0xff] %v1309_v63  ;;  %v1315_v2 = vld [vmem:[%s12523_s0 + $0x1010] sm:$0xff] }
  0xb1   : > { %1312 = vst [vmem:[%s12528_s29 + $0x800] sm:$0xff] %v1311_v0  ;;  %1314 = vst [vmem:[%s12528_s29 + $0x808] sm:$0xff] %v1313_v1  ;;  %v1317_v3 = vld [vmem:[%s12523_s0 + $0x1018] sm:$0xff]  ;;  %v1319_v4 = vld [vmem:[%s12523_s0 + $0x1020] sm:$0xff] }
  0xb2   : > { %1316 = vst [vmem:[%s12528_s29 + $0x810] sm:$0xff] %v1315_v2  ;;  %1318 = vst [vmem:[%s12528_s29 + $0x818] sm:$0xff] %v1317_v3  ;;  %v1321_v5 = vld [vmem:[%s12523_s0 + $0x1028] sm:$0xff]  ;;  %v1323_v6 = vld [vmem:[%s12523_s0 + $0x1030] sm:$0xff] }
  0xb3   : > { %1320 = vst [vmem:[%s12528_s29 + $0x820] sm:$0xff] %v1319_v4  ;;  %v1325_v7 = vld [vmem:[%s12523_s0 + $0x1038] sm:$0xff]  ;;  %1322 = vst [vmem:[%s12528_s29 + $0x828] sm:$0xff] %v1321_v5  ;;  %v1327_v8 = vld [vmem:[%s12523_s0 + $0x1040] sm:$0xff] }
  0xb4   : > { %1324 = vst [vmem:[%s12528_s29 + $0x830] sm:$0xff] %v1323_v6  ;;  %1326 = vst [vmem:[%s12528_s29 + $0x838] sm:$0xff] %v1325_v7  ;;  %v1329_v9 = vld [vmem:[%s12523_s0 + $0x1048] sm:$0xff]  ;;  %v1331_v10 = vld [vmem:[%s12523_s0 + $0x1050] sm:$0xff] }
  0xb5   : > { %1328 = vst [vmem:[%s12528_s29 + $0x840] sm:$0xff] %v1327_v8  ;;  %1330 = vst [vmem:[%s12528_s29 + $0x848] sm:$0xff] %v1329_v9  ;;  %v1333_v11 = vld [vmem:[%s12523_s0 + $0x1058] sm:$0xff]  ;;  %v1335_v12 = vld [vmem:[%s12523_s0 + $0x1060] sm:$0xff] }
  0xb6   : > { %1332 = vst [vmem:[%s12528_s29 + $0x850] sm:$0xff] %v1331_v10  ;;  %v1337_v13 = vld [vmem:[%s12523_s0 + $0x1068] sm:$0xff]  ;;  %1334 = vst [vmem:[%s12528_s29 + $0x858] sm:$0xff] %v1333_v11  ;;  %v1339_v14 = vld [vmem:[%s12523_s0 + $0x1070] sm:$0xff] }
  0xb7   : > { %1336 = vst [vmem:[%s12528_s29 + $0x860] sm:$0xff] %v1335_v12  ;;  %1338 = vst [vmem:[%s12528_s29 + $0x868] sm:$0xff] %v1337_v13  ;;  %v1341_v15 = vld [vmem:[%s12523_s0 + $0x1078] sm:$0xff]  ;;  %v1343_v16 = vld [vmem:[%s12523_s0 + $0x1100] sm:$0xff] }
  0xb8   : > { %1340 = vst [vmem:[%s12528_s29 + $0x870] sm:$0xff] %v1339_v14  ;;  %1342 = vst [vmem:[%s12528_s29 + $0x878] sm:$0xff] %v1341_v15  ;;  %v1345_v17 = vld [vmem:[%s12523_s0 + $0x1108] sm:$0xff]  ;;  %v1347_v18 = vld [vmem:[%s12523_s0 + $0x1110] sm:$0xff] }
  0xb9   : > { %1344 = vst [vmem:[%s12528_s29 + $0x880] sm:$0xff] %v1343_v16  ;;  %v1349_v19 = vld [vmem:[%s12523_s0 + $0x1118] sm:$0xff]  ;;  %1346 = vst [vmem:[%s12528_s29 + $0x888] sm:$0xff] %v1345_v17  ;;  %v1351_v20 = vld [vmem:[%s12523_s0 + $0x1120] sm:$0xff] }
  0xba   : > { %1348 = vst [vmem:[%s12528_s29 + $0x890] sm:$0xff] %v1347_v18  ;;  %1350 = vst [vmem:[%s12528_s29 + $0x898] sm:$0xff] %v1349_v19  ;;  %v1353_v21 = vld [vmem:[%s12523_s0 + $0x1128] sm:$0xff]  ;;  %v1355_v22 = vld [vmem:[%s12523_s0 + $0x1130] sm:$0xff] }
  0xbb   : > { %1352 = vst [vmem:[%s12528_s29 + $0x8a0] sm:$0xff] %v1351_v20  ;;  %1354 = vst [vmem:[%s12528_s29 + $0x8a8] sm:$0xff] %v1353_v21  ;;  %v1357_v23 = vld [vmem:[%s12523_s0 + $0x1138] sm:$0xff]  ;;  %v1359_v24 = vld [vmem:[%s12523_s0 + $0x1140] sm:$0xff] }
  0xbc   : > { %1356 = vst [vmem:[%s12528_s29 + $0x8b0] sm:$0xff] %v1355_v22  ;;  %v1361_v25 = vld [vmem:[%s12523_s0 + $0x1148] sm:$0xff]  ;;  %1358 = vst [vmem:[%s12528_s29 + $0x8b8] sm:$0xff] %v1357_v23  ;;  %v1363_v26 = vld [vmem:[%s12523_s0 + $0x1150] sm:$0xff] }
  0xbd   : > { %1360 = vst [vmem:[%s12528_s29 + $0x8c0] sm:$0xff] %v1359_v24  ;;  %1362 = vst [vmem:[%s12528_s29 + $0x8c8] sm:$0xff] %v1361_v25  ;;  %v1365_v27 = vld [vmem:[%s12523_s0 + $0x1158] sm:$0xff]  ;;  %v1367_v28 = vld [vmem:[%s12523_s0 + $0x1160] sm:$0xff] }
  0xbe   : > { %1364 = vst [vmem:[%s12528_s29 + $0x8d0] sm:$0xff] %v1363_v26  ;;  %1366 = vst [vmem:[%s12528_s29 + $0x8d8] sm:$0xff] %v1365_v27  ;;  %v1369_v29 = vld [vmem:[%s12523_s0 + $0x1168] sm:$0xff]  ;;  %v1371_v30 = vld [vmem:[%s12523_s0 + $0x1170] sm:$0xff] }
  0xbf   : > { %1368 = vst [vmem:[%s12528_s29 + $0x8e0] sm:$0xff] %v1367_v28  ;;  %v1373_v31 = vld [vmem:[%s12523_s0 + $0x1178] sm:$0xff]  ;;  %1370 = vst [vmem:[%s12528_s29 + $0x8e8] sm:$0xff] %v1369_v29  ;;  %v1375_v32 = vld [vmem:[%s12523_s0 + $0x1200] sm:$0xff] }
  0xc0   : > { %1372 = vst [vmem:[%s12528_s29 + $0x8f0] sm:$0xff] %v1371_v30  ;;  %1374 = vst [vmem:[%s12528_s29 + $0x8f8] sm:$0xff] %v1373_v31  ;;  %v1377_v33 = vld [vmem:[%s12523_s0 + $0x1208] sm:$0xff]  ;;  %v1379_v34 = vld [vmem:[%s12523_s0 + $0x1210] sm:$0xff] }
  0xc1   : > { %1376 = vst [vmem:[%s12528_s29 + $0x900] sm:$0xff] %v1375_v32  ;;  %1378 = vst [vmem:[%s12528_s29 + $0x908] sm:$0xff] %v1377_v33  ;;  %v1381_v35 = vld [vmem:[%s12523_s0 + $0x1218] sm:$0xff]  ;;  %v1383_v36 = vld [vmem:[%s12523_s0 + $0x1220] sm:$0xff] }
  0xc2   : > { %1380 = vst [vmem:[%s12528_s29 + $0x910] sm:$0xff] %v1379_v34  ;;  %v1385_v37 = vld [vmem:[%s12523_s0 + $0x1228] sm:$0xff]  ;;  %1382 = vst [vmem:[%s12528_s29 + $0x918] sm:$0xff] %v1381_v35  ;;  %v1387_v38 = vld [vmem:[%s12523_s0 + $0x1230] sm:$0xff] }
  0xc3   : > { %1384 = vst [vmem:[%s12528_s29 + $0x920] sm:$0xff] %v1383_v36  ;;  %1386 = vst [vmem:[%s12528_s29 + $0x928] sm:$0xff] %v1385_v37  ;;  %v1389_v39 = vld [vmem:[%s12523_s0 + $0x1238] sm:$0xff]  ;;  %v1391_v40 = vld [vmem:[%s12523_s0 + $0x1240] sm:$0xff] }
  0xc4   : > { %1388 = vst [vmem:[%s12528_s29 + $0x930] sm:$0xff] %v1387_v38  ;;  %1390 = vst [vmem:[%s12528_s29 + $0x938] sm:$0xff] %v1389_v39  ;;  %v1393_v41 = vld [vmem:[%s12523_s0 + $0x1248] sm:$0xff]  ;;  %v1395_v42 = vld [vmem:[%s12523_s0 + $0x1250] sm:$0xff] }
  0xc5   : > { %1392 = vst [vmem:[%s12528_s29 + $0x940] sm:$0xff] %v1391_v40  ;;  %v1397_v43 = vld [vmem:[%s12523_s0 + $0x1258] sm:$0xff]  ;;  %1394 = vst [vmem:[%s12528_s29 + $0x948] sm:$0xff] %v1393_v41  ;;  %v1399_v44 = vld [vmem:[%s12523_s0 + $0x1260] sm:$0xff] }
  0xc6   : > { %1396 = vst [vmem:[%s12528_s29 + $0x950] sm:$0xff] %v1395_v42  ;;  %1398 = vst [vmem:[%s12528_s29 + $0x958] sm:$0xff] %v1397_v43  ;;  %v1401_v45 = vld [vmem:[%s12523_s0 + $0x1268] sm:$0xff]  ;;  %v1403_v46 = vld [vmem:[%s12523_s0 + $0x1270] sm:$0xff] }
  0xc7   : > { %1400 = vst [vmem:[%s12528_s29 + $0x960] sm:$0xff] %v1399_v44  ;;  %1402 = vst [vmem:[%s12528_s29 + $0x968] sm:$0xff] %v1401_v45  ;;  %v1405_v47 = vld [vmem:[%s12523_s0 + $0x1278] sm:$0xff]  ;;  %v1407_v48 = vld [vmem:[%s12523_s0 + $0x1300] sm:$0xff] }
  0xc8   : > { %1404 = vst [vmem:[%s12528_s29 + $0x970] sm:$0xff] %v1403_v46  ;;  %v1409_v49 = vld [vmem:[%s12523_s0 + $0x1308] sm:$0xff]  ;;  %1406 = vst [vmem:[%s12528_s29 + $0x978] sm:$0xff] %v1405_v47  ;;  %v1411_v50 = vld [vmem:[%s12523_s0 + $0x1310] sm:$0xff] }
  0xc9   : > { %1408 = vst [vmem:[%s12528_s29 + $0x980] sm:$0xff] %v1407_v48  ;;  %1410 = vst [vmem:[%s12528_s29 + $0x988] sm:$0xff] %v1409_v49  ;;  %v1413_v51 = vld [vmem:[%s12523_s0 + $0x1318] sm:$0xff]  ;;  %v1415_v52 = vld [vmem:[%s12523_s0 + $0x1320] sm:$0xff] }
  0xca   : > { %1412 = vst [vmem:[%s12528_s29 + $0x990] sm:$0xff] %v1411_v50  ;;  %1414 = vst [vmem:[%s12528_s29 + $0x998] sm:$0xff] %v1413_v51  ;;  %v1417_v53 = vld [vmem:[%s12523_s0 + $0x1328] sm:$0xff]  ;;  %v1419_v54 = vld [vmem:[%s12523_s0 + $0x1330] sm:$0xff] }
  0xcb   : > { %1416 = vst [vmem:[%s12528_s29 + $0x9a0] sm:$0xff] %v1415_v52  ;;  %v1421_v55 = vld [vmem:[%s12523_s0 + $0x1338] sm:$0xff]  ;;  %1418 = vst [vmem:[%s12528_s29 + $0x9a8] sm:$0xff] %v1417_v53  ;;  %v1423_v56 = vld [vmem:[%s12523_s0 + $0x1340] sm:$0xff] }
  0xcc   : > { %1420 = vst [vmem:[%s12528_s29 + $0x9b0] sm:$0xff] %v1419_v54  ;;  %1422 = vst [vmem:[%s12528_s29 + $0x9b8] sm:$0xff] %v1421_v55  ;;  %v1425_v57 = vld [vmem:[%s12523_s0 + $0x1348] sm:$0xff]  ;;  %v1427_v58 = vld [vmem:[%s12523_s0 + $0x1350] sm:$0xff] }
  0xcd   : > { %1424 = vst [vmem:[%s12528_s29 + $0x9c0] sm:$0xff] %v1423_v56  ;;  %1426 = vst [vmem:[%s12528_s29 + $0x9c8] sm:$0xff] %v1425_v57  ;;  %v1429_v59 = vld [vmem:[%s12523_s0 + $0x1358] sm:$0xff]  ;;  %v1431_v60 = vld [vmem:[%s12523_s0 + $0x1360] sm:$0xff] }
  0xce   : > { %1428 = vst [vmem:[%s12528_s29 + $0x9d0] sm:$0xff] %v1427_v58  ;;  %v1433_v61 = vld [vmem:[%s12523_s0 + $0x1368] sm:$0xff]  ;;  %1430 = vst [vmem:[%s12528_s29 + $0x9d8] sm:$0xff] %v1429_v59  ;;  %v1435_v62 = vld [vmem:[%s12523_s0 + $0x1370] sm:$0xff] }
  0xcf   : > { %1432 = vst [vmem:[%s12528_s29 + $0x9e0] sm:$0xff] %v1431_v60  ;;  %1434 = vst [vmem:[%s12528_s29 + $0x9e8] sm:$0xff] %v1433_v61  ;;  %v1437_v63 = vld [vmem:[%s12523_s0 + $0x1378] sm:$0xff]  ;;  %v1439_v0 = vld [vmem:[%s12523_s0 + $0x1400] sm:$0xff] }
  0xd0   : > { %1436 = vst [vmem:[%s12528_s29 + $0x9f0] sm:$0xff] %v1435_v62  ;;  %1438 = vst [vmem:[%s12528_s29 + $0x9f8] sm:$0xff] %v1437_v63  ;;  %v1441_v1 = vld [vmem:[%s12523_s0 + $0x1408] sm:$0xff]  ;;  %v1443_v2 = vld [vmem:[%s12523_s0 + $0x1410] sm:$0xff] }
  0xd1   : > { %1440 = vst [vmem:[%s12528_s29 + $0xa00] sm:$0xff] %v1439_v0  ;;  %v1445_v3 = vld [vmem:[%s12523_s0 + $0x1418] sm:$0xff]  ;;  %1442 = vst [vmem:[%s12528_s29 + $0xa08] sm:$0xff] %v1441_v1  ;;  %v1447_v4 = vld [vmem:[%s12523_s0 + $0x1420] sm:$0xff] }
  0xd2   : > { %1444 = vst [vmem:[%s12528_s29 + $0xa10] sm:$0xff] %v1443_v2  ;;  %1446 = vst [vmem:[%s12528_s29 + $0xa18] sm:$0xff] %v1445_v3  ;;  %v1449_v5 = vld [vmem:[%s12523_s0 + $0x1428] sm:$0xff]  ;;  %v1451_v6 = vld [vmem:[%s12523_s0 + $0x1430] sm:$0xff] }
  0xd3   : > { %1448 = vst [vmem:[%s12528_s29 + $0xa20] sm:$0xff] %v1447_v4  ;;  %1450 = vst [vmem:[%s12528_s29 + $0xa28] sm:$0xff] %v1449_v5  ;;  %v1453_v7 = vld [vmem:[%s12523_s0 + $0x1438] sm:$0xff]  ;;  %v1455_v8 = vld [vmem:[%s12523_s0 + $0x1440] sm:$0xff] }
  0xd4   : > { %1452 = vst [vmem:[%s12528_s29 + $0xa30] sm:$0xff] %v1451_v6  ;;  %v1457_v9 = vld [vmem:[%s12523_s0 + $0x1448] sm:$0xff]  ;;  %1454 = vst [vmem:[%s12528_s29 + $0xa38] sm:$0xff] %v1453_v7  ;;  %v1459_v10 = vld [vmem:[%s12523_s0 + $0x1450] sm:$0xff] }
  0xd5   : > { %1456 = vst [vmem:[%s12528_s29 + $0xa40] sm:$0xff] %v1455_v8  ;;  %1458 = vst [vmem:[%s12528_s29 + $0xa48] sm:$0xff] %v1457_v9  ;;  %v1461_v11 = vld [vmem:[%s12523_s0 + $0x1458] sm:$0xff]  ;;  %v1463_v12 = vld [vmem:[%s12523_s0 + $0x1460] sm:$0xff] }
  0xd6   : > { %1460 = vst [vmem:[%s12528_s29 + $0xa50] sm:$0xff] %v1459_v10  ;;  %1462 = vst [vmem:[%s12528_s29 + $0xa58] sm:$0xff] %v1461_v11  ;;  %v1465_v13 = vld [vmem:[%s12523_s0 + $0x1468] sm:$0xff]  ;;  %v1467_v14 = vld [vmem:[%s12523_s0 + $0x1470] sm:$0xff] }
  0xd7   : > { %1464 = vst [vmem:[%s12528_s29 + $0xa60] sm:$0xff] %v1463_v12  ;;  %v1469_v15 = vld [vmem:[%s12523_s0 + $0x1478] sm:$0xff]  ;;  %1466 = vst [vmem:[%s12528_s29 + $0xa68] sm:$0xff] %v1465_v13  ;;  %v1471_v16 = vld [vmem:[%s12523_s0 + $0x1500] sm:$0xff] }
  0xd8   : > { %1468 = vst [vmem:[%s12528_s29 + $0xa70] sm:$0xff] %v1467_v14  ;;  %1470 = vst [vmem:[%s12528_s29 + $0xa78] sm:$0xff] %v1469_v15  ;;  %v1473_v17 = vld [vmem:[%s12523_s0 + $0x1508] sm:$0xff]  ;;  %v1475_v18 = vld [vmem:[%s12523_s0 + $0x1510] sm:$0xff] }
  0xd9   : > { %1472 = vst [vmem:[%s12528_s29 + $0xa80] sm:$0xff] %v1471_v16  ;;  %1474 = vst [vmem:[%s12528_s29 + $0xa88] sm:$0xff] %v1473_v17  ;;  %v1477_v19 = vld [vmem:[%s12523_s0 + $0x1518] sm:$0xff]  ;;  %v1479_v20 = vld [vmem:[%s12523_s0 + $0x1520] sm:$0xff] }
  0xda   : > { %1476 = vst [vmem:[%s12528_s29 + $0xa90] sm:$0xff] %v1475_v18  ;;  %v1481_v21 = vld [vmem:[%s12523_s0 + $0x1528] sm:$0xff]  ;;  %1478 = vst [vmem:[%s12528_s29 + $0xa98] sm:$0xff] %v1477_v19  ;;  %v1483_v22 = vld [vmem:[%s12523_s0 + $0x1530] sm:$0xff] }
  0xdb   : > { %1480 = vst [vmem:[%s12528_s29 + $0xaa0] sm:$0xff] %v1479_v20  ;;  %1482 = vst [vmem:[%s12528_s29 + $0xaa8] sm:$0xff] %v1481_v21  ;;  %v1485_v23 = vld [vmem:[%s12523_s0 + $0x1538] sm:$0xff]  ;;  %v1487_v24 = vld [vmem:[%s12523_s0 + $0x1540] sm:$0xff] }
  0xdc   : > { %1484 = vst [vmem:[%s12528_s29 + $0xab0] sm:$0xff] %v1483_v22  ;;  %1486 = vst [vmem:[%s12528_s29 + $0xab8] sm:$0xff] %v1485_v23  ;;  %v1489_v25 = vld [vmem:[%s12523_s0 + $0x1548] sm:$0xff]  ;;  %v1491_v26 = vld [vmem:[%s12523_s0 + $0x1550] sm:$0xff] }
  0xdd   : > { %1488 = vst [vmem:[%s12528_s29 + $0xac0] sm:$0xff] %v1487_v24  ;;  %v1493_v27 = vld [vmem:[%s12523_s0 + $0x1558] sm:$0xff]  ;;  %1490 = vst [vmem:[%s12528_s29 + $0xac8] sm:$0xff] %v1489_v25  ;;  %v1495_v28 = vld [vmem:[%s12523_s0 + $0x1560] sm:$0xff] }
  0xde   : > { %1492 = vst [vmem:[%s12528_s29 + $0xad0] sm:$0xff] %v1491_v26  ;;  %1494 = vst [vmem:[%s12528_s29 + $0xad8] sm:$0xff] %v1493_v27  ;;  %v1497_v29 = vld [vmem:[%s12523_s0 + $0x1568] sm:$0xff]  ;;  %v1499_v30 = vld [vmem:[%s12523_s0 + $0x1570] sm:$0xff] }
  0xdf   : > { %1496 = vst [vmem:[%s12528_s29 + $0xae0] sm:$0xff] %v1495_v28  ;;  %1498 = vst [vmem:[%s12528_s29 + $0xae8] sm:$0xff] %v1497_v29  ;;  %v1501_v31 = vld [vmem:[%s12523_s0 + $0x1578] sm:$0xff]  ;;  %v1503_v32 = vld [vmem:[%s12523_s0 + $0x1600] sm:$0xff] }
  0xe0   : > { %1500 = vst [vmem:[%s12528_s29 + $0xaf0] sm:$0xff] %v1499_v30  ;;  %v1505_v33 = vld [vmem:[%s12523_s0 + $0x1608] sm:$0xff]  ;;  %1502 = vst [vmem:[%s12528_s29 + $0xaf8] sm:$0xff] %v1501_v31  ;;  %v1507_v34 = vld [vmem:[%s12523_s0 + $0x1610] sm:$0xff] }
  0xe1   : > { %1504 = vst [vmem:[%s12528_s29 + $0xb00] sm:$0xff] %v1503_v32  ;;  %1506 = vst [vmem:[%s12528_s29 + $0xb08] sm:$0xff] %v1505_v33  ;;  %v1509_v35 = vld [vmem:[%s12523_s0 + $0x1618] sm:$0xff]  ;;  %v1511_v36 = vld [vmem:[%s12523_s0 + $0x1620] sm:$0xff] }
  0xe2   : > { %1508 = vst [vmem:[%s12528_s29 + $0xb10] sm:$0xff] %v1507_v34  ;;  %1510 = vst [vmem:[%s12528_s29 + $0xb18] sm:$0xff] %v1509_v35  ;;  %v1513_v37 = vld [vmem:[%s12523_s0 + $0x1628] sm:$0xff]  ;;  %v1515_v38 = vld [vmem:[%s12523_s0 + $0x1630] sm:$0xff] }
  0xe3   : > { %1512 = vst [vmem:[%s12528_s29 + $0xb20] sm:$0xff] %v1511_v36  ;;  %v1517_v39 = vld [vmem:[%s12523_s0 + $0x1638] sm:$0xff]  ;;  %1514 = vst [vmem:[%s12528_s29 + $0xb28] sm:$0xff] %v1513_v37  ;;  %v1519_v40 = vld [vmem:[%s12523_s0 + $0x1640] sm:$0xff] }
  0xe4   : > { %1516 = vst [vmem:[%s12528_s29 + $0xb30] sm:$0xff] %v1515_v38  ;;  %1518 = vst [vmem:[%s12528_s29 + $0xb38] sm:$0xff] %v1517_v39  ;;  %v1521_v41 = vld [vmem:[%s12523_s0 + $0x1648] sm:$0xff]  ;;  %v1523_v42 = vld [vmem:[%s12523_s0 + $0x1650] sm:$0xff] }
  0xe5   : > { %1520 = vst [vmem:[%s12528_s29 + $0xb40] sm:$0xff] %v1519_v40  ;;  %1522 = vst [vmem:[%s12528_s29 + $0xb48] sm:$0xff] %v1521_v41  ;;  %v1525_v43 = vld [vmem:[%s12523_s0 + $0x1658] sm:$0xff]  ;;  %v1527_v44 = vld [vmem:[%s12523_s0 + $0x1660] sm:$0xff] }
  0xe6   : > { %1524 = vst [vmem:[%s12528_s29 + $0xb50] sm:$0xff] %v1523_v42  ;;  %v1529_v45 = vld [vmem:[%s12523_s0 + $0x1668] sm:$0xff]  ;;  %1526 = vst [vmem:[%s12528_s29 + $0xb58] sm:$0xff] %v1525_v43  ;;  %v1531_v46 = vld [vmem:[%s12523_s0 + $0x1670] sm:$0xff] }
  0xe7   : > { %1528 = vst [vmem:[%s12528_s29 + $0xb60] sm:$0xff] %v1527_v44  ;;  %1530 = vst [vmem:[%s12528_s29 + $0xb68] sm:$0xff] %v1529_v45  ;;  %v1533_v47 = vld [vmem:[%s12523_s0 + $0x1678] sm:$0xff]  ;;  %v1535_v48 = vld [vmem:[%s12523_s0 + $0x1700] sm:$0xff] }
  0xe8   : > { %1532 = vst [vmem:[%s12528_s29 + $0xb70] sm:$0xff] %v1531_v46  ;;  %1534 = vst [vmem:[%s12528_s29 + $0xb78] sm:$0xff] %v1533_v47  ;;  %v1537_v49 = vld [vmem:[%s12523_s0 + $0x1708] sm:$0xff]  ;;  %v1539_v50 = vld [vmem:[%s12523_s0 + $0x1710] sm:$0xff] }
  0xe9   : > { %1536 = vst [vmem:[%s12528_s29 + $0xb80] sm:$0xff] %v1535_v48  ;;  %v1541_v51 = vld [vmem:[%s12523_s0 + $0x1718] sm:$0xff]  ;;  %1538 = vst [vmem:[%s12528_s29 + $0xb88] sm:$0xff] %v1537_v49  ;;  %v1543_v52 = vld [vmem:[%s12523_s0 + $0x1720] sm:$0xff] }
  0xea   : > { %1540 = vst [vmem:[%s12528_s29 + $0xb90] sm:$0xff] %v1539_v50  ;;  %1542 = vst [vmem:[%s12528_s29 + $0xb98] sm:$0xff] %v1541_v51  ;;  %v1545_v53 = vld [vmem:[%s12523_s0 + $0x1728] sm:$0xff]  ;;  %v1547_v54 = vld [vmem:[%s12523_s0 + $0x1730] sm:$0xff] }
  0xeb   : > { %1544 = vst [vmem:[%s12528_s29 + $0xba0] sm:$0xff] %v1543_v52  ;;  %1546 = vst [vmem:[%s12528_s29 + $0xba8] sm:$0xff] %v1545_v53  ;;  %v1549_v55 = vld [vmem:[%s12523_s0 + $0x1738] sm:$0xff]  ;;  %v1551_v56 = vld [vmem:[%s12523_s0 + $0x1740] sm:$0xff] }
  0xec   : > { %1548 = vst [vmem:[%s12528_s29 + $0xbb0] sm:$0xff] %v1547_v54  ;;  %v1553_v57 = vld [vmem:[%s12523_s0 + $0x1748] sm:$0xff]  ;;  %1550 = vst [vmem:[%s12528_s29 + $0xbb8] sm:$0xff] %v1549_v55  ;;  %v1555_v58 = vld [vmem:[%s12523_s0 + $0x1750] sm:$0xff] }
  0xed   : > { %1552 = vst [vmem:[%s12528_s29 + $0xbc0] sm:$0xff] %v1551_v56  ;;  %1554 = vst [vmem:[%s12528_s29 + $0xbc8] sm:$0xff] %v1553_v57  ;;  %v1557_v59 = vld [vmem:[%s12523_s0 + $0x1758] sm:$0xff]  ;;  %v1559_v60 = vld [vmem:[%s12523_s0 + $0x1760] sm:$0xff] }
  0xee   : > { %1556 = vst [vmem:[%s12528_s29 + $0xbd0] sm:$0xff] %v1555_v58  ;;  %1558 = vst [vmem:[%s12528_s29 + $0xbd8] sm:$0xff] %v1557_v59  ;;  %v1561_v61 = vld [vmem:[%s12523_s0 + $0x1768] sm:$0xff]  ;;  %v1563_v62 = vld [vmem:[%s12523_s0 + $0x1770] sm:$0xff] }
  0xef   : > { %1560 = vst [vmem:[%s12528_s29 + $0xbe0] sm:$0xff] %v1559_v60  ;;  %v1565_v63 = vld [vmem:[%s12523_s0 + $0x1778] sm:$0xff]  ;;  %1562 = vst [vmem:[%s12528_s29 + $0xbe8] sm:$0xff] %v1561_v61  ;;  %v1567_v0 = vld [vmem:[%s12523_s0 + $0x1800] sm:$0xff] }
  0xf0   : > { %1564 = vst [vmem:[%s12528_s29 + $0xbf0] sm:$0xff] %v1563_v62  ;;  %1566 = vst [vmem:[%s12528_s29 + $0xbf8] sm:$0xff] %v1565_v63  ;;  %v1569_v1 = vld [vmem:[%s12523_s0 + $0x1808] sm:$0xff]  ;;  %v1571_v2 = vld [vmem:[%s12523_s0 + $0x1810] sm:$0xff] }
  0xf1   : > { %1568 = vst [vmem:[%s12528_s29 + $0xc00] sm:$0xff] %v1567_v0  ;;  %1570 = vst [vmem:[%s12528_s29 + $0xc08] sm:$0xff] %v1569_v1  ;;  %v1573_v3 = vld [vmem:[%s12523_s0 + $0x1818] sm:$0xff]  ;;  %v1575_v4 = vld [vmem:[%s12523_s0 + $0x1820] sm:$0xff] }
  0xf2   : > { %1572 = vst [vmem:[%s12528_s29 + $0xc10] sm:$0xff] %v1571_v2  ;;  %v1577_v5 = vld [vmem:[%s12523_s0 + $0x1828] sm:$0xff]  ;;  %1574 = vst [vmem:[%s12528_s29 + $0xc18] sm:$0xff] %v1573_v3  ;;  %v1579_v6 = vld [vmem:[%s12523_s0 + $0x1830] sm:$0xff] }
  0xf3   : > { %1576 = vst [vmem:[%s12528_s29 + $0xc20] sm:$0xff] %v1575_v4  ;;  %1578 = vst [vmem:[%s12528_s29 + $0xc28] sm:$0xff] %v1577_v5  ;;  %v1581_v7 = vld [vmem:[%s12523_s0 + $0x1838] sm:$0xff]  ;;  %v1583_v8 = vld [vmem:[%s12523_s0 + $0x1840] sm:$0xff] }
  0xf4   : > { %1580 = vst [vmem:[%s12528_s29 + $0xc30] sm:$0xff] %v1579_v6  ;;  %1582 = vst [vmem:[%s12528_s29 + $0xc38] sm:$0xff] %v1581_v7  ;;  %v1585_v9 = vld [vmem:[%s12523_s0 + $0x1848] sm:$0xff]  ;;  %v1587_v10 = vld [vmem:[%s12523_s0 + $0x1850] sm:$0xff] }
  0xf5   : > { %1584 = vst [vmem:[%s12528_s29 + $0xc40] sm:$0xff] %v1583_v8  ;;  %v1589_v11 = vld [vmem:[%s12523_s0 + $0x1858] sm:$0xff]  ;;  %1586 = vst [vmem:[%s12528_s29 + $0xc48] sm:$0xff] %v1585_v9  ;;  %v1591_v12 = vld [vmem:[%s12523_s0 + $0x1860] sm:$0xff] }
  0xf6   : > { %1588 = vst [vmem:[%s12528_s29 + $0xc50] sm:$0xff] %v1587_v10  ;;  %1590 = vst [vmem:[%s12528_s29 + $0xc58] sm:$0xff] %v1589_v11  ;;  %v1593_v13 = vld [vmem:[%s12523_s0 + $0x1868] sm:$0xff]  ;;  %v1595_v14 = vld [vmem:[%s12523_s0 + $0x1870] sm:$0xff] }
  0xf7   : > { %1592 = vst [vmem:[%s12528_s29 + $0xc60] sm:$0xff] %v1591_v12  ;;  %1594 = vst [vmem:[%s12528_s29 + $0xc68] sm:$0xff] %v1593_v13  ;;  %v1597_v15 = vld [vmem:[%s12523_s0 + $0x1878] sm:$0xff]  ;;  %v1599_v16 = vld [vmem:[%s12523_s0 + $0x1900] sm:$0xff] }
  0xf8   : > { %1596 = vst [vmem:[%s12528_s29 + $0xc70] sm:$0xff] %v1595_v14  ;;  %v1601_v17 = vld [vmem:[%s12523_s0 + $0x1908] sm:$0xff]  ;;  %1598 = vst [vmem:[%s12528_s29 + $0xc78] sm:$0xff] %v1597_v15  ;;  %v1603_v18 = vld [vmem:[%s12523_s0 + $0x1910] sm:$0xff] }
  0xf9   : > { %1600 = vst [vmem:[%s12528_s29 + $0xc80] sm:$0xff] %v1599_v16  ;;  %1602 = vst [vmem:[%s12528_s29 + $0xc88] sm:$0xff] %v1601_v17  ;;  %v1605_v19 = vld [vmem:[%s12523_s0 + $0x1918] sm:$0xff]  ;;  %v1607_v20 = vld [vmem:[%s12523_s0 + $0x1920] sm:$0xff] }
  0xfa   : > { %1604 = vst [vmem:[%s12528_s29 + $0xc90] sm:$0xff] %v1603_v18  ;;  %1606 = vst [vmem:[%s12528_s29 + $0xc98] sm:$0xff] %v1605_v19  ;;  %v1609_v21 = vld [vmem:[%s12523_s0 + $0x1928] sm:$0xff]  ;;  %v1611_v22 = vld [vmem:[%s12523_s0 + $0x1930] sm:$0xff] }
  0xfb   : > { %1608 = vst [vmem:[%s12528_s29 + $0xca0] sm:$0xff] %v1607_v20  ;;  %v1613_v23 = vld [vmem:[%s12523_s0 + $0x1938] sm:$0xff]  ;;  %1610 = vst [vmem:[%s12528_s29 + $0xca8] sm:$0xff] %v1609_v21  ;;  %v1615_v24 = vld [vmem:[%s12523_s0 + $0x1940] sm:$0xff] }
  0xfc   : > { %1612 = vst [vmem:[%s12528_s29 + $0xcb0] sm:$0xff] %v1611_v22  ;;  %1614 = vst [vmem:[%s12528_s29 + $0xcb8] sm:$0xff] %v1613_v23  ;;  %v1617_v25 = vld [vmem:[%s12523_s0 + $0x1948] sm:$0xff]  ;;  %v1619_v26 = vld [vmem:[%s12523_s0 + $0x1950] sm:$0xff] }
  0xfd   : > { %1616 = vst [vmem:[%s12528_s29 + $0xcc0] sm:$0xff] %v1615_v24  ;;  %1618 = vst [vmem:[%s12528_s29 + $0xcc8] sm:$0xff] %v1617_v25  ;;  %v1621_v27 = vld [vmem:[%s12523_s0 + $0x1958] sm:$0xff]  ;;  %v1623_v28 = vld [vmem:[%s12523_s0 + $0x1960] sm:$0xff] }
  0xfe   : > { %1620 = vst [vmem:[%s12528_s29 + $0xcd0] sm:$0xff] %v1619_v26  ;;  %v1625_v29 = vld [vmem:[%s12523_s0 + $0x1968] sm:$0xff]  ;;  %1622 = vst [vmem:[%s12528_s29 + $0xcd8] sm:$0xff] %v1621_v27  ;;  %v1627_v30 = vld [vmem:[%s12523_s0 + $0x1970] sm:$0xff] }
  0xff   : > { %1624 = vst [vmem:[%s12528_s29 + $0xce0] sm:$0xff] %v1623_v28  ;;  %1626 = vst [vmem:[%s12528_s29 + $0xce8] sm:$0xff] %v1625_v29  ;;  %v1629_v31 = vld [vmem:[%s12523_s0 + $0x1978] sm:$0xff]  ;;  %v1631_v32 = vld [vmem:[%s12523_s0 + $0x1a00] sm:$0xff] }
 0x100   : > { %1628 = vst [vmem:[%s12528_s29 + $0xcf0] sm:$0xff] %v1627_v30  ;;  %1630 = vst [vmem:[%s12528_s29 + $0xcf8] sm:$0xff] %v1629_v31  ;;  %v1633_v33 = vld [vmem:[%s12523_s0 + $0x1a08] sm:$0xff]  ;;  %v1635_v34 = vld [vmem:[%s12523_s0 + $0x1a10] sm:$0xff] }
 0x101   : > { %1632 = vst [vmem:[%s12528_s29 + $0xd00] sm:$0xff] %v1631_v32  ;;  %v1637_v35 = vld [vmem:[%s12523_s0 + $0x1a18] sm:$0xff]  ;;  %1634 = vst [vmem:[%s12528_s29 + $0xd08] sm:$0xff] %v1633_v33  ;;  %v1639_v36 = vld [vmem:[%s12523_s0 + $0x1a20] sm:$0xff] }
 0x102   : > { %1636 = vst [vmem:[%s12528_s29 + $0xd10] sm:$0xff] %v1635_v34  ;;  %1638 = vst [vmem:[%s12528_s29 + $0xd18] sm:$0xff] %v1637_v35  ;;  %v1641_v37 = vld [vmem:[%s12523_s0 + $0x1a28] sm:$0xff]  ;;  %v1643_v38 = vld [vmem:[%s12523_s0 + $0x1a30] sm:$0xff] }
 0x103   : > { %1640 = vst [vmem:[%s12528_s29 + $0xd20] sm:$0xff] %v1639_v36  ;;  %1642 = vst [vmem:[%s12528_s29 + $0xd28] sm:$0xff] %v1641_v37  ;;  %v1645_v39 = vld [vmem:[%s12523_s0 + $0x1a38] sm:$0xff]  ;;  %v1647_v40 = vld [vmem:[%s12523_s0 + $0x1a40] sm:$0xff] }
 0x104   : > { %1644 = vst [vmem:[%s12528_s29 + $0xd30] sm:$0xff] %v1643_v38  ;;  %v1649_v41 = vld [vmem:[%s12523_s0 + $0x1a48] sm:$0xff]  ;;  %1646 = vst [vmem:[%s12528_s29 + $0xd38] sm:$0xff] %v1645_v39  ;;  %v1651_v42 = vld [vmem:[%s12523_s0 + $0x1a50] sm:$0xff] }
 0x105   : > { %1648 = vst [vmem:[%s12528_s29 + $0xd40] sm:$0xff] %v1647_v40  ;;  %1650 = vst [vmem:[%s12528_s29 + $0xd48] sm:$0xff] %v1649_v41  ;;  %v1653_v43 = vld [vmem:[%s12523_s0 + $0x1a58] sm:$0xff]  ;;  %v1655_v44 = vld [vmem:[%s12523_s0 + $0x1a60] sm:$0xff] }
 0x106   : > { %1652 = vst [vmem:[%s12528_s29 + $0xd50] sm:$0xff] %v1651_v42  ;;  %1654 = vst [vmem:[%s12528_s29 + $0xd58] sm:$0xff] %v1653_v43  ;;  %v1657_v45 = vld [vmem:[%s12523_s0 + $0x1a68] sm:$0xff]  ;;  %v1659_v46 = vld [vmem:[%s12523_s0 + $0x1a70] sm:$0xff] }
 0x107   : > { %1656 = vst [vmem:[%s12528_s29 + $0xd60] sm:$0xff] %v1655_v44  ;;  %v1661_v47 = vld [vmem:[%s12523_s0 + $0x1a78] sm:$0xff]  ;;  %1658 = vst [vmem:[%s12528_s29 + $0xd68] sm:$0xff] %v1657_v45  ;;  %v1663_v48 = vld [vmem:[%s12523_s0 + $0x1b00] sm:$0xff] }
 0x108   : > { %1660 = vst [vmem:[%s12528_s29 + $0xd70] sm:$0xff] %v1659_v46  ;;  %1662 = vst [vmem:[%s12528_s29 + $0xd78] sm:$0xff] %v1661_v47  ;;  %v1665_v49 = vld [vmem:[%s12523_s0 + $0x1b08] sm:$0xff]  ;;  %v1667_v50 = vld [vmem:[%s12523_s0 + $0x1b10] sm:$0xff] }
 0x109   : > { %1664 = vst [vmem:[%s12528_s29 + $0xd80] sm:$0xff] %v1663_v48  ;;  %1666 = vst [vmem:[%s12528_s29 + $0xd88] sm:$0xff] %v1665_v49  ;;  %v1669_v51 = vld [vmem:[%s12523_s0 + $0x1b18] sm:$0xff]  ;;  %v1671_v52 = vld [vmem:[%s12523_s0 + $0x1b20] sm:$0xff] }
 0x10a   : > { %1668 = vst [vmem:[%s12528_s29 + $0xd90] sm:$0xff] %v1667_v50  ;;  %v1673_v53 = vld [vmem:[%s12523_s0 + $0x1b28] sm:$0xff]  ;;  %1670 = vst [vmem:[%s12528_s29 + $0xd98] sm:$0xff] %v1669_v51  ;;  %v1675_v54 = vld [vmem:[%s12523_s0 + $0x1b30] sm:$0xff] }
 0x10b   : > { %1672 = vst [vmem:[%s12528_s29 + $0xda0] sm:$0xff] %v1671_v52  ;;  %1674 = vst [vmem:[%s12528_s29 + $0xda8] sm:$0xff] %v1673_v53  ;;  %v1677_v55 = vld [vmem:[%s12523_s0 + $0x1b38] sm:$0xff]  ;;  %v1679_v56 = vld [vmem:[%s12523_s0 + $0x1b40] sm:$0xff] }
 0x10c   : > { %1676 = vst [vmem:[%s12528_s29 + $0xdb0] sm:$0xff] %v1675_v54  ;;  %1678 = vst [vmem:[%s12528_s29 + $0xdb8] sm:$0xff] %v1677_v55  ;;  %v1681_v57 = vld [vmem:[%s12523_s0 + $0x1b48] sm:$0xff]  ;;  %v1683_v58 = vld [vmem:[%s12523_s0 + $0x1b50] sm:$0xff] }
 0x10d   : > { %1680 = vst [vmem:[%s12528_s29 + $0xdc0] sm:$0xff] %v1679_v56  ;;  %v1685_v59 = vld [vmem:[%s12523_s0 + $0x1b58] sm:$0xff]  ;;  %1682 = vst [vmem:[%s12528_s29 + $0xdc8] sm:$0xff] %v1681_v57  ;;  %v1687_v60 = vld [vmem:[%s12523_s0 + $0x1b60] sm:$0xff] }
 0x10e   : > { %1684 = vst [vmem:[%s12528_s29 + $0xdd0] sm:$0xff] %v1683_v58  ;;  %1686 = vst [vmem:[%s12528_s29 + $0xdd8] sm:$0xff] %v1685_v59  ;;  %v1689_v61 = vld [vmem:[%s12523_s0 + $0x1b68] sm:$0xff]  ;;  %v1691_v62 = vld [vmem:[%s12523_s0 + $0x1b70] sm:$0xff] }
 0x10f   : > { %1688 = vst [vmem:[%s12528_s29 + $0xde0] sm:$0xff] %v1687_v60  ;;  %1690 = vst [vmem:[%s12528_s29 + $0xde8] sm:$0xff] %v1689_v61  ;;  %v1693_v63 = vld [vmem:[%s12523_s0 + $0x1b78] sm:$0xff]  ;;  %v1695_v0 = vld [vmem:[%s12523_s0 + $0x1c00] sm:$0xff] }
 0x110   : > { %1692 = vst [vmem:[%s12528_s29 + $0xdf0] sm:$0xff] %v1691_v62  ;;  %v1697_v1 = vld [vmem:[%s12523_s0 + $0x1c08] sm:$0xff]  ;;  %1694 = vst [vmem:[%s12528_s29 + $0xdf8] sm:$0xff] %v1693_v63  ;;  %v1699_v2 = vld [vmem:[%s12523_s0 + $0x1c10] sm:$0xff] }
 0x111   : > { %1696 = vst [vmem:[%s12528_s29 + $0xe00] sm:$0xff] %v1695_v0  ;;  %1698 = vst [vmem:[%s12528_s29 + $0xe08] sm:$0xff] %v1697_v1  ;;  %v1701_v3 = vld [vmem:[%s12523_s0 + $0x1c18] sm:$0xff]  ;;  %v1703_v4 = vld [vmem:[%s12523_s0 + $0x1c20] sm:$0xff] }
 0x112   : > { %1700 = vst [vmem:[%s12528_s29 + $0xe10] sm:$0xff] %v1699_v2  ;;  %1702 = vst [vmem:[%s12528_s29 + $0xe18] sm:$0xff] %v1701_v3  ;;  %v1705_v5 = vld [vmem:[%s12523_s0 + $0x1c28] sm:$0xff]  ;;  %v1707_v6 = vld [vmem:[%s12523_s0 + $0x1c30] sm:$0xff] }
 0x113   : > { %1704 = vst [vmem:[%s12528_s29 + $0xe20] sm:$0xff] %v1703_v4  ;;  %v1709_v7 = vld [vmem:[%s12523_s0 + $0x1c38] sm:$0xff]  ;;  %1706 = vst [vmem:[%s12528_s29 + $0xe28] sm:$0xff] %v1705_v5  ;;  %v1711_v8 = vld [vmem:[%s12523_s0 + $0x1c40] sm:$0xff] }
 0x114   : > { %1708 = vst [vmem:[%s12528_s29 + $0xe30] sm:$0xff] %v1707_v6  ;;  %1710 = vst [vmem:[%s12528_s29 + $0xe38] sm:$0xff] %v1709_v7  ;;  %v1713_v9 = vld [vmem:[%s12523_s0 + $0x1c48] sm:$0xff]  ;;  %v1715_v10 = vld [vmem:[%s12523_s0 + $0x1c50] sm:$0xff] }
 0x115   : > { %1712 = vst [vmem:[%s12528_s29 + $0xe40] sm:$0xff] %v1711_v8  ;;  %1714 = vst [vmem:[%s12528_s29 + $0xe48] sm:$0xff] %v1713_v9  ;;  %v1717_v11 = vld [vmem:[%s12523_s0 + $0x1c58] sm:$0xff]  ;;  %v1719_v12 = vld [vmem:[%s12523_s0 + $0x1c60] sm:$0xff] }
 0x116   : > { %1716 = vst [vmem:[%s12528_s29 + $0xe50] sm:$0xff] %v1715_v10  ;;  %v1721_v13 = vld [vmem:[%s12523_s0 + $0x1c68] sm:$0xff]  ;;  %1718 = vst [vmem:[%s12528_s29 + $0xe58] sm:$0xff] %v1717_v11  ;;  %v1723_v14 = vld [vmem:[%s12523_s0 + $0x1c70] sm:$0xff] }
 0x117   : > { %1720 = vst [vmem:[%s12528_s29 + $0xe60] sm:$0xff] %v1719_v12  ;;  %1722 = vst [vmem:[%s12528_s29 + $0xe68] sm:$0xff] %v1721_v13  ;;  %v1725_v15 = vld [vmem:[%s12523_s0 + $0x1c78] sm:$0xff]  ;;  %v1727_v16 = vld [vmem:[%s12523_s0 + $0x1d00] sm:$0xff] }
 0x118   : > { %1724 = vst [vmem:[%s12528_s29 + $0xe70] sm:$0xff] %v1723_v14  ;;  %1726 = vst [vmem:[%s12528_s29 + $0xe78] sm:$0xff] %v1725_v15  ;;  %v1729_v17 = vld [vmem:[%s12523_s0 + $0x1d08] sm:$0xff]  ;;  %v1731_v18 = vld [vmem:[%s12523_s0 + $0x1d10] sm:$0xff] }
 0x119   : > { %1728 = vst [vmem:[%s12528_s29 + $0xe80] sm:$0xff] %v1727_v16  ;;  %v1733_v19 = vld [vmem:[%s12523_s0 + $0x1d18] sm:$0xff]  ;;  %1730 = vst [vmem:[%s12528_s29 + $0xe88] sm:$0xff] %v1729_v17  ;;  %v1735_v20 = vld [vmem:[%s12523_s0 + $0x1d20] sm:$0xff] }
 0x11a   : > { %1732 = vst [vmem:[%s12528_s29 + $0xe90] sm:$0xff] %v1731_v18  ;;  %1734 = vst [vmem:[%s12528_s29 + $0xe98] sm:$0xff] %v1733_v19  ;;  %v1737_v21 = vld [vmem:[%s12523_s0 + $0x1d28] sm:$0xff]  ;;  %v1739_v22 = vld [vmem:[%s12523_s0 + $0x1d30] sm:$0xff] }
 0x11b   : > { %1736 = vst [vmem:[%s12528_s29 + $0xea0] sm:$0xff] %v1735_v20  ;;  %1738 = vst [vmem:[%s12528_s29 + $0xea8] sm:$0xff] %v1737_v21  ;;  %v1741_v23 = vld [vmem:[%s12523_s0 + $0x1d38] sm:$0xff]  ;;  %v1743_v24 = vld [vmem:[%s12523_s0 + $0x1d40] sm:$0xff] }
 0x11c   : > { %1740 = vst [vmem:[%s12528_s29 + $0xeb0] sm:$0xff] %v1739_v22  ;;  %v1745_v25 = vld [vmem:[%s12523_s0 + $0x1d48] sm:$0xff]  ;;  %1742 = vst [vmem:[%s12528_s29 + $0xeb8] sm:$0xff] %v1741_v23  ;;  %v1747_v26 = vld [vmem:[%s12523_s0 + $0x1d50] sm:$0xff] }
 0x11d   : > { %1744 = vst [vmem:[%s12528_s29 + $0xec0] sm:$0xff] %v1743_v24  ;;  %1746 = vst [vmem:[%s12528_s29 + $0xec8] sm:$0xff] %v1745_v25  ;;  %v1749_v27 = vld [vmem:[%s12523_s0 + $0x1d58] sm:$0xff]  ;;  %v1751_v28 = vld [vmem:[%s12523_s0 + $0x1d60] sm:$0xff] }
 0x11e   : > { %1748 = vst [vmem:[%s12528_s29 + $0xed0] sm:$0xff] %v1747_v26  ;;  %1750 = vst [vmem:[%s12528_s29 + $0xed8] sm:$0xff] %v1749_v27  ;;  %v1753_v29 = vld [vmem:[%s12523_s0 + $0x1d68] sm:$0xff]  ;;  %v1755_v30 = vld [vmem:[%s12523_s0 + $0x1d70] sm:$0xff] }
 0x11f   : > { %1752 = vst [vmem:[%s12528_s29 + $0xee0] sm:$0xff] %v1751_v28  ;;  %v1757_v31 = vld [vmem:[%s12523_s0 + $0x1d78] sm:$0xff]  ;;  %1754 = vst [vmem:[%s12528_s29 + $0xee8] sm:$0xff] %v1753_v29  ;;  %v1759_v32 = vld [vmem:[%s12523_s0 + $0x1e00] sm:$0xff] }
 0x120   : > { %1756 = vst [vmem:[%s12528_s29 + $0xef0] sm:$0xff] %v1755_v30  ;;  %1758 = vst [vmem:[%s12528_s29 + $0xef8] sm:$0xff] %v1757_v31  ;;  %v1761_v33 = vld [vmem:[%s12523_s0 + $0x1e08] sm:$0xff]  ;;  %v1763_v34 = vld [vmem:[%s12523_s0 + $0x1e10] sm:$0xff] }
 0x121   : > { %1760 = vst [vmem:[%s12528_s29 + $0xf00] sm:$0xff] %v1759_v32  ;;  %1762 = vst [vmem:[%s12528_s29 + $0xf08] sm:$0xff] %v1761_v33  ;;  %v1765_v35 = vld [vmem:[%s12523_s0 + $0x1e18] sm:$0xff]  ;;  %v1767_v36 = vld [vmem:[%s12523_s0 + $0x1e20] sm:$0xff] }
 0x122   : > { %1764 = vst [vmem:[%s12528_s29 + $0xf10] sm:$0xff] %v1763_v34  ;;  %v1769_v37 = vld [vmem:[%s12523_s0 + $0x1e28] sm:$0xff]  ;;  %1766 = vst [vmem:[%s12528_s29 + $0xf18] sm:$0xff] %v1765_v35  ;;  %v1771_v38 = vld [vmem:[%s12523_s0 + $0x1e30] sm:$0xff] }
 0x123   : > { %1768 = vst [vmem:[%s12528_s29 + $0xf20] sm:$0xff] %v1767_v36  ;;  %1770 = vst [vmem:[%s12528_s29 + $0xf28] sm:$0xff] %v1769_v37  ;;  %v1773_v39 = vld [vmem:[%s12523_s0 + $0x1e38] sm:$0xff]  ;;  %v1775_v40 = vld [vmem:[%s12523_s0 + $0x1e40] sm:$0xff] }
 0x124   : > { %1772 = vst [vmem:[%s12528_s29 + $0xf30] sm:$0xff] %v1771_v38  ;;  %1774 = vst [vmem:[%s12528_s29 + $0xf38] sm:$0xff] %v1773_v39  ;;  %v1777_v41 = vld [vmem:[%s12523_s0 + $0x1e48] sm:$0xff]  ;;  %v1779_v42 = vld [vmem:[%s12523_s0 + $0x1e50] sm:$0xff] }
 0x125   : > { %1776 = vst [vmem:[%s12528_s29 + $0xf40] sm:$0xff] %v1775_v40  ;;  %v1781_v43 = vld [vmem:[%s12523_s0 + $0x1e58] sm:$0xff]  ;;  %1778 = vst [vmem:[%s12528_s29 + $0xf48] sm:$0xff] %v1777_v41  ;;  %v1783_v44 = vld [vmem:[%s12523_s0 + $0x1e60] sm:$0xff] }
 0x126   : > { %1780 = vst [vmem:[%s12528_s29 + $0xf50] sm:$0xff] %v1779_v42  ;;  %1782 = vst [vmem:[%s12528_s29 + $0xf58] sm:$0xff] %v1781_v43  ;;  %v1785_v45 = vld [vmem:[%s12523_s0 + $0x1e68] sm:$0xff]  ;;  %v1787_v46 = vld [vmem:[%s12523_s0 + $0x1e70] sm:$0xff] }
 0x127   : > { %1784 = vst [vmem:[%s12528_s29 + $0xf60] sm:$0xff] %v1783_v44  ;;  %1786 = vst [vmem:[%s12528_s29 + $0xf68] sm:$0xff] %v1785_v45  ;;  %v1789_v47 = vld [vmem:[%s12523_s0 + $0x1e78] sm:$0xff]  ;;  %v1791_v48 = vld [vmem:[%s12523_s0 + $0x1f00] sm:$0xff] }
 0x128   : > { %1788 = vst [vmem:[%s12528_s29 + $0xf70] sm:$0xff] %v1787_v46  ;;  %v1793_v49 = vld [vmem:[%s12523_s0 + $0x1f08] sm:$0xff]  ;;  %1790 = vst [vmem:[%s12528_s29 + $0xf78] sm:$0xff] %v1789_v47  ;;  %v1795_v50 = vld [vmem:[%s12523_s0 + $0x1f10] sm:$0xff] }
 0x129   : > { %1792 = vst [vmem:[%s12528_s29 + $0xf80] sm:$0xff] %v1791_v48  ;;  %1794 = vst [vmem:[%s12528_s29 + $0xf88] sm:$0xff] %v1793_v49  ;;  %v1797_v51 = vld [vmem:[%s12523_s0 + $0x1f18] sm:$0xff]  ;;  %v1799_v52 = vld [vmem:[%s12523_s0 + $0x1f20] sm:$0xff] }
 0x12a   : > { %1796 = vst [vmem:[%s12528_s29 + $0xf90] sm:$0xff] %v1795_v50  ;;  %1798 = vst [vmem:[%s12528_s29 + $0xf98] sm:$0xff] %v1797_v51  ;;  %v1801_v53 = vld [vmem:[%s12523_s0 + $0x1f28] sm:$0xff]  ;;  %v1803_v54 = vld [vmem:[%s12523_s0 + $0x1f30] sm:$0xff] }
 0x12b   : > { %1800 = vst [vmem:[%s12528_s29 + $0xfa0] sm:$0xff] %v1799_v52  ;;  %v1805_v55 = vld [vmem:[%s12523_s0 + $0x1f38] sm:$0xff]  ;;  %1802 = vst [vmem:[%s12528_s29 + $0xfa8] sm:$0xff] %v1801_v53  ;;  %v1807_v56 = vld [vmem:[%s12523_s0 + $0x1f40] sm:$0xff] }
 0x12c   : > { %1804 = vst [vmem:[%s12528_s29 + $0xfb0] sm:$0xff] %v1803_v54  ;;  %1806 = vst [vmem:[%s12528_s29 + $0xfb8] sm:$0xff] %v1805_v55  ;;  %v1809_v57 = vld [vmem:[%s12523_s0 + $0x1f48] sm:$0xff]  ;;  %v1811_v58 = vld [vmem:[%s12523_s0 + $0x1f50] sm:$0xff] }
 0x12d   : > { %1808 = vst [vmem:[%s12528_s29 + $0xfc0] sm:$0xff] %v1807_v56  ;;  %1810 = vst [vmem:[%s12528_s29 + $0xfc8] sm:$0xff] %v1809_v57  ;;  %v1813_v59 = vld [vmem:[%s12523_s0 + $0x1f58] sm:$0xff]  ;;  %v1815_v60 = vld [vmem:[%s12523_s0 + $0x1f60] sm:$0xff] }
 0x12e   : > { %1812 = vst [vmem:[%s12528_s29 + $0xfd0] sm:$0xff] %v1811_v58  ;;  %v1817_v61 = vld [vmem:[%s12523_s0 + $0x1f68] sm:$0xff]  ;;  %1814 = vst [vmem:[%s12528_s29 + $0xfd8] sm:$0xff] %v1813_v59  ;;  %v1819_v62 = vld [vmem:[%s12523_s0 + $0x1f70] sm:$0xff] }
 0x12f   : > { %1816 = vst [vmem:[%s12528_s29 + $0xfe0] sm:$0xff] %v1815_v60  ;;  %1818 = vst [vmem:[%s12528_s29 + $0xfe8] sm:$0xff] %v1817_v61  ;;  %v1821_v63 = vld [vmem:[%s12523_s0 + $0x1f78] sm:$0xff] }
 0x130   : > { %1820 = vst [vmem:[%s12528_s29 + $0xff0] sm:$0xff] %v1819_v62  ;;  %1822 = vst [vmem:[%s12528_s29 + $0xff8] sm:$0xff] %v1821_v63 }
 0x131 PF: > { %p9472_p7 = scmp.ge.s32.totalorder %s12317_s10, 1  ;;  %p1827_p8 = scmp.lt.s32.totalorder %s12317_s10, 5 }
 0x133   : > { %p1828_p9 = pnand %p9472_p7, %p1827_p8 }
 0x134   : > { %s1834_s23 = sand.u32 (!%p1828_p9), 1, %s12293_s8   ;;  %p1916_p10 = scmp.lt.s32.totalorder (!%p1828_p9), %s12305_s30, 1 }
 0x135   : > { %1831 = sbr.rel (%p1828_p9) target bundleno = 4104 (0x1008), region = 151  ;;  %s9473_s25 = sshll.u32 (!%p1828_p9), %s1834_s23, 12 }
 0x136   : > { %s9475_s2 = sshll.u32 (!%p1828_p9), %s12301_s9, 4  ;;  %s16195_s27 = sld [smem:[#allocation57_spill]] (!%p1828_p9) }
 0x137   : > { %p1925_p11 = scmp.lt.s32.totalorder (!%p1828_p9), %s9475_s2, 31  ;;  %s13567_s8 = scalar_lea.vmem (!%p1828_p9), [#allocation4], %s9473_s25 }
 0x138   : > { %p9478_p12 = scmp.ne.s32.totalorder (!%p1828_p9), %s12301_s9, 0 }
 0x13c   : > { %s16343_s30 = smov (!%p1916_p10, %s12305_s30), 1  ;;  %s16345_s2 = smov (!%p1925_p11, %s9475_s2), 31 }
 0x13d   : > { %s11983_s0 = smul.u32 96, %s16343_s30  ;;  %s9476_s12 = sshll.u32 %s16343_s30, 5 }
 0x13e   : > { %s1928_s1 = sadd.s32 %s9476_s12, %s16345_s2  ;;  %1936 = sbr.rel (%p9478_p12) target bundleno = 3627 (0xe2b), region = 159 }
 0x13f   : > { %s13560_s11 = scalar_lea.vmem %s16195_s27, %s11983_s0  ;;  %s9477_s6 = sshll.u32 %s1928_s1, 2 }
 0x140   : > { %s13565_s5 = scalar_lea.vmem %s16136_s28, %s9477_s6 }
 0x145   : > { %s16196_s30 = sld [smem:[#allocation59_spill]]  ;;  %v12319_v2 = vmov 0   ;;  %v12044_v3 = vld [vmem:[%s13560_s11 + $0x4] ss:$8 sps:$4 sm:$0xff]   ;;  %v12046_v4 = vld [vmem:[%s13560_s11] ss:$8 sps:$4 sm:$0xff]  }
 0x146   : > { %12043 = vset.pattern.permute.xlu1 %v12319_v2  ;;  %12042 = vset.pattern.permute.xlu0 %v12319_v2  ;;  %v12047_v7 = vld [vmem:[%s13560_s11 + $0x14] ss:$8 sps:$4 sm:$0xff]   ;;  %v12049_v8 = vld [vmem:[%s13560_s11 + $0x10] ss:$8 sps:$4 sm:$0xff]   ;;  %v12050_v9 = vld [vmem:[%s13560_s11 + $0x24] ss:$8 sps:$4 sm:$0xff]  }
 0x147   : > { %2054 = vmatprep.subr.bf16.mxu0 %v12044_v3  ;;  %2086 = vmatprep.mubr.bf16.mxu0 %v12319_v2  ;;  %s16198_s0 = sld [smem:[#allocation62_spill]]  ;;  %v12052_v12 = vld [vmem:[%s13560_s11 + $0x20] ss:$8 sps:$4 sm:$0xff]   ;;  %v12053_v13 = vld [vmem:[%s13560_s11 + $0x34] ss:$8 sps:$4 sm:$0xff]   ;;  %s16199_s4 = sld [smem:[#allocation65_spill]] }
 0x148   : > { %2055 = vmatpush1.bf16.msra.mxu0 %v12046_v4  ;;  %v12055_v16 = vld [vmem:[%s13560_s11 + $0x30] ss:$8 sps:$4 sm:$0xff]   ;;  %v12056_v17 = vld [vmem:[%s13560_s11 + $0x44] ss:$8 sps:$4 sm:$0xff]   ;;  %v12058_v20 = vld [vmem:[%s13560_s11 + $0x40] ss:$8 sps:$4 sm:$0xff]  }
 0x149   : > { %2056 = vmatprep.subr.bf16.mxu0 %v12047_v7  ;;  %v12059_v21 = vld [vmem:[%s13560_s11 + $0x54] ss:$8 sps:$4 sm:$0xff]   ;;  %v12061_v24 = vld [vmem:[%s13560_s11 + $0x50] ss:$8 sps:$4 sm:$0xff]   ;;  %s16200_s2 = sld [smem:[#allocation58_spill]]  ;;  %vm2047_vm0 = vcmask 785408  }
 0x14a   : > { %v6838_v43 = vld [vmem:[%s16123_s15 + $0x8] sm:$0xff]  ;;  %v6837_v44 = vld [vmem:[%s16123_s15] sm:$0xff]  ;;  %v6840_v45 = vld [vmem:[%s16123_s15 + $0x18] sm:$0xff]  ;;  %s16201_s29 = sld [smem:[#allocation68_spill]]  ;;  %s16203_s3 = sld [smem:[#allocation61_spill]]  ;;  %vm2515_vm1 = vcmask 261120  }
 0x14b   : > { %s16197_s22 = smov %s16196_s30  ;;  %v1955_v0 = vld [vmem:[%s16196_s30 + $0x10] sm:$0xff]  ;;  %v6842_v47 = vld [vmem:[%s16123_s15 + $0x28] sm:$0xff]  ;;  %v6841_v48 = vld [vmem:[%s16123_s15 + $0x20] sm:$0xff]  ;;  %s16202_s7 = sld [smem:[#allocation60_spill]]  ;;  %vm3378_vm2 = vcmask 523264   ;;  %vm4653_vm3 = vcmask 130048  }
 0x14c   : > { %v1953_v1 = vld [vmem:[%s16197_s22] sm:$0xff]  ;;  %1969 = vperm.xlu1 %12043, %v1955_v0   ;;  %v1956_v5 = vld [vmem:[%s16197_s22 + $0x18] sm:$0xff]  ;;  %v1954_v6 = vld [vmem:[%s16197_s22 + $0x8] sm:$0xff]  ;;  %2057 = vmatpush1.bf16.msra.mxu0 %v12049_v8  ;;  %s16205_s9 = sld [smem:[#allocation63_spill]]  ;;  %s16207_s11 = sld [smem:[#allocation64_spill]]  ;;  %vm7714_vm4 = vcmask 1043456  }
 0x14d   : > { %1959 = vperm.xlu0 %12042, %v1953_v1   ;;  %v3279_v10 = vld [vmem:[%s16198_s0 + $0x8] sm:$0xff]  ;;  %v3278_v11 = vld [vmem:[%s16198_s0] sm:$0xff]  ;;  %2058 = vmatprep.subr.bf16.mxu0 %v12050_v9  ;;  %v3281_v14 = vld [vmem:[%s16198_s0 + $0x18] sm:$0xff]  ;;  %s16208_s6 = sld [smem:[#allocation66_spill]]  ;;  %s16291_s10 = sld [smem:[#allocation70_spill]]  ;;  %vm7689_vm5 = vcmask 31744  }
 0x14e   : > { %v3280_v15 = vld [vmem:[%s16198_s0 + $0x10] sm:$0xff]  ;;  %v3283_v18 = vld [vmem:[%s16198_s0 + $0x28] sm:$0xff]  ;;  %v3282_v19 = vld [vmem:[%s16198_s0 + $0x20] sm:$0xff] }
 0x14f   : > { %v3285_v22 = vld [vmem:[%s16198_s0 + $0x38] sm:$0xff]  ;;  %v3284_v23 = vld [vmem:[%s16198_s0 + $0x30] sm:$0xff]  ;;  %v4510_v25 = vld [vmem:[%s16199_s4 + $0x8] sm:$0xff] }
 0x150   : > { %1974 = vperm.xlu1 %12043, %v1956_v5   ;;  %2059 = vmatpush1.bf16.msra.mxu0 %v12052_v12  ;;  %v4509_v26 = vld [vmem:[%s16199_s4] sm:$0xff]  ;;  %v4512_v28 = vld [vmem:[%s16199_s4 + $0x18] sm:$0xff]  ;;  %v4511_v29 = vld [vmem:[%s16199_s4 + $0x10] sm:$0xff]  ;;  %s16204_s25 = smov %s16203_s3 }
 0x151   : > { %1964 = vperm.xlu0 %12042, %v1954_v6   ;;  %2060 = vmatprep.subr.bf16.mxu0 %v12053_v13  ;;  %v12062_v27 = vld [vmem:[%s16200_s2] sm:$0xff]   ;;  %v4514_v30 = vld [vmem:[%s16199_s4 + $0x28] sm:$0xff]  ;;  %v4516_v33 = vld [vmem:[%s16199_s4 + $0x38] sm:$0xff] }
 0x152   : > { %v4513_v31 = vld [vmem:[%s16199_s4 + $0x20] sm:$0xff]  ;;  %v12063_v32 = vld [vmem:[%s16200_s2 + $0x8] sm:$0xff]   ;;  %v4515_v34 = vld [vmem:[%s16199_s4 + $0x30] sm:$0xff]  ;;  %s16206_s0 = smov %s16205_s9 }
 0x153   : > { %v4518_v35 = vld [vmem:[%s16199_s4 + $0x48] sm:$0xff]  ;;  %v4517_v36 = vld [vmem:[%s16199_s4 + $0x40] sm:$0xff]  ;;  %v4520_v37 = vld [vmem:[%s16199_s4 + $0x58] sm:$0xff]  ;;  %s16209_s12 = smov %s16208_s6 }
 0x154   : > { %3293 = vperm.xlu1 %12043, %v3279_v10   ;;  %2061 = vmatpush1.bf16.msra.mxu0 %v12055_v16  ;;  %v4519_v38 = vld [vmem:[%s16199_s4 + $0x50] sm:$0xff]  ;;  %v4522_v39 = vld [vmem:[%s16199_s4 + $0x68] sm:$0xff]  ;;  %v4521_v40 = vld [vmem:[%s16199_s4 + $0x60] sm:$0xff] }
 0x155   : > { %3288 = vperm.xlu0 %12042, %v3278_v11   ;;  %2062 = vmatprep.subr.bf16.mxu0 %v12056_v17  ;;  %v4524_v41 = vld [vmem:[%s16199_s4 + $0x78] sm:$0xff]  ;;  %v4523_v42 = vld [vmem:[%s16199_s4 + $0x70] sm:$0xff]  ;;  %v6365_v51 = vld [vmem:[%s16201_s29 + $0x88] sm:$0xff] }
 0x156   : > { %v6839_v46 = vld [vmem:[%s16123_s15 + $0x10] sm:$0xff]  ;;  %v6844_v49 = vld [vmem:[%s16123_s15 + $0x38] sm:$0xff]  ;;  %v6364_v52 = vld [vmem:[%s16201_s29 + $0x80] sm:$0xff] }
 0x157   : > { %v6843_v50 = vld [vmem:[%s16123_s15 + $0x30] sm:$0xff]  ;;  %v6349_v53 = vld [vmem:[%s16201_s29 + $0x8] sm:$0xff]  ;;  %v6348_v54 = vld [vmem:[%s16201_s29] sm:$0xff] }
 0x158   : > { %3303 = vperm.xlu1 %12043, %v3281_v14   ;;  %2063 = vmatpush1.bf16.msra.mxu0 %v12058_v20  ;;  %v6367_v55 = vld [vmem:[%s16201_s29 + $0x98] sm:$0xff]  ;;  %v6366_v56 = vld [vmem:[%s16201_s29 + $0x90] sm:$0xff]  ;;  %v7191_v58 = vld [vmem:[%s16125_s17] sm:$0xff] }
 0x159   : > { %3298 = vperm.xlu0 %12042, %v3280_v15   ;;  %2064 = vmatprep.subr.bf16.mxu0 %v12059_v21  ;;  %v6350_v57 = vld [vmem:[%s16201_s29 + $0x10] sm:$0xff]  ;;  %v6368_v59 = vld [vmem:[%s16201_s29 + $0xa0] sm:$0xff]  ;;  %v6351_v60 = vld [vmem:[%s16201_s29 + $0x18] sm:$0xff] }
 0x15a   : > { %v12064_v61 = vld [vmem:[%s16202_s7 + $0xc0] sm:$0xff]   ;;  %v7192_v1 = vld [vmem:[%s16125_s17 + $0x8] sm:$0xff]  ;;  %v12072_v9 = vld [vmem:[%s16202_s7 + $0xd0] sm:$0xff]  }
 0x15b   : > { %v12065_v62 = vld [vmem:[%s16202_s7 + $0x40] sm:$0xff]   ;;  %v12068_v3 = vld [vmem:[%s16202_s7 + $0xc8] sm:$0xff]   ;;  %v12073_v10 = vld [vmem:[%s16202_s7 + $0x50] sm:$0xff]  }
 0x15c   : > { %3313 = vperm.xlu1 %12043, %v3283_v18   ;;  %2065 = vmatpush1.bf16.msra.mxu0 %v12061_v24  ;;  %v12066_v63 = vld [vmem:[%s16202_s7 + $0x80] sm:$0xff]   ;;  %v12069_v4 = vld [vmem:[%s16202_s7 + $0x48] sm:$0xff]   ;;  %v12074_v11 = vld [vmem:[%s16202_s7 + $0x90] sm:$0xff]  }
 0x15d   : > { %3308 = vperm.xlu0 %12042, %v3282_v19   ;;  %10155 = vmatprep.subr.bf16.mxu0 %v12064_v61  ;;  %v12067_v0 = vld [vmem:[%s16202_s7] sm:$0xff]   ;;  %v12070_v5 = vld [vmem:[%s16202_s7 + $0x88] sm:$0xff]   ;;  %v12075_v12 = vld [vmem:[%s16202_s7 + $0x10] sm:$0xff]  }
 0x15e   : > { %10127 = vmatprep.subr.bf16.mxu1 %v12065_v62  ;;  %v12071_v6 = vld [vmem:[%s16202_s7 + $0x8] sm:$0xff]   ;;  %v6352_v8 = vld [vmem:[%s16201_s29 + $0x20] sm:$0xff]  ;;  %v6371_v13 = vld [vmem:[%s16201_s29 + $0xb8] sm:$0xff] }
 0x15f   : > { %9493 = vmatmul.mubr.msk.bf16.vlgmr.msra.gmra.mrb[0].mxu0 %vm2047_vm0, %v12062_v27  ;;  %10128 = vmatpush3.bf16.msra.mxu1 %v12067_v0  ;;  %v6353_v7 = vld [vmem:[%s16201_s29 + $0x28] sm:$0xff]  ;;  %v6370_v14 = vld [vmem:[%s16201_s29 + $0xb0] sm:$0xff]  ;;  %v12076_v15 = vld [vmem:[%s16202_s7 + $0xd8] sm:$0xff]  }
 0x160   : > { %3323 = vperm.xlu1 %12043, %v3285_v22   ;;  %2096 = vmatprep.mubr.bf16.mxu0 %v12319_v2  ;;  %v6369_v2 = vld [vmem:[%s16201_s29 + $0xa8] sm:$0xff]  ;;  %v12077_v16 = vld [vmem:[%s16202_s7 + $0x58] sm:$0xff]   ;;  %v6354_v19 = vld [vmem:[%s16201_s29 + $0x30] sm:$0xff] }
 0x161   : > { %3318 = vperm.xlu0 %12042, %v3284_v23   ;;  %10156 = vmatpush3.bf16.msra.mxu0 %v12066_v63  ;;  %v12078_v17 = vld [vmem:[%s16202_s7 + $0x98] sm:$0xff]   ;;  %v7193_v20 = vld [vmem:[%s16125_s17 + $0x10] sm:$0xff]  ;;  %v12080_v21 = vld [vmem:[%s16202_s7 + $0xe0] sm:$0xff]  }
 0x162   : > { %10157 = vmatprep.subr.bf16.mxu0 %v12068_v3  ;;  %10129 = vmatprep.subr.bf16.mxu1 %v12069_v4  ;;  %v12079_v18 = vld [vmem:[%s16202_s7 + $0x18] sm:$0xff]   ;;  %v12081_v22 = vld [vmem:[%s16202_s7 + $0x60] sm:$0xff]   ;;  %v12084_v27 = vld [vmem:[%s16202_s7 + $0xe8] sm:$0xff]  }
 0x163   : > { %10130 = vmatpush3.bf16.msra.mxu1 %v12071_v6  ;;  %v12082_v23 = vld [vmem:[%s16202_s7 + $0xa0] sm:$0xff]   ;;  %v7536_v62 = vld [vmem:[%s16127_s19 + $0x18] sm:$0xff]  ;;  %v7535_v63 = vld [vmem:[%s16127_s19 + $0x10] sm:$0xff] }
 0x164   : > { %4532 = vperm.xlu1 %12043, %v4510_v25   ;;  %10131 = vmatprep.subr.bf16.mxu1 %v12073_v10  ;;  %v12083_v24 = vld [vmem:[%s16202_s7 + $0x20] sm:$0xff]   ;;  %v7538_v0 = vld [vmem:[%s16127_s19 + $0x28] sm:$0xff]  ;;  %v7539_v3 = vld [vmem:[%s16127_s19 + $0x30] sm:$0xff] }
 0x165   : > { %4527 = vperm.xlu0 %12042, %v4509_v26   ;;  %10158 = vmatpush3.bf16.msra.mxu0 %v12070_v5  ;;  %v6372_v25 = vld [vmem:[%s16201_s29 + $0xc0] sm:$0xff]  ;;  %v6355_v26 = vld [vmem:[%s16201_s29 + $0x38] sm:$0xff]  ;;  %v6637_v4 = vld [vmem:[%s16121_s13 + $0x8] sm:$0xff] }
 0x166   : > { %10159 = vmatprep.subr.bf16.mxu0 %v12072_v9  ;;  %v7533_v61 = vld [vmem:[%s16127_s19] sm:$0xff]  ;;  %v6639_v6 = vld [vmem:[%s16121_s13 + $0x18] sm:$0xff] }
 0x167   : > { %9494 = vmatmul.mubr.msk.bf16.gmra.mrb[4].mxu0 %vm2047_vm0, %v12063_v32  ;;  %10132 = vmatpush3.bf16.msra.mxu1 %v12075_v12  ;;  %v6373_v32 = vld [vmem:[%s16201_s29 + $0xc8] sm:$0xff]  ;;  %v6636_v5 = vld [vmem:[%s16121_s13] sm:$0xff]  ;;  %v6643_v10 = vld [vmem:[%s16121_s13 + $0x38] sm:$0xff] }
 0x168   : > { %4542 = vperm.xlu1 %12043, %v4512_v28   ;;  %10133 = vmatprep.subr.bf16.mxu1 %v12077_v16  ;;  %v12085_v28 = vld [vmem:[%s16202_s7 + $0x68] sm:$0xff]   ;;  %v6640_v9 = vld [vmem:[%s16121_s13 + $0x20] sm:$0xff] }
 0x169   : > { %4537 = vperm.xlu0 %12042, %v4511_v29   ;;  %10160 = vmatpush3.bf16.msra.mxu0 %v12074_v11  ;;  %v12086_v29 = vld [vmem:[%s16202_s7 + $0xa8] sm:$0xff]   ;;  %v6642_v11 = vld [vmem:[%s16121_s13 + $0x30] sm:$0xff] }
 0x16a   : > { %10161 = vmatprep.subr.bf16.mxu0 %v12076_v15  ;;  %v7977_v12 = vld [vmem:[%s16132_s24 + $0x8] sm:$0xff]  ;;  %v7978_v15 = vld [vmem:[%s16132_s24 + $0x10] sm:$0xff] }
 0x16b   : > { %10134 = vmatpush3.bf16.msra.mxu1 %v12079_v18  ;;  %v7981_v16 = vld [vmem:[%s16132_s24 + $0x28] sm:$0xff]  ;;  %v7983_v18 = vld [vmem:[%s16132_s24 + $0x38] sm:$0xff] }
 0x16c   : > { %4552 = vperm.xlu1 %12043, %v4514_v30   ;;  %10135 = vmatprep.subr.bf16.mxu1 %v12081_v22  ;;  %v12087_v30 = vld [vmem:[%s16202_s7 + $0x28] sm:$0xff]   ;;  %v8154_v22 = vld [vmem:[%s16134_s26] sm:$0xf] }
 0x16d   : > { %4547 = vperm.xlu0 %12042, %v4513_v31   ;;  %10162 = vmatpush3.bf16.msra.mxu0 %v12078_v17  ;;  %v7194_v31 = vld [vmem:[%s16125_s17 + $0x18] sm:$0xff]  ;;  %v7980_v17 = vld [vmem:[%s16132_s24 + $0x20] sm:$0xff] }
 0x16e   : > { %10163 = vmatprep.subr.bf16.mxu0 %v12080_v21 }
 0x16f   : > { %10136 = vmatpush3.bf16.msra.mxu1 %v12083_v24 }
 0x170   : > { %4562 = vperm.xlu1 %12043, %v4516_v33   ;;  %10137 = vmatprep.subr.bf16.mxu1 %v12085_v28  ;;  %v12088_v33 = vld [vmem:[%s16202_s7 + $0xf0] sm:$0xff]  }
 0x171   : > { %4557 = vperm.xlu0 %12042, %v4515_v34   ;;  %10164 = vmatpush3.bf16.msra.mxu0 %v12082_v23  ;;  %v12089_v34 = vld [vmem:[%s16202_s7 + $0x70] sm:$0xff]  }
 0x172   : > { %10165 = vmatprep.subr.bf16.mxu0 %v12084_v27 }
 0x173   : > { %10138 = vmatpush3.bf16.msra.mxu1 %v12087_v30 }
 0x174   : > { %4572 = vperm.xlu1 %12043, %v4518_v35   ;;  %v12090_v35 = vld [vmem:[%s16202_s7 + $0xb0] sm:$0xff]   ;;  %10139 = vmatprep.subr.bf16.mxu1 %v12089_v34 }
 0x175   : > { %4567 = vperm.xlu0 %12042, %v4517_v36   ;;  %10166 = vmatpush3.bf16.msra.mxu0 %v12086_v29  ;;  %v6357_v36 = vld [vmem:[%s16201_s29 + $0x48] sm:$0xff] }
 0x176   : > { %10167 = vmatprep.subr.bf16.mxu0 %v12088_v33 }
 0x178   : > { %4582 = vperm.xlu1 %12043, %v4520_v37   ;;  %v6356_v37 = vld [vmem:[%s16201_s29 + $0x40] sm:$0xff] }
 0x179   : > { %4577 = vperm.xlu0 %12042, %v4519_v38   ;;  %v12091_v38 = vld [vmem:[%s16202_s7 + $0x30] sm:$0xff]   ;;  %10168 = vmatpush3.bf16.msra.mxu0 %v12090_v35 }
 0x17a   : > { %10140 = vmatpush3.bf16.msra.mxu1 %v12091_v38 }
 0x17c   : > { %4592 = vperm.xlu1 %12043, %v4522_v39   ;;  %v12092_v39 = vld [vmem:[%s16202_s7 + $0xf8] sm:$0xff]  }
 0x17d   : > { %4587 = vperm.xlu0 %12042, %v4521_v40   ;;  %v12093_v40 = vld [vmem:[%s16202_s7 + $0x78] sm:$0xff]   ;;  %10169 = vmatprep.subr.bf16.mxu0 %v12092_v39 }
 0x17e   : > { %10141 = vmatprep.subr.bf16.mxu1 %v12093_v40 }
 0x180   : > { %4602 = vperm.xlu1 %12043, %v4524_v41   ;;  %v12094_v41 = vld [vmem:[%s16202_s7 + $0xb8] sm:$0xff]  }
 0x181   : > { %4597 = vperm.xlu0 %12042, %v4523_v42   ;;  %v6375_v42 = vld [vmem:[%s16201_s29 + $0xd8] sm:$0xff]  ;;  %10170 = vmatpush3.bf16.msra.mxu0 %v12094_v41  ;;  %v12097_v41 = vld [vmem:[%s16202_s7 + $0x100] sm:$0xff]  }
 0x184   : > { %6852 = vperm.xlu1 %12043, %v6838_v43   ;;  %v6374_v43 = vld [vmem:[%s16201_s29 + $0xd0] sm:$0xff] }
 0x185   : > { %6847 = vperm.xlu0 %12042, %v6837_v44   ;;  %v12095_v44 = vld [vmem:[%s16202_s7 + $0x38] sm:$0xff]  }
 0x186   : > { %10142 = vmatpush3.bf16.msra.mxu1 %v12095_v44  ;;  %v12098_v44 = vld [vmem:[%s16202_s7 + $0x148] sm:$0xff]  }
 0x188   : > { %6862 = vperm.xlu1 %12043, %v6840_v45   ;;  %v12096_v45 = vld [vmem:[%s16202_s7 + $0x140] sm:$0xff]  }
 0x189   : > { %6857 = vperm.xlu0 %12042, %v6839_v46   ;;  %v6358_v46 = vld [vmem:[%s16201_s29 + $0x50] sm:$0xff]  ;;  %10195 = vmatprep.subr.bf16.mxu0 %v12096_v45 }
 0x18c   : > { %6872 = vperm.xlu1 %12043, %v6842_v47   ;;  %v7195_v47 = vld [vmem:[%s16125_s17 + $0x20] sm:$0xff] }
 0x18d   : > { %6867 = vperm.xlu0 %12042, %v6841_v48   ;;  %v6376_v48 = vld [vmem:[%s16201_s29 + $0xe0] sm:$0xff] }
 0x190   : > { %6882 = vperm.xlu1 %12043, %v6844_v49   ;;  %v6359_v49 = vld [vmem:[%s16201_s29 + $0x58] sm:$0xff] }
 0x191   : > { %6877 = vperm.xlu0 %12042, %v6843_v50   ;;  %v7196_v50 = vld [vmem:[%s16125_s17 + $0x28] sm:$0xff] }
 0x194   : > { %6467 = vperm.xlu1 %12043, %v6365_v51   ;;  %v6377_v51 = vld [vmem:[%s16201_s29 + $0xe8] sm:$0xff] }
 0x195   : > { %6462 = vperm.xlu0 %12042, %v6364_v52   ;;  %v6361_v52 = vld [vmem:[%s16201_s29 + $0x68] sm:$0xff] }
 0x198   : > { %6387 = vperm.xlu1 %12043, %v6349_v53   ;;  %v6360_v53 = vld [vmem:[%s16201_s29 + $0x60] sm:$0xff] }
 0x199   : > { %6382 = vperm.xlu0 %12042, %v6348_v54   ;;  %v6379_v54 = vld [vmem:[%s16201_s29 + $0xf8] sm:$0xff] }
 0x19c   : > { %6477 = vperm.xlu1 %12043, %v6367_v55   ;;  %v6378_v55 = vld [vmem:[%s16201_s29 + $0xf0] sm:$0xff] }
 0x19d   : > { %6472 = vperm.xlu0 %12042, %v6366_v56   ;;  %v6362_v56 = vld [vmem:[%s16201_s29 + $0x70] sm:$0xff] }
 0x1a0   : > { %6392 = vperm.xlu1 %12043, %v6350_v57   ;;  %v7197_v57 = vld [vmem:[%s16125_s17 + $0x30] sm:$0xff] }
 0x1a1   : > { %7201 = vperm.xlu0 %12042, %v7191_v58   ;;  %v7198_v58 = vld [vmem:[%s16125_s17 + $0x38] sm:$0xff] }
 0x1a4   : > { %6482 = vperm.xlu1 %12043, %v6368_v59   ;;  %v6363_v59 = vld [vmem:[%s16201_s29 + $0x78] sm:$0xff] }
 0x1a5   : > { %6397 = vperm.xlu0 %12042, %v6351_v60   ;;  %v7534_v60 = vld [vmem:[%s16127_s19 + $0x8] sm:$0xff] }
 0x1a8   : > { %7206 = vperm.xlu1 %12043, %v7192_v1   ;;  %v7537_v1 = vld [vmem:[%s16127_s19 + $0x20] sm:$0xff] }
 0x1a9   : > { %6487 = vperm.xlu0 %12042, %v6369_v2   ;;  %v7540_v2 = vld [vmem:[%s16127_s19 + $0x38] sm:$0xff] }
 0x1ac   : > { %6407 = vperm.xlu1 %12043, %v6353_v7   ;;  %v6638_v7 = vld [vmem:[%s16121_s13 + $0x10] sm:$0xff] }
 0x1ad   : > { %6402 = vperm.xlu0 %12042, %v6352_v8   ;;  %v6641_v8 = vld [vmem:[%s16121_s13 + $0x28] sm:$0xff] }
 0x1b0   : > { %6497 = vperm.xlu1 %12043, %v6371_v13   ;;  %v7976_v13 = vld [vmem:[%s16132_s24] sm:$0xff] }
 0x1b1   : > { %6492 = vperm.xlu0 %12042, %v6370_v14   ;;  %v7979_v14 = vld [vmem:[%s16132_s24 + $0x18] sm:$0xff] }
 0x1b4   : > { %6412 = vperm.xlu1 %12043, %v6354_v19   ;;  %v7982_v19 = vld [vmem:[%s16132_s24 + $0x30] sm:$0xff] }
 0x1b5   : > { %7211 = vperm.xlu0 %12042, %v7193_v20  }
 0x1b8   : > { %6502 = vperm.xlu1 %12043, %v6372_v25  }
 0x1b9   : > { %6417 = vperm.xlu0 %12042, %v6355_v26  }
 0x1bc   : > { %7216 = vperm.xlu1 %12043, %v7194_v31  }
 0x1bd   : > { %6507 = vperm.xlu0 %12042, %v6373_v32  }
 0x1c0   : > { %6427 = vperm.xlu1 %12043, %v6357_v36  }
 0x1c1   : > { %6422 = vperm.xlu0 %12042, %v6356_v37  }
 0x1c4   : > { %6517 = vperm.xlu1 %12043, %v6375_v42  }
 0x1c5   : > { %6512 = vperm.xlu0 %12042, %v6374_v43  }
 0x1c8   : > { %6432 = vperm.xlu1 %12043, %v6358_v46  }
 0x1c9   : > { %7221 = vperm.xlu0 %12042, %v7195_v47  }
 0x1cb   : > { %v1970_v21 = vpop.permute.xlu1 %1969 }
 0x1cc   : > { %6522 = vperm.xlu1 %12043, %v6376_v48   ;;  %v1960_v20 = vpop.permute.xlu0 %1959 }
 0x1cd   : > { %6437 = vperm.xlu0 %12042, %v6359_v49  }
 0x1cf   : > { %v1975_v42 = vpop.permute.xlu1 %1974 }
 0x1d0   : > { %7226 = vperm.xlu1 %12043, %v7196_v50   ;;  %v1965_v23 = vpop.permute.xlu0 %1964 }
 0x1d1   : > { %6527 = vperm.xlu0 %12042, %v6377_v51   ;;  %v12099_v51 = vld [vmem:[%s16202_s7 + $0x108] sm:$0xff]  }
 0x1d4   : > { %6447 = vperm.xlu1 %12043, %v6361_v52   ;;  %v12100_v52 = vld [vmem:[%s16202_s7 + $0x150] sm:$0xff]  }
 0x1d5   : > { %6442 = vperm.xlu0 %12042, %v6360_v53  }
 0x1d8   : > { %6537 = vperm.xlu1 %12043, %v6379_v54  }
 0x1d9   : > { %6532 = vperm.xlu0 %12042, %v6378_v55  }
 0x1dc   : > { %6452 = vperm.xlu1 %12043, %v6362_v56  }
 0x1dd   : > { %7231 = vperm.xlu0 %12042, %v7197_v57   ;;  %v12101_v57 = vld [vmem:[%s16202_s7 + $0x110] sm:$0xff]  }
 0x1e0   : > { %7236 = vperm.xlu1 %12043, %v7198_v58   ;;  %v12102_v58 = vld [vmem:[%s16202_s7 + $0x158] sm:$0xff]  }
 0x1e1   : > { %6457 = vperm.xlu0 %12042, %v6363_v59   ;;  %v12103_v59 = vld [vmem:[%s16202_s7 + $0x118] sm:$0xff]  }
 0x1e4   : > { %7548 = vperm.xlu1 %12043, %v7534_v60   ;;  %v12104_v60 = vld [vmem:[%s16202_s7 + $0x160] sm:$0xff]  }
 0x1e5   : > { %7543 = vperm.xlu0 %12042, %v7533_v61   ;;  %v12105_v61 = vld [vmem:[%s16202_s7 + $0x120] sm:$0xff]  }
 0x1e8   : > { %7558 = vperm.xlu1 %12043, %v7536_v62   ;;  %v12106_v62 = vld [vmem:[%s16202_s7 + $0x168] sm:$0xff]  }
 0x1e9   : > { %7553 = vperm.xlu0 %12042, %v7535_v63   ;;  %v12107_v63 = vld [vmem:[%s16202_s7 + $0x128] sm:$0xff]  }
 0x1ec   : > { %7568 = vperm.xlu1 %12043, %v7538_v0   ;;  %v12108_v0 = vld [vmem:[%s16202_s7 + $0x170] sm:$0xff]  }
 0x1ed   : > { %7563 = vperm.xlu0 %12042, %v7537_v1   ;;  %v12109_v1 = vld [vmem:[%s16202_s7 + $0x130] sm:$0xff]  }
 0x1f0   : > { %7578 = vperm.xlu1 %12043, %v7540_v2   ;;  %v12110_v2 = vld [vmem:[%s16202_s7 + $0x178] sm:$0xff]  }
 0x1f1   : > { %7573 = vperm.xlu0 %12042, %v7539_v3   ;;  %v12111_v3 = vld [vmem:[%s16202_s7 + $0x138] sm:$0xff]  }
 0x1f4   : > { %6651 = vperm.xlu1 %12043, %v6637_v4   ;;  %v12112_v4 = vld [vmem:[%s16203_s3 + $0x20] sm:$0xff]   ;;  %s16210_s3 = sld [smem:[#allocation69_spill]] }
 0x1f5   : > { %6646 = vperm.xlu0 %12042, %v6636_v5  }
 0x1f8   : > { %6661 = vperm.xlu1 %12043, %v6639_v6  }
 0x1f9   : > { %6656 = vperm.xlu0 %12042, %v6638_v7  }
 0x1fa   : > { %s16211_s1 = smov %s16210_s3 }
 0x1fc   : > { %6671 = vperm.xlu1 %12043, %v6641_v8  }
 0x1fd   : > { %6666 = vperm.xlu0 %12042, %v6640_v9  }
 0x200   : > { %6681 = vperm.xlu1 %12043, %v6643_v10  }
 0x201   : > { %6676 = vperm.xlu0 %12042, %v6642_v11  }
 0x204   : > { %7991 = vperm.xlu1 %12043, %v7977_v12  }
 0x205   : > { %7986 = vperm.xlu0 %12042, %v7976_v13  }
 0x208   : > { %8001 = vperm.xlu1 %12043, %v7979_v14  }
 0x209   : > { %7996 = vperm.xlu0 %12042, %v7978_v15  }
 0x20c   : > { %8011 = vperm.xlu1 %12043, %v7981_v16  }
 0x20d   : > { %8006 = vperm.xlu0 %12042, %v7980_v17  }
 0x210   : > { %8021 = vperm.xlu1 %12043, %v7983_v18  }
 0x211   : > { %8016 = vperm.xlu0 %12042, %v7982_v19  }
 0x215   : > { %8157 = vperm.xlu0 %12042, %v8154_v22  }
 0x232   : > { %v2088_v24 = vpop.f32.mrb[0].mxu0 }
 0x233   : > { %v2089_v25 = vadd.f32 %v2088_v24, %v1960_v20  ;;  %v2090_v26 = vpop.f32.mrb[1].mxu0 }
 0x234   : > { %v2092_v27 = vpop.f32.mrb[2].mxu0  ;;  %v2091_v28 = vadd.f32 %v2090_v26, %v1960_v20 }
 0x235   : > { %v2093_v29 = vadd.f32 %v2092_v27, %v1965_v23  ;;  %v2094_v30 = vpop.f32.mrb[3].mxu0  ;;  %v2107_v31 = vmax.f32 %v2089_v25, 0.0 }
 0x236   : > { %v2095_v33 = vadd.f32 %v2094_v30, %v1965_v23  ;;  %v2108_v34 = vmax.f32 %v2091_v28, 0.0 }
 0x237   : > { %v2109_v32 = vmax.f32 %v2093_v29, 0.0 }
 0x238   : > { %v2110_v36 = vmax.f32 %v2095_v33, 0.0  ;;  %v12113_v33 = vld [vmem:[%s16204_s25 + $0x28] sm:$0xff]  }
 0x239   : > { %v13990_v35 = vpack.c.bf16 %v2109_v32, %v2107_v31 }
 0x23a   : > { %v2098_v37 = vpop.f32.mrb[4].mxu0  ;;  %v13992_v38 = vpack.c.bf16 %v2110_v36, %v2108_v34  ;;  %v12114_v34 = vld [vmem:[%s16204_s25 + $0x30] sm:$0xff]   ;;  %v12115_v36 = vld [vmem:[%s16204_s25 + $0x38] sm:$0xff]  }
 0x23b   : > { %v2099_v39 = vadd.f32 %v2098_v37, %v1970_v21  ;;  %v2100_v40 = vpop.f32.mrb[5].mxu0  ;;  %v12116_v37 = vld [vmem:[%s16204_s25] sm:$0xff]  }
 0x23c   : > { %v2102_v43 = vpop.f32.mrb[6].mxu0  ;;  %v2101_v45 = vadd.f32 %v2100_v40, %v1970_v21  ;;  %2279 = vmatprep.mubr.bf16.mxu1 %v13992_v38  ;;  %2467 = vmatprep.mubr.bf16.mxu0 %v13992_v38  ;;  %v12117_v40 = vld [vmem:[%s16204_s25 + $0x8] sm:$0xff]  }
 0x23d   : > { %v2103_v46 = vadd.f32 %v2102_v43, %v1975_v42  ;;  %v2104_v47 = vpop.f32.mrb[7].mxu0  ;;  %2280 = vmatmul.mubr.bf16.vlgmr.msra.gmra.mrb[0].mxu1 %v13990_v35  ;;  %2468 = vmatmul.mubr.bf16.vlgmr.msra.gmra.mrb[8].mxu0 %v13990_v35  ;;  %v2111_v48 = vmax.f32 %v2099_v39, 0.0 }
 0x23e   : > { %v2105_v50 = vadd.f32 %v2104_v47, %v1975_v42  ;;  %10196 = vmatpush3.bf16.msra.mxu0 %v12097_v41  ;;  %v2112_v53 = vmax.f32 %v2101_v45, 0.0  ;;  %v12118_v42 = vld [vmem:[%s16204_s25 + $0x10] sm:$0xff]  }
 0x23f   : > { %v2113_v49 = vmax.f32 %v2103_v46, 0.0  ;;  %10197 = vmatprep.subr.bf16.mxu0 %v12098_v44 }
 0x240   : > { %v2114_v55 = vmax.f32 %v2105_v50, 0.0 }
 0x241   : > { %v14010_v54 = vpack.c.bf16 %v2113_v49, %v2111_v48  ;;  %v12119_v49 = vld [vmem:[%s16204_s25 + $0x18] sm:$0xff]  }
 0x242   : > { %v14012_v56 = vpack.c.bf16 %v2114_v55, %v2112_v53  ;;  %10198 = vmatpush3.bf16.msra.mxu0 %v12099_v51  ;;  %v12120_v51 = vld [vmem:[%s16204_s25 + $0x40] sm:$0xff]  }
 0x243   : > { %10199 = vmatprep.subr.bf16.mxu0 %v12100_v52 }
 0x244   : > { %2287 = vmatprep.mubr.bf16.mxu1 %v14012_v56  ;;  %2475 = vmatprep.mubr.bf16.mxu0 %v14012_v56 }
 0x245   : > { %2288 = vmatmul.mubr.bf16.gmra.mrb[4].mxu1 %v14010_v54  ;;  %2476 = vmatmul.mubr.bf16.gmra.mrb[12].mxu0 %v14010_v54 }
 0x246   : > { %10200 = vmatpush3.bf16.msra.mxu0 %v12101_v57  ;;  %2851 = vmatprep.mubr.bf16.mxu0 %v13992_v38 }
 0x247   : > { %10201 = vmatprep.subr.bf16.mxu0 %v12102_v58  ;;  %10575 = vmatprep.mubr.msk.bf16.mxu1 %vm2515_vm1, %v12112_v4  ;;  %v12130_v4 = vld [vmem:[%s16202_s7 + $0x1d8] sm:$0xff]  }
 0x24a   : > { %10202 = vmatpush3.bf16.msra.mxu0 %v12103_v59  ;;  %v12121_v59 = vld [vmem:[%s16202_s7 + $0x1c0] sm:$0xff]  }
 0x24b   : > { %10203 = vmatprep.subr.bf16.mxu0 %v12104_v60  ;;  %v12122_v60 = vld [vmem:[%s16204_s25 + $0x48] sm:$0xff]  }
 0x24e   : > { %10204 = vmatpush3.bf16.msra.mxu0 %v12105_v61  ;;  %v12123_v61 = vld [vmem:[%s16202_s7 + $0x180] sm:$0xff]  }
 0x24f   : > { %10205 = vmatprep.subr.bf16.mxu0 %v12106_v62  ;;  %v12126_v62 = vld [vmem:[%s16204_s25 + $0x50] sm:$0xff]  }
 0x252   : > { %10206 = vmatpush3.bf16.msra.mxu0 %v12107_v63  ;;  %v12124_v63 = vld [vmem:[%s16202_s7 + $0x1c8] sm:$0xff]  }
 0x253   : > { %10207 = vmatprep.subr.bf16.mxu0 %v12108_v0  ;;  %v12125_v0 = vld [vmem:[%s16202_s7 + $0x188] sm:$0xff]  }
 0x256   : > { %10208 = vmatpush3.bf16.msra.mxu0 %v12109_v1  ;;  %v12127_v1 = vld [vmem:[%s16202_s7 + $0x1d0] sm:$0xff]  }
 0x257   : > { %10209 = vmatprep.subr.bf16.mxu0 %v12110_v2  ;;  %v12128_v2 = vld [vmem:[%s16204_s25 + $0x58] sm:$0xff]  }
 0x25a   : > { %10210 = vmatpush3.bf16.msra.mxu0 %v12111_v3  ;;  %v12129_v3 = vld [vmem:[%s16202_s7 + $0x190] sm:$0xff]  }
 0x25d   : > { %2852 = vmatmul.mubr.bf16.vlgmr.msra.gmra.mrb[16].mxu0 %v13990_v35 }
 0x25e   : > { %2859 = vmatprep.mubr.bf16.mxu0 %v14012_v56 }
 0x265   : > { %2860 = vmatmul.mubr.bf16.gmra.mrb[20].mxu0 %v14010_v54 }
 0x310   : > { %v10143_v5 = vpop.f32.mrb[0].mxu1  ;;  %v10171_v6 = vpop.f32.mrb[8].mxu0 }
 0x311   : > { %v10144_v7 = vpop.f32.mrb[1].mxu1  ;;  %v10172_v8 = vpop.f32.mrb[9].mxu0 }
 0x312   : > { %v10145_v9 = vadd.f32 %v10144_v7, %v10143_v5  ;;  %v10173_v10 = vadd.f32 %v10172_v8, %v10171_v6  ;;  %v10146_v11 = vpop.f32.mrb[2].mxu1  ;;  %v10174_v12 = vpop.f32.mrb[10].mxu0  ;;  %v12131_v5 = vld [vmem:[%s16202_s7 + $0x198] sm:$0xff]   ;;  %v12132_v6 = vld [vmem:[%s16202_s7 + $0x1e0] sm:$0xff]   ;;  %v12134_v8 = vld [vmem:[%s16202_s7 + $0x1e8] sm:$0xff]  }
 0x313   : > { %v10147_v13 = vpop.f32.mrb[3].mxu1  ;;  %v10175_v14 = vpop.f32.mrb[11].mxu0  ;;  %v12133_v7 = vld [vmem:[%s16202_s7 + $0x1a0] sm:$0xff]  }
 0x314   : > { %v10148_v15 = vadd.f32 %v10147_v13, %v10146_v11  ;;  %v10176_v16 = vadd.f32 %v10175_v14, %v10174_v12  ;;  %v12137_v11 = vld [vmem:[%s16202_s7 + $0x1b0] sm:$0xff]   ;;  %v12138_v12 = vld [vmem:[%s16202_s7 + $0x1f8] sm:$0xff]   ;;  %v12140_v14 = vld [vmem:[%s16204_s25 + $0x60] sm:$0xff]  }
 0x315   : > { %v12139_v13 = vld [vmem:[%s16202_s7 + $0x1b8] sm:$0xff]  }
 0x316   : > { %v2296_v17 = vpack.c.bf16 %v10148_v15, %v10145_v9  ;;  %v2484_v18 = vpack.c.bf16 %v10176_v16, %v10173_v10  ;;  %v12135_v9 = vld [vmem:[%s16202_s7 + $0x1a8] sm:$0xff]   ;;  %v12136_v10 = vld [vmem:[%s16202_s7 + $0x1f0] sm:$0xff]   ;;  %v12144_v15 = vld [vmem:[%s16205_s9] sm:$0xff]   ;;  %s16328_s7 = sld [smem:[#allocation72_spill]] }
 0x317   : > { %v12146_v16 = vld [vmem:[%s16206_s0 + $0x8] sm:$0xff]   ;;  %10619 = vmatprep.subr.bf16.mxu0 %v12144_v15 }
 0x318   : > { %v10149_v19 = vpop.f32.mrb[4].mxu1  ;;  %v10177_v20 = vpop.f32.mrb[12].mxu0  ;;  %10571 = vmatprep.subr.bf16.mxu1 %v2484_v18  ;;  %10620 = vmatpush3.bf16.msra.mxu0 %v12144_v15 }
 0x319   : > { %v10150_v21 = vpop.f32.mrb[5].mxu1  ;;  %v10178_v22 = vpop.f32.mrb[13].mxu0  ;;  %10572 = vmatpush3.bf16.msra.mxu1 %v2484_v18  ;;  %10621 = vmatprep.subr.bf16.mxu0 %v12146_v16 }
 0x31a   : > { %v10151_v23 = vadd.f32 %v10150_v21, %v10149_v19  ;;  %v10179_v24 = vadd.f32 %v10178_v22, %v10177_v20  ;;  %v10152_v25 = vpop.f32.mrb[6].mxu1  ;;  %v10180_v26 = vpop.f32.mrb[14].mxu0 }
 0x31b   : > { %v10153_v27 = vpop.f32.mrb[7].mxu1  ;;  %v10181_v28 = vpop.f32.mrb[15].mxu0 }
 0x31c   : > { %v10154_v29 = vadd.f32 %v10153_v27, %v10152_v25  ;;  %v10182_v30 = vadd.f32 %v10181_v28, %v10180_v26  ;;  %10622 = vmatpush3.bf16.msra.mxu0 %v12146_v16  ;;  %v12156_v16 = vld [vmem:[%s16206_s0 + $0x30] sm:$0xff]  }
 0x31e   : > { %v2297_v31 = vpack.c.bf16 %v10154_v29, %v10151_v23  ;;  %v2485_v32 = vpack.c.bf16 %v10182_v30, %v10179_v24 }
 0x320   : > { %10573 = vmatprep.subr.bf16.mxu1 %v2485_v32 }
 0x321   : > { %10574 = vmatpush3.bf16.msra.mxu1 %v2485_v32  ;;  %v12141_v32 = vld [vmem:[%s16204_s25 + $0x68] sm:$0xff]  }
 0x322   : > { %10583 = vmatprep.subr.bf16.mxu1 %v2296_v17 }
 0x324   : > { %10576 = vmatmul.mubr.msk.bf16.vlgmr.msra.gmra.mrb[8].mxu1 %vm2515_vm1, %v12113_v33  ;;  %v12142_v33 = vld [vmem:[%s16204_s25 + $0x70] sm:$0xff]  }
 0x325   : > { %10584 = vmatpush3.bf16.msra.mxu1 %v2296_v17  ;;  %10579 = vmatprep.mubr.msk.bf16.mxu1 %vm2515_vm1, %v12114_v34  ;;  %v12147_v34 = vld [vmem:[%s16206_s0 + $0x48] sm:$0xff]  }
 0x326   : > { %10585 = vmatprep.subr.bf16.mxu1 %v2297_v31 }
 0x329   : > { %10586 = vmatpush3.bf16.msra.mxu1 %v2297_v31  ;;  %v12145_v31 = vld [vmem:[%s16206_s0 + $0x40] sm:$0xff]  }
 0x32c   : > { %10580 = vmatmul.mubr.msk.bf16.gmra.mrb[12].mxu1 %vm2515_vm1, %v12115_v36  ;;  %v12143_v36 = vld [vmem:[%s16204_s25 + $0x78] sm:$0xff]  }
 0x32d   : > { %10587 = vmatprep.mubr.msk.bf16.mxu1 %vm2515_vm1, %v12116_v37  ;;  %v12148_v37 = vld [vmem:[%s16206_s0 + $0x10] sm:$0xff]  }
 0x32e   : > { %10623 = vmatprep.subr.bf16.mxu0 %v12148_v37 }
 0x32f   : > { %10624 = vmatpush3.bf16.msra.mxu0 %v12148_v37 }
 0x330   : > { %v10211_v39 = vpop.f32.mrb[16].mxu0 }
 0x331   : > { %v10212_v41 = vpop.f32.mrb[17].mxu0 }
 0x332   : > { %v10213_v43 = vadd.f32 %v10212_v41, %v10211_v39  ;;  %v10214_v44 = vpop.f32.mrb[18].mxu0  ;;  %v12149_v39 = vld [vmem:[%s16206_s0 + $0x50] sm:$0xff]   ;;  %v12151_v41 = vld [vmem:[%s16206_s0 + $0x58] sm:$0xff]  }
 0x333   : > { %v10215_v45 = vpop.f32.mrb[19].mxu0 }
 0x334   : > { %v10216_v46 = vadd.f32 %v10215_v45, %v10214_v44  ;;  %10588 = vmatmul.mubr.msk.bf16.vlgmr.msra.gmra.mrb[8].mxu1 %vm2515_vm1, %v12117_v40  ;;  %v12150_v40 = vld [vmem:[%s16206_s0 + $0x18] sm:$0xff]   ;;  %v3289_v44 = vpop.permute.xlu0 %3288  ;;  %v3294_v45 = vpop.permute.xlu1 %3293 }
 0x335   : > { %10591 = vmatprep.mubr.msk.bf16.mxu1 %vm2515_vm1, %v12118_v42  ;;  %10625 = vmatprep.subr.bf16.mxu0 %v12150_v40  ;;  %v12152_v42 = vld [vmem:[%s16206_s0 + $0x20] sm:$0xff]  }
 0x336   : > { %v2868_v47 = vpack.c.bf16 %v10216_v46, %v10213_v43  ;;  %10626 = vmatpush3.bf16.msra.mxu0 %v12150_v40  ;;  %v12153_v43 = vld [vmem:[%s16206_s0 + $0x60] sm:$0xff]  }
 0x337   : > { %10635 = vmatprep.subr.bf16.mxu0 %v12152_v42 }
 0x338   : > { %v10217_v48 = vpop.f32.mrb[20].mxu0  ;;  %10595 = vmatprep.subr.bf16.mxu1 %v2868_v47  ;;  %v3299_v46 = vpop.permute.xlu0 %3298 }
 0x339   : > { %v10218_v50 = vpop.f32.mrb[21].mxu0  ;;  %10596 = vmatpush3.bf16.msra.mxu1 %v2868_v47  ;;  %v3304_v47 = vpop.permute.xlu1 %3303 }
 0x33a   : > { %v10219_v52 = vadd.f32 %v10218_v50, %v10217_v48  ;;  %v10220_v53 = vpop.f32.mrb[22].mxu0 }
 0x33b   : > { %v10221_v55 = vpop.f32.mrb[23].mxu0 }
 0x33c   : > { %v10222_v57 = vadd.f32 %v10221_v55, %v10220_v53  ;;  %10592 = vmatmul.mubr.msk.bf16.gmra.mrb[12].mxu1 %vm2515_vm1, %v12119_v49 }
 0x33d   : > { %10599 = vmatprep.mubr.msk.bf16.mxu1 %vm2515_vm1, %v12120_v51  ;;  %v3309_v51 = vpop.permute.xlu0 %3308 }
 0x33e   : > { %v2869_v58 = vpack.c.bf16 %v10222_v57, %v10219_v52 }
 0x340   : > { %10597 = vmatprep.subr.bf16.mxu1 %v2869_v58 }
 0x341   : > { %10598 = vmatpush3.bf16.msra.mxu1 %v2869_v58  ;;  %v3314_v58 = vpop.permute.xlu1 %3313 }
 0x342   : > { %10229 = vmatprep.subr.bf16.mxu1 %v12121_v59 }
 0x344   : > { %10600 = vmatmul.mubr.msk.bf16.vlgmr.msra.gmra.mrb[8].mxu1 %vm2515_vm1, %v12122_v60 }
 0x345   : > { %10230 = vmatpush3.bf16.msra.mxu1 %v12123_v61  ;;  %10603 = vmatprep.mubr.msk.bf16.mxu1 %vm2515_vm1, %v12126_v62 }
 0x346   : > { %10231 = vmatprep.subr.bf16.mxu1 %v12124_v63 }
 0x349   : > { %10232 = vmatpush3.bf16.msra.mxu1 %v12125_v0 }
 0x34a   : > { %10233 = vmatprep.subr.bf16.mxu1 %v12127_v1  ;;  %v3319_v1 = vpop.permute.xlu0 %3318 }
 0x34c   : > { %10604 = vmatmul.mubr.msk.bf16.gmra.mrb[12].mxu1 %vm2515_vm1, %v12128_v2 }
 0x34d   : > { %10234 = vmatpush3.bf16.msra.mxu1 %v12129_v3  ;;  %3145 = vmatprep.mubr.bf16.mxu1 %v13992_v38 }
 0x34e   : > { %10235 = vmatprep.subr.bf16.mxu1 %v12130_v4 }
 0x351   : > { %10236 = vmatpush3.bf16.msra.mxu1 %v12131_v5 }
 0x352   : > { %10237 = vmatprep.subr.bf16.mxu1 %v12132_v6  ;;  %v12154_v6 = vld [vmem:[%s16206_s0 + $0x28] sm:$0xff]  }
 0x355   : > { %10238 = vmatpush3.bf16.msra.mxu1 %v12133_v7  ;;  %v12155_v7 = vld [vmem:[%s16206_s0 + $0x68] sm:$0xff]  }
 0x356   : > { %10239 = vmatprep.subr.bf16.mxu1 %v12134_v8  ;;  %v3324_v8 = vpop.permute.xlu1 %3323 }
 0x359   : > { %10240 = vmatpush3.bf16.msra.mxu1 %v12135_v9 }
 0x35a   : > { %10241 = vmatprep.subr.bf16.mxu1 %v12136_v10 }
 0x35d   : > { %10242 = vmatpush3.bf16.msra.mxu1 %v12137_v11 }
 0x35e   : > { %10243 = vmatprep.subr.bf16.mxu1 %v12138_v12 }
 0x361   : > { %10244 = vmatpush3.bf16.msra.mxu1 %v12139_v13 }
 0x364   : > { %3146 = vmatmul.mubr.bf16.vlgmr.msra.gmra.mrb[16].mxu1 %v13990_v35 }
 0x365   : > { %3153 = vmatprep.mubr.bf16.mxu1 %v14012_v56 }
 0x36c   : > { %3154 = vmatmul.mubr.bf16.gmra.mrb[20].mxu1 %v14010_v54 }
 0x36d   : > { %10611 = vmatprep.mubr.msk.bf16.mxu1 %vm2515_vm1, %v12140_v14 }
 0x437   : > { %v10245_v17 = vpop.f32.mrb[16].mxu1 }
 0x438   : > { %v10246_v18 = vpop.f32.mrb[17].mxu1 }
 0x439   : > { %v10247_v19 = vadd.f32 %v10246_v18, %v10245_v17  ;;  %v10248_v20 = vpop.f32.mrb[18].mxu1  ;;  %v12157_v17 = vld [vmem:[%s16206_s0 + $0x70] sm:$0xff]  }
 0x43a   : > { %v10249_v21 = vpop.f32.mrb[19].mxu1 }
 0x43b   : > { %v10250_v22 = vadd.f32 %v10249_v21, %v10248_v20 }
 0x43d   : > { %v3162_v23 = vpack.c.bf16 %v10250_v22, %v10247_v19  ;;  %v12158_v22 = vld [vmem:[%s16206_s0 + $0x38] sm:$0xff]  }
 0x43f   : > { %v10251_v24 = vpop.f32.mrb[20].mxu1  ;;  %10607 = vmatprep.subr.bf16.mxu1 %v3162_v23 }
 0x440   : > { %v10252_v25 = vpop.f32.mrb[21].mxu1  ;;  %10608 = vmatpush3.bf16.msra.mxu1 %v3162_v23  ;;  %v12159_v23 = vld [vmem:[%s16206_s0 + $0x78] sm:$0xff]  }
 0x441   : > { %v10253_v26 = vadd.f32 %v10252_v25, %v10251_v24  ;;  %v10254_v27 = vpop.f32.mrb[22].mxu1  ;;  %v12160_v24 = vld [vmem:[%s16207_s11 + $0x40] sm:$0xff]  }
 0x442   : > { %v10255_v28 = vpop.f32.mrb[23].mxu1 }
 0x443   : > { %v10256_v29 = vadd.f32 %v10255_v28, %v10254_v27 }
 0x445   : > { %v3163_v30 = vpack.c.bf16 %v10256_v29, %v10253_v26 }
 0x447   : > { %10609 = vmatprep.subr.bf16.mxu1 %v3163_v30 }
 0x448   : > { %10610 = vmatpush3.bf16.msra.mxu1 %v3163_v30 }
 0x449   : > { %10699 = vmatprep.subr.bf16.mxu1 %v12145_v31 }
 0x44b   : > { %10612 = vmatmul.mubr.msk.bf16.vlgmr.msra.gmra.mrb[8].mxu1 %vm2515_vm1, %v12141_v32 }
 0x44c   : > { %10615 = vmatprep.mubr.msk.bf16.mxu1 %vm2515_vm1, %v12142_v33  ;;  %10700 = vmatpush3.bf16.msra.mxu1 %v12145_v31 }
 0x44d   : > { %10701 = vmatprep.subr.bf16.mxu1 %v12147_v34 }
 0x450   : > { %10702 = vmatpush3.bf16.msra.mxu1 %v12147_v34 }
 0x451   : > { %10703 = vmatprep.subr.bf16.mxu1 %v12149_v39 }
 0x453   : > { %10616 = vmatmul.mubr.msk.bf16.gmra.mrb[12].mxu1 %vm2515_vm1, %v12143_v36 }
 0x454   : > { %10704 = vmatpush3.bf16.msra.mxu1 %v12149_v39 }
 0x455   : > { %10705 = vmatprep.subr.bf16.mxu1 %v12151_v41 }
 0x458   : > { %10706 = vmatpush3.bf16.msra.mxu1 %v12151_v41 }
 0x459   : > { %10739 = vmatprep.subr.bf16.mxu1 %v12153_v43 }
 0x51e   : > { %v10613_v48 = vpop.f32.mrb[8].mxu1 }
 0x51f   : > { %v3328_v49 = vadd.f32 %v10613_v48, %v3299_v46  ;;  %v3239_v50 = vpop.f32.mrb[9].mxu1 }
 0x520   : > { %v3326_v52 = vadd.f32 %v3289_v44, %v3239_v50  ;;  %v10614_v53 = vpop.f32.mrb[10].mxu1 }
 0x521   : > { %v3329_v55 = vadd.f32 %v10614_v53, %v3304_v47  ;;  %v3242_v57 = vpop.f32.mrb[11].mxu1  ;;  %v3336_v60 = vmax.f32 %v3328_v49, 0.0 }
 0x522   : > { %v3327_v59 = vadd.f32 %v3294_v45, %v3242_v57  ;;  %v3334_v62 = vmax.f32 %v3326_v52, 0.0 }
 0x523   : > { %v3337_v61 = vmax.f32 %v3329_v55, 0.0 }
 0x524   : > { %v3335_v63 = vmax.f32 %v3327_v59, 0.0 }
 0x525   : > { %v14201_v0 = vpack.c.bf16 %v3337_v61, %v3336_v60 }
 0x526   : > { %v14203_v2 = vpack.c.bf16 %v3335_v63, %v3334_v62  ;;  %v10617_v3 = vpop.f32.mrb[12].mxu1 }
 0x527   : > { %v3332_v4 = vadd.f32 %v10617_v3, %v3319_v1  ;;  %v3255_v5 = vpop.f32.mrb[13].mxu1 }
 0x528   : > { %v3330_v9 = vadd.f32 %v3309_v51, %v3255_v5  ;;  %v10618_v10 = vpop.f32.mrb[14].mxu1  ;;  %10627 = vmatprep.mubr.msk.bf16.mxu0 %vm3378_vm2, %v14203_v2  ;;  %10707 = vmatprep.mubr.msk.bf16.mxu1 %vm3378_vm2, %v14203_v2 }
 0x529   : > { %v3333_v11 = vadd.f32 %v10618_v10, %v3324_v8  ;;  %v3258_v12 = vpop.f32.mrb[15].mxu1  ;;  %10628 = vmatmul.mubr.msk.bf16.vlgmr.msra.gmra.mrb[24].mxu0 %vm3378_vm2, %v14201_v0  ;;  %10708 = vmatmul.mubr.msk.bf16.vlgmr.msra.gmra.mrb[24].mxu1 %vm3378_vm2, %v14201_v0  ;;  %v3340_v14 = vmax.f32 %v3332_v4, 0.0 }
 0x52a   : > { %v3331_v13 = vadd.f32 %v3314_v58, %v3258_v12  ;;  %10636 = vmatpush3.bf16.msra.mxu0 %v12152_v42  ;;  %10740 = vmatpush3.bf16.msra.mxu1 %v12153_v43  ;;  %v3338_v18 = vmax.f32 %v3330_v9, 0.0 }
 0x52b   : > { %v3341_v15 = vmax.f32 %v3333_v11, 0.0  ;;  %10637 = vmatprep.subr.bf16.mxu0 %v12154_v6  ;;  %10741 = vmatprep.subr.bf16.mxu1 %v12155_v7 }
 0x52c   : > { %v3339_v19 = vmax.f32 %v3331_v13, 0.0 }
 0x52d   : > { %v14225_v20 = vpack.c.bf16 %v3341_v15, %v3340_v14  ;;  %v12192_v15 = vld [vmem:[%s16208_s6] sm:$0xff]   ;;  %s16221_s6 = sld [smem:[#allocation67_spill]] }
 0x52e   : > { %v14227_v21 = vpack.c.bf16 %v3339_v19, %v3338_v18  ;;  %10638 = vmatpush3.bf16.msra.mxu0 %v12154_v6  ;;  %10742 = vmatpush3.bf16.msra.mxu1 %v12155_v7  ;;  %v12163_v18 = vld [vmem:[%s16207_s11 + $0x58] sm:$0xff]   ;;  %v12164_v19 = vld [vmem:[%s16207_s11 + $0x60] sm:$0xff]  }
 0x52f   : > { %10639 = vmatprep.subr.bf16.mxu0 %v12156_v16  ;;  %10743 = vmatprep.subr.bf16.mxu1 %v12157_v17 }
 0x530   : > { %10631 = vmatprep.mubr.msk.bf16.mxu0 %vm3378_vm2, %v14227_v21  ;;  %10711 = vmatprep.mubr.msk.bf16.mxu1 %vm3378_vm2, %v14227_v21 }
 0x531   : > { %10632 = vmatmul.mubr.msk.bf16.gmra.mrb[28].mxu0 %vm3378_vm2, %v14225_v20  ;;  %10712 = vmatmul.mubr.msk.bf16.gmra.mrb[28].mxu1 %vm3378_vm2, %v14225_v20 }
 0x532   : > { %10640 = vmatpush3.bf16.msra.mxu0 %v12156_v16  ;;  %10643 = vmatprep.mubr.msk.bf16.mxu0 %vm3378_vm2, %v14203_v2  ;;  %v12161_v16 = vld [vmem:[%s16207_s11 + $0x48] sm:$0xff]  }
 0x533   : > { %10744 = vmatpush3.bf16.msra.mxu1 %v12157_v17  ;;  %10747 = vmatprep.mubr.msk.bf16.mxu1 %vm3378_vm2, %v14203_v2  ;;  %v12162_v17 = vld [vmem:[%s16207_s11 + $0x50] sm:$0xff]   ;;  %s16222_s23 = smov %s16221_s6 }
 0x534   : > { %10641 = vmatprep.subr.bf16.mxu0 %v12158_v22  ;;  %10745 = vmatprep.subr.bf16.mxu1 %v12159_v23 }
 0x536   : > { %10642 = vmatpush3.bf16.msra.mxu0 %v12158_v22  ;;  %v12165_v22 = vld [vmem:[%s16207_s11 + $0x68] sm:$0xff]  }
 0x537   : > { %10746 = vmatpush3.bf16.msra.mxu1 %v12159_v23  ;;  %v12166_v23 = vld [vmem:[%s16207_s11 + $0x70] sm:$0xff]  }
 0x538   : > { %10779 = vmatprep.subr.bf16.mxu1 %v12192_v15 }
 0x539   : > { %10644 = vmatmul.mubr.msk.bf16.vlgmr.msra.gmra.mrb[32].mxu0 %vm3378_vm2, %v14201_v0 }
 0x53a   : > { %10748 = vmatmul.mubr.msk.bf16.vlgmr.msra.gmra.mrb[32].mxu1 %vm3378_vm2, %v14201_v0  ;;  %10647 = vmatprep.mubr.msk.bf16.mxu0 %vm3378_vm2, %v14227_v21 }
 0x53b   : > { %10751 = vmatprep.mubr.msk.bf16.mxu1 %vm3378_vm2, %v14227_v21  ;;  %10780 = vmatpush3.bf16.msra.mxu1 %v12192_v15 }
 0x541   : > { %10648 = vmatmul.mubr.msk.bf16.gmra.mrb[36].mxu0 %vm3378_vm2, %v14225_v20 }
 0x542   : > { %10752 = vmatmul.mubr.msk.bf16.gmra.mrb[36].mxu1 %vm3378_vm2, %v14225_v20  ;;  %10659 = vmatprep.mubr.msk.bf16.mxu0 %vm3378_vm2, %v12160_v24  ;;  %v12167_v24 = vld [vmem:[%s16207_s11 + $0x78] sm:$0xff]  }
 0x5fc   : > { %v10629_v25 = vpop.f32.mrb[24].mxu0  ;;  %v10709_v26 = vpop.f32.mrb[24].mxu1 }
 0x5fd   : > { %v3425_v27 = vpop.f32.mrb[25].mxu0  ;;  %v3984_v28 = vpop.f32.mrb[25].mxu1 }
 0x5fe   : > { %v10630_v29 = vpop.f32.mrb[26].mxu0  ;;  %v10710_v30 = vpop.f32.mrb[26].mxu1 }
 0x5ff   : > { %v3457_v31 = vpack.c.bf16 %v10630_v29, %v10629_v25  ;;  %v14263_v32 = vpack.c.bf16 %v10710_v30, %v10709_v26  ;;  %v3428_v33 = vpop.f32.mrb[27].mxu0  ;;  %v3987_v34 = vpop.f32.mrb[27].mxu1  ;;  %v12168_v25 = vld [vmem:[%s16207_s11] sm:$0xff]   ;;  %v12169_v26 = vld [vmem:[%s16207_s11 + $0x8] sm:$0xff]  }
 0x600   : > { %v3456_v36 = vpack.c.bf16 %v3428_v33, %v3425_v27  ;;  %v14265_v37 = vpack.c.bf16 %v3987_v34, %v3984_v28  ;;  %v12170_v27 = vld [vmem:[%s16207_s11 + $0x10] sm:$0xff]   ;;  %v12171_v28 = vld [vmem:[%s16207_s11 + $0x18] sm:$0xff]   ;;  %v12172_v29 = vld [vmem:[%s16207_s11 + $0x20] sm:$0xff]  }
 0x601   : > { %v12173_v30 = vld [vmem:[%s16207_s11 + $0x28] sm:$0xff]   ;;  %v12176_v33 = vld [vmem:[%s16207_s11 + $0x80] sm:$0xff]  }
 0x602   : > { %v12177_v34 = vld [vmem:[%s16207_s11 + $0x88] sm:$0xff]  }
 0x604   : > { %v10633_v39 = vpop.f32.mrb[28].mxu0  ;;  %v10713_v40 = vpop.f32.mrb[28].mxu1 }
 0x605   : > { %v3441_v41 = vpop.f32.mrb[29].mxu0  ;;  %v4000_v42 = vpop.f32.mrb[29].mxu1 }
 0x606   : > { %v10634_v43 = vpop.f32.mrb[30].mxu0  ;;  %v10714_v44 = vpop.f32.mrb[30].mxu1 }
 0x607   : > { %v3459_v45 = vpack.c.bf16 %v10634_v43, %v10633_v39  ;;  %v14267_v46 = vpack.c.bf16 %v10714_v44, %v10713_v40  ;;  %v3444_v47 = vpop.f32.mrb[31].mxu0  ;;  %v4003_v48 = vpop.f32.mrb[31].mxu1  ;;  %v12180_v39 = vld [vmem:[%s16207_s11 + $0xa0] sm:$0xff]   ;;  %v12181_v40 = vld [vmem:[%s16207_s11 + $0xa8] sm:$0xff]  }
 0x608   : > { %v3458_v49 = vpack.c.bf16 %v3444_v47, %v3441_v41  ;;  %v14269_v50 = vpack.c.bf16 %v4003_v48, %v4000_v42  ;;  %v12182_v41 = vld [vmem:[%s16207_s11 + $0xb0] sm:$0xff]   ;;  %v12183_v42 = vld [vmem:[%s16207_s11 + $0xb8] sm:$0xff]   ;;  %v12184_v43 = vld [vmem:[%s16207_s11 + $0xc0] sm:$0xff]  }
 0x609   : > { %v12185_v44 = vld [vmem:[%s16207_s11 + $0xc8] sm:$0xff]   ;;  %v12188_v47 = vld [vmem:[%s16207_s11 + $0xe0] sm:$0xff]  }
 0x60a   : > { %v12189_v48 = vld [vmem:[%s16207_s11 + $0xe8] sm:$0xff]  }
 0x60c   : > { %v10645_v51 = vpop.f32.mrb[32].mxu0 }
 0x60d   : > { %v10749_v52 = vpop.f32.mrb[32].mxu1  ;;  %v3543_v53 = vpop.f32.mrb[33].mxu0 }
 0x60e   : > { %v4280_v55 = vpop.f32.mrb[33].mxu1  ;;  %v10646_v57 = vpop.f32.mrb[34].mxu0 }
 0x60f   : > { %v3575_v58 = vpack.c.bf16 %v10646_v57, %v10645_v51  ;;  %v10750_v59 = vpop.f32.mrb[34].mxu1  ;;  %v3546_v60 = vpop.f32.mrb[35].mxu0  ;;  %v12193_v51 = vld [vmem:[%s16209_s12 + $0x10] sm:$0xff]  }
 0x610   : > { %v14271_v61 = vpack.c.bf16 %v10750_v59, %v10749_v52  ;;  %v3574_v62 = vpack.c.bf16 %v3546_v60, %v3543_v53  ;;  %v4283_v63 = vpop.f32.mrb[35].mxu1  ;;  %v12194_v52 = vld [vmem:[%s16209_s12 + $0x18] sm:$0xff]   ;;  %v12195_v53 = vld [vmem:[%s16209_s12 + $0x8] sm:$0xff]   ;;  %v4533_v57 = vpop.permute.xlu1 %4532 }
 0x611   : > { %v14273_v1 = vpack.c.bf16 %v4283_v63, %v4280_v55  ;;  %10797 = vmatprep.subr.bf16.mxu1 %v12195_v53  ;;  %v4528_v55 = vpop.permute.xlu0 %4527 }
 0x612   : > { %10651 = vmatprep.subr.bf16.mxu0 %v3574_v62 }
 0x613   : > { %10652 = vmatpush3.bf16.msra.mxu0 %v3574_v62 }
 0x614   : > { %v10649_v3 = vpop.f32.mrb[36].mxu0  ;;  %10653 = vmatprep.subr.bf16.mxu0 %v3575_v58  ;;  %v4543_v59 = vpop.permute.xlu1 %4542 }
 0x615   : > { %v10753_v4 = vpop.f32.mrb[36].mxu1  ;;  %v3559_v5 = vpop.f32.mrb[37].mxu0 }
 0x616   : > { %v4296_v6 = vpop.f32.mrb[37].mxu1  ;;  %v10650_v7 = vpop.f32.mrb[38].mxu0 }
 0x617   : > { %v3577_v8 = vpack.c.bf16 %v10650_v7, %v10649_v3  ;;  %v10754_v9 = vpop.f32.mrb[38].mxu1  ;;  %v3562_v10 = vpop.f32.mrb[39].mxu0  ;;  %10654 = vmatpush3.bf16.msra.mxu0 %v3575_v58 }
 0x618   : > { %v14275_v11 = vpack.c.bf16 %v10754_v9, %v10753_v4  ;;  %v3576_v12 = vpack.c.bf16 %v3562_v10, %v3559_v5  ;;  %v4299_v13 = vpop.f32.mrb[39].mxu1  ;;  %v4538_v58 = vpop.permute.xlu0 %4537 }
 0x619   : > { %v14277_v14 = vpack.c.bf16 %v4299_v13, %v4296_v6 }
 0x61a   : > { %10655 = vmatprep.subr.bf16.mxu0 %v3576_v12 }
 0x61b   : > { %10656 = vmatpush3.bf16.msra.mxu0 %v3576_v12 }
 0x61c   : > { %10657 = vmatprep.subr.bf16.mxu0 %v3577_v8  ;;  %v4548_v60 = vpop.permute.xlu0 %4547 }
 0x61f   : > { %10658 = vmatpush3.bf16.msra.mxu0 %v3577_v8 }
 0x620   : > { %10675 = vmatprep.subr.bf16.mxu0 %v3456_v36  ;;  %v4558_v62 = vpop.permute.xlu0 %4557 }
 0x622   : > { %10660 = vmatmul.mubr.msk.bf16.vlgmr.msra.gmra.mrb[40].mxu0 %vm3378_vm2, %v12161_v16 }
 0x623   : > { %10676 = vmatpush3.bf16.msra.mxu0 %v3456_v36  ;;  %10663 = vmatprep.mubr.msk.bf16.mxu0 %vm3378_vm2, %v12162_v17  ;;  %v12178_v36 = vld [vmem:[%s16207_s11 + $0x90] sm:$0xff]  }
 0x624   : > { %10677 = vmatprep.subr.bf16.mxu0 %v3457_v31  ;;  %v4568_v12 = vpop.permute.xlu0 %4567 }
 0x627   : > { %10678 = vmatpush3.bf16.msra.mxu0 %v3457_v31  ;;  %v12174_v31 = vld [vmem:[%s16207_s11 + $0x30] sm:$0xff]  }
 0x628   : > { %10679 = vmatprep.subr.bf16.mxu0 %v3458_v49 }
 0x62a   : > { %10664 = vmatmul.mubr.msk.bf16.gmra.mrb[44].mxu0 %vm3378_vm2, %v12163_v18 }
 0x62b   : > { %10680 = vmatpush3.bf16.msra.mxu0 %v3458_v49  ;;  %10667 = vmatprep.mubr.msk.bf16.mxu0 %vm3378_vm2, %v12164_v19  ;;  %v12190_v49 = vld [vmem:[%s16207_s11 + $0xf0] sm:$0xff]  }
 0x62c   : > { %10681 = vmatprep.subr.bf16.mxu0 %v3459_v45 }
 0x62f   : > { %10682 = vmatpush3.bf16.msra.mxu0 %v3459_v45  ;;  %v12186_v45 = vld [vmem:[%s16207_s11 + $0xd0] sm:$0xff]  }
 0x630   : > { %10715 = vmatprep.subr.bf16.mxu0 %v14265_v37 }
 0x632   : > { %10668 = vmatmul.mubr.msk.bf16.gmra.mrb[48].mxu0 %vm3378_vm2, %v12165_v22 }
 0x633   : > { %10671 = vmatprep.mubr.msk.bf16.mxu0 %vm3378_vm2, %v12166_v23 }
 0x63a   : > { %10672 = vmatmul.mubr.msk.bf16.gmra.mrb[52].mxu0 %vm3378_vm2, %v12167_v24 }
 0x63b   : > { %10683 = vmatprep.mubr.msk.bf16.mxu0 %vm3378_vm2, %v12168_v25 }
 0x642   : > { %10684 = vmatmul.mubr.msk.bf16.vlgmr.msra.gmra.mrb[40].mxu0 %vm3378_vm2, %v12169_v26 }
 0x643   : > { %10716 = vmatpush3.bf16.msra.mxu0 %v14265_v37  ;;  %10687 = vmatprep.mubr.msk.bf16.mxu0 %vm3378_vm2, %v12170_v27  ;;  %v12179_v37 = vld [vmem:[%s16207_s11 + $0x98] sm:$0xff]   ;;  %v4578_v27 = vpop.permute.xlu0 %4577 }
 0x644   : > { %10717 = vmatprep.subr.bf16.mxu0 %v14263_v32 }
 0x647   : > { %10718 = vmatpush3.bf16.msra.mxu0 %v14263_v32  ;;  %v12175_v32 = vld [vmem:[%s16207_s11 + $0x38] sm:$0xff]  }
 0x648   : > { %10719 = vmatprep.subr.bf16.mxu0 %v14269_v50 }
 0x64a   : > { %10688 = vmatmul.mubr.msk.bf16.gmra.mrb[44].mxu0 %vm3378_vm2, %v12171_v28 }
 0x64b   : > { %10720 = vmatpush3.bf16.msra.mxu0 %v14269_v50  ;;  %10691 = vmatprep.mubr.msk.bf16.mxu0 %vm3378_vm2, %v12172_v29  ;;  %v12191_v50 = vld [vmem:[%s16207_s11 + $0xf8] sm:$0xff]  }
 0x64c   : > { %10721 = vmatprep.subr.bf16.mxu0 %v14267_v46 }
 0x64f   : > { %10722 = vmatpush3.bf16.msra.mxu0 %v14267_v46  ;;  %v12187_v46 = vld [vmem:[%s16207_s11 + $0xd8] sm:$0xff]  }
 0x650   : > { %10755 = vmatprep.subr.bf16.mxu0 %v14273_v1 }
 0x652   : > { %10692 = vmatmul.mubr.msk.bf16.gmra.mrb[48].mxu0 %vm3378_vm2, %v12173_v30 }
 0x653   : > { %10695 = vmatprep.mubr.msk.bf16.mxu0 %vm3378_vm2, %v12174_v31 }
 0x65a   : > { %10696 = vmatmul.mubr.msk.bf16.gmra.mrb[52].mxu0 %vm3378_vm2, %v12175_v32 }
 0x65b   : > { %10723 = vmatprep.mubr.msk.bf16.mxu0 %vm3378_vm2, %v12176_v33 }
 0x662   : > { %10724 = vmatmul.mubr.msk.bf16.vlgmr.msra.gmra.mrb[40].mxu0 %vm3378_vm2, %v12177_v34 }
 0x663   : > { %10756 = vmatpush3.bf16.msra.mxu0 %v14273_v1  ;;  %10727 = vmatprep.mubr.msk.bf16.mxu0 %vm3378_vm2, %v12178_v36 }
 0x664   : > { %10757 = vmatprep.subr.bf16.mxu0 %v14271_v61 }
 0x667   : > { %10758 = vmatpush3.bf16.msra.mxu0 %v14271_v61  ;;  %v4553_v61 = vpop.permute.xlu1 %4552 }
 0x668   : > { %10759 = vmatprep.subr.bf16.mxu0 %v14277_v14 }
 0x66a   : > { %10728 = vmatmul.mubr.msk.bf16.gmra.mrb[44].mxu0 %vm3378_vm2, %v12179_v37 }
 0x66b   : > { %10760 = vmatpush3.bf16.msra.mxu0 %v14277_v14  ;;  %10731 = vmatprep.mubr.msk.bf16.mxu0 %vm3378_vm2, %v12180_v39  ;;  %v4563_v4 = vpop.permute.xlu1 %4562 }
 0x66c   : > { %10761 = vmatprep.subr.bf16.mxu0 %v14275_v11 }
 0x66f   : > { %10762 = vmatpush3.bf16.msra.mxu0 %v14275_v11  ;;  %v4573_v16 = vpop.permute.xlu1 %4572 }
 0x670   : > { %10911 = vmatprep.subr.bf16.mxu0 %v12193_v51 }
 0x672   : > { %10732 = vmatmul.mubr.msk.bf16.gmra.mrb[48].mxu0 %vm3378_vm2, %v12181_v40 }
 0x673   : > { %10735 = vmatprep.mubr.msk.bf16.mxu0 %vm3378_vm2, %v12182_v41  ;;  %v4583_v31 = vpop.permute.xlu1 %4582  ;;  %v4588_v41 = vpop.permute.xlu0 %4587 }
 0x67a   : > { %10736 = vmatmul.mubr.msk.bf16.gmra.mrb[52].mxu0 %vm3378_vm2, %v12183_v42 }
 0x67b   : > { %10763 = vmatprep.mubr.msk.bf16.mxu0 %vm3378_vm2, %v12184_v43 }
 0x682   : > { %10764 = vmatmul.mubr.msk.bf16.vlgmr.msra.gmra.mrb[40].mxu0 %vm3378_vm2, %v12185_v44 }
 0x683   : > { %10767 = vmatprep.mubr.msk.bf16.mxu0 %vm3378_vm2, %v12186_v45  ;;  %10912 = vmatpush3.bf16.msra.mxu0 %v12193_v51  ;;  %v4593_v45 = vpop.permute.xlu1 %4592 }
 0x684   : > { %10977 = vmatprep.subr.bf16.mxu0 %v12194_v52 }
 0x68a   : > { %10768 = vmatmul.mubr.msk.bf16.gmra.mrb[44].mxu0 %vm3378_vm2, %v12187_v46 }
 0x68b   : > { %10771 = vmatprep.mubr.msk.bf16.mxu0 %vm3378_vm2, %v12188_v47 }
 0x692   : > { %10772 = vmatmul.mubr.msk.bf16.gmra.mrb[48].mxu0 %vm3378_vm2, %v12189_v48 }
 0x693   : > { %10775 = vmatprep.mubr.msk.bf16.mxu0 %vm3378_vm2, %v12190_v49 }
 0x69a   : > { %10776 = vmatmul.mubr.msk.bf16.gmra.mrb[52].mxu0 %vm3378_vm2, %v12191_v50 }
 0x755   : > { %v10765_v63 = vpop.f32.mrb[40].mxu0 }
 0x756   : > { %v4607_v1 = vadd.f32 %v10765_v63, %v4538_v58  ;;  %v4430_v3 = vpop.f32.mrb[41].mxu0 }
 0x757   : > { %v4605_v5 = vadd.f32 %v4528_v55, %v4430_v3  ;;  %v10766_v6 = vpop.f32.mrb[42].mxu0 }
 0x758   : > { %v4608_v7 = vadd.f32 %v10766_v6, %v4543_v59  ;;  %v4433_v8 = vpop.f32.mrb[43].mxu0  ;;  %v4623_v10 = vmax.f32 %v4607_v1, 0.0  ;;  %v4603_v59 = vpop.permute.xlu1 %4602 }
 0x759   : > { %v4606_v9 = vadd.f32 %v4533_v57, %v4433_v8  ;;  %v4621_v13 = vmax.f32 %v4605_v5, 0.0 }
 0x75a   : > { %v4624_v11 = vmax.f32 %v4608_v7, 0.0 }
 0x75b   : > { %v4622_v14 = vmax.f32 %v4606_v9, 0.0  ;;  %v6622_v9 = vld [vmem:[%s16211_s1 + $0x10] sm:$0xff] }
 0x75c   : > { %v14431_v15 = vpack.c.bf16 %v4624_v11, %v4623_v10  ;;  %v7017_v10 = vld [vmem:[%s16128_s20 + $0x18] sm:$0xff] }
 0x75d   : > { %v14433_v17 = vpack.c.bf16 %v4622_v14, %v4621_v13  ;;  %v10769_v18 = vpop.f32.mrb[44].mxu0  ;;  %v6627_v13 = vld [vmem:[%s16211_s1 + $0x38] sm:$0xff]  ;;  %v6821_v14 = vld [vmem:[%s16122_s14] sm:$0xff] }
 0x75e   : > { %v4611_v19 = vadd.f32 %v10769_v18, %v4558_v62  ;;  %v4446_v22 = vpop.f32.mrb[45].mxu0  ;;  %v7016_v18 = vld [vmem:[%s16128_s20 + $0x10] sm:$0xff] }
 0x75f   : > { %v4609_v23 = vadd.f32 %v4548_v60, %v4446_v22  ;;  %v10770_v24 = vpop.f32.mrb[46].mxu0  ;;  %10781 = vmatprep.mubr.msk.bf16.mxu1 %vm4653_vm3, %v14433_v17  ;;  %10913 = vmatprep.mubr.msk.bf16.mxu0 %vm4653_vm3, %v14433_v17  ;;  %v7021_v22 = vld [vmem:[%s16128_s20 + $0x38] sm:$0xff] }
 0x760   : > { %v4612_v25 = vadd.f32 %v10770_v24, %v4563_v4  ;;  %v4449_v26 = vpop.f32.mrb[47].mxu0  ;;  %10782 = vmatmul.mubr.msk.bf16.vlgmr.msra.gmra.mrb[40].mxu1 %vm4653_vm3, %v14431_v15  ;;  %10914 = vmatmul.mubr.msk.bf16.vlgmr.msra.gmra.mrb[56].mxu0 %vm4653_vm3, %v14431_v15  ;;  %v4627_v29 = vmax.f32 %v4611_v19, 0.0  ;;  %v7019_v19 = vld [vmem:[%s16128_s20 + $0x28] sm:$0xff] }
 0x761   : > { %v4610_v28 = vadd.f32 %v4553_v61, %v4449_v26  ;;  %10978 = vmatpush3.bf16.msra.mxu0 %v12194_v52  ;;  %10798 = vmatpush3.bf16.msra.mxu1 %v12195_v53  ;;  %v4625_v32 = vmax.f32 %v4609_v23, 0.0  ;;  %v4598_v52 = vpop.permute.xlu0 %4597  ;;  %v6822_v23 = vld [vmem:[%s16122_s14 + $0x8] sm:$0xff]  ;;  %v11143_v26 = vpack.c.bf16 %v7021_v22, %v7019_v19 }
 0x762   : > { %v4628_v30 = vmax.f32 %v4612_v25, 0.0  ;;  %11116 = vmatprep.subr.bf16.mxu0 %v13992_v38  ;;  %v6823_v25 = vld [vmem:[%s16122_s14 + $0x10] sm:$0xff] }
 0x763   : > { %v4626_v33 = vmax.f32 %v4610_v28, 0.0  ;;  %v7020_v28 = vld [vmem:[%s16128_s20 + $0x30] sm:$0xff] }
 0x764   : > { %v14444_v34 = vpack.c.bf16 %v4628_v30, %v4627_v29  ;;  %v7023_v29 = vld [vmem:[%s16128_s20 + $0x48] sm:$0xff]  ;;  %v7025_v30 = vld [vmem:[%s16128_s20 + $0x58] sm:$0xff] }
 0x765   : > { %v14446_v36 = vpack.c.bf16 %v4626_v33, %v4625_v32  ;;  %v10773_v37 = vpop.f32.mrb[48].mxu0  ;;  %v14605_v32 = vpop.permute.xlu0 %6847  ;;  %v6824_v33 = vld [vmem:[%s16122_s14 + $0x18] sm:$0xff] }
 0x766   : > { %v4615_v39 = vadd.f32 %v10773_v37, %v4578_v27  ;;  %v4462_v40 = vpop.f32.mrb[49].mxu0  ;;  %v7018_v27 = vld [vmem:[%s16128_s20 + $0x20] sm:$0xff] }
 0x767   : > { %v4613_v42 = vadd.f32 %v4568_v12, %v4462_v40  ;;  %v10774_v43 = vpop.f32.mrb[50].mxu0  ;;  %10785 = vmatprep.mubr.msk.bf16.mxu1 %vm4653_vm3, %v14446_v36  ;;  %10917 = vmatprep.mubr.msk.bf16.mxu0 %vm4653_vm3, %v14446_v36  ;;  %v6624_v12 = vld [vmem:[%s16211_s1 + $0x20] sm:$0xff]  ;;  %v11145_v37 = vpack.c.bf16 %v7020_v28, %v7018_v27  ;;  %v11147_v40 = vpack.c.bf16 %v7025_v30, %v7023_v29 }
 0x768   : > { %v4616_v38 = vadd.f32 %v10774_v43, %v4583_v31  ;;  %v4465_v44 = vpop.f32.mrb[51].mxu0  ;;  %10786 = vmatmul.mubr.msk.bf16.gmra.mrb[44].mxu1 %vm4653_vm3, %v14444_v34  ;;  %10918 = vmatmul.mubr.msk.bf16.gmra.mrb[60].mxu0 %vm4653_vm3, %v14444_v34  ;;  %v4631_v47 = vmax.f32 %v4615_v39, 0.0  ;;  %v14603_v31 = vpop.permute.xlu1 %6852  ;;  %v6825_v39 = vld [vmem:[%s16122_s14 + $0x20] sm:$0xff]  ;;  %v7027_v43 = vld [vmem:[%s16128_s20 + $0x68] sm:$0xff] }
 0x769   : > { %v4614_v46 = vadd.f32 %v4573_v16, %v4465_v44  ;;  %v4629_v49 = vmax.f32 %v4613_v42, 0.0  ;;  %v7014_v16 = vld [vmem:[%s16128_s20] sm:$0xff]  ;;  %v7024_v42 = vld [vmem:[%s16128_s20 + $0x50] sm:$0xff]  ;;  %v6826_v44 = vld [vmem:[%s16122_s14 + $0x28] sm:$0xff] }
 0x76a   : > { %v4632_v48 = vmax.f32 %v4616_v38, 0.0  ;;  %v11141_v24 = vpack.c.bf16 %v7016_v18, %v7014_v16  ;;  %v7029_v38 = vld [vmem:[%s16128_s20 + $0x78] sm:$0xff] }
 0x76b   : > { %v4630_v50 = vmax.f32 %v4614_v46, 0.0 }
 0x76c   : > { %v14456_v51 = vpack.c.bf16 %v4632_v48, %v4631_v47  ;;  %v14632_v46 = vpop.permute.xlu1 %6862  ;;  %v14634_v47 = vpop.permute.xlu0 %6857  ;;  %v6827_v48 = vld [vmem:[%s16122_s14 + $0x30] sm:$0xff] }
 0x76d   : > { %v14458_v53 = vpack.c.bf16 %v4630_v50, %v4629_v49  ;;  %v10777_v55 = vpop.f32.mrb[52].mxu0  ;;  %v11151_v49 = vpack.c.bf16 %v7029_v38, %v7027_v43  ;;  %v7026_v50 = vld [vmem:[%s16128_s20 + $0x60] sm:$0xff] }
 0x76e   : > { %v4619_v57 = vadd.f32 %v10777_v55, %v4598_v52  ;;  %v4478_v58 = vpop.f32.mrb[53].mxu0  ;;  %v7028_v52 = vld [vmem:[%s16128_s20 + $0x70] sm:$0xff]  ;;  %v6828_v55 = vld [vmem:[%s16122_s14 + $0x38] sm:$0xff] }
 0x76f   : > { %v4617_v60 = vadd.f32 %v4588_v41, %v4478_v58  ;;  %v10778_v61 = vpop.f32.mrb[54].mxu0  ;;  %10789 = vmatprep.mubr.msk.bf16.mxu1 %vm4653_vm3, %v14458_v53  ;;  %10921 = vmatprep.mubr.msk.bf16.mxu0 %vm4653_vm3, %v14458_v53  ;;  %v7022_v41 = vld [vmem:[%s16128_s20 + $0x40] sm:$0xff] }
 0x770   : > { %v4620_v62 = vadd.f32 %v10778_v61, %v4603_v59  ;;  %v4481_v63 = vpop.f32.mrb[55].mxu0  ;;  %10790 = vmatmul.mubr.msk.bf16.gmra.mrb[48].mxu1 %vm4653_vm3, %v14456_v51  ;;  %10922 = vmatmul.mubr.msk.bf16.gmra.mrb[64].mxu0 %vm4653_vm3, %v14456_v51  ;;  %v4635_v3 = vmax.f32 %v4619_v57, 0.0  ;;  %v11153_v57 = vpack.c.bf16 %v7028_v52, %v7026_v50  ;;  %v14650_v58 = vpop.permute.xlu1 %6872 }
 0x771   : > { %v4618_v1 = vadd.f32 %v4593_v45, %v4481_v63  ;;  %v4633_v5 = vmax.f32 %v4617_v60, 0.0  ;;  %v11149_v45 = vpack.c.bf16 %v7024_v42, %v7022_v41  ;;  %v14652_v59 = vpop.permute.xlu0 %6867 }
 0x772   : > { %v4636_v4 = vmax.f32 %v4620_v62, 0.0 }
 0x773   : > { %v4634_v6 = vmax.f32 %v4618_v1, 0.0 }
 0x774   : > { %v14468_v7 = vpack.c.bf16 %v4636_v4, %v4635_v3  ;;  %v14657_v60 = vpop.permute.xlu1 %6882 }
 0x775   : > { %v14470_v8 = vpack.c.bf16 %v4634_v6, %v4633_v5  ;;  %v14659_v61 = vpop.permute.xlu0 %6877 }
 0x777   : > { %10793 = vmatprep.mubr.msk.bf16.mxu1 %vm4653_vm3, %v14470_v8  ;;  %10925 = vmatprep.mubr.msk.bf16.mxu0 %vm4653_vm3, %v14470_v8 }
 0x778   : > { %10794 = vmatmul.mubr.msk.bf16.gmra.mrb[52].mxu1 %vm4653_vm3, %v14468_v7  ;;  %10926 = vmatmul.mubr.msk.bf16.gmra.mrb[68].mxu0 %vm4653_vm3, %v14468_v7  ;;  %v14661_v62 = vpop.permute.xlu1 %6467 }
 0x779   : > { %10799 = vmatprep.mubr.msk.bf16.mxu1 %vm4653_vm3, %v14433_v17  ;;  %10979 = vmatprep.mubr.msk.bf16.mxu0 %vm4653_vm3, %v14433_v17  ;;  %16212 = vst [vmem:[#allocation12_spill] sm:$0xff] %v14661_v62  ;;  %v14663_v63 = vpop.permute.xlu0 %6462 }
 0x77a   : > { %16213 = vst [vmem:[#allocation13_spill] sm:$0xff] %v14663_v63 }
 0x77c   : > { %v14665_v1 = vpop.permute.xlu1 %6387 }
 0x77d   : > { %16214 = vst [vmem:[#allocation14_spill] sm:$0xff] %v14665_v1  ;;  %v14667_v3 = vpop.permute.xlu0 %6382 }
 0x77e   : > { %16215 = vst [vmem:[#allocation15_spill] sm:$0xff] %v14667_v3 }
 0x780   : > { %10800 = vmatmul.mubr.msk.bf16.vlgmr.msra.gmra.mrb[56].mxu1 %vm4653_vm3, %v14431_v15  ;;  %10980 = vmatmul.mubr.msk.bf16.vlgmr.msra.gmra.mrb[72].mxu0 %vm4653_vm3, %v14431_v15  ;;  %v14669_v4 = vpop.permute.xlu1 %6477 }
 0x781   : > { %11118 = vmatpush1.bf16.msra.mxu0 %v13990_v35  ;;  %10803 = vmatprep.mubr.msk.bf16.mxu1 %vm4653_vm3, %v14446_v36  ;;  %v16161_v35 = vmov 0.0   ;;  %16216 = vst [vmem:[#allocation16_spill] sm:$0xff] %v14669_v4  ;;  %v14671_v5 = vpop.permute.xlu0 %6472 }
 0x782   : > { %10983 = vmatprep.mubr.msk.bf16.mxu0 %vm4653_vm3, %v14446_v36  ;;  %11120 = vmatprep.subr.bf16.mxu0 %v14012_v56  ;;  %v6621_v56 = vld [vmem:[%s16211_s1 + $0x8] sm:$0xff]  ;;  %16217 = vst [vmem:[#allocation17_spill] sm:$0xff] %v14671_v5 }
 0x784   : > { %v14673_v6 = vpop.permute.xlu1 %6392 }
 0x785   : > { %11122 = vmatpush1.bf16.msra.mxu0 %v14010_v54  ;;  %v6620_v54 = vld [vmem:[%s16210_s3] sm:$0xff] }
 0x786   : > { %11124 = vmatprep.subr.bf16.mxu0 %v14203_v2 }
 0x788   : > { %10804 = vmatmul.mubr.msk.bf16.gmra.mrb[60].mxu1 %vm4653_vm3, %v14444_v34  ;;  %10984 = vmatmul.mubr.msk.bf16.gmra.mrb[76].mxu0 %vm4653_vm3, %v14444_v34 }
 0x789   : > { %10807 = vmatprep.mubr.msk.bf16.mxu1 %vm4653_vm3, %v14458_v53  ;;  %10987 = vmatprep.mubr.msk.bf16.mxu0 %vm4653_vm3, %v14458_v53 }
 0x790   : > { %10808 = vmatmul.mubr.msk.bf16.gmra.mrb[64].mxu1 %vm4653_vm3, %v14456_v51  ;;  %10988 = vmatmul.mubr.msk.bf16.gmra.mrb[80].mxu0 %vm4653_vm3, %v14456_v51 }
 0x791   : > { %10811 = vmatprep.mubr.msk.bf16.mxu1 %vm4653_vm3, %v14470_v8  ;;  %10991 = vmatprep.mubr.msk.bf16.mxu0 %vm4653_vm3, %v14470_v8 }
 0x798   : > { %10812 = vmatmul.mubr.msk.bf16.gmra.mrb[68].mxu1 %vm4653_vm3, %v14468_v7  ;;  %10992 = vmatmul.mubr.msk.bf16.gmra.mrb[84].mxu0 %vm4653_vm3, %v14468_v7 }
 0x799   : > { %6772 = vmatprep.mubr.f32.mxu0 %v16161_v35 }
 0x7a0   : > { %10081 = vmatmul.mubr.msk.f32.vlgmr.msra.gmra.mrb[88].mxu0 %vm2515_vm1, %v6620_v54  ;;  %v14675_v54 = vpop.permute.xlu0 %7201 }
 0x7a1   : > { %11126 = vmatpush3.bf16.msra.mxu0 %v14203_v2  ;;  %6778 = vmatprep.mubr.f32.mxu0 %v16161_v35  ;;  %v7015_v2 = vld [vmem:[%s16128_s20 + $0x8] sm:$0xff] }
 0x7a2   : > { %11128 = vmatprep.subr.bf16.mxu0 %v14201_v0  ;;  %v11139_v11 = vpack.c.bf16 %v7017_v10, %v7015_v2 }
 0x7a4   : > { %10082 = vmatmul.mubr.msk.f32.gmra.mrb[90].mxu0 %vm2515_vm1, %v6621_v56  ;;  %v14677_v56 = vpop.permute.xlu1 %6482 }
 0x7a5   : > { %11130 = vmatpush3.bf16.msra.mxu0 %v14201_v0  ;;  %6784 = vmatprep.mubr.f32.mxu0 %v16161_v35  ;;  %v6623_v0 = vld [vmem:[%s16211_s1 + $0x18] sm:$0xff]  ;;  %16218 = vst [vmem:[#allocation18_spill] sm:$0xff] %v14677_v56 }
 0x7a6   : > { %11132 = vmatprep.subr.bf16.mxu0 %v14227_v21 }
 0x7a8   : > { %10083 = vmatmul.mubr.msk.f32.gmra.mrb[92].mxu0 %vm2515_vm1, %v6622_v9  ;;  %v14679_v9 = vpop.permute.xlu0 %6397  ;;  %v14681_v2 = vpop.permute.xlu1 %7206 }
 0x7a9   : > { %11134 = vmatpush3.bf16.msra.mxu0 %v14227_v21  ;;  %6790 = vmatprep.mubr.f32.mxu0 %v16161_v35  ;;  %v6625_v21 = vld [vmem:[%s16211_s1 + $0x28] sm:$0xff]  ;;  %16219 = vst [vmem:[#allocation19_spill] sm:$0xff] %v14679_v9 }
 0x7aa   : > { %11136 = vmatprep.subr.bf16.mxu0 %v14225_v20 }
 0x7ac   : > { %10084 = vmatmul.mubr.msk.f32.gmra.mrb[94].mxu0 %vm2515_vm1, %v6623_v0  ;;  %v14683_v10 = vpop.permute.xlu0 %6487  ;;  %v12196_v0 = vld [vmem:[%s16221_s6 + $0x80] sm:$0xff]  }
 0x7ad   : > { %11138 = vmatpush3.bf16.msra.mxu0 %v14225_v20  ;;  %6796 = vmatprep.mubr.f32.mxu0 %v16161_v35  ;;  %v6626_v20 = vld [vmem:[%s16211_s1 + $0x30] sm:$0xff]  ;;  %16220 = vst [vmem:[#allocation20_spill] sm:$0xff] %v14683_v10 }
 0x7ae   : > { %11140 = vmatprep.subr.bf16.mxu0 %v11139_v11  ;;  %10831 = vmatprep.mubr.bf16.mxu1 %v12196_v0  ;;  %v14688_v11 = vpop.permute.xlu1 %6407 }
 0x7af   : > { %16223 = vst [vmem:[#allocation21_spill] sm:$0xff] %v14688_v11 }
 0x7b0   : > { %10085 = vmatmul.mubr.msk.f32.gmra.mrb[96].mxu0 %vm2515_vm1, %v6624_v12  ;;  %v14690_v12 = vpop.permute.xlu0 %6402 }
 0x7b1   : > { %6802 = vmatprep.mubr.f32.mxu0 %v16161_v35  ;;  %16224 = vst [vmem:[#allocation22_spill] sm:$0xff] %v14690_v12 }
 0x7b4   : > { %10086 = vmatmul.mubr.msk.f32.gmra.mrb[98].mxu0 %vm2515_vm1, %v6625_v21  ;;  %v14692_v21 = vpop.permute.xlu1 %6497 }
 0x7b5   : > { %6808 = vmatprep.mubr.f32.mxu0 %v16161_v35  ;;  %16225 = vst [vmem:[#allocation23_spill] sm:$0xff] %v14692_v21 }
 0x7b8   : > { %10087 = vmatmul.mubr.msk.f32.gmra.mrb[100].mxu0 %vm2515_vm1, %v6626_v20  ;;  %v14694_v20 = vpop.permute.xlu0 %6492 }
 0x7b9   : > { %6814 = vmatprep.mubr.f32.mxu0 %v16161_v35  ;;  %16226 = vst [vmem:[#allocation24_spill] sm:$0xff] %v14694_v20 }
 0x7bc   : > { %10088 = vmatmul.mubr.msk.f32.gmra.mrb[102].mxu0 %vm2515_vm1, %v6627_v13  ;;  %v14696_v13 = vpop.permute.xlu1 %6412 }
 0x7bd   : > { %11059 = vmatprep.mubr.msk.f32.mxu0 %vm3378_vm2, %v6821_v14  ;;  %16227 = vst [vmem:[#allocation25_spill] sm:$0xff] %v14696_v13  ;;  %v14698_v14 = vpop.permute.xlu0 %7211 }
 0x7c0   : > { %11060 = vmatmul.mubr.msk.f32.vlgmr.msra.gmra.mrb[104].mxu0 %vm3378_vm2, %v6822_v23  ;;  %v14700_v16 = vpop.permute.xlu1 %6502 }
 0x7c1   : > { %11142 = vmatpush1.bf16.msra.mxu0 %v11141_v24  ;;  %11062 = vmatprep.mubr.msk.f32.mxu0 %vm3378_vm2, %v6823_v25  ;;  %16228 = vst [vmem:[#allocation26_spill] sm:$0xff] %v14700_v16  ;;  %v14702_v18 = vpop.permute.xlu0 %6417 }
 0x7c2   : > { %11144 = vmatprep.subr.bf16.mxu0 %v11143_v26  ;;  %16229 = vst [vmem:[#allocation27_spill] sm:$0xff] %v14702_v18 }
 0x7c4   : > { %11063 = vmatmul.mubr.msk.f32.gmra.mrb[106].mxu0 %vm3378_vm2, %v6824_v33  ;;  %v14704_v19 = vpop.permute.xlu1 %7216 }
 0x7c5   : > { %11146 = vmatpush1.bf16.msra.mxu0 %v11145_v37  ;;  %11065 = vmatprep.mubr.msk.f32.mxu0 %vm3378_vm2, %v6825_v39  ;;  %v14706_v22 = vpop.permute.xlu0 %6507 }
 0x7c6   : > { %11148 = vmatprep.subr.bf16.mxu0 %v11147_v40  ;;  %16230 = vst [vmem:[#allocation28_spill] sm:$0xff] %v14706_v22 }
 0x7c8   : > { %11066 = vmatmul.mubr.msk.f32.gmra.mrb[108].mxu0 %vm3378_vm2, %v6826_v44  ;;  %v14708_v23 = vpop.permute.xlu1 %6427 }
 0x7c9   : > { %11150 = vmatpush1.bf16.msra.mxu0 %v11149_v45  ;;  %11068 = vmatprep.mubr.msk.f32.mxu0 %vm3378_vm2, %v6827_v48  ;;  %16231 = vst [vmem:[#allocation29_spill] sm:$0xff] %v14708_v23  ;;  %v14710_v24 = vpop.permute.xlu0 %6422 }
 0x7ca   : > { %11152 = vmatprep.subr.bf16.mxu0 %v11151_v49  ;;  %16232 = vst [vmem:[#allocation30_spill] sm:$0xff] %v14710_v24 }
 0x7cc   : > { %11069 = vmatmul.mubr.msk.f32.gmra.mrb[110].mxu0 %vm3378_vm2, %v6828_v55  ;;  %v14712_v25 = vpop.permute.xlu1 %6517 }
 0x7cd   : > { %11154 = vmatpush1.bf16.msra.mxu0 %v11153_v57  ;;  %7118 = vmatprep.mubr.f32.mxu0 %v16161_v35  ;;  %16233 = vst [vmem:[#allocation31_spill] sm:$0xff] %v14712_v25  ;;  %v14714_v26 = vpop.permute.xlu0 %6512 }
 0x7ce   : > { %11156 = vmatprep.subr.bf16.mxu0 %v14433_v17  ;;  %16234 = vst [vmem:[#allocation32_spill] sm:$0xff] %v14714_v26 }
 0x7d0   : > { %v14716_v27 = vpop.permute.xlu1 %6432 }
 0x7d1   : > { %16235 = vst [vmem:[#allocation33_spill] sm:$0xff] %v14716_v27  ;;  %v14718_v28 = vpop.permute.xlu0 %7221 }
 0x7d4   : > { %v14720_v29 = vpop.permute.xlu1 %6522 }
 0x7d5   : > { %16236 = vst [vmem:[#allocation34_spill] sm:$0xff] %v14720_v29  ;;  %v14722_v30 = vpop.permute.xlu0 %6437 }
 0x7d6   : > { %16237 = vst [vmem:[#allocation35_spill] sm:$0xff] %v14722_v30 }
 0x7d8   : > { %v14724_v33 = vpop.permute.xlu1 %7226 }
 0x7d9   : > { %v14726_v37 = vpop.permute.xlu0 %6527 }
 0x7da   : > { %16238 = vst [vmem:[#allocation36_spill] sm:$0xff] %v14726_v37 }
 0x7dc   : > { %v14736_v55 = vpop.permute.xlu1 %6447 }
 0x7dd   : > { %16239 = vst [vmem:[#allocation37_spill] sm:$0xff] %v14736_v55  ;;  %v14738_v57 = vpop.permute.xlu0 %6442 }
 0x7de   : > { %16240 = vst [vmem:[#allocation38_spill] sm:$0xff] %v14738_v57 }
 0x833   : > { %v10783_v39 = vpop.f32.mrb[40].mxu1  ;;  %v10915_v40 = vpop.f32.mrb[56].mxu0 }
 0x834   : > { %v4712_v41 = vpop.f32.mrb[41].mxu1  ;;  %v5519_v42 = vpop.f32.mrb[57].mxu0 }
 0x835   : > { %v10784_v43 = vpop.f32.mrb[42].mxu1  ;;  %v10916_v38 = vpop.f32.mrb[58].mxu0 }
 0x836   : > { %v14728_v44 = vpack.c.bf16 %v10784_v43, %v10783_v39  ;;  %v14730_v45 = vpack.c.bf16 %v10916_v38, %v10915_v40  ;;  %v4715_v48 = vpop.f32.mrb[43].mxu1  ;;  %v5522_v49 = vpop.f32.mrb[59].mxu0 }
 0x837   : > { %v14732_v50 = vpack.c.bf16 %v4715_v48, %v4712_v41  ;;  %v14734_v52 = vpack.c.bf16 %v5522_v49, %v5519_v42  ;;  %v14748_v48 = vpop.permute.xlu1 %6537  ;;  %v14750_v49 = vpop.permute.xlu0 %6532 }
 0x838   : > { %16241 = vst [vmem:[#allocation39_spill] sm:$0xff] %v14748_v48  ;;  %16242 = vst [vmem:[#allocation40_spill] sm:$0xff] %v14750_v49 }
 0x83b   : > { %v10787_v0 = vpop.f32.mrb[44].mxu1  ;;  %v10919_v35 = vpop.f32.mrb[60].mxu0 }
 0x83c   : > { %v4728_v37 = vpop.f32.mrb[45].mxu1  ;;  %v5535_v29 = vpop.f32.mrb[61].mxu0 }
 0x83d   : > { %v10788_v22 = vpop.f32.mrb[46].mxu1  ;;  %v10920_v25 = vpop.f32.mrb[62].mxu0 }
 0x83e   : > { %v14740_v39 = vpack.c.bf16 %v10788_v22, %v10787_v0  ;;  %v14742_v40 = vpack.c.bf16 %v10920_v25, %v10919_v35  ;;  %v4731_v43 = vpop.f32.mrb[47].mxu1  ;;  %v5538_v38 = vpop.f32.mrb[63].mxu0 }
 0x83f   : > { %v14744_v41 = vpack.c.bf16 %v4731_v43, %v4728_v37  ;;  %v14746_v42 = vpack.c.bf16 %v5538_v38, %v5535_v29  ;;  %v14760_v43 = vpop.permute.xlu1 %6452  ;;  %v14762_v38 = vpop.permute.xlu0 %7231 }
 0x840   : > { %16243 = vst [vmem:[#allocation41_spill] sm:$0xff] %v14760_v43 }
 0x843   : > { %v10791_v16 = vpop.f32.mrb[48].mxu1  ;;  %v10923_v26 = vpop.f32.mrb[64].mxu0 }
 0x844   : > { %v4744_v10 = vpop.f32.mrb[49].mxu1  ;;  %v5551_v21 = vpop.f32.mrb[65].mxu0 }
 0x845   : > { %v10792_v56 = vpop.f32.mrb[50].mxu1  ;;  %v10924_v20 = vpop.f32.mrb[66].mxu0 }
 0x846   : > { %v14752_v22 = vpack.c.bf16 %v10792_v56, %v10791_v16  ;;  %v14754_v35 = vpack.c.bf16 %v10924_v20, %v10923_v26  ;;  %v4747_v25 = vpop.f32.mrb[51].mxu1  ;;  %v5554_v0 = vpop.f32.mrb[67].mxu0 }
 0x847   : > { %v14756_v37 = vpack.c.bf16 %v4747_v25, %v4744_v10  ;;  %v14758_v29 = vpack.c.bf16 %v5554_v0, %v5551_v21  ;;  %v14772_v25 = vpop.permute.xlu1 %7236  ;;  %v14774_v0 = vpop.permute.xlu0 %6457 }
 0x848   : > { %16244 = vst [vmem:[#allocation42_spill] sm:$0xff] %v14774_v0 }
 0x84b   : > { %v10795_v48 = vpop.f32.mrb[52].mxu1  ;;  %v10927_v49 = vpop.f32.mrb[68].mxu0 }
 0x84c   : > { %v4760_v62 = vpop.f32.mrb[53].mxu1  ;;  %v5567_v4 = vpop.f32.mrb[69].mxu0 }
 0x84d   : > { %v10796_v63 = vpop.f32.mrb[54].mxu1  ;;  %v10928_v5 = vpop.f32.mrb[70].mxu0 }
 0x84e   : > { %v14764_v56 = vpack.c.bf16 %v10796_v63, %v10795_v48  ;;  %v14766_v20 = vpack.c.bf16 %v10928_v5, %v10927_v49  ;;  %v4763_v16 = vpop.f32.mrb[55].mxu1  ;;  %v5570_v26 = vpop.f32.mrb[71].mxu0 }
 0x84f   : > { %v14768_v10 = vpack.c.bf16 %v4763_v16, %v4760_v62  ;;  %v14770_v21 = vpack.c.bf16 %v5570_v26, %v5567_v4  ;;  %v14780_v4 = vpop.permute.xlu1 %7548  ;;  %v14782_v16 = vpop.permute.xlu0 %7543 }
 0x850   : > { %16245 = vst [vmem:[#allocation43_spill] sm:$0xff] %v14780_v4  ;;  %16246 = vst [vmem:[#allocation44_spill] sm:$0xff] %v14782_v16 }
 0x853   : > { %v10801_v55 = vpop.f32.mrb[56].mxu1  ;;  %v10981_v57 = vpop.f32.mrb[72].mxu0 }
 0x854   : > { %v4858_v43 = vpop.f32.mrb[57].mxu1  ;;  %v5955_v23 = vpop.f32.mrb[73].mxu0 }
 0x855   : > { %v10802_v30 = vpop.f32.mrb[58].mxu1  ;;  %v10982_v24 = vpop.f32.mrb[74].mxu0 }
 0x856   : > { %v4922_v63 = vpack.c.bf16 %v10802_v30, %v10801_v55  ;;  %v14776_v48 = vpack.c.bf16 %v10982_v24, %v10981_v57  ;;  %v4861_v5 = vpop.f32.mrb[59].mxu1  ;;  %v5958_v49 = vpop.f32.mrb[75].mxu0 }
 0x857   : > { %v4921_v27 = vpack.c.bf16 %v4861_v5, %v4858_v43  ;;  %v14778_v62 = vpack.c.bf16 %v5958_v49, %v5955_v23  ;;  %v14788_v49 = vpop.permute.xlu1 %7558 }
 0x858   : > { %16247 = vst [vmem:[#allocation45_spill] sm:$0xff] %v14788_v49 }
 0x859   : > { %10815 = vmatprep.subr.bf16.mxu1 %v4921_v27 }
 0x85a   : > { %10816 = vmatpush3.bf16.msra.mxu1 %v4921_v27  ;;  %v14790_v27 = vpop.permute.xlu0 %7553 }
 0x85b   : > { %v10805_v26 = vpop.f32.mrb[60].mxu1  ;;  %10817 = vmatprep.subr.bf16.mxu1 %v4922_v63  ;;  %v10985_v0 = vpop.f32.mrb[76].mxu0  ;;  %16248 = vst [vmem:[#allocation46_spill] sm:$0xff] %v14790_v27 }
 0x85c   : > { %v4874_v11 = vpop.f32.mrb[61].mxu1  ;;  %v5971_v18 = vpop.f32.mrb[77].mxu0 }
 0x85d   : > { %v10806_v12 = vpop.f32.mrb[62].mxu1  ;;  %v10986_v30 = vpop.f32.mrb[78].mxu0 }
 0x85e   : > { %v4924_v24 = vpack.c.bf16 %v10806_v12, %v10805_v26  ;;  %v14784_v55 = vpack.c.bf16 %v10986_v30, %v10985_v0  ;;  %v4877_v57 = vpop.f32.mrb[63].mxu1  ;;  %10818 = vmatpush3.bf16.msra.mxu1 %v4922_v63  ;;  %v5974_v23 = vpop.f32.mrb[79].mxu0 }
 0x85f   : > { %v4923_v43 = vpack.c.bf16 %v4877_v57, %v4874_v11  ;;  %v14786_v5 = vpack.c.bf16 %v5974_v23, %v5971_v18  ;;  %v14796_v23 = vpop.permute.xlu1 %7568 }
 0x860   : > { %16249 = vst [vmem:[#allocation47_spill] sm:$0xff] %v14796_v23 }
 0x861   : > { %10819 = vmatprep.subr.bf16.mxu1 %v4923_v43 }
 0x862   : > { %10820 = vmatpush3.bf16.msra.mxu1 %v4923_v43  ;;  %v14798_v43 = vpop.permute.xlu0 %7563 }
 0x863   : > { %v10809_v4 = vpop.f32.mrb[64].mxu1  ;;  %10821 = vmatprep.subr.bf16.mxu1 %v4924_v24  ;;  %v10989_v16 = vpop.f32.mrb[80].mxu0  ;;  %16250 = vst [vmem:[#allocation48_spill] sm:$0xff] %v14798_v43 }
 0x864   : > { %v4890_v13 = vpop.f32.mrb[65].mxu1  ;;  %v5987_v1 = vpop.f32.mrb[81].mxu0 }
 0x865   : > { %v10810_v12 = vpop.f32.mrb[66].mxu1  ;;  %v10990_v0 = vpop.f32.mrb[82].mxu0 }
 0x866   : > { %v4926_v26 = vpack.c.bf16 %v10810_v12, %v10809_v4  ;;  %v14792_v30 = vpack.c.bf16 %v10990_v0, %v10989_v16  ;;  %v4893_v63 = vpop.f32.mrb[67].mxu1  ;;  %10822 = vmatpush3.bf16.msra.mxu1 %v4924_v24  ;;  %v5990_v11 = vpop.f32.mrb[83].mxu0 }
 0x867   : > { %v4925_v18 = vpack.c.bf16 %v4893_v63, %v4890_v13  ;;  %v14794_v57 = vpack.c.bf16 %v5990_v11, %v5987_v1  ;;  %v14804_v11 = vpop.permute.xlu1 %7578  ;;  %v14806_v23 = vpop.permute.xlu0 %7573 }
 0x868   : > { %16251 = vst [vmem:[#allocation49_spill] sm:$0xff] %v14804_v11 }
 0x869   : > { %10823 = vmatprep.subr.bf16.mxu1 %v4925_v18 }
 0x86a   : > { %10824 = vmatpush3.bf16.msra.mxu1 %v4925_v18 }
 0x86b   : > { %v10813_v49 = vpop.f32.mrb[68].mxu1  ;;  %10825 = vmatprep.subr.bf16.mxu1 %v4926_v26  ;;  %v10993_v27 = vpop.f32.mrb[84].mxu0 }
 0x86c   : > { %v4906_v9 = vpop.f32.mrb[69].mxu1  ;;  %v6003_v3 = vpop.f32.mrb[85].mxu0 }
 0x86d   : > { %v10814_v4 = vpop.f32.mrb[70].mxu1  ;;  %v10994_v16 = vpop.f32.mrb[86].mxu0 }
 0x86e   : > { %v4928_v12 = vpack.c.bf16 %v10814_v4, %v10813_v49  ;;  %v14800_v0 = vpack.c.bf16 %v10994_v16, %v10993_v27  ;;  %v4909_v24 = vpop.f32.mrb[71].mxu1  ;;  %10826 = vmatpush3.bf16.msra.mxu1 %v4926_v26  ;;  %v6006_v1 = vpop.f32.mrb[87].mxu0  ;;  %v12197_v49 = vld [vmem:[%s16222_s23 + $0x88] sm:$0xff]  }
 0x86f   : > { %v4927_v13 = vpack.c.bf16 %v4909_v24, %v4906_v9  ;;  %v14802_v63 = vpack.c.bf16 %v6006_v1, %v6003_v3  ;;  %v6652_v27 = vpop.permute.xlu1 %6651  ;;  %v12198_v3 = vld [vmem:[%s16222_s23 + $0x90] sm:$0xff]   ;;  %v6647_v9 = vpop.permute.xlu0 %6646 }
 0x871   : > { %10827 = vmatprep.subr.bf16.mxu1 %v4927_v13 }
 0x872   : > { %10828 = vmatpush3.bf16.msra.mxu1 %v4927_v13 }
 0x873   : > { %10829 = vmatprep.subr.bf16.mxu1 %v4928_v12  ;;  %v6774_v18 = vpop.f32.mrb[88].mxu0 }
 0x874   : > { %v6776_v43 = vpop.f32.mrb[89].mxu0  ;;  %v14815_v4 = vadd.f32 %v6774_v18, %v6647_v9 }
 0x875   : > { %v14819_v1 = vadd.f32 %v6776_v43, %v6647_v9  ;;  %v12199_v43 = vld [vmem:[%s16222_s23 + $0x98] sm:$0xff]  }
 0x876   : > { %10830 = vmatpush3.bf16.msra.mxu1 %v4928_v12  ;;  %16252 = vst [vmem:[#allocation50_spill] sm:$0xff] %v14815_v4 }
 0x877   : > { %10863 = vmatprep.subr.bf16.mxu1 %v14732_v50  ;;  %v6780_v26 = vpop.f32.mrb[90].mxu0 }
 0x878   : > { %v14817_v16 = vadd.f32 %v6780_v26, %v6652_v27  ;;  %v6782_v24 = vpop.f32.mrb[91].mxu0 }
 0x879   : > { %v14821_v13 = vadd.f32 %v6782_v24, %v6652_v27  ;;  %10832 = vmatmul.mubr.bf16.vlgmr.msra.gmra.mrb[72].mxu1 %v12197_v49  ;;  %v6662_v27 = vpop.permute.xlu1 %6661  ;;  %v12200_v49 = vld [vmem:[%s16222_s23 + $0xa0] sm:$0xff]  }
 0x87a   : > { %16253 = vst [vmem:[#allocation51_spill] sm:$0xff] %v14817_v16  ;;  %10864 = vmatpush3.bf16.msra.mxu1 %v14732_v50  ;;  %10835 = vmatprep.mubr.bf16.mxu1 %v12198_v3  ;;  %v6657_v50 = vpop.permute.xlu0 %6656 }
 0x87b   : > { %10865 = vmatprep.subr.bf16.mxu1 %v14728_v44  ;;  %v6786_v18 = vpop.f32.mrb[92].mxu0 }
 0x87c   : > { %v6788_v26 = vpop.f32.mrb[93].mxu0  ;;  %v14837_v9 = vadd.f32 %v6786_v18, %v6657_v50 }
 0x87d   : > { %v14841_v11 = vadd.f32 %v6788_v26, %v6657_v50  ;;  %v12201_v26 = vld [vmem:[%s16222_s23 + $0xa8] sm:$0xff]  }
 0x87e   : > { %10866 = vmatpush3.bf16.msra.mxu1 %v14728_v44  ;;  %16254 = vst [vmem:[#allocation52_spill] sm:$0xff] %v14837_v9 }
 0x87f   : > { %10867 = vmatprep.subr.bf16.mxu1 %v14744_v41  ;;  %v6792_v3 = vpop.f32.mrb[94].mxu0 }
 0x880   : > { %v14839_v24 = vadd.f32 %v6792_v3, %v6662_v27  ;;  %v6794_v12 = vpop.f32.mrb[95].mxu0 }
 0x881   : > { %v14843_v4 = vadd.f32 %v6794_v12, %v6662_v27  ;;  %10836 = vmatmul.mubr.bf16.gmra.mrb[76].mxu1 %v12199_v43  ;;  %v6672_v12 = vpop.permute.xlu1 %6671  ;;  %v12202_v43 = vld [vmem:[%s16222_s23 + $0xb0] sm:$0xff]  }
 0x882   : > { %16255 = vst [vmem:[#allocation53_spill] sm:$0xff] %v14839_v24  ;;  %10868 = vmatpush3.bf16.msra.mxu1 %v14744_v41  ;;  %10839 = vmatprep.mubr.bf16.mxu1 %v12200_v49  ;;  %v6667_v41 = vpop.permute.xlu0 %6666 }
 0x883   : > { %10869 = vmatprep.subr.bf16.mxu1 %v14740_v39  ;;  %v6798_v18 = vpop.f32.mrb[96].mxu0 }
 0x884   : > { %v6800_v3 = vpop.f32.mrb[97].mxu0  ;;  %v14859_v49 = vadd.f32 %v6798_v18, %v6667_v41 }
 0x885   : > { %v14863_v16 = vadd.f32 %v6800_v3, %v6667_v41  ;;  %v12203_v3 = vld [vmem:[%s16222_s23 + $0xb8] sm:$0xff]  }
 0x886   : > { %10870 = vmatpush3.bf16.msra.mxu1 %v14740_v39  ;;  %16256 = vst [vmem:[#allocation54_spill] sm:$0xff] %v14859_v49 }
 0x887   : > { %10871 = vmatprep.subr.bf16.mxu1 %v14756_v37  ;;  %v6804_v27 = vpop.f32.mrb[98].mxu0  ;;  %16258 = vst [vmem:[#allocation56_spill] sm:$0xff] %v14863_v16 }
 0x888   : > { %v14861_v50 = vadd.f32 %v6804_v27, %v6672_v12  ;;  %v6806_v44 = vpop.f32.mrb[99].mxu0 }
 0x889   : > { %v14865_v9 = vadd.f32 %v6806_v44, %v6672_v12  ;;  %10840 = vmatmul.mubr.bf16.gmra.mrb[80].mxu1 %v12201_v26  ;;  %v6682_v44 = vpop.permute.xlu1 %6681  ;;  %v12204_v26 = vld [vmem:[%s16222_s23 + $0xc0] sm:$0xff]  }
 0x88a   : > { %16257 = vst [vmem:[#allocation55_spill] sm:$0xff] %v14861_v50  ;;  %10872 = vmatpush3.bf16.msra.mxu1 %v14756_v37  ;;  %10843 = vmatprep.mubr.bf16.mxu1 %v12202_v43  ;;  %v6677_v37 = vpop.permute.xlu0 %6676  ;;  %v16278_v50 = vld [vmem:[#allocation12_spill] sm:$0xff] }
 0x88b   : > { %10873 = vmatprep.subr.bf16.mxu1 %v14752_v22  ;;  %v6810_v18 = vpop.f32.mrb[100].mxu0 }
 0x88c   : > { %v6812_v27 = vpop.f32.mrb[101].mxu0  ;;  %v14881_v43 = vadd.f32 %v6810_v18, %v6677_v37 }
 0x88d   : > { %v14885_v24 = vadd.f32 %v6812_v27, %v6677_v37 }
 0x88e   : > { %10874 = vmatpush3.bf16.msra.mxu1 %v14752_v22  ;;  %v16277_v22 = vld [vmem:[#allocation16_spill] sm:$0xff] }
 0x88f   : > { %10875 = vmatprep.subr.bf16.mxu1 %v14768_v10  ;;  %v6816_v12 = vpop.f32.mrb[102].mxu0 }
 0x890   : > { %v14883_v41 = vadd.f32 %v6816_v12, %v6682_v44  ;;  %v6818_v39 = vpop.f32.mrb[103].mxu0 }
 0x891   : > { %v14887_v49 = vadd.f32 %v6818_v39, %v6682_v44  ;;  %10844 = vmatmul.mubr.bf16.gmra.mrb[84].mxu1 %v12203_v3  ;;  %v12205_v39 = vld [vmem:[%s16222_s23 + $0xc8] sm:$0xff]   ;;  %v16259_v44 = vmov 0.0  }
 0x892   : > { %10876 = vmatpush3.bf16.msra.mxu1 %v14768_v10  ;;  %10847 = vmatprep.mubr.bf16.mxu1 %v12204_v26  ;;  %v12206_v10 = vld [vmem:[%s16222_s23 + $0xd0] sm:$0xff]  }
 0x893   : > { %10877 = vmatprep.subr.bf16.mxu1 %v14764_v56  ;;  %v11061_v18 = vpop.f32.mrb[104].mxu0 }
 0x894   : > { %v6975_v12 = vpop.f32.mrb[105].mxu0 }
 0x895   : > { %v6976_v16 = vadd.f32 %v6975_v12, %v14605_v32  ;;  %v6981_v32 = vadd.f32 %v11061_v18, %v14603_v31  ;;  %v12208_v31 = vld [vmem:[%s16222_s23 + $0xe0] sm:$0xff]   ;;  %v7169_v12 = vld [vmem:[%s16124_s16 + $0x10] sm:$0xff] }
 0x896   : > { %10878 = vmatpush3.bf16.msra.mxu1 %v14764_v56 }
 0x897   : > { %10929 = vmatprep.subr.bf16.mxu1 %v14734_v52  ;;  %v11064_v27 = vpop.f32.mrb[106].mxu0  ;;  %10097 = vmatmul.mubr.msk.f32.vlgmr.msra.gmra.mrb[112].mxu0 %vm3378_vm2, %v6976_v16 }
 0x898   : > { %11158 = vmatpush3.bf16.msra.mxu0 %v14433_v17  ;;  %v6985_v3 = vpop.f32.mrb[107].mxu0  ;;  %7124 = vmatprep.mubr.f32.mxu0 %v16259_v44  ;;  %v12207_v17 = vld [vmem:[%s16222_s23 + $0xd8] sm:$0xff]  }
 0x899   : > { %11160 = vmatprep.subr.bf16.mxu0 %v14431_v15  ;;  %10848 = vmatmul.mubr.bf16.gmra.mrb[88].mxu1 %v12205_v39  ;;  %v6986_v16 = vadd.f32 %v6985_v3, %v14634_v47  ;;  %v6991_v47 = vadd.f32 %v11064_v27, %v14632_v46  ;;  %v12210_v46 = vld [vmem:[%s16222_s23 + $0xf0] sm:$0xff]   ;;  %v7172_v27 = vld [vmem:[%s16124_s16 + $0x28] sm:$0xff]  ;;  %v12215_v3 = vld [vmem:[%s16222_s23 + $0x18] sm:$0xff]  }
 0x89a   : > { %10851 = vmatprep.mubr.bf16.mxu1 %v12206_v10  ;;  %v12214_v39 = vld [vmem:[%s16222_s23 + $0x10] sm:$0xff]   ;;  %v7171_v10 = vld [vmem:[%s16124_s16 + $0x20] sm:$0xff] }
 0x89b   : > { %v11067_v56 = vpop.f32.mrb[108].mxu0  ;;  %10098 = vmatmul.mubr.msk.f32.gmra.mrb[114].mxu0 %vm3378_vm2, %v6981_v32  ;;  %v7173_v32 = vld [vmem:[%s16124_s16 + $0x30] sm:$0xff] }
 0x89c   : > { %11162 = vmatpush3.bf16.msra.mxu0 %v14431_v15  ;;  %v6995_v26 = vpop.f32.mrb[109].mxu0  ;;  %7130 = vmatprep.mubr.f32.mxu0 %v16259_v44 }
 0x89d   : > { %11164 = vmatprep.subr.bf16.mxu0 %v14446_v36  ;;  %v6996_v18 = vadd.f32 %v6995_v26, %v14652_v59  ;;  %v12218_v26 = vld [vmem:[%s16222_s23 + $0x30] sm:$0xff]  }
 0x89f   : > { %v11070_v37 = vpop.f32.mrb[110].mxu0  ;;  %10099 = vmatmul.mubr.msk.f32.gmra.mrb[116].mxu0 %vm3378_vm2, %v6986_v16  ;;  %v12224_v16 = vld [vmem:[%s16222_s23 + $0x60] sm:$0xff]  }
 0x8a0   : > { %11166 = vmatpush3.bf16.msra.mxu0 %v14446_v36  ;;  %v7005_v15 = vpop.f32.mrb[111].mxu0  ;;  %7136 = vmatprep.mubr.f32.mxu0 %v16259_v44  ;;  %v12209_v36 = vld [vmem:[%s16222_s23 + $0xe8] sm:$0xff]  }
 0x8a1   : > { %11168 = vmatprep.subr.bf16.mxu0 %v14444_v34  ;;  %10852 = vmatmul.mubr.bf16.gmra.mrb[92].mxu1 %v12207_v17  ;;  %v7006_v59 = vadd.f32 %v7005_v15, %v14659_v61  ;;  %v7167_v61 = vld [vmem:[%s16124_s16] sm:$0xff]  ;;  %v12226_v17 = vld [vmem:[%s16222_s23 + $0x70] sm:$0xff]   ;;  %v12229_v15 = vld [vmem:[%s16222_s23 + $0x108] sm:$0xff]  }
 0x8a2   : > { %10855 = vmatprep.mubr.bf16.mxu1 %v12208_v31  ;;  %v12227_v31 = vld [vmem:[%s16222_s23 + $0x78] sm:$0xff]  }
 0x8a3   : > { %10100 = vmatmul.mubr.msk.f32.gmra.mrb[118].mxu0 %vm3378_vm2, %v6991_v47  ;;  %v12230_v47 = vld [vmem:[%s16222_s23 + $0x110] sm:$0xff]  }
 0x8a4   : > { %11170 = vmatpush3.bf16.msra.mxu0 %v14444_v34  ;;  %7142 = vmatprep.mubr.f32.mxu0 %v16259_v44  ;;  %v7001_v34 = vadd.f32 %v11067_v56, %v14650_v58  ;;  %v12212_v58 = vld [vmem:[%s16222_s23] sm:$0xff]   ;;  %v7174_v56 = vld [vmem:[%s16124_s16 + $0x38] sm:$0xff] }
 0x8a5   : > { %11172 = vmatprep.subr.bf16.mxu0 %v14458_v53 }
 0x8a7   : > { %10101 = vmatmul.mubr.msk.f32.gmra.mrb[120].mxu0 %vm3378_vm2, %v6996_v18  ;;  %v12231_v18 = vld [vmem:[%s16222_s23 + $0x118] sm:$0xff]  }
 0x8a8   : > { %11174 = vmatpush3.bf16.msra.mxu0 %v14458_v53  ;;  %7148 = vmatprep.mubr.f32.mxu0 %v16259_v44  ;;  %v12211_v53 = vld [vmem:[%s16222_s23 + $0xf8] sm:$0xff]  }
 0x8a9   : > { %11176 = vmatprep.subr.bf16.mxu0 %v14456_v51  ;;  %10856 = vmatmul.mubr.bf16.gmra.mrb[96].mxu1 %v12209_v36  ;;  %v12232_v36 = vld [vmem:[%s16222_s23 + $0x120] sm:$0xff]  }
 0x8aa   : > { %10859 = vmatprep.mubr.bf16.mxu1 %v12210_v46  ;;  %v7345_v46 = vld [vmem:[%s16129_s21 + $0x8] sm:$0xff] }
 0x8ab   : > { %10102 = vmatmul.mubr.msk.f32.gmra.mrb[122].mxu0 %vm3378_vm2, %v7001_v34 }
 0x8ac   : > { %11178 = vmatpush3.bf16.msra.mxu0 %v14456_v51  ;;  %7154 = vmatprep.mubr.f32.mxu0 %v16259_v44  ;;  %v7011_v51 = vadd.f32 %v11070_v37, %v14657_v60  ;;  %v12213_v60 = vld [vmem:[%s16222_s23 + $0x8] sm:$0xff]   ;;  %v12228_v37 = vld [vmem:[%s16222_s23 + $0x100] sm:$0xff]  }
 0x8ad   : > { %11180 = vmatprep.subr.bf16.mxu0 %v14470_v8 }
 0x8af   : > { %10103 = vmatmul.mubr.msk.f32.gmra.mrb[124].mxu0 %vm3378_vm2, %v7006_v59  ;;  %v7346_v59 = vld [vmem:[%s16129_s21 + $0x10] sm:$0xff] }
 0x8b0   : > { %11182 = vmatpush3.bf16.msra.mxu0 %v14470_v8  ;;  %7160 = vmatprep.mubr.f32.mxu0 %v16259_v44  ;;  %v7168_v8 = vld [vmem:[%s16124_s16 + $0x8] sm:$0xff] }
 0x8b1   : > { %11184 = vmatprep.subr.bf16.mxu0 %v14468_v7  ;;  %10860 = vmatmul.mubr.bf16.gmra.mrb[100].mxu1 %v12211_v53 }
 0x8b2   : > { %10879 = vmatprep.mubr.bf16.mxu1 %v12212_v58  ;;  %v12235_v58 = vld [vmem:[%s16222_s23 + $0x138] sm:$0xff]  }
 0x8b3   : > { %10104 = vmatmul.mubr.msk.f32.gmra.mrb[126].mxu0 %vm3378_vm2, %v7011_v51  ;;  %v12236_v51 = vld [vmem:[%s16222_s23 + $0x140] sm:$0xff]  }
 0x8b4   : > { %11186 = vmatpush3.bf16.msra.mxu0 %v14468_v7  ;;  %11103 = vmatprep.mubr.f32.mxu0 %v7167_v61  ;;  %v7170_v7 = vld [vmem:[%s16124_s16 + $0x18] sm:$0xff] }
 0x8b5   : > { %v12239_v61 = vld [vmem:[%s16222_s23 + $0x158] sm:$0xff]  }
 0x8b7   : > { %11104 = vmatmul.mubr.f32.vlgmr.msra.gmra.mrb[128].mxu0 %v7168_v8  ;;  %v12242_v8 = vld [vmem:[%s16222_s23 + $0x170] sm:$0xff]  }
 0x8b8   : > { %11106 = vmatprep.mubr.f32.mxu0 %v7169_v12  ;;  %v12244_v12 = vld [vmem:[%s16222_s23 + $0x180] sm:$0xff]  }
 0x8b9   : > { %10880 = vmatmul.mubr.bf16.vlgmr.msra.gmra.mrb[72].mxu1 %v12213_v60  ;;  %v12243_v60 = vld [vmem:[%s16222_s23 + $0x178] sm:$0xff]  }
 0x8ba   : > { %10930 = vmatpush3.bf16.msra.mxu1 %v14734_v52  ;;  %10883 = vmatprep.mubr.bf16.mxu1 %v12214_v39  ;;  %v12216_v52 = vld [vmem:[%s16222_s23 + $0x20] sm:$0xff]   ;;  %v12245_v39 = vld [vmem:[%s16222_s23 + $0x188] sm:$0xff]  }
 0x8bb   : > { %10931 = vmatprep.subr.bf16.mxu1 %v14730_v45  ;;  %11107 = vmatmul.mubr.f32.gmra.mrb[130].mxu0 %v7170_v7  ;;  %v12246_v7 = vld [vmem:[%s16222_s23 + $0x190] sm:$0xff]  }
 0x8bc   : > { %11109 = vmatprep.mubr.f32.mxu0 %v7171_v10  ;;  %v12247_v10 = vld [vmem:[%s16222_s23 + $0x198] sm:$0xff]  }
 0x8be   : > { %10932 = vmatpush3.bf16.msra.mxu1 %v14730_v45  ;;  %v12217_v45 = vld [vmem:[%s16222_s23 + $0x28] sm:$0xff]  }
 0x8bf   : > { %10933 = vmatprep.subr.bf16.mxu1 %v14746_v42  ;;  %11110 = vmatmul.mubr.f32.gmra.mrb[132].mxu0 %v7172_v27  ;;  %v12248_v27 = vld [vmem:[%s16222_s23 + $0x1a0] sm:$0xff]  }
 0x8c0   : > { %11112 = vmatprep.mubr.f32.mxu0 %v7173_v32  ;;  %v12250_v32 = vld [vmem:[%s16222_s23 + $0x1b0] sm:$0xff]  }
 0x8c1   : > { %10884 = vmatmul.mubr.bf16.gmra.mrb[76].mxu1 %v12215_v3  ;;  %v12249_v3 = vld [vmem:[%s16222_s23 + $0x1a8] sm:$0xff]  }
 0x8c2   : > { %10934 = vmatpush3.bf16.msra.mxu1 %v14746_v42  ;;  %10887 = vmatprep.mubr.bf16.mxu1 %v12216_v52  ;;  %v12219_v42 = vld [vmem:[%s16222_s23 + $0x38] sm:$0xff]  }
 0x8c3   : > { %10935 = vmatprep.subr.bf16.mxu1 %v14742_v40  ;;  %11113 = vmatmul.mubr.f32.gmra.mrb[134].mxu0 %v7174_v56  ;;  %v12251_v52 = vld [vmem:[%s16222_s23 + $0x1b8] sm:$0xff]   ;;  %v12252_v56 = vld [vmem:[%s16222_s23 + $0x1c0] sm:$0xff]  }
 0x8c4   : > { %7436 = vmatprep.mubr.f32.mxu0 %v16259_v44 }
 0x8c6   : > { %10936 = vmatpush3.bf16.msra.mxu1 %v14742_v40  ;;  %v12220_v40 = vld [vmem:[%s16222_s23 + $0x40] sm:$0xff]  }
 0x8c7   : > { %10937 = vmatprep.subr.bf16.mxu1 %v14758_v29 }
 0x8c9   : > { %10888 = vmatmul.mubr.bf16.gmra.mrb[80].mxu1 %v12217_v45  ;;  %v12253_v45 = vld [vmem:[%s16222_s23 + $0x1c8] sm:$0xff]  }
 0x8ca   : > { %10938 = vmatpush3.bf16.msra.mxu1 %v14758_v29  ;;  %10891 = vmatprep.mubr.bf16.mxu1 %v12218_v26  ;;  %v12221_v29 = vld [vmem:[%s16222_s23 + $0x48] sm:$0xff]   ;;  %v12254_v26 = vld [vmem:[%s16222_s23 + $0x1d0] sm:$0xff]  }
 0x8cb   : > { %10939 = vmatprep.subr.bf16.mxu1 %v14754_v35 }
 0x8ce   : > { %10940 = vmatpush3.bf16.msra.mxu1 %v14754_v35  ;;  %v12222_v35 = vld [vmem:[%s16222_s23 + $0x50] sm:$0xff]  }
 0x8cf   : > { %10941 = vmatprep.subr.bf16.mxu1 %v14770_v21 }
 0x8d1   : > { %10892 = vmatmul.mubr.bf16.gmra.mrb[84].mxu1 %v12219_v42  ;;  %v12255_v42 = vld [vmem:[%s16222_s23 + $0x1d8] sm:$0xff]  }
 0x8d2   : > { %10942 = vmatpush3.bf16.msra.mxu1 %v14770_v21  ;;  %10895 = vmatprep.mubr.bf16.mxu1 %v12220_v40  ;;  %v12223_v21 = vld [vmem:[%s16222_s23 + $0x58] sm:$0xff]   ;;  %v12256_v40 = vld [vmem:[%s16222_s23 + $0x1e0] sm:$0xff]  }
 0x8d3   : > { %10943 = vmatprep.subr.bf16.mxu1 %v14766_v20 }
 0x8d6   : > { %10944 = vmatpush3.bf16.msra.mxu1 %v14766_v20  ;;  %v12225_v20 = vld [vmem:[%s16222_s23 + $0x68] sm:$0xff]  }
 0x8d7   : > { %10995 = vmatprep.subr.bf16.mxu1 %v14778_v62 }
 0x8d9   : > { %10896 = vmatmul.mubr.bf16.gmra.mrb[88].mxu1 %v12221_v29  ;;  %v12257_v29 = vld [vmem:[%s16222_s23 + $0x1e8] sm:$0xff]  }
 0x8da   : > { %10899 = vmatprep.mubr.bf16.mxu1 %v12222_v35  ;;  %v12258_v35 = vld [vmem:[%s16222_s23 + $0x1f0] sm:$0xff]  }
 0x8e1   : > { %10900 = vmatmul.mubr.bf16.gmra.mrb[92].mxu1 %v12223_v21 }
 0x8e2   : > { %10903 = vmatprep.mubr.bf16.mxu1 %v12224_v16 }
 0x8e9   : > { %10904 = vmatmul.mubr.bf16.gmra.mrb[96].mxu1 %v12225_v20  ;;  %v12259_v20 = vld [vmem:[%s16222_s23 + $0x1f8] sm:$0xff]  }
 0x8ea   : > { %10907 = vmatprep.mubr.bf16.mxu1 %v12226_v17 }
 0x8f1   : > { %10908 = vmatmul.mubr.bf16.gmra.mrb[100].mxu1 %v12227_v31 }
 0x8f2   : > { %10945 = vmatprep.mubr.bf16.mxu1 %v12228_v37 }
 0x8f9   : > { %10946 = vmatmul.mubr.bf16.vlgmr.msra.gmra.mrb[72].mxu1 %v12229_v15 }
 0x8fa   : > { %10996 = vmatpush3.bf16.msra.mxu1 %v14778_v62  ;;  %10949 = vmatprep.mubr.bf16.mxu1 %v12230_v47  ;;  %v12233_v62 = vld [vmem:[%s16222_s23 + $0x128] sm:$0xff]  }
 0x8fb   : > { %10997 = vmatprep.subr.bf16.mxu1 %v14776_v48 }
 0x8fe   : > { %10998 = vmatpush3.bf16.msra.mxu1 %v14776_v48  ;;  %v12234_v48 = vld [vmem:[%s16222_s23 + $0x130] sm:$0xff]  }
 0x8ff   : > { %10999 = vmatprep.subr.bf16.mxu1 %v14786_v5 }
 0x901   : > { %10950 = vmatmul.mubr.bf16.gmra.mrb[76].mxu1 %v12231_v18 }
 0x902   : > { %11000 = vmatpush3.bf16.msra.mxu1 %v14786_v5  ;;  %10953 = vmatprep.mubr.bf16.mxu1 %v12232_v36  ;;  %v7347_v5 = vld [vmem:[%s16129_s21 + $0x18] sm:$0xff] }
 0x903   : > { %11001 = vmatprep.subr.bf16.mxu1 %v14784_v55  ;;  %v11187_v34 = vpack.c.bf16 %v7347_v5, %v7345_v46 }
 0x905   : > { %11188 = vmatprep.subr.bf16.mxu0 %v11187_v34 }
 0x906   : > { %11002 = vmatpush3.bf16.msra.mxu1 %v14784_v55  ;;  %v7344_v55 = vld [vmem:[%s16129_s21] sm:$0xff] }
 0x907   : > { %11003 = vmatprep.subr.bf16.mxu1 %v14794_v57  ;;  %v11189_v53 = vpack.c.bf16 %v7346_v59, %v7344_v55 }
 0x909   : > { %10954 = vmatmul.mubr.bf16.gmra.mrb[80].mxu1 %v12233_v62  ;;  %11190 = vmatpush1.bf16.msra.mxu0 %v11189_v53 }
 0x90a   : > { %11004 = vmatpush3.bf16.msra.mxu1 %v14794_v57  ;;  %10957 = vmatprep.mubr.bf16.mxu1 %v12234_v48  ;;  %v12237_v57 = vld [vmem:[%s16222_s23 + $0x148] sm:$0xff]  }
 0x90b   : > { %11005 = vmatprep.subr.bf16.mxu1 %v14792_v30 }
 0x90e   : > { %11006 = vmatpush3.bf16.msra.mxu1 %v14792_v30  ;;  %v12238_v30 = vld [vmem:[%s16222_s23 + $0x150] sm:$0xff]  }
 0x90f   : > { %11007 = vmatprep.subr.bf16.mxu1 %v14802_v63 }
 0x911   : > { %10958 = vmatmul.mubr.bf16.gmra.mrb[84].mxu1 %v12235_v58  ;;  %v16293_v58 = vld [vmem:[#allocation43_spill] sm:$0xff] }
 0x912   : > { %11008 = vmatpush3.bf16.msra.mxu1 %v14802_v63  ;;  %10961 = vmatprep.mubr.bf16.mxu1 %v12236_v51  ;;  %v12240_v63 = vld [vmem:[%s16222_s23 + $0x160] sm:$0xff]  }
 0x913   : > { %11009 = vmatprep.subr.bf16.mxu1 %v14800_v0 }
 0x916   : > { %11010 = vmatpush3.bf16.msra.mxu1 %v14800_v0  ;;  %v12241_v0 = vld [vmem:[%s16222_s23 + $0x168] sm:$0xff]  }
 0x919   : > { %10962 = vmatmul.mubr.bf16.gmra.mrb[88].mxu1 %v12237_v57 }
 0x91a   : > { %10965 = vmatprep.mubr.bf16.mxu1 %v12238_v30 }
 0x921   : > { %10966 = vmatmul.mubr.bf16.gmra.mrb[92].mxu1 %v12239_v61 }
 0x922   : > { %10969 = vmatprep.mubr.bf16.mxu1 %v12240_v63 }
 0x929   : > { %10970 = vmatmul.mubr.bf16.gmra.mrb[96].mxu1 %v12241_v0 }
 0x92a   : > { %10973 = vmatprep.mubr.bf16.mxu1 %v12242_v8 }
 0x931   : > { %10974 = vmatmul.mubr.bf16.gmra.mrb[100].mxu1 %v12243_v60 }
 0x932   : > { %11011 = vmatprep.mubr.bf16.mxu1 %v12244_v12 }
 0x939   : > { %11012 = vmatmul.mubr.bf16.vlgmr.msra.gmra.mrb[72].mxu1 %v12245_v39 }
 0x93a   : > { %11015 = vmatprep.mubr.bf16.mxu1 %v12246_v7 }
 0x941   : > { %11016 = vmatmul.mubr.bf16.gmra.mrb[76].mxu1 %v12247_v10 }
 0x942   : > { %11019 = vmatprep.mubr.bf16.mxu1 %v12248_v27 }
 0x949   : > { %11020 = vmatmul.mubr.bf16.gmra.mrb[80].mxu1 %v12249_v3 }
 0x94a   : > { %11023 = vmatprep.mubr.bf16.mxu1 %v12250_v32 }
 0x951   : > { %11024 = vmatmul.mubr.bf16.gmra.mrb[84].mxu1 %v12251_v52 }
 0x952   : > { %11027 = vmatprep.mubr.bf16.mxu1 %v12252_v56 }
 0x959   : > { %11028 = vmatmul.mubr.bf16.gmra.mrb[88].mxu1 %v12253_v45 }
 0x95a   : > { %11031 = vmatprep.mubr.bf16.mxu1 %v12254_v26 }
 0x961   : > { %11032 = vmatmul.mubr.bf16.gmra.mrb[92].mxu1 %v12255_v42 }
 0x962   : > { %11035 = vmatprep.mubr.bf16.mxu1 %v12256_v40  ;;  %v16260_v40 = vld [vmem:[#allocation15_spill] sm:$0xff] }
 0x969   : > { %11036 = vmatmul.mubr.bf16.gmra.mrb[96].mxu1 %v12257_v29 }
 0x96a   : > { %v15165_v21 = vpop.f32.mrb[112].mxu0  ;;  %11039 = vmatprep.mubr.bf16.mxu1 %v12258_v35  ;;  %v16261_v35 = vld [vmem:[#allocation19_spill] sm:$0xff] }
 0x96b   : > { %v15167_v16 = vpop.f32.mrb[113].mxu0 }
 0x96e   : > { %v15172_v17 = vpop.f32.mrb[114].mxu0 }
 0x96f   : > { %v15176_v37 = vpop.f32.mrb[115].mxu0 }
 0x971   : > { %11040 = vmatmul.mubr.bf16.gmra.mrb[100].mxu1 %v12259_v20 }
 0x972   : > { %v15180_v47 = vpop.f32.mrb[116].mxu0 }
 0x973   : > { %v15182_v18 = vpop.f32.mrb[117].mxu0 }
 0x976   : > { %v15184_v36 = vpop.f32.mrb[118].mxu0 }
 0x977   : > { %v15188_v48 = vpop.f32.mrb[119].mxu0 }
 0x97a   : > { %v15192_v5 = vpop.f32.mrb[120].mxu0 }
 0x97b   : > { %v15194_v34 = vpop.f32.mrb[121].mxu0 }
 0x97e   : > { %v15196_v55 = vpop.f32.mrb[122].mxu0 }
 0x97f   : > { %v15200_v53 = vpop.f32.mrb[123].mxu0 }
 0x982   : > { %v15204_v51 = vpop.f32.mrb[124].mxu0 }
 0x983   : > { %v15206_v57 = vpop.f32.mrb[125].mxu0 }
 0x986   : > { %v15208_v30 = vpop.f32.mrb[126].mxu0 }
 0x987   : > { %v15212_v63 = vpop.f32.mrb[127].mxu0 }
 0x98a   : > { %v11105_v8 = vpop.f32.mrb[128].mxu0 }
 0x98b   : > { %v7305_v60 = vpop.f32.mrb[129].mxu0  ;;  %v7311_v10 = vadd.f32 %v11105_v8, %v14681_v2 }
 0x98c   : > { %v7306_v12 = vadd.f32 %v7305_v60, %v14675_v54  ;;  %v16262_v60 = vld [vmem:[#allocation14_spill] sm:$0xff] }
 0x98e   : > { %v11108_v39 = vpop.f32.mrb[130].mxu0  ;;  %10105 = vmatmul.mubr.msk.f32.vlgmr.msra.gmra.mrb[136].mxu0 %vm4653_vm3, %v7306_v12 }
 0x98f   : > { %v7315_v7 = vpop.f32.mrb[131].mxu0  ;;  %7442 = vmatprep.mubr.f32.mxu0 %v16259_v44  ;;  %v7321_v56 = vadd.f32 %v11108_v39, %v14704_v19 }
 0x990   : > { %v7316_v32 = vadd.f32 %v7315_v7, %v14698_v14 }
 0x992   : > { %v11111_v27 = vpop.f32.mrb[132].mxu0  ;;  %10106 = vmatmul.mubr.msk.f32.gmra.mrb[138].mxu0 %vm4653_vm3, %v7311_v10 }
 0x993   : > { %v7325_v3 = vpop.f32.mrb[133].mxu0  ;;  %7448 = vmatprep.mubr.f32.mxu0 %v16259_v44  ;;  %v7331_v14 = vadd.f32 %v11111_v27, %v14724_v33 }
 0x994   : > { %v7326_v2 = vadd.f32 %v7325_v3, %v14718_v28  ;;  %v7486_v28 = vld [vmem:[%s16126_s18 + $0x8] sm:$0xff] }
 0x996   : > { %v11114_v52 = vpop.f32.mrb[134].mxu0  ;;  %10107 = vmatmul.mubr.msk.f32.gmra.mrb[140].mxu0 %vm4653_vm3, %v7316_v32 }
 0x997   : > { %v7335_v54 = vpop.f32.mrb[135].mxu0  ;;  %7454 = vmatprep.mubr.f32.mxu0 %v16259_v44  ;;  %v7341_v19 = vadd.f32 %v11114_v52, %v14772_v25  ;;  %v16263_v52 = vld [vmem:[#allocation25_spill] sm:$0xff] }
 0x998   : > { %v7336_v45 = vadd.f32 %v7335_v54, %v14762_v38 }
 0x99a   : > { %10108 = vmatmul.mubr.msk.f32.gmra.mrb[142].mxu0 %vm4653_vm3, %v7321_v56  ;;  %v16264_v56 = vld [vmem:[#allocation22_spill] sm:$0xff] }
 0x99b   : > { %7460 = vmatprep.mubr.f32.mxu0 %v16259_v44 }
 0x99e   : > { %10109 = vmatmul.mubr.msk.f32.gmra.mrb[144].mxu0 %vm4653_vm3, %v7326_v2 }
 0x99f   : > { %7466 = vmatprep.mubr.f32.mxu0 %v16259_v44 }
 0x9a2   : > { %10110 = vmatmul.mubr.msk.f32.gmra.mrb[146].mxu0 %vm4653_vm3, %v7331_v14 }
 0x9a3   : > { %7472 = vmatprep.mubr.f32.mxu0 %v16259_v44 }
 0x9a6   : > { %10111 = vmatmul.mubr.msk.f32.gmra.mrb[148].mxu0 %vm4653_vm3, %v7336_v45  ;;  %v16265_v45 = vld [vmem:[#allocation27_spill] sm:$0xff] }
 0x9a7   : > { %7478 = vmatprep.mubr.f32.mxu0 %v16259_v44 }
 0x9aa   : > { %10112 = vmatmul.mubr.msk.f32.gmra.mrb[150].mxu0 %vm4653_vm3, %v7341_v19 }
 0x9ab   : > { %7645 = vmatprep.mubr.f32.mxu0 %v7486_v28 }
 0xa0c   : > { %v11013_v33 = vpop.f32.mrb[72].mxu1 }
 0xa0d   : > { %v6542_v26 = vadd.f32 %v11013_v33, %v14673_v6  ;;  %v6189_v42 = vpop.f32.mrb[73].mxu1  ;;  %v16266_v33 = vld [vmem:[#allocation21_spill] sm:$0xff] }
 0xa0e   : > { %v6540_v29 = vadd.f32 %v16260_v40, %v6189_v42  ;;  %v11014_v38 = vpop.f32.mrb[74].mxu1 }
 0xa0f   : > { %v6543_v20 = vadd.f32 %v11014_v38, %v16261_v35  ;;  %v6192_v8 = vpop.f32.mrb[75].mxu1  ;;  %v6574_v25 = vmax.f32 %v6542_v26, 0.0 }
 0xa10   : > { %v6541_v12 = vadd.f32 %v16262_v60, %v6192_v8  ;;  %v6572_v7 = vmax.f32 %v6540_v29, 0.0  ;;  %v16267_v60 = vld [vmem:[#allocation33_spill] sm:$0xff] }
 0xa11   : > { %v6575_v39 = vmax.f32 %v6543_v20, 0.0 }
 0xa12   : > { %v6573_v10 = vmax.f32 %v6541_v12, 0.0 }
 0xa13   : > { %v15246_v27 = vpack.c.bf16 %v6575_v39, %v6574_v25  ;;  %v16268_v39 = vld [vmem:[#allocation30_spill] sm:$0xff] }
 0xa14   : > { %v15248_v3 = vpack.c.bf16 %v6573_v10, %v6572_v7  ;;  %v11017_v32 = vpop.f32.mrb[76].mxu1 }
 0xa15   : > { %v6546_v6 = vadd.f32 %v11017_v32, %v16263_v52  ;;  %v6205_v54 = vpop.f32.mrb[77].mxu1  ;;  %v16269_v32 = vld [vmem:[#allocation35_spill] sm:$0xff] }
 0xa16   : > { %v6544_v2 = vadd.f32 %v16264_v56, %v6205_v54  ;;  %v11018_v14 = vpop.f32.mrb[78].mxu1  ;;  %v16270_v56 = vld [vmem:[#allocation29_spill] sm:$0xff] }
 0xa17   : > { %v6547_v19 = vadd.f32 %v11018_v14, %v16265_v45  ;;  %v6208_v28 = vpop.f32.mrb[79].mxu1  ;;  %v6578_v26 = vmax.f32 %v6546_v6, 0.0 }
 0xa18   : > { %v6545_v42 = vadd.f32 %v16266_v33, %v6208_v28  ;;  %v6576_v29 = vmax.f32 %v6544_v2, 0.0 }
 0xa19   : > { %v6579_v40 = vmax.f32 %v6547_v19, 0.0 }
 0xa1a   : > { %v6577_v38 = vmax.f32 %v6545_v42, 0.0 }
 0xa1b   : > { %v15254_v35 = vpack.c.bf16 %v6579_v40, %v6578_v26  ;;  %v16271_v26 = vld [vmem:[#allocation41_spill] sm:$0xff] }
 0xa1c   : > { %v15256_v20 = vpack.c.bf16 %v6577_v38, %v6576_v29  ;;  %v11021_v8 = vpop.f32.mrb[80].mxu1  ;;  %v16272_v38 = vld [vmem:[#allocation38_spill] sm:$0xff] }
 0xa1d   : > { %v6550_v12 = vadd.f32 %v11021_v8, %v16267_v60  ;;  %v6221_v25 = vpop.f32.mrb[81].mxu1 }
 0xa1e   : > { %v6548_v7 = vadd.f32 %v16268_v39, %v6221_v25  ;;  %v11022_v10 = vpop.f32.mrb[82].mxu1  ;;  %v16273_v25 = vld [vmem:[#allocation42_spill] sm:$0xff] }
 0xa1f   : > { %v6551_v52 = vadd.f32 %v11022_v10, %v16269_v32  ;;  %v6224_v54 = vpop.f32.mrb[83].mxu1  ;;  %v6582_v6 = vmax.f32 %v6550_v12, 0.0  ;;  %v16274_v32 = vld [vmem:[#allocation37_spill] sm:$0xff] }
 0xa20   : > { %v6549_v14 = vadd.f32 %v16270_v56, %v6224_v54  ;;  %v6580_v2 = vmax.f32 %v6548_v7, 0.0 }
 0xa21   : > { %v6583_v45 = vmax.f32 %v6551_v52, 0.0 }
 0xa22   : > { %v6581_v19 = vmax.f32 %v6549_v14, 0.0 }
 0xa23   : > { %v15262_v28 = vpack.c.bf16 %v6583_v45, %v6582_v6 }
 0xa24   : > { %v15264_v33 = vpack.c.bf16 %v6581_v19, %v6580_v2  ;;  %v11025_v42 = vpop.f32.mrb[84].mxu1  ;;  %v16275_v2 = vld [vmem:[#allocation17_spill] sm:$0xff] }
 0xa25   : > { %v6554_v40 = vadd.f32 %v11025_v42, %v16271_v26  ;;  %v6237_v29 = vpop.f32.mrb[85].mxu1  ;;  %v16276_v26 = vld [vmem:[#allocation13_spill] sm:$0xff] }
 0xa26   : > { %v6552_v8 = vadd.f32 %v16272_v38, %v6237_v29  ;;  %v11026_v60 = vpop.f32.mrb[86].mxu1 }
 0xa27   : > { %v6555_v39 = vadd.f32 %v11026_v60, %v16273_v25  ;;  %v6240_v10 = vpop.f32.mrb[87].mxu1  ;;  %v6586_v12 = vmax.f32 %v6554_v40, 0.0 }
 0xa28   : > { %v6553_v54 = vadd.f32 %v16274_v32, %v6240_v10  ;;  %v6584_v7 = vmax.f32 %v6552_v8, 0.0 }
 0xa29   : > { %v6587_v52 = vmax.f32 %v6555_v39, 0.0 }
 0xa2a   : > { %v6585_v56 = vmax.f32 %v6553_v54, 0.0 }
 0xa2b   : > { %v15270_v14 = vpack.c.bf16 %v6587_v52, %v6586_v12 }
 0xa2c   : > { %v15272_v6 = vpack.c.bf16 %v6585_v56, %v6584_v7  ;;  %v11029_v45 = vpop.f32.mrb[88].mxu1  ;;  %v16279_v7 = vld [vmem:[#allocation24_spill] sm:$0xff] }
 0xa2d   : > { %v6558_v19 = vadd.f32 %v11029_v45, %v16275_v2  ;;  %v6253_v42 = vpop.f32.mrb[89].mxu1  ;;  %v16280_v45 = vld [vmem:[#allocation18_spill] sm:$0xff] }
 0xa2e   : > { %v6556_v29 = vadd.f32 %v16276_v26, %v6253_v42  ;;  %v11030_v38 = vpop.f32.mrb[90].mxu1  ;;  %v16281_v42 = vld [vmem:[#allocation23_spill] sm:$0xff] }
 0xa2f   : > { %v6559_v60 = vadd.f32 %v11030_v38, %v16277_v22  ;;  %v6256_v25 = vpop.f32.mrb[91].mxu1  ;;  %v6590_v40 = vmax.f32 %v6558_v19, 0.0 }
 0xa30   : > { %v6557_v10 = vadd.f32 %v16278_v50, %v6256_v25  ;;  %v6588_v8 = vmax.f32 %v6556_v29, 0.0  ;;  %v16282_v50 = vld [vmem:[#allocation20_spill] sm:$0xff] }
 0xa31   : > { %v6591_v39 = vmax.f32 %v6559_v60, 0.0 }
 0xa32   : > { %v6589_v32 = vmax.f32 %v6557_v10, 0.0 }
 0xa33   : > { %v6613_v54 = vpack.c.bf16 %v6591_v39, %v6590_v40 }
 0xa34   : > { %v6612_v12 = vpack.c.bf16 %v6589_v32, %v6588_v8  ;;  %v11033_v52 = vpop.f32.mrb[92].mxu1 }
 0xa35   : > { %v6562_v56 = vadd.f32 %v11033_v52, %v16279_v7  ;;  %v6269_v61 = vpop.f32.mrb[93].mxu1 }
 0xa36   : > { %v6560_v2 = vadd.f32 %v16280_v45, %v6269_v61  ;;  %v11034_v0 = vpop.f32.mrb[94].mxu1  ;;  %11192 = vmatprep.subr.bf16.mxu0 %v6612_v12  ;;  %v16283_v61 = vld [vmem:[#allocation32_spill] sm:$0xff]  ;;  %v16284_v12 = vld [vmem:[#allocation26_spill] sm:$0xff] }
 0xa37   : > { %v6563_v26 = vadd.f32 %v11034_v0, %v16281_v42  ;;  %v6272_v22 = vpop.f32.mrb[95].mxu1  ;;  %11194 = vmatpush3.bf16.msra.mxu0 %v15248_v3  ;;  %v6594_v29 = vmax.f32 %v6562_v56, 0.0  ;;  %v16285_v3 = vld [vmem:[#allocation31_spill] sm:$0xff] }
 0xa38   : > { %v6561_v19 = vadd.f32 %v16282_v50, %v6272_v22  ;;  %11196 = vmatprep.subr.bf16.mxu0 %v6613_v54  ;;  %v6592_v60 = vmax.f32 %v6560_v2, 0.0  ;;  %v16286_v54 = vld [vmem:[#allocation28_spill] sm:$0xff] }
 0xa39   : > { %v6595_v38 = vmax.f32 %v6563_v26, 0.0 }
 0xa3a   : > { %v6593_v25 = vmax.f32 %v6561_v19, 0.0 }
 0xa3b   : > { %v6615_v10 = vpack.c.bf16 %v6595_v38, %v6594_v29  ;;  %11198 = vmatpush3.bf16.msra.mxu0 %v15246_v27  ;;  %v16287_v29 = vld [vmem:[#allocation40_spill] sm:$0xff] }
 0xa3c   : > { %v6614_v40 = vpack.c.bf16 %v6593_v25, %v6592_v60  ;;  %v11037_v39 = vpop.f32.mrb[96].mxu1  ;;  %v16288_v25 = vld [vmem:[#allocation34_spill] sm:$0xff] }
 0xa3d   : > { %v6566_v8 = vadd.f32 %v11037_v39, %v16283_v61  ;;  %v6285_v32 = vpop.f32.mrb[97].mxu1 }
 0xa3e   : > { %v6564_v0 = vadd.f32 %v16284_v12, %v6285_v32  ;;  %v11038_v52 = vpop.f32.mrb[98].mxu1  ;;  %11200 = vmatprep.subr.bf16.mxu0 %v6614_v40 }
 0xa3f   : > { %v6567_v7 = vadd.f32 %v11038_v52, %v16285_v3  ;;  %v6288_v45 = vpop.f32.mrb[99].mxu1  ;;  %11202 = vmatpush3.bf16.msra.mxu0 %v15256_v20  ;;  %v6598_v2 = vmax.f32 %v6566_v8, 0.0  ;;  %v16289_v20 = vld [vmem:[#allocation39_spill] sm:$0xff] }
 0xa40   : > { %v6565_v56 = vadd.f32 %v16286_v54, %v6288_v45  ;;  %11204 = vmatprep.subr.bf16.mxu0 %v6615_v10  ;;  %v6596_v27 = vmax.f32 %v6564_v0, 0.0  ;;  %v16290_v10 = vld [vmem:[#allocation36_spill] sm:$0xff]  ;;  %v7686_v45 = vld [vmem:[%s16291_s10] sm:$0xff]  ;;  %s16299_s10 = sld [smem:[#allocation71_spill]] }
 0xa41   : > { %v6599_v42 = vmax.f32 %v6567_v7, 0.0  ;;  %v7485_v54 = vld [vmem:[%s16126_s18] sm:$0xff] }
 0xa42   : > { %v6597_v26 = vmax.f32 %v6565_v56, 0.0  ;;  %v7489_v56 = vld [vmem:[%s16126_s18 + $0x20] sm:$0xff] }
 0xa43   : > { %v6617_v22 = vpack.c.bf16 %v6599_v42, %v6598_v2  ;;  %11206 = vmatpush3.bf16.msra.mxu0 %v15254_v35  ;;  %v7492_v2 = vld [vmem:[%s16126_s18 + $0x38] sm:$0xff]  ;;  %v7491_v42 = vld [vmem:[%s16126_s18 + $0x30] sm:$0xff] }
 0xa44   : > { %v6616_v50 = vpack.c.bf16 %v6597_v26, %v6596_v27  ;;  %v11041_v19 = vpop.f32.mrb[100].mxu1  ;;  %v7494_v27 = vld [vmem:[%s16126_s18 + $0x48] sm:$0xff] }
 0xa45   : > { %v6570_v38 = vadd.f32 %v11041_v19, %v16287_v29  ;;  %v6301_v60 = vpop.f32.mrb[101].mxu1  ;;  %v7496_v19 = vld [vmem:[%s16126_s18 + $0x58] sm:$0xff] }
 0xa46   : > { %v6568_v40 = vadd.f32 %v16288_v25, %v6301_v60  ;;  %v11042_v39 = vpop.f32.mrb[102].mxu1  ;;  %11208 = vmatprep.subr.bf16.mxu0 %v6616_v50  ;;  %v7493_v50 = vld [vmem:[%s16126_s18 + $0x40] sm:$0xff]  ;;  %s16300_s4 = smov %s16299_s10 }
 0xa47   : > { %v6571_v61 = vadd.f32 %v11042_v39, %v16289_v20  ;;  %v6304_v32 = vpop.f32.mrb[103].mxu1  ;;  %11210 = vmatpush3.bf16.msra.mxu0 %v15264_v33  ;;  %v6602_v12 = vmax.f32 %v6570_v38, 0.0  ;;  %v7688_v33 = vcombine.high %v7686_v45, %v7686_v45  ;;  %v7498_v39 = vld [vmem:[%s16126_s18 + $0x68] sm:$0xff] }
 0xa48   : > { %v6569_v8 = vadd.f32 %v16290_v10, %v6304_v32  ;;  %11212 = vmatprep.subr.bf16.mxu0 %v6617_v22  ;;  %v6600_v35 = vmax.f32 %v6568_v40, 0.0  ;;  %v7495_v40 = vld [vmem:[%s16126_s18 + $0x50] sm:$0xff]  ;;  %v7497_v32 = vld [vmem:[%s16126_s18 + $0x60] sm:$0xff]  ;;  %v7500_v10 = vld [vmem:[%s16126_s18 + $0x78] sm:$0xff] }
 0xa49   : > { %v6603_v0 = vmax.f32 %v6571_v61, 0.0 }
 0xa4a   : > { %v6601_v52 = vmax.f32 %v6569_v8, 0.0 }
 0xa4b   : > { %v6619_v3 = vpack.c.bf16 %v6603_v0, %v6602_v12  ;;  %11214 = vmatpush3.bf16.msra.mxu0 %v15262_v28  ;;  %v7488_v28 = vld [vmem:[%s16126_s18 + $0x18] sm:$0xff] }
 0xa4c   : > { %v6618_v7 = vpack.c.bf16 %v6601_v52, %v6600_v35  ;;  %v7499_v52 = vld [vmem:[%s16126_s18 + $0x70] sm:$0xff] }
 0xa4e   : > { %11216 = vmatprep.subr.bf16.mxu0 %v6618_v7 }
 0xa4f   : > { %11218 = vmatpush3.bf16.msra.mxu0 %v15272_v6  ;;  %v7487_v6 = vld [vmem:[%s16126_s18 + $0x10] sm:$0xff] }
 0xa50   : > { %11220 = vmatprep.subr.bf16.mxu0 %v6619_v3 }
 0xa53   : > { %11222 = vmatpush3.bf16.msra.mxu0 %v15270_v14  ;;  %v7490_v14 = vld [vmem:[%s16126_s18 + $0x28] sm:$0xff] }
 0xa54   : > { %10113 = vmatprep.subr.msk.mxu0 %vm7714_vm4, %v7688_v33 }
 0xa56   : > { %7646 = vmatmul.mubr.f32.vlgmr.msra.gmra.mrb[152].mxu0 %v7485_v54 }
 0xa57   : > { %7650 = vmatprep.mubr.f32.mxu0 %v7488_v28  ;;  %10114 = vmatpush1.msk.msra.mxu0 %vm7714_vm4, %v7686_v45 }
 0xa5a   : > { %7651 = vmatmul.mubr.f32.gmra.mrb[154].mxu0 %v7487_v6 }
 0xa5b   : > { %7655 = vmatprep.mubr.f32.mxu0 %v7490_v14 }
 0xa5e   : > { %7656 = vmatmul.mubr.f32.gmra.mrb[156].mxu0 %v7489_v56 }
 0xa5f   : > { %7660 = vmatprep.mubr.f32.mxu0 %v7492_v2 }
 0xa61   : > { %v15325_v26 = vpop.f32.mrb[136].mxu0 }
 0xa62   : > { %v15327_v22 = vpop.f32.mrb[137].mxu0  ;;  %7661 = vmatmul.mubr.f32.gmra.mrb[158].mxu0 %v7491_v42 }
 0xa63   : > { %7665 = vmatprep.mubr.f32.mxu0 %v7494_v27 }
 0xa65   : > { %v15335_v29 = vpop.f32.mrb[138].mxu0 }
 0xa66   : > { %v11241_v38 = vpack.c.bf16 %v15335_v29, %v15325_v26  ;;  %v15339_v60 = vpop.f32.mrb[139].mxu0  ;;  %7666 = vmatmul.mubr.f32.gmra.mrb[160].mxu0 %v7493_v50 }
 0xa67   : > { %v11239_v25 = vpack.c.bf16 %v15339_v60, %v15327_v22  ;;  %7670 = vmatprep.mubr.f32.mxu0 %v7496_v19  ;;  %v16306_v60 = vpack.c.bf16 %v15172_v17, %v15165_v21  ;;  %v16311_v21 = vpack.c.bf16 %v15212_v63, %v15206_v57  ;;  %v16312_v17 = vpack.c.bf16 %v15208_v30, %v15204_v51  ;;  %v16323_v57 = vld [vmem:[#allocation55_spill] sm:$0xff]  ;;  %v16324_v30 = vld [vmem:[#allocation54_spill] sm:$0xff]  ;;  %v7898_v63 = vld [vmem:[%s16300_s4 + $0x10] sm:$0xff] }
 0xa69   : > { %v15349_v20 = vpop.f32.mrb[140].mxu0 }
 0xa6a   : > { %v15351_v61 = vpop.f32.mrb[141].mxu0  ;;  %7671 = vmatmul.mubr.f32.gmra.mrb[162].mxu0 %v7495_v40 }
 0xa6b   : > { %7675 = vmatprep.mubr.f32.mxu0 %v7498_v39  ;;  %v16292_v39 = vld [vmem:[#allocation44_spill] sm:$0xff] }
 0xa6d   : > { %v15359_v8 = vpop.f32.mrb[142].mxu0 }
 0xa6e   : > { %v11245_v12 = vpack.c.bf16 %v15359_v8, %v15349_v20  ;;  %v15363_v0 = vpop.f32.mrb[143].mxu0  ;;  %7676 = vmatmul.mubr.f32.gmra.mrb[164].mxu0 %v7497_v32  ;;  %v16308_v20 = vpack.c.bf16 %v15184_v36, %v15180_v47  ;;  %v16314_v47 = vld [vmem:[#allocation51_spill] sm:$0xff]  ;;  %v7905_v8 = vld [vmem:[%s16300_s4 + $0x48] sm:$0xff] }
 0xa6f   : > { %v11243_v35 = vpack.c.bf16 %v15363_v0, %v15351_v61  ;;  %7680 = vmatprep.mubr.f32.mxu0 %v7500_v10  ;;  %v16309_v61 = vpack.c.bf16 %v15200_v53, %v15194_v34  ;;  %v16319_v34 = vld [vmem:[#allocation52_spill] sm:$0xff]  ;;  %v7907_v0 = vld [vmem:[%s16300_s4 + $0x58] sm:$0xff] }
 0xa70   : > { %v16321_v53 = vld [vmem:[#allocation56_spill] sm:$0xff] }
 0xa71   : > { %v15370_v3 = vpop.f32.mrb[144].mxu0  ;;  %v16322_v51 = vpack.c.bf16 %v14865_v9, %v16321_v53  ;;  %v7899_v9 = vld [vmem:[%s16300_s4 + $0x18] sm:$0xff] }
 0xa72   : > { %v15372_v7 = vpop.f32.mrb[145].mxu0  ;;  %7681 = vmatmul.mubr.f32.gmra.mrb[166].mxu0 %v7499_v52 }
 0xa73   : > { %7783 = vmatprep.mubr.f32.mxu0 %v16259_v44 }
 0xa75   : > { %v15375_v45 = vpop.f32.mrb[146].mxu0 }
 0xa76   : > { %v15379_v54 = vpop.f32.mrb[147].mxu0  ;;  %v16302_v22 = vpack.c.bf16 %v15375_v45, %v15370_v3  ;;  %v7909_v3 = vld [vmem:[%s16300_s4 + $0x68] sm:$0xff]  ;;  %v7911_v45 = vld [vmem:[%s16300_s4 + $0x78] sm:$0xff] }
 0xa79   : > { %v15383_v6 = vpop.f32.mrb[148].mxu0 }
 0xa7a   : > { %v15385_v14 = vpop.f32.mrb[149].mxu0 }
 0xa7d   : > { %v15387_v56 = vpop.f32.mrb[150].mxu0 }
 0xa7e   : > { %v15391_v42 = vpop.f32.mrb[151].mxu0  ;;  %v16304_v29 = vpack.c.bf16 %v15387_v56, %v15383_v6 }
 0xa7f   : > { %v16303_v26 = vpack.c.bf16 %v15391_v42, %v15385_v14  ;;  %v7987_v14 = vpop.permute.xlu0 %7986  ;;  %v7992_v42 = vpop.permute.xlu1 %7991 }
 0xb29   : > { %v10547_v50 = vpop.f32.mrb[152].mxu0 }
 0xb2a   : > { %v10548_v19 = vpop.f32.mrb[153].mxu0 }
 0xb2b   : > { %v10549_v40 = vadd.f32 %v10548_v19, %v10547_v50  ;;  %v16294_v50 = vld [vmem:[#allocation46_spill] sm:$0xff] }
 0xb2d   : > { %v7648_v32 = vadd.f32 %v10549_v40, %v16292_v39  ;;  %v10550_v10 = vpop.f32.mrb[154].mxu0 }
 0xb2e   : > { %v10551_v52 = vpop.f32.mrb[155].mxu0 }
 0xb2f   : > { %v10552_v59 = vadd.f32 %v10551_v52, %v10550_v10  ;;  %10115 = vmatmul.mubr.msk.f32.vlgmr.msra.gmra.mrb[168].mxu0 %vm7689_vm5, %v7648_v32  ;;  %v16295_v32 = vld [vmem:[#allocation45_spill] sm:$0xff] }
 0xb30   : > { %7789 = vmatprep.mubr.f32.mxu0 %v16259_v44 }
 0xb31   : > { %v7653_v62 = vadd.f32 %v10552_v59, %v16293_v58  ;;  %v10553_v46 = vpop.f32.mrb[156].mxu0 }
 0xb32   : > { %v10554_v31 = vpop.f32.mrb[157].mxu0 }
 0xb33   : > { %v10555_v15 = vadd.f32 %v10554_v31, %v10553_v46  ;;  %10116 = vmatmul.mubr.msk.f32.gmra.mrb[170].mxu0 %vm7689_vm5, %v7653_v62  ;;  %v16296_v31 = vld [vmem:[#allocation48_spill] sm:$0xff] }
 0xb34   : > { %7795 = vmatprep.mubr.f32.mxu0 %v16259_v44 }
 0xb35   : > { %v7658_v19 = vadd.f32 %v10555_v15, %v16294_v50  ;;  %v10556_v2 = vpop.f32.mrb[158].mxu0 }
 0xb36   : > { %v10557_v40 = vpop.f32.mrb[159].mxu0 }
 0xb37   : > { %v10558_v39 = vadd.f32 %v10557_v40, %v10556_v2  ;;  %10117 = vmatmul.mubr.msk.f32.gmra.mrb[172].mxu0 %vm7689_vm5, %v7658_v19  ;;  %v16297_v2 = vld [vmem:[#allocation47_spill] sm:$0xff] }
 0xb38   : > { %7801 = vmatprep.mubr.f32.mxu0 %v16259_v44 }
 0xb39   : > { %v7663_v10 = vadd.f32 %v10558_v39, %v16295_v32  ;;  %v10559_v52 = vpop.f32.mrb[160].mxu0 }
 0xb3a   : > { %v10560_v59 = vpop.f32.mrb[161].mxu0 }
 0xb3b   : > { %v10561_v58 = vadd.f32 %v10560_v59, %v10559_v52  ;;  %10118 = vmatmul.mubr.msk.f32.gmra.mrb[174].mxu0 %vm7689_vm5, %v7663_v10 }
 0xb3c   : > { %7807 = vmatprep.mubr.f32.mxu0 %v16259_v44 }
 0xb3d   : > { %v7668_v62 = vadd.f32 %v10561_v58, %v16296_v31  ;;  %v10562_v46 = vpop.f32.mrb[162].mxu0  ;;  %v16298_v31 = vld [vmem:[#allocation49_spill] sm:$0xff] }
 0xb3e   : > { %v10563_v15 = vpop.f32.mrb[163].mxu0 }
 0xb3f   : > { %v10564_v50 = vadd.f32 %v10563_v15, %v10562_v46  ;;  %10119 = vmatmul.mubr.msk.f32.gmra.mrb[176].mxu0 %vm7689_vm5, %v7668_v62  ;;  %v7897_v46 = vld [vmem:[%s16299_s10 + $0x8] sm:$0xff] }
 0xb40   : > { %7813 = vmatprep.mubr.f32.mxu0 %v16259_v44  ;;  %8088 = vmatprep.mubr.f32.mxu1 %v7897_v46 }
 0xb41   : > { %v7673_v19 = vadd.f32 %v10564_v50, %v16297_v2  ;;  %v10565_v40 = vpop.f32.mrb[164].mxu0 }
 0xb42   : > { %v10566_v39 = vpop.f32.mrb[165].mxu0 }
 0xb43   : > { %v10567_v32 = vadd.f32 %v10566_v39, %v10565_v40  ;;  %10120 = vmatmul.mubr.msk.f32.gmra.mrb[178].mxu0 %vm7689_vm5, %v7673_v19 }
 0xb44   : > { %7819 = vmatprep.mubr.f32.mxu0 %v16259_v44 }
 0xb45   : > { %v7678_v10 = vadd.f32 %v10567_v32, %v14806_v23  ;;  %v10568_v52 = vpop.f32.mrb[166].mxu0 }
 0xb46   : > { %v10569_v59 = vpop.f32.mrb[167].mxu0 }
 0xb47   : > { %v10570_v58 = vadd.f32 %v10569_v59, %v10568_v52  ;;  %10121 = vmatmul.mubr.msk.f32.gmra.mrb[180].mxu0 %vm7689_vm5, %v7678_v10 }
 0xb48   : > { %7825 = vmatprep.mubr.f32.mxu0 %v16259_v44 }
 0xb49   : > { %v7683_v62 = vadd.f32 %v10570_v58, %v16298_v31 }
 0xb4b   : > { %10122 = vmatmul.mubr.msk.f32.gmra.mrb[182].mxu0 %vm7689_vm5, %v7683_v62 }
 0xb4c   : > { %8227 = vmatprep.mubr.f32.mxu0 %v16259_v44 }
 0xc02   : > { %v7785_v15 = vpop.f32.mrb[168].mxu0 }
 0xc03   : > { %v7787_v23 = vpop.f32.mrb[169].mxu0 }
 0xc06   : > { %v7791_v50 = vpop.f32.mrb[170].mxu0 }
 0xc07   : > { %v11225_v2 = vpack.c.bf16 %v7791_v50, %v7785_v15  ;;  %v7793_v19 = vpop.f32.mrb[171].mxu0 }
 0xc08   : > { %v11223_v40 = vpack.c.bf16 %v7793_v19, %v7787_v23 }
 0xc0a   : > { %v7797_v39 = vpop.f32.mrb[172].mxu0  ;;  %11224 = vmatprep.subr.bf16.mxu1 %v11223_v40 }
 0xc0b   : > { %v7799_v32 = vpop.f32.mrb[173].mxu0  ;;  %11226 = vmatpush1.bf16.msra.mxu1 %v11225_v2 }
 0xc0e   : > { %v7803_v10 = vpop.f32.mrb[174].mxu0 }
 0xc0f   : > { %v11229_v52 = vpack.c.bf16 %v7803_v10, %v7797_v39  ;;  %v7805_v59 = vpop.f32.mrb[175].mxu0 }
 0xc10   : > { %v11227_v58 = vpack.c.bf16 %v7805_v59, %v7799_v32 }
 0xc12   : > { %v7809_v44 = vpop.f32.mrb[176].mxu0  ;;  %11228 = vmatprep.subr.bf16.mxu1 %v11227_v58 }
 0xc13   : > { %v7811_v31 = vpop.f32.mrb[177].mxu0  ;;  %11230 = vmatpush1.bf16.msra.mxu1 %v11229_v52 }
 0xc16   : > { %v7815_v62 = vpop.f32.mrb[178].mxu0 }
 0xc17   : > { %v11233_v46 = vpack.c.bf16 %v7815_v62, %v7809_v44  ;;  %v7817_v27 = vpop.f32.mrb[179].mxu0 }
 0xc18   : > { %v11231_v33 = vpack.c.bf16 %v7817_v27, %v7811_v31 }
 0xc1a   : > { %v7821_v28 = vpop.f32.mrb[180].mxu0  ;;  %11232 = vmatprep.subr.bf16.mxu1 %v11231_v33  ;;  %v16301_v33 = vpack.c.bf16 %v15379_v54, %v15372_v7  ;;  %v7908_v7 = vld [vmem:[%s16300_s4 + $0x60] sm:$0xff]  ;;  %v7910_v54 = vld [vmem:[%s16300_s4 + $0x70] sm:$0xff] }
 0xc1b   : > { %v7823_v15 = vpop.f32.mrb[181].mxu0  ;;  %11234 = vmatpush1.bf16.msra.mxu1 %v11233_v46 }
 0xc1e   : > { %v7827_v23 = vpop.f32.mrb[182].mxu0 }
 0xc1f   : > { %v11237_v50 = vpack.c.bf16 %v7827_v23, %v7821_v28  ;;  %v7829_v19 = vpop.f32.mrb[183].mxu0 }
 0xc20   : > { %v11235_v2 = vpack.c.bf16 %v7829_v19, %v7823_v15  ;;  %v7997_v15 = vpop.permute.xlu0 %7996  ;;  %v8002_v19 = vpop.permute.xlu1 %8001 }
 0xc22   : > { %11236 = vmatprep.subr.bf16.mxu1 %v11235_v2 }
 0xc23   : > { %11238 = vmatpush1.bf16.msra.mxu1 %v11237_v50 }
 0xc24   : > { %11240 = vmatprep.subr.bf16.mxu1 %v11239_v25  ;;  %v16307_v25 = vpack.c.bf16 %v15188_v48, %v15182_v18  ;;  %v16315_v18 = vld [vmem:[#allocation50_spill] sm:$0xff]  ;;  %v16317_v48 = vpack.c.bf16 %v14843_v4, %v14841_v11  ;;  %v16327_v11 = vpack.c.bf16 %v14883_v41, %v14881_v43  ;;  %v7896_v4 = vld [vmem:[%s16300_s4] sm:$0xff]  ;;  %v7902_v41 = vld [vmem:[%s16300_s4 + $0x30] sm:$0xff] }
 0xc25   : > { %v16316_v36 = vpack.c.bf16 %v16314_v47, %v16315_v18  ;;  %v7903_v43 = vld [vmem:[%s16300_s4 + $0x38] sm:$0xff]  ;;  %v8012_v18 = vpop.permute.xlu1 %8011 }
 0xc27   : > { %11242 = vmatpush1.bf16.msra.mxu1 %v11241_v38  ;;  %v16305_v38 = vpack.c.bf16 %v15176_v37, %v15167_v16  ;;  %v16310_v16 = vpack.c.bf16 %v15196_v55, %v15192_v5  ;;  %v16313_v37 = vpack.c.bf16 %v14821_v13, %v14819_v1  ;;  %v16318_v5 = vld [vmem:[#allocation53_spill] sm:$0xff]  ;;  %v16325_v1 = vpack.c.bf16 %v16323_v57, %v16324_v30 }
 0xc28   : > { %11244 = vmatprep.subr.bf16.mxu1 %v11243_v35  ;;  %v16320_v55 = vpack.c.bf16 %v16318_v5, %v16319_v34  ;;  %v16326_v13 = vpack.c.bf16 %v14887_v49, %v14885_v24  ;;  %v7901_v24 = vld [vmem:[%s16300_s4 + $0x28] sm:$0xff]  ;;  %v7900_v49 = vld [vmem:[%s16300_s4 + $0x20] sm:$0xff]  ;;  %v7906_v35 = vld [vmem:[%s16300_s4 + $0x50] sm:$0xff] }
 0xc2b   : > { %11246 = vmatpush1.bf16.msra.mxu1 %v11245_v12  ;;  %v7904_v12 = vld [vmem:[%s16300_s4 + $0x40] sm:$0xff] }
 0xc2c   : > { %11248 = vmatprep.subr.bf16.mxu1 %v16301_v33 }
 0xc2f   : > { %11250 = vmatpush1.bf16.msra.mxu1 %v16302_v22 }
 0xc30   : > { %11252 = vmatprep.subr.bf16.mxu1 %v16303_v26 }
 0xc33   : > { %11254 = vmatpush1.bf16.msra.mxu1 %v16304_v29 }
 0xc34   : > { %11256 = vmatprep.subr.bf16.mxu1 %v16305_v38 }
 0xc37   : > { %11258 = vmatpush1.bf16.msra.mxu1 %v16306_v60 }
 0xc38   : > { %11260 = vmatprep.subr.bf16.mxu1 %v16307_v25 }
 0xc3b   : > { %11262 = vmatpush1.bf16.msra.mxu1 %v16308_v20 }
 0xc3c   : > { %11264 = vmatprep.subr.bf16.mxu1 %v16309_v61 }
 0xc3f   : > { %11266 = vmatpush1.bf16.msra.mxu1 %v16310_v16 }
 0xc40   : > { %11268 = vmatprep.subr.bf16.mxu1 %v16311_v21 }
 0xc43   : > { %11270 = vmatpush1.bf16.msra.mxu1 %v16312_v17  ;;  %v8007_v17 = vpop.permute.xlu0 %8006 }
 0xc44   : > { %11272 = vmatprep.subr.bf16.mxu1 %v16313_v37 }
 0xc47   : > { %11274 = vmatpush1.bf16.msra.mxu1 %v16316_v36 }
 0xc48   : > { %11276 = vmatprep.subr.bf16.mxu1 %v16317_v48 }
 0xc4b   : > { %11278 = vmatpush1.bf16.msra.mxu1 %v16320_v55 }
 0xc4c   : > { %11280 = vmatprep.subr.bf16.mxu1 %v16322_v51 }
 0xc4f   : > { %11282 = vmatpush1.bf16.msra.mxu1 %v16325_v1 }
 0xc50   : > { %11284 = vmatprep.subr.bf16.mxu1 %v16326_v13 }
 0xc53   : > { %11286 = vmatpush1.bf16.msra.mxu1 %v16327_v11 }
 0xc56   : > { %8089 = vmatmul.mubr.f32.vlgmr.msra.gmra.mrb[104].mxu1 %v7896_v4  ;;  %v8017_v4 = vpop.permute.xlu0 %8016 }
 0xc57   : > { %8094 = vmatprep.mubr.f32.mxu1 %v7899_v9 }
 0xc5a   : > { %8095 = vmatmul.mubr.f32.gmra.mrb[106].mxu1 %v7898_v63 }
 0xc5b   : > { %8100 = vmatprep.mubr.f32.mxu1 %v7901_v24  ;;  %v8022_v24 = vpop.permute.xlu1 %8021 }
 0xc5e   : > { %8101 = vmatmul.mubr.f32.gmra.mrb[108].mxu1 %v7900_v49 }
 0xc5f   : > { %8106 = vmatprep.mubr.f32.mxu1 %v7903_v43 }
 0xc62   : > { %8107 = vmatmul.mubr.f32.gmra.mrb[110].mxu1 %v7902_v41 }
 0xc63   : > { %8112 = vmatprep.mubr.f32.mxu1 %v7905_v8 }
 0xc66   : > { %8113 = vmatmul.mubr.f32.gmra.mrb[112].mxu1 %v7904_v12 }
 0xc67   : > { %8118 = vmatprep.mubr.f32.mxu1 %v7907_v0 }
 0xc6a   : > { %8119 = vmatmul.mubr.f32.gmra.mrb[114].mxu1 %v7906_v35 }
 0xc6b   : > { %8124 = vmatprep.mubr.f32.mxu1 %v7909_v3 }
 0xc6e   : > { %8125 = vmatmul.mubr.f32.gmra.mrb[116].mxu1 %v7908_v7 }
 0xc6f   : > { %8130 = vmatprep.mubr.f32.mxu1 %v7911_v45 }
 0xc72   : > { %8131 = vmatmul.mubr.f32.gmra.mrb[118].mxu1 %v7910_v54 }
 0xd29   : > { %v8090_v28 = vpop.f32.mrb[104].mxu1 }
 0xd2a   : > { %v8092_v6 = vpop.f32.mrb[105].mxu1  ;;  %v8091_v56 = vadd.f32 %v8090_v28, %v7987_v14  ;;  %v8153_v28 = vld [vmem:[%s16328_s7] sm:$0xf] }
 0xd2b   : > { %v8093_v27 = vadd.f32 %v8092_v6, %v7987_v14  ;;  %v8158_v6 = vpop.permute.xlu0 %8157 }
 0xd2c   : > { %v8137_v52 = vmax.f32 %v8091_v56, 0.0 }
 0xd2d   : > { %v8096_v40 = vpop.f32.mrb[106].mxu1  ;;  %v8138_v58 = vmax.f32 %v8093_v27, 0.0 }
 0xd2e   : > { %v8097_v39 = vadd.f32 %v8096_v40, %v7992_v42  ;;  %v8098_v32 = vpop.f32.mrb[107].mxu1 }
 0xd2f   : > { %v8099_v10 = vadd.f32 %v8098_v32, %v7992_v42 }
 0xd30   : > { %v8139_v59 = vmax.f32 %v8097_v39, 0.0 }
 0xd31   : > { %v8140_v44 = vmax.f32 %v8099_v10, 0.0  ;;  %v8102_v31 = vpop.f32.mrb[108].mxu1 }
 0xd32   : > { %v11289_v62 = vpack.c.bf16 %v8139_v59, %v8137_v52  ;;  %v8104_v46 = vpop.f32.mrb[109].mxu1  ;;  %v8103_v50 = vadd.f32 %v8102_v31, %v7997_v15 }
 0xd33   : > { %v11287_v23 = vpack.c.bf16 %v8140_v44, %v8138_v58  ;;  %v8105_v2 = vadd.f32 %v8104_v46, %v7997_v15 }
 0xd34   : > { %v8141_v38 = vmax.f32 %v8103_v50, 0.0 }
 0xd35   : > { %v8108_v33 = vpop.f32.mrb[110].mxu1  ;;  %11288 = vmatprep.subr.bf16.mxu0 %v11287_v23  ;;  %v8142_v25 = vmax.f32 %v8105_v2, 0.0 }
 0xd36   : > { %v8109_v22 = vadd.f32 %v8108_v33, %v8002_v19  ;;  %v8110_v26 = vpop.f32.mrb[111].mxu1  ;;  %11290 = vmatpush1.bf16.msra.mxu0 %v11289_v62 }
 0xd37   : > { %v8111_v29 = vadd.f32 %v8110_v26, %v8002_v19 }
 0xd38   : > { %v8143_v60 = vmax.f32 %v8109_v22, 0.0 }
 0xd39   : > { %v8144_v20 = vmax.f32 %v8111_v29, 0.0  ;;  %v8114_v61 = vpop.f32.mrb[112].mxu1 }
 0xd3a   : > { %v11293_v16 = vpack.c.bf16 %v8143_v60, %v8141_v38  ;;  %v8116_v21 = vpop.f32.mrb[113].mxu1  ;;  %v8115_v47 = vadd.f32 %v8114_v61, %v8007_v17 }
 0xd3b   : > { %v11291_v37 = vpack.c.bf16 %v8144_v20, %v8142_v25  ;;  %v8117_v36 = vadd.f32 %v8116_v21, %v8007_v17 }
 0xd3c   : > { %v8145_v53 = vmax.f32 %v8115_v47, 0.0 }
 0xd3d   : > { %v8120_v48 = vpop.f32.mrb[114].mxu1  ;;  %11292 = vmatprep.subr.bf16.mxu0 %v11291_v37  ;;  %v8146_v57 = vmax.f32 %v8117_v36, 0.0 }
 0xd3e   : > { %v8121_v5 = vadd.f32 %v8120_v48, %v8012_v18  ;;  %v8122_v34 = vpop.f32.mrb[115].mxu1  ;;  %11294 = vmatpush1.bf16.msra.mxu0 %v11293_v16 }
 0xd3f   : > { %v8123_v55 = vadd.f32 %v8122_v34, %v8012_v18 }
 0xd40   : > { %v8147_v51 = vmax.f32 %v8121_v5, 0.0 }
 0xd41   : > { %v8148_v30 = vmax.f32 %v8123_v55, 0.0  ;;  %v8126_v1 = vpop.f32.mrb[116].mxu1 }
 0xd42   : > { %v11297_v13 = vpack.c.bf16 %v8147_v51, %v8145_v53  ;;  %v8128_v11 = vpop.f32.mrb[117].mxu1  ;;  %v8127_v63 = vadd.f32 %v8126_v1, %v8017_v4 }
 0xd43   : > { %v11295_v9 = vpack.c.bf16 %v8148_v30, %v8146_v57  ;;  %v8129_v49 = vadd.f32 %v8128_v11, %v8017_v4 }
 0xd44   : > { %v8149_v0 = vmax.f32 %v8127_v63, 0.0 }
 0xd45   : > { %v8132_v43 = vpop.f32.mrb[118].mxu1  ;;  %11296 = vmatprep.subr.bf16.mxu0 %v11295_v9  ;;  %v8150_v3 = vmax.f32 %v8129_v49, 0.0 }
 0xd46   : > { %v8133_v41 = vadd.f32 %v8132_v43, %v8022_v24  ;;  %v8134_v8 = vpop.f32.mrb[119].mxu1  ;;  %11298 = vmatpush1.bf16.msra.mxu0 %v11297_v13 }
 0xd47   : > { %v8135_v12 = vadd.f32 %v8134_v8, %v8022_v24 }
 0xd48   : > { %v8151_v35 = vmax.f32 %v8133_v41, 0.0 }
 0xd49   : > { %v8152_v7 = vmax.f32 %v8135_v12, 0.0 }
 0xd4a   : > { %v11301_v45 = vpack.c.bf16 %v8151_v35, %v8149_v0 }
 0xd4b   : > { %v11299_v54 = vpack.c.bf16 %v8152_v7, %v8150_v3 }
 0xd4d   : > { %11300 = vmatprep.subr.bf16.mxu0 %v11299_v54 }
 0xd4e   : > { %11302 = vmatpush1.bf16.msra.mxu0 %v11301_v45 }
 0xd51   : > { %10123 = vmatmul.mubr.msk.f32.vlgmr.msra.gmra.mrb[184].mxu0 %vm3378_vm2, %v8153_v28 }
 0xe24   : > { %v8229_v14 = vpop.f32.mrb[184].mxu0 }
 0xe25   : > { %v8230_v56 = vadd.f32 %v8229_v14, %v8158_v6  ;;  %v8231_v42 = vpop.f32.mrb[185].mxu0 }
 0xe26   : > { %v8232_v27 = vadd.f32 %v8231_v42, %v8158_v6 }
 0xe28   : > { %v8236_v40 = vcombine.low %v8230_v56, %v8232_v27 }
 0xe2a   : > { %8238 = vst [vmem:[#allocation2] sm:$0xff] %v8236_v40 }
 0xe2b PF: > { %v8241_v39 = vld [vmem:[%s13567_s8 + $0x8] sm:$0xff]  ;;  %v8243_v10 = vld [vmem:[%s13567_s8 + $0x18] sm:$0xff]  ;;  %v8240_v58 = vld [vmem:[%s13567_s8] sm:$0xff] }
 0xe2c   : > { %v8257_v32 = vld [vmem:[%s13567_s8 + $0x88] sm:$0xff]  ;;  %v8259_v59 = vld [vmem:[%s13567_s8 + $0x98] sm:$0xff]  ;;  %v8256_v44 = vld [vmem:[%s13567_s8 + $0x80] sm:$0xff] }
 0xe2d   : > { %v11303_v52 = vpack.c.bf16 %v8257_v32, %v8241_v39  ;;  %v11367_v31 = vpack.c.bf16 %v8259_v59, %v8243_v10  ;;  %v11305_v62 = vpack.c.bf16 %v8256_v44, %v8240_v58  ;;  %v8242_v46 = vld [vmem:[%s13567_s8 + $0x10] sm:$0xff]  ;;  %v8273_v23 = vld [vmem:[%s13567_s8 + $0x108] sm:$0xff]  ;;  %v8275_v2 = vld [vmem:[%s13567_s8 + $0x118] sm:$0xff] }
 0xe2e   : > { %v8258_v15 = vld [vmem:[%s13567_s8 + $0x90] sm:$0xff]  ;;  %v8289_v19 = vld [vmem:[%s13567_s8 + $0x188] sm:$0xff]  ;;  %v8291_v33 = vld [vmem:[%s13567_s8 + $0x198] sm:$0xff] }
 0xe2f   : > { %11304 = vmatprep.subr.bf16.mxu0 %v11303_v52  ;;  %v11369_v50 = vpack.c.bf16 %v8258_v15, %v8242_v46  ;;  %11368 = vmatprep.subr.bf16.mxu1 %v11367_v31  ;;  %v11307_v22 = vpack.c.bf16 %v8289_v19, %v8273_v23  ;;  %v11371_v26 = vpack.c.bf16 %v8291_v33, %v8275_v2  ;;  %v8272_v29 = vld [vmem:[%s13567_s8 + $0x100] sm:$0xff]  ;;  %v8274_v60 = vld [vmem:[%s13567_s8 + $0x110] sm:$0xff]  ;;  %v8305_v61 = vld [vmem:[%s13567_s8 + $0x208] sm:$0xff] }
 0xe30   : > { %11306 = vmatpush1.bf16.msra.mxu0 %v11305_v62  ;;  %v8288_v38 = vld [vmem:[%s13567_s8 + $0x180] sm:$0xff]  ;;  %v8290_v20 = vld [vmem:[%s13567_s8 + $0x190] sm:$0xff]  ;;  %v8321_v16 = vld [vmem:[%s13567_s8 + $0x288] sm:$0xff] }
 0xe31   : > { %11370 = vmatpush1.bf16.msra.mxu1 %v11369_v50  ;;  %v11309_v25 = vpack.c.bf16 %v8288_v38, %v8272_v29  ;;  %11308 = vmatprep.subr.bf16.mxu0 %v11307_v22  ;;  %v11373_v21 = vpack.c.bf16 %v8290_v20, %v8274_v60  ;;  %v11311_v17 = vpack.c.bf16 %v8321_v16, %v8305_v61  ;;  %v8307_v37 = vld [vmem:[%s13567_s8 + $0x218] sm:$0xff]  ;;  %v8304_v18 = vld [vmem:[%s13567_s8 + $0x200] sm:$0xff]  ;;  %v8306_v5 = vld [vmem:[%s13567_s8 + $0x210] sm:$0xff] }
 0xe32   : > { %11372 = vmatprep.subr.bf16.mxu1 %v11371_v26  ;;  %v8323_v47 = vld [vmem:[%s13567_s8 + $0x298] sm:$0xff]  ;;  %v8320_v48 = vld [vmem:[%s13567_s8 + $0x280] sm:$0xff]  ;;  %v8322_v34 = vld [vmem:[%s13567_s8 + $0x290] sm:$0xff] }
 0xe33   : > { %v11375_v36 = vpack.c.bf16 %v8323_v47, %v8307_v37  ;;  %v11313_v55 = vpack.c.bf16 %v8320_v48, %v8304_v18  ;;  %v8337_v53 = vld [vmem:[%s13567_s8 + $0x308] sm:$0xff]  ;;  %v8339_v57 = vld [vmem:[%s13567_s8 + $0x318] sm:$0xff]  ;;  %v11377_v30 = vpack.c.bf16 %v8322_v34, %v8306_v5  ;;  %v8336_v11 = vld [vmem:[%s13567_s8 + $0x300] sm:$0xff] }
 0xe34   : > { %11310 = vmatpush1.bf16.msra.mxu0 %v11309_v25  ;;  %v8353_v51 = vld [vmem:[%s13567_s8 + $0x388] sm:$0xff]  ;;  %v8355_v13 = vld [vmem:[%s13567_s8 + $0x398] sm:$0xff]  ;;  %v8352_v4 = vld [vmem:[%s13567_s8 + $0x380] sm:$0xff] }
 0xe35   : > { %11374 = vmatpush1.bf16.msra.mxu1 %v11373_v21  ;;  %11312 = vmatprep.subr.bf16.mxu0 %v11311_v17  ;;  %v11315_v1 = vpack.c.bf16 %v8353_v51, %v8337_v53  ;;  %v11379_v9 = vpack.c.bf16 %v8355_v13, %v8339_v57  ;;  %v8338_v63 = vld [vmem:[%s13567_s8 + $0x310] sm:$0xff]  ;;  %v8369_v49 = vld [vmem:[%s13567_s8 + $0x408] sm:$0xff]  ;;  %v8371_v41 = vld [vmem:[%s13567_s8 + $0x418] sm:$0xff]  ;;  %v11317_v12 = vpack.c.bf16 %v8352_v4, %v8336_v11 }
 0xe36   : > { %11376 = vmatprep.subr.bf16.mxu1 %v11375_v36  ;;  %v8354_v24 = vld [vmem:[%s13567_s8 + $0x390] sm:$0xff]  ;;  %v8385_v43 = vld [vmem:[%s13567_s8 + $0x488] sm:$0xff]  ;;  %v8387_v8 = vld [vmem:[%s13567_s8 + $0x498] sm:$0xff] }
 0xe37   : > { %v11381_v0 = vpack.c.bf16 %v8354_v24, %v8338_v63  ;;  %v11319_v35 = vpack.c.bf16 %v8385_v43, %v8369_v49  ;;  %v8368_v3 = vld [vmem:[%s13567_s8 + $0x400] sm:$0xff]  ;;  %v8370_v45 = vld [vmem:[%s13567_s8 + $0x410] sm:$0xff]  ;;  %v11383_v54 = vpack.c.bf16 %v8387_v8, %v8371_v41  ;;  %v8401_v6 = vld [vmem:[%s13567_s8 + $0x508] sm:$0xff] }
 0xe38   : > { %11314 = vmatpush1.bf16.msra.mxu0 %v11313_v55  ;;  %v8384_v7 = vld [vmem:[%s13567_s8 + $0x480] sm:$0xff]  ;;  %v8386_v28 = vld [vmem:[%s13567_s8 + $0x490] sm:$0xff]  ;;  %v8417_v14 = vld [vmem:[%s13567_s8 + $0x588] sm:$0xff] }
 0xe39   : > { %11378 = vmatpush1.bf16.msra.mxu1 %v11377_v30  ;;  %11316 = vmatprep.subr.bf16.mxu0 %v11315_v1  ;;  %v8403_v56 = vld [vmem:[%s13567_s8 + $0x518] sm:$0xff]  ;;  %v11321_v27 = vpack.c.bf16 %v8384_v7, %v8368_v3  ;;  %v11385_v40 = vpack.c.bf16 %v8386_v28, %v8370_v45  ;;  %v11323_v39 = vpack.c.bf16 %v8417_v14, %v8401_v6  ;;  %v8400_v32 = vld [vmem:[%s13567_s8 + $0x500] sm:$0xff]  ;;  %v8402_v52 = vld [vmem:[%s13567_s8 + $0x510] sm:$0xff] }
 0xe3a   : > { %11380 = vmatprep.subr.bf16.mxu1 %v11379_v9  ;;  %v8419_v42 = vld [vmem:[%s13567_s8 + $0x598] sm:$0xff]  ;;  %v8416_v10 = vld [vmem:[%s13567_s8 + $0x580] sm:$0xff]  ;;  %v8418_v58 = vld [vmem:[%s13567_s8 + $0x590] sm:$0xff] }
 0xe3b   : > { %v11387_v59 = vpack.c.bf16 %v8419_v42, %v8403_v56  ;;  %v8433_v44 = vld [vmem:[%s13567_s8 + $0x608] sm:$0xff]  ;;  %v8435_v62 = vld [vmem:[%s13567_s8 + $0x618] sm:$0xff]  ;;  %v11325_v15 = vpack.c.bf16 %v8416_v10, %v8400_v32  ;;  %v11389_v23 = vpack.c.bf16 %v8418_v58, %v8402_v52  ;;  %v8432_v19 = vld [vmem:[%s13567_s8 + $0x600] sm:$0xff] }
 0xe3c   : > { %11318 = vmatpush1.bf16.msra.mxu0 %v11317_v12  ;;  %v8449_v31 = vld [vmem:[%s13567_s8 + $0x688] sm:$0xff]  ;;  %v8451_v46 = vld [vmem:[%s13567_s8 + $0x698] sm:$0xff]  ;;  %v8448_v2 = vld [vmem:[%s13567_s8 + $0x680] sm:$0xff] }
 0xe3d   : > { %11382 = vmatpush1.bf16.msra.mxu1 %v11381_v0  ;;  %11320 = vmatprep.subr.bf16.mxu0 %v11319_v35  ;;  %v11327_v50 = vpack.c.bf16 %v8449_v31, %v8433_v44  ;;  %v8434_v33 = vld [vmem:[%s13567_s8 + $0x610] sm:$0xff]  ;;  %v11391_v22 = vpack.c.bf16 %v8451_v46, %v8435_v62  ;;  %v8465_v29 = vld [vmem:[%s13567_s8 + $0x708] sm:$0xff]  ;;  %v8467_v60 = vld [vmem:[%s13567_s8 + $0x718] sm:$0xff]  ;;  %v11329_v20 = vpack.c.bf16 %v8448_v2, %v8432_v19 }
 0xe3e   : > { %11384 = vmatprep.subr.bf16.mxu1 %v11383_v54  ;;  %v8450_v26 = vld [vmem:[%s13567_s8 + $0x690] sm:$0xff]  ;;  %v8481_v38 = vld [vmem:[%s13567_s8 + $0x788] sm:$0xff]  ;;  %v8483_v25 = vld [vmem:[%s13567_s8 + $0x798] sm:$0xff] }
 0xe3f   : > { %v11393_v61 = vpack.c.bf16 %v8450_v26, %v8434_v33  ;;  %v11331_v16 = vpack.c.bf16 %v8481_v38, %v8465_v29  ;;  %v8464_v21 = vld [vmem:[%s13567_s8 + $0x700] sm:$0xff]  ;;  %v8466_v37 = vld [vmem:[%s13567_s8 + $0x710] sm:$0xff]  ;;  %v11395_v47 = vpack.c.bf16 %v8483_v25, %v8467_v60  ;;  %v8497_v36 = vld [vmem:[%s13567_s8 + $0x808] sm:$0xff] }
 0xe40   : > { %11322 = vmatpush1.bf16.msra.mxu0 %v11321_v27  ;;  %v8480_v17 = vld [vmem:[%s13567_s8 + $0x780] sm:$0xff]  ;;  %v8482_v18 = vld [vmem:[%s13567_s8 + $0x790] sm:$0xff]  ;;  %v8513_v48 = vld [vmem:[%s13567_s8 + $0x888] sm:$0xff] }
 0xe41   : > { %11386 = vmatpush1.bf16.msra.mxu1 %v11385_v40  ;;  %11324 = vmatprep.subr.bf16.mxu0 %v11323_v39  ;;  %v8499_v5 = vld [vmem:[%s13567_s8 + $0x818] sm:$0xff]  ;;  %v11333_v55 = vpack.c.bf16 %v8480_v17, %v8464_v21  ;;  %v11397_v53 = vpack.c.bf16 %v8482_v18, %v8466_v37  ;;  %v11335_v51 = vpack.c.bf16 %v8513_v48, %v8497_v36  ;;  %v8496_v57 = vld [vmem:[%s13567_s8 + $0x800] sm:$0xff]  ;;  %v8498_v1 = vld [vmem:[%s13567_s8 + $0x810] sm:$0xff] }
 0xe42   : > { %11388 = vmatprep.subr.bf16.mxu1 %v11387_v59  ;;  %v8515_v34 = vld [vmem:[%s13567_s8 + $0x898] sm:$0xff]  ;;  %v8512_v30 = vld [vmem:[%s13567_s8 + $0x880] sm:$0xff]  ;;  %v8514_v11 = vld [vmem:[%s13567_s8 + $0x890] sm:$0xff] }
 0xe43   : > { %v11399_v13 = vpack.c.bf16 %v8515_v34, %v8499_v5  ;;  %v8529_v4 = vld [vmem:[%s13567_s8 + $0x908] sm:$0xff]  ;;  %v8531_v63 = vld [vmem:[%s13567_s8 + $0x918] sm:$0xff]  ;;  %v11337_v49 = vpack.c.bf16 %v8512_v30, %v8496_v57  ;;  %v11401_v43 = vpack.c.bf16 %v8514_v11, %v8498_v1  ;;  %v8528_v8 = vld [vmem:[%s13567_s8 + $0x900] sm:$0xff] }
 0xe44   : > { %11326 = vmatpush1.bf16.msra.mxu0 %v11325_v15  ;;  %v8545_v9 = vld [vmem:[%s13567_s8 + $0x988] sm:$0xff]  ;;  %v8547_v24 = vld [vmem:[%s13567_s8 + $0x998] sm:$0xff]  ;;  %v8544_v12 = vld [vmem:[%s13567_s8 + $0x980] sm:$0xff] }
 0xe45   : > { %11390 = vmatpush1.bf16.msra.mxu1 %v11389_v23  ;;  %11328 = vmatprep.subr.bf16.mxu0 %v11327_v50  ;;  %v11339_v41 = vpack.c.bf16 %v8545_v9, %v8529_v4  ;;  %v8530_v0 = vld [vmem:[%s13567_s8 + $0x910] sm:$0xff]  ;;  %v11403_v35 = vpack.c.bf16 %v8547_v24, %v8531_v63  ;;  %v8561_v7 = vld [vmem:[%s13567_s8 + $0xa08] sm:$0xff]  ;;  %v8563_v54 = vld [vmem:[%s13567_s8 + $0xa18] sm:$0xff]  ;;  %v11341_v6 = vpack.c.bf16 %v8544_v12, %v8528_v8 }
 0xe46   : > { %11392 = vmatprep.subr.bf16.mxu1 %v11391_v22  ;;  %v8546_v3 = vld [vmem:[%s13567_s8 + $0x990] sm:$0xff]  ;;  %v8577_v45 = vld [vmem:[%s13567_s8 + $0xa88] sm:$0xff]  ;;  %v8579_v28 = vld [vmem:[%s13567_s8 + $0xa98] sm:$0xff] }
 0xe47   : > { %v11405_v14 = vpack.c.bf16 %v8546_v3, %v8530_v0  ;;  %v11343_v56 = vpack.c.bf16 %v8577_v45, %v8561_v7  ;;  %v8560_v42 = vld [vmem:[%s13567_s8 + $0xa00] sm:$0xff]  ;;  %v8562_v40 = vld [vmem:[%s13567_s8 + $0xa10] sm:$0xff]  ;;  %v11407_v39 = vpack.c.bf16 %v8579_v28, %v8563_v54  ;;  %v8593_v10 = vld [vmem:[%s13567_s8 + $0xb08] sm:$0xff] }
 0xe48   : > { %11330 = vmatpush1.bf16.msra.mxu0 %v11329_v20  ;;  %v8576_v27 = vld [vmem:[%s13567_s8 + $0xa80] sm:$0xff]  ;;  %v8578_v32 = vld [vmem:[%s13567_s8 + $0xa90] sm:$0xff]  ;;  %v8609_v52 = vld [vmem:[%s13567_s8 + $0xb88] sm:$0xff] }
 0xe49   : > { %11394 = vmatpush1.bf16.msra.mxu1 %v11393_v61  ;;  %11332 = vmatprep.subr.bf16.mxu0 %v11331_v16  ;;  %v8595_v59 = vld [vmem:[%s13567_s8 + $0xb18] sm:$0xff]  ;;  %v11345_v44 = vpack.c.bf16 %v8576_v27, %v8560_v42  ;;  %v8592_v31 = vld [vmem:[%s13567_s8 + $0xb00] sm:$0xff]  ;;  %v11409_v62 = vpack.c.bf16 %v8578_v32, %v8562_v40  ;;  %v11347_v46 = vpack.c.bf16 %v8609_v52, %v8593_v10  ;;  %v8594_v23 = vld [vmem:[%s13567_s8 + $0xb10] sm:$0xff] }
 0xe4a   : > { %11396 = vmatprep.subr.bf16.mxu1 %v11395_v47  ;;  %v8611_v58 = vld [vmem:[%s13567_s8 + $0xb98] sm:$0xff]  ;;  %v8608_v15 = vld [vmem:[%s13567_s8 + $0xb80] sm:$0xff]  ;;  %v8610_v50 = vld [vmem:[%s13567_s8 + $0xb90] sm:$0xff] }
 0xe4b   : > { %v11411_v19 = vpack.c.bf16 %v8611_v58, %v8595_v59  ;;  %v8625_v2 = vld [vmem:[%s13567_s8 + $0xc08] sm:$0xff]  ;;  %v15641_v22 = vld [vmem:[#allocation2] sm:$0xff]  ;;  %v11349_v60 = vpack.c.bf16 %v8608_v15, %v8592_v31  ;;  %v11413_v25 = vpack.c.bf16 %v8610_v50, %v8594_v23  ;;  %v8624_v61 = vld [vmem:[%s13567_s8 + $0xc00] sm:$0xff] }
 0xe4c   : > { %11334 = vmatpush1.bf16.msra.mxu0 %v11333_v55  ;;  %v8641_v33 = vld [vmem:[%s13567_s8 + $0xc88] sm:$0xff]  ;;  %v8627_v26 = vld [vmem:[%s13567_s8 + $0xc18] sm:$0xff]  ;;  %v15647_v38 = vcombine.high %v15641_v22, %v15641_v22  ;;  %v8640_v16 = vld [vmem:[%s13567_s8 + $0xc80] sm:$0xff] }
 0xe4d   : > { %11398 = vmatpush1.bf16.msra.mxu1 %v11397_v53  ;;  %11336 = vmatprep.subr.bf16.mxu0 %v11335_v51  ;;  %v8643_v29 = vld [vmem:[%s13567_s8 + $0xc98] sm:$0xff]  ;;  %v11351_v20 = vpack.c.bf16 %v8641_v33, %v8625_v2  ;;  %v8626_v21 = vld [vmem:[%s13567_s8 + $0xc10] sm:$0xff]  ;;  %v8657_v47 = vld [vmem:[%s13567_s8 + $0xd08] sm:$0xff]  ;;  %v11353_v5 = vpack.c.bf16 %v8640_v16, %v8624_v61 }
 0xe4e   : > { %11400 = vmatprep.subr.bf16.mxu1 %v11399_v13  ;;  %v11415_v17 = vpack.c.bf16 %v8643_v29, %v8627_v26  ;;  %v8642_v37 = vld [vmem:[%s13567_s8 + $0xc90] sm:$0xff]  ;;  %v8673_v18 = vld [vmem:[%s13567_s8 + $0xd88] sm:$0xff]  ;;  %8819 = vmatprep.mubr.f32.mxu0 %v15647_v38  ;;  %v8659_v36 = vld [vmem:[%s13567_s8 + $0xd18] sm:$0xff] }
 0xe4f   : > { %v8675_v48 = vld [vmem:[%s13567_s8 + $0xd98] sm:$0xff]  ;;  %8890 = vmatprep.mubr.f32.mxu1 %v15647_v38  ;;  %v11417_v34 = vpack.c.bf16 %v8642_v37, %v8626_v21  ;;  %v11355_v55 = vpack.c.bf16 %v8673_v18, %v8657_v47  ;;  %v8656_v53 = vld [vmem:[%s13567_s8 + $0xd00] sm:$0xff]  ;;  %v8658_v57 = vld [vmem:[%s13567_s8 + $0xd10] sm:$0xff] }
 0xe50   : > { %11338 = vmatpush1.bf16.msra.mxu0 %v11337_v49  ;;  %v8672_v51 = vld [vmem:[%s13567_s8 + $0xd80] sm:$0xff]  ;;  %v11419_v30 = vpack.c.bf16 %v8675_v48, %v8659_v36  ;;  %v8674_v1 = vld [vmem:[%s13567_s8 + $0xd90] sm:$0xff]  ;;  %v8689_v13 = vld [vmem:[%s13567_s8 + $0xe08] sm:$0xff] }
 0xe51   : > { %11402 = vmatpush1.bf16.msra.mxu1 %v11401_v43  ;;  %11340 = vmatprep.subr.bf16.mxu0 %v11339_v41  ;;  %v8705_v11 = vld [vmem:[%s13567_s8 + $0xe88] sm:$0xff]  ;;  %v8691_v4 = vld [vmem:[%s13567_s8 + $0xe18] sm:$0xff]  ;;  %v11357_v63 = vpack.c.bf16 %v8672_v51, %v8656_v53  ;;  %v11421_v24 = vpack.c.bf16 %v8674_v1, %v8658_v57  ;;  %v8688_v43 = vld [vmem:[%s13567_s8 + $0xe00] sm:$0xff] }
 0xe52   : > { %11404 = vmatprep.subr.bf16.mxu1 %v11403_v35  ;;  %v8707_v9 = vld [vmem:[%s13567_s8 + $0xe98] sm:$0xff]  ;;  %v11359_v49 = vpack.c.bf16 %v8705_v11, %v8689_v13  ;;  %v8704_v41 = vld [vmem:[%s13567_s8 + $0xe80] sm:$0xff]  ;;  %v8690_v8 = vld [vmem:[%s13567_s8 + $0xe10] sm:$0xff] }
 0xe53   : > { %v11423_v12 = vpack.c.bf16 %v8707_v9, %v8691_v4  ;;  %v8706_v0 = vld [vmem:[%s13567_s8 + $0xe90] sm:$0xff]  ;;  %v8721_v35 = vld [vmem:[%s13567_s8 + $0xf08] sm:$0xff]  ;;  %v8723_v7 = vld [vmem:[%s13567_s8 + $0xf18] sm:$0xff]  ;;  %v11361_v54 = vpack.c.bf16 %v8704_v41, %v8688_v43 }
 0xe54   : > { %11342 = vmatpush1.bf16.msra.mxu0 %v11341_v6  ;;  %v8737_v3 = vld [vmem:[%s13567_s8 + $0xf88] sm:$0xff]  ;;  %v8739_v45 = vld [vmem:[%s13567_s8 + $0xf98] sm:$0xff]  ;;  %v11425_v28 = vpack.c.bf16 %v8706_v0, %v8690_v8  ;;  %v8722_v42 = vld [vmem:[%s13567_s8 + $0xf10] sm:$0xff] }
 0xe55   : > { %11406 = vmatpush1.bf16.msra.mxu1 %v11405_v14  ;;  %11344 = vmatprep.subr.bf16.mxu0 %v11343_v56  ;;  %v11363_v6 = vpack.c.bf16 %v8737_v3, %v8721_v35  ;;  %v8720_v14 = vld [vmem:[%s13567_s8 + $0xf00] sm:$0xff]  ;;  %v11427_v27 = vpack.c.bf16 %v8739_v45, %v8723_v7  ;;  %v8738_v40 = vld [vmem:[%s13567_s8 + $0xf90] sm:$0xff]  ;;  %v8261_v32 = vld [vmem:[%s13567_s8 + $0xa8] sm:$0xff] }
 0xe56   : > { %11408 = vmatprep.subr.bf16.mxu1 %v11407_v39  ;;  %v8736_v56 = vld [vmem:[%s13567_s8 + $0xf80] sm:$0xff]  ;;  %v8245_v39 = vld [vmem:[%s13567_s8 + $0x28] sm:$0xff]  ;;  %v8247_v10 = vld [vmem:[%s13567_s8 + $0x38] sm:$0xff]  ;;  %v11429_v58 = vpack.c.bf16 %v8738_v40, %v8722_v42 }
 0xe57   : > { %v8263_v52 = vld [vmem:[%s13567_s8 + $0xb8] sm:$0xff]  ;;  %v11365_v59 = vpack.c.bf16 %v8736_v56, %v8720_v14  ;;  %v8244_v31 = vld [vmem:[%s13567_s8 + $0x20] sm:$0xff]  ;;  %v8262_v23 = vld [vmem:[%s13567_s8 + $0xb0] sm:$0xff] }
 0xe58   : > { %11346 = vmatpush1.bf16.msra.mxu0 %v11345_v44  ;;  %v11431_v44 = vpack.c.bf16 %v8261_v32, %v8245_v39  ;;  %v11495_v15 = vpack.c.bf16 %v8263_v52, %v8247_v10  ;;  %v8277_v50 = vld [vmem:[%s13567_s8 + $0x128] sm:$0xff]  ;;  %v8279_v2 = vld [vmem:[%s13567_s8 + $0x138] sm:$0xff]  ;;  %v8278_v61 = vld [vmem:[%s13567_s8 + $0x130] sm:$0xff] }
 0xe59   : > { %11410 = vmatpush1.bf16.msra.mxu1 %v11409_v62  ;;  %11348 = vmatprep.subr.bf16.mxu0 %v11347_v46  ;;  %v8260_v62 = vld [vmem:[%s13567_s8 + $0xa0] sm:$0xff]  ;;  %v8246_v46 = vld [vmem:[%s13567_s8 + $0x30] sm:$0xff]  ;;  %v8295_v33 = vld [vmem:[%s13567_s8 + $0x1b8] sm:$0xff] }
 0xe5a   : > { %11412 = vmatprep.subr.bf16.mxu1 %v11411_v19  ;;  %v8293_v19 = vld [vmem:[%s13567_s8 + $0x1a8] sm:$0xff]  ;;  %v11433_v26 = vpack.c.bf16 %v8260_v62, %v8244_v31  ;;  %v11497_v29 = vpack.c.bf16 %v8262_v23, %v8246_v46  ;;  %v11499_v16 = vpack.c.bf16 %v8295_v33, %v8279_v2  ;;  %v8294_v21 = vld [vmem:[%s13567_s8 + $0x1b0] sm:$0xff]  ;;  %v8311_v47 = vld [vmem:[%s13567_s8 + $0x238] sm:$0xff] }
 0xe5b   : > { %v8325_v37 = vld [vmem:[%s13567_s8 + $0x2a8] sm:$0xff]  ;;  %v8327_v18 = vld [vmem:[%s13567_s8 + $0x2b8] sm:$0xff]  ;;  %v11501_v48 = vpack.c.bf16 %v8294_v21, %v8278_v61  ;;  %v8310_v53 = vld [vmem:[%s13567_s8 + $0x230] sm:$0xff] }
 0xe5c   : > { %11350 = vmatpush1.bf16.msra.mxu0 %v11349_v60  ;;  %v11435_v60 = vpack.c.bf16 %v8293_v19, %v8277_v50  ;;  %v11503_v51 = vpack.c.bf16 %v8327_v18, %v8311_v47  ;;  %v8326_v57 = vld [vmem:[%s13567_s8 + $0x2b0] sm:$0xff]  ;;  %v8357_v1 = vld [vmem:[%s13567_s8 + $0x3a8] sm:$0xff]  ;;  %v8343_v13 = vld [vmem:[%s13567_s8 + $0x338] sm:$0xff] }
 0xe5d   : > { %11414 = vmatpush1.bf16.msra.mxu1 %v11413_v25  ;;  %11352 = vmatprep.subr.bf16.mxu0 %v11351_v20  ;;  %v8276_v25 = vld [vmem:[%s13567_s8 + $0x120] sm:$0xff]  ;;  %v8359_v11 = vld [vmem:[%s13567_s8 + $0x3b8] sm:$0xff]  ;;  %v11505_v9 = vpack.c.bf16 %v8326_v57, %v8310_v53  ;;  %v8342_v43 = vld [vmem:[%s13567_s8 + $0x330] sm:$0xff] }
 0xe5e   : > { %11416 = vmatprep.subr.bf16.mxu1 %v11415_v17  ;;  %v8292_v20 = vld [vmem:[%s13567_s8 + $0x1a0] sm:$0xff]  ;;  %v8309_v17 = vld [vmem:[%s13567_s8 + $0x228] sm:$0xff]  ;;  %v11507_v41 = vpack.c.bf16 %v8359_v11, %v8343_v13  ;;  %v8358_v8 = vld [vmem:[%s13567_s8 + $0x3b0] sm:$0xff] }
 0xe5f   : > { %v11437_v36 = vpack.c.bf16 %v8292_v20, %v8276_v25  ;;  %v8389_v0 = vld [vmem:[%s13567_s8 + $0x4a8] sm:$0xff]  ;;  %v8375_v35 = vld [vmem:[%s13567_s8 + $0x438] sm:$0xff]  ;;  %v11509_v45 = vpack.c.bf16 %v8358_v8, %v8342_v43  ;;  %v8374_v14 = vld [vmem:[%s13567_s8 + $0x430] sm:$0xff] }
 0xe60   : > { %11354 = vmatpush1.bf16.msra.mxu0 %v11353_v5  ;;  %v11439_v5 = vpack.c.bf16 %v8325_v37, %v8309_v17  ;;  %v8391_v3 = vld [vmem:[%s13567_s8 + $0x4b8] sm:$0xff]  ;;  %v8390_v42 = vld [vmem:[%s13567_s8 + $0x4b0] sm:$0xff]  ;;  %v8421_v40 = vld [vmem:[%s13567_s8 + $0x5a8] sm:$0xff] }
 0xe61   : > { %11418 = vmatpush1.bf16.msra.mxu1 %v11417_v34  ;;  %11356 = vmatprep.subr.bf16.mxu0 %v11355_v55  ;;  %v8308_v34 = vld [vmem:[%s13567_s8 + $0x220] sm:$0xff]  ;;  %v11511_v56 = vpack.c.bf16 %v8391_v3, %v8375_v35  ;;  %v8407_v39 = vld [vmem:[%s13567_s8 + $0x538] sm:$0xff]  ;;  %v11513_v52 = vpack.c.bf16 %v8390_v42, %v8374_v14  ;;  %v8406_v31 = vld [vmem:[%s13567_s8 + $0x530] sm:$0xff] }
 0xe62   : > { %11420 = vmatprep.subr.bf16.mxu1 %v11419_v30  ;;  %v8324_v55 = vld [vmem:[%s13567_s8 + $0x2a0] sm:$0xff]  ;;  %v8341_v30 = vld [vmem:[%s13567_s8 + $0x328] sm:$0xff]  ;;  %v8423_v32 = vld [vmem:[%s13567_s8 + $0x5b8] sm:$0xff] }
 0xe63   : > { %v11441_v4 = vpack.c.bf16 %v8324_v55, %v8308_v34  ;;  %v11515_v62 = vpack.c.bf16 %v8423_v32, %v8407_v39  ;;  %v8422_v46 = vld [vmem:[%s13567_s8 + $0x5b0] sm:$0xff]  ;;  %v8453_v23 = vld [vmem:[%s13567_s8 + $0x6a8] sm:$0xff]  ;;  %v8439_v50 = vld [vmem:[%s13567_s8 + $0x638] sm:$0xff] }
 0xe64   : > { %11358 = vmatpush1.bf16.msra.mxu0 %v11357_v63  ;;  %v11443_v63 = vpack.c.bf16 %v8357_v1, %v8341_v30  ;;  %v8455_v19 = vld [vmem:[%s13567_s8 + $0x6b8] sm:$0xff]  ;;  %v11517_v33 = vpack.c.bf16 %v8422_v46, %v8406_v31  ;;  %v8438_v25 = vld [vmem:[%s13567_s8 + $0x630] sm:$0xff]  ;;  %v8485_v21 = vld [vmem:[%s13567_s8 + $0x7a8] sm:$0xff] }
 0xe65   : > { %11422 = vmatpush1.bf16.msra.mxu1 %v11421_v24  ;;  %11360 = vmatprep.subr.bf16.mxu0 %v11359_v49  ;;  %v8340_v24 = vld [vmem:[%s13567_s8 + $0x320] sm:$0xff]  ;;  %v11519_v20 = vpack.c.bf16 %v8455_v19, %v8439_v50  ;;  %v8454_v61 = vld [vmem:[%s13567_s8 + $0x6b0] sm:$0xff]  ;;  %v8471_v17 = vld [vmem:[%s13567_s8 + $0x738] sm:$0xff] }
 0xe66   : > { %11424 = vmatprep.subr.bf16.mxu1 %v11423_v12  ;;  %v8356_v49 = vld [vmem:[%s13567_s8 + $0x3a0] sm:$0xff]  ;;  %v8373_v12 = vld [vmem:[%s13567_s8 + $0x428] sm:$0xff]  ;;  %v8487_v37 = vld [vmem:[%s13567_s8 + $0x7b8] sm:$0xff]  ;;  %v11521_v18 = vpack.c.bf16 %v8454_v61, %v8438_v25 }
 0xe67   : > { %v11445_v7 = vpack.c.bf16 %v8356_v49, %v8340_v24  ;;  %v8470_v34 = vld [vmem:[%s13567_s8 + $0x730] sm:$0xff]  ;;  %v11523_v55 = vpack.c.bf16 %v8487_v37, %v8471_v17  ;;  %v8517_v57 = vld [vmem:[%s13567_s8 + $0x8a8] sm:$0xff]  ;;  %v8503_v30 = vld [vmem:[%s13567_s8 + $0x838] sm:$0xff] }
 0xe68   : > { %11362 = vmatpush1.bf16.msra.mxu0 %v11361_v54  ;;  %v11447_v54 = vpack.c.bf16 %v8389_v0, %v8373_v12  ;;  %v8486_v53 = vld [vmem:[%s13567_s8 + $0x7b0] sm:$0xff]  ;;  %v8519_v1 = vld [vmem:[%s13567_s8 + $0x8b8] sm:$0xff]  ;;  %v8549_v8 = vld [vmem:[%s13567_s8 + $0x9a8] sm:$0xff] }
 0xe69   : > { %11426 = vmatpush1.bf16.msra.mxu1 %v11425_v28  ;;  %11364 = vmatprep.subr.bf16.mxu0 %v11363_v6  ;;  %v8372_v28 = vld [vmem:[%s13567_s8 + $0x420] sm:$0xff]  ;;  %v11525_v11 = vpack.c.bf16 %v8486_v53, %v8470_v34  ;;  %v8502_v24 = vld [vmem:[%s13567_s8 + $0x830] sm:$0xff]  ;;  %v11527_v49 = vpack.c.bf16 %v8519_v1, %v8503_v30  ;;  %v8535_v12 = vld [vmem:[%s13567_s8 + $0x938] sm:$0xff] }
 0xe6a   : > { %11428 = vmatprep.subr.bf16.mxu1 %v11427_v27  ;;  %v8388_v6 = vld [vmem:[%s13567_s8 + $0x4a0] sm:$0xff]  ;;  %v8405_v27 = vld [vmem:[%s13567_s8 + $0x528] sm:$0xff]  ;;  %v8518_v43 = vld [vmem:[%s13567_s8 + $0x8b0] sm:$0xff] }
 0xe6b   : > { %v11449_v10 = vpack.c.bf16 %v8388_v6, %v8372_v28  ;;  %v8551_v0 = vld [vmem:[%s13567_s8 + $0x9b8] sm:$0xff]  ;;  %v11529_v3 = vpack.c.bf16 %v8518_v43, %v8502_v24  ;;  %v8534_v28 = vld [vmem:[%s13567_s8 + $0x930] sm:$0xff]  ;;  %v8581_v42 = vld [vmem:[%s13567_s8 + $0xaa8] sm:$0xff] }
 0xe6c   : > { %11366 = vmatpush1.bf16.msra.mxu0 %v11365_v59  ;;  %v11451_v59 = vpack.c.bf16 %v8421_v40, %v8405_v27  ;;  %v11531_v6 = vpack.c.bf16 %v8551_v0, %v8535_v12  ;;  %v8550_v14 = vld [vmem:[%s13567_s8 + $0x9b0] sm:$0xff]  ;;  %v8567_v27 = vld [vmem:[%s13567_s8 + $0xa38] sm:$0xff]  ;;  %v8613_v46 = vld [vmem:[%s13567_s8 + $0xba8] sm:$0xff] }
 0xe6d   : > { %11430 = vmatpush1.bf16.msra.mxu1 %v11429_v58  ;;  %11432 = vmatprep.subr.bf16.mxu0 %v11431_v44  ;;  %v8404_v58 = vld [vmem:[%s13567_s8 + $0x520] sm:$0xff]  ;;  %v8583_v40 = vld [vmem:[%s13567_s8 + $0xab8] sm:$0xff]  ;;  %v11533_v32 = vpack.c.bf16 %v8550_v14, %v8534_v28  ;;  %v8582_v31 = vld [vmem:[%s13567_s8 + $0xab0] sm:$0xff] }
 0xe6e   : > { %11496 = vmatprep.subr.bf16.mxu1 %v11495_v15  ;;  %v8420_v44 = vld [vmem:[%s13567_s8 + $0x5a0] sm:$0xff]  ;;  %v8437_v15 = vld [vmem:[%s13567_s8 + $0x628] sm:$0xff]  ;;  %v8614_v25 = vld [vmem:[%s13567_s8 + $0xbb0] sm:$0xff] }
 0xe6f   : > { %8820 = vmatmul.mubr.f32.vlgmr.msra.gmra.mrb[0].mxu0 %v15641_v22  ;;  %v11453_v2 = vpack.c.bf16 %v8420_v44, %v8404_v58  ;;  %v8566_v58 = vld [vmem:[%s13567_s8 + $0xa30] sm:$0xff]  ;;  %v11535_v44 = vpack.c.bf16 %v8583_v40, %v8567_v27  ;;  %v8645_v61 = vld [vmem:[%s13567_s8 + $0xca8] sm:$0xff] }
 0xe70   : > { %8891 = vmatmul.mubr.f32.vlgmr.msra.gmra.mrb[0].mxu1 %v15641_v22  ;;  %11434 = vmatpush1.bf16.msra.mxu0 %v11433_v26  ;;  %v11455_v26 = vpack.c.bf16 %v8453_v23, %v8437_v15  ;;  %v8599_v15 = vld [vmem:[%s13567_s8 + $0xb38] sm:$0xff]  ;;  %v11537_v19 = vpack.c.bf16 %v8582_v31, %v8566_v58  ;;  %v8646_v34 = vld [vmem:[%s13567_s8 + $0xcb0] sm:$0xff]  ;;  %v8677_v53 = vld [vmem:[%s13567_s8 + $0xda8] sm:$0xff] }
 0xe71   : > { %11498 = vmatpush1.bf16.msra.mxu1 %v11497_v29  ;;  %11436 = vmatprep.subr.bf16.mxu0 %v11435_v60  ;;  %v8436_v29 = vld [vmem:[%s13567_s8 + $0x620] sm:$0xff]  ;;  %v8615_v23 = vld [vmem:[%s13567_s8 + $0xbb8] sm:$0xff]  ;;  %v8678_v24 = vld [vmem:[%s13567_s8 + $0xdb0] sm:$0xff] }
 0xe72   : > { %11500 = vmatprep.subr.bf16.mxu1 %v11499_v16  ;;  %8961 = vmatprep.mubr.f32.mxu0 %v15647_v38  ;;  %v8452_v60 = vld [vmem:[%s13567_s8 + $0x6a0] sm:$0xff]  ;;  %v8469_v16 = vld [vmem:[%s13567_s8 + $0x728] sm:$0xff]  ;;  %v8710_v28 = vld [vmem:[%s13567_s8 + $0xeb0] sm:$0xff] }
 0xe73   : > { %9032 = vmatprep.mubr.f32.mxu1 %v15647_v38  ;;  %v11457_v47 = vpack.c.bf16 %v8452_v60, %v8436_v29  ;;  %v8598_v29 = vld [vmem:[%s13567_s8 + $0xb30] sm:$0xff]  ;;  %v11539_v60 = vpack.c.bf16 %v8615_v23, %v8599_v15  ;;  %v8709_v43 = vld [vmem:[%s13567_s8 + $0xea8] sm:$0xff] }
 0xe74   : > { %11438 = vmatpush1.bf16.msra.mxu0 %v11437_v36  ;;  %v11459_v36 = vpack.c.bf16 %v8485_v21, %v8469_v16  ;;  %v8631_v16 = vld [vmem:[%s13567_s8 + $0xc38] sm:$0xff]  ;;  %v11541_v37 = vpack.c.bf16 %v8614_v25, %v8598_v29  ;;  %v8741_v14 = vld [vmem:[%s13567_s8 + $0xfa8] sm:$0xff]  ;;  %v8742_v58 = vld [vmem:[%s13567_s8 + $0xfb0] sm:$0xff] }
 0xe75   : > { %11502 = vmatpush1.bf16.msra.mxu1 %v11501_v48  ;;  %11440 = vmatprep.subr.bf16.mxu0 %v11439_v5  ;;  %v8468_v48 = vld [vmem:[%s13567_s8 + $0x720] sm:$0xff]  ;;  %v8647_v21 = vld [vmem:[%s13567_s8 + $0xcb8] sm:$0xff]  ;;  %v8265_v31 = vld [vmem:[%s13567_s8 + $0xc8] sm:$0xff] }
 0xe76   : > { %11504 = vmatprep.subr.bf16.mxu1 %v11503_v51  ;;  %v8484_v5 = vld [vmem:[%s13567_s8 + $0x7a0] sm:$0xff]  ;;  %v8501_v51 = vld [vmem:[%s13567_s8 + $0x828] sm:$0xff]  ;;  %v8266_v29 = vld [vmem:[%s13567_s8 + $0xd0] sm:$0xff] }
 0xe77   : > { %v11461_v13 = vpack.c.bf16 %v8484_v5, %v8468_v48  ;;  %v8630_v48 = vld [vmem:[%s13567_s8 + $0xc30] sm:$0xff]  ;;  %v11543_v5 = vpack.c.bf16 %v8647_v21, %v8631_v16  ;;  %v8297_v25 = vld [vmem:[%s13567_s8 + $0x1c8] sm:$0xff] }
 0xe78   : > { %11442 = vmatpush1.bf16.msra.mxu0 %v11441_v4  ;;  %v11463_v4 = vpack.c.bf16 %v8517_v57, %v8501_v51  ;;  %v8663_v51 = vld [vmem:[%s13567_s8 + $0xd38] sm:$0xff]  ;;  %v11545_v1 = vpack.c.bf16 %v8646_v34, %v8630_v48  ;;  %v8298_v48 = vld [vmem:[%s13567_s8 + $0x1d0] sm:$0xff]  ;;  %v8329_v34 = vld [vmem:[%s13567_s8 + $0x2c8] sm:$0xff] }
 0xe79   : > { %11506 = vmatpush1.bf16.msra.mxu1 %v11505_v9  ;;  %11444 = vmatprep.subr.bf16.mxu0 %v11443_v63  ;;  %v8500_v9 = vld [vmem:[%s13567_s8 + $0x820] sm:$0xff]  ;;  %v8679_v57 = vld [vmem:[%s13567_s8 + $0xdb8] sm:$0xff] }
 0xe7a   : > { %11508 = vmatprep.subr.bf16.mxu1 %v11507_v41  ;;  %v8516_v63 = vld [vmem:[%s13567_s8 + $0x8a0] sm:$0xff]  ;;  %v8533_v41 = vld [vmem:[%s13567_s8 + $0x928] sm:$0xff] }
 0xe7b   : > { %v11465_v35 = vpack.c.bf16 %v8516_v63, %v8500_v9  ;;  %v8662_v9 = vld [vmem:[%s13567_s8 + $0xd30] sm:$0xff]  ;;  %v11547_v63 = vpack.c.bf16 %v8679_v57, %v8663_v51 }
 0xe7c   : > { %11446 = vmatpush1.bf16.msra.mxu0 %v11445_v7  ;;  %v11467_v7 = vpack.c.bf16 %v8549_v8, %v8533_v41  ;;  %v8695_v41 = vld [vmem:[%s13567_s8 + $0xe38] sm:$0xff]  ;;  %v11549_v0 = vpack.c.bf16 %v8678_v24, %v8662_v9  ;;  %v8330_v9 = vld [vmem:[%s13567_s8 + $0x2d0] sm:$0xff]  ;;  %v8361_v24 = vld [vmem:[%s13567_s8 + $0x3c8] sm:$0xff] }
 0xe7d   : > { %11510 = vmatpush1.bf16.msra.mxu1 %v11509_v45  ;;  %11448 = vmatprep.subr.bf16.mxu0 %v11447_v54  ;;  %v8532_v45 = vld [vmem:[%s13567_s8 + $0x920] sm:$0xff]  ;;  %v8711_v8 = vld [vmem:[%s13567_s8 + $0xeb8] sm:$0xff] }
 0xe7e   : > { %11512 = vmatprep.subr.bf16.mxu1 %v11511_v56  ;;  %v8548_v54 = vld [vmem:[%s13567_s8 + $0x9a0] sm:$0xff]  ;;  %v8565_v56 = vld [vmem:[%s13567_s8 + $0xa28] sm:$0xff] }
 0xe7f   : > { %v11469_v39 = vpack.c.bf16 %v8548_v54, %v8532_v45  ;;  %v8694_v45 = vld [vmem:[%s13567_s8 + $0xe30] sm:$0xff]  ;;  %v11551_v54 = vpack.c.bf16 %v8711_v8, %v8695_v41 }
 0xe80   : > { %11450 = vmatpush1.bf16.msra.mxu0 %v11449_v10  ;;  %v11471_v10 = vpack.c.bf16 %v8581_v42, %v8565_v56  ;;  %v8727_v56 = vld [vmem:[%s13567_s8 + $0xf38] sm:$0xff]  ;;  %v11553_v40 = vpack.c.bf16 %v8710_v28, %v8694_v45  ;;  %v8377_v45 = vld [vmem:[%s13567_s8 + $0x448] sm:$0xff] }
 0xe81   : > { %11514 = vmatpush1.bf16.msra.mxu1 %v11513_v52  ;;  %11452 = vmatprep.subr.bf16.mxu0 %v11451_v59  ;;  %v8564_v52 = vld [vmem:[%s13567_s8 + $0xa20] sm:$0xff]  ;;  %v8743_v42 = vld [vmem:[%s13567_s8 + $0xfb8] sm:$0xff] }
 0xe82   : > { %11516 = vmatprep.subr.bf16.mxu1 %v11515_v62  ;;  %v8580_v59 = vld [vmem:[%s13567_s8 + $0xaa0] sm:$0xff]  ;;  %v8597_v62 = vld [vmem:[%s13567_s8 + $0xb28] sm:$0xff]  ;;  %v8379_v28 = vld [vmem:[%s13567_s8 + $0x458] sm:$0xff] }
 0xe83   : > { %v11473_v50 = vpack.c.bf16 %v8580_v59, %v8564_v52  ;;  %v8726_v52 = vld [vmem:[%s13567_s8 + $0xf30] sm:$0xff]  ;;  %v11555_v59 = vpack.c.bf16 %v8743_v42, %v8727_v56 }
 0xe84   : > { %11454 = vmatpush1.bf16.msra.mxu0 %v11453_v2  ;;  %v11475_v2 = vpack.c.bf16 %v8613_v46, %v8597_v62  ;;  %v8251_v62 = vld [vmem:[%s13567_s8 + $0x58] sm:$0xff]  ;;  %v11557_v23 = vpack.c.bf16 %v8742_v58, %v8726_v52  ;;  %v8409_v52 = vld [vmem:[%s13567_s8 + $0x548] sm:$0xff] }
 0xe85   : > { %11518 = vmatpush1.bf16.msra.mxu1 %v11517_v33  ;;  %11456 = vmatprep.subr.bf16.mxu0 %v11455_v26  ;;  %v8596_v33 = vld [vmem:[%s13567_s8 + $0xb20] sm:$0xff]  ;;  %v8267_v46 = vld [vmem:[%s13567_s8 + $0xd8] sm:$0xff] }
 0xe86   : > { %11520 = vmatprep.subr.bf16.mxu1 %v11519_v20  ;;  %v8612_v26 = vld [vmem:[%s13567_s8 + $0xba0] sm:$0xff]  ;;  %v8629_v20 = vld [vmem:[%s13567_s8 + $0xc28] sm:$0xff]  ;;  %v8411_v58 = vld [vmem:[%s13567_s8 + $0x558] sm:$0xff] }
 0xe87   : > { %v11477_v17 = vpack.c.bf16 %v8612_v26, %v8596_v33  ;;  %v8250_v33 = vld [vmem:[%s13567_s8 + $0x50] sm:$0xff]  ;;  %v11623_v26 = vpack.c.bf16 %v8267_v46, %v8251_v62 }
 0xe88   : > { %11458 = vmatpush1.bf16.msra.mxu0 %v11457_v47  ;;  %v11479_v47 = vpack.c.bf16 %v8645_v61, %v8629_v20  ;;  %v8283_v20 = vld [vmem:[%s13567_s8 + $0x158] sm:$0xff]  ;;  %v11625_v21 = vpack.c.bf16 %v8266_v29, %v8250_v33  ;;  %v8441_v33 = vld [vmem:[%s13567_s8 + $0x648] sm:$0xff] }
 0xe89   : > { %11522 = vmatpush1.bf16.msra.mxu1 %v11521_v18  ;;  %11460 = vmatprep.subr.bf16.mxu0 %v11459_v36  ;;  %v8628_v18 = vld [vmem:[%s13567_s8 + $0xc20] sm:$0xff]  ;;  %v8299_v61 = vld [vmem:[%s13567_s8 + $0x1d8] sm:$0xff] }
 0xe8a   : > { %11524 = vmatprep.subr.bf16.mxu1 %v11523_v55  ;;  %v8644_v36 = vld [vmem:[%s13567_s8 + $0xca0] sm:$0xff]  ;;  %v8661_v55 = vld [vmem:[%s13567_s8 + $0xd28] sm:$0xff]  ;;  %v8443_v29 = vld [vmem:[%s13567_s8 + $0x658] sm:$0xff] }
 0xe8b   : > { %v11481_v30 = vpack.c.bf16 %v8644_v36, %v8628_v18  ;;  %v8282_v18 = vld [vmem:[%s13567_s8 + $0x150] sm:$0xff]  ;;  %v11627_v36 = vpack.c.bf16 %v8299_v61, %v8283_v20 }
 0xe8c   : > { %11462 = vmatpush1.bf16.msra.mxu0 %v11461_v13  ;;  %v11483_v13 = vpack.c.bf16 %v8677_v53, %v8661_v55  ;;  %v8315_v55 = vld [vmem:[%s13567_s8 + $0x258] sm:$0xff]  ;;  %v11629_v57 = vpack.c.bf16 %v8298_v48, %v8282_v18  ;;  %v8473_v18 = vld [vmem:[%s13567_s8 + $0x748] sm:$0xff] }
 0xe8d   : > { %11526 = vmatpush1.bf16.msra.mxu1 %v11525_v11  ;;  %11464 = vmatprep.subr.bf16.mxu0 %v11463_v4  ;;  %v8660_v11 = vld [vmem:[%s13567_s8 + $0xd20] sm:$0xff]  ;;  %v8331_v53 = vld [vmem:[%s13567_s8 + $0x2d8] sm:$0xff] }
 0xe8e   : > { %11528 = vmatprep.subr.bf16.mxu1 %v11527_v49  ;;  %v8676_v4 = vld [vmem:[%s13567_s8 + $0xda0] sm:$0xff]  ;;  %v8693_v49 = vld [vmem:[%s13567_s8 + $0xe28] sm:$0xff]  ;;  %v8475_v48 = vld [vmem:[%s13567_s8 + $0x758] sm:$0xff] }
 0xe8f   : > { %v11485_v12 = vpack.c.bf16 %v8676_v4, %v8660_v11  ;;  %v8314_v11 = vld [vmem:[%s13567_s8 + $0x250] sm:$0xff]  ;;  %v11631_v4 = vpack.c.bf16 %v8331_v53, %v8315_v55 }
 0xe90   : > { %11466 = vmatpush1.bf16.msra.mxu0 %v11465_v35  ;;  %v11487_v35 = vpack.c.bf16 %v8709_v43, %v8693_v49  ;;  %v8363_v49 = vld [vmem:[%s13567_s8 + $0x3d8] sm:$0xff]  ;;  %v11633_v41 = vpack.c.bf16 %v8330_v9, %v8314_v11  ;;  %v8505_v11 = vld [vmem:[%s13567_s8 + $0x848] sm:$0xff] }
 0xe91   : > { %11530 = vmatpush1.bf16.msra.mxu1 %v11529_v3  ;;  %11468 = vmatprep.subr.bf16.mxu0 %v11467_v7  ;;  %v8692_v3 = vld [vmem:[%s13567_s8 + $0xe20] sm:$0xff]  ;;  %v8507_v9 = vld [vmem:[%s13567_s8 + $0x858] sm:$0xff] }
 0xe92   : > { %11532 = vmatprep.subr.bf16.mxu1 %v11531_v6  ;;  %v8708_v7 = vld [vmem:[%s13567_s8 + $0xea0] sm:$0xff]  ;;  %v8725_v6 = vld [vmem:[%s13567_s8 + $0xf28] sm:$0xff] }
 0xe93   : > { %v11489_v27 = vpack.c.bf16 %v8708_v7, %v8692_v3  ;;  %v8362_v7 = vld [vmem:[%s13567_s8 + $0x3d0] sm:$0xff] }
 0xe94   : > { %11470 = vmatpush1.bf16.msra.mxu0 %v11469_v39  ;;  %v11491_v39 = vpack.c.bf16 %v8741_v14, %v8725_v6  ;;  %v8395_v6 = vld [vmem:[%s13567_s8 + $0x4d8] sm:$0xff] }
 0xe95   : > { %11534 = vmatpush1.bf16.msra.mxu1 %v11533_v32  ;;  %11472 = vmatprep.subr.bf16.mxu0 %v11471_v10  ;;  %v8724_v32 = vld [vmem:[%s13567_s8 + $0xf20] sm:$0xff] }
 0xe96   : > { %11536 = vmatprep.subr.bf16.mxu1 %v11535_v44  ;;  %v8740_v10 = vld [vmem:[%s13567_s8 + $0xfa0] sm:$0xff]  ;;  %v8249_v44 = vld [vmem:[%s13567_s8 + $0x48] sm:$0xff] }
 0xe97   : > { %v11493_v15 = vpack.c.bf16 %v8740_v10, %v8724_v32  ;;  %v11639_v32 = vpack.c.bf16 %v8395_v6, %v8379_v28  ;;  %v8394_v10 = vld [vmem:[%s13567_s8 + $0x4d0] sm:$0xff] }
 0xe98   : > { %11474 = vmatpush1.bf16.msra.mxu0 %v11473_v50  ;;  %v11559_v50 = vpack.c.bf16 %v8265_v31, %v8249_v44  ;;  %v8427_v44 = vld [vmem:[%s13567_s8 + $0x5d8] sm:$0xff] }
 0xe99   : > { %11538 = vmatpush1.bf16.msra.mxu1 %v11537_v19  ;;  %11476 = vmatprep.subr.bf16.mxu0 %v11475_v2  ;;  %v8248_v19 = vld [vmem:[%s13567_s8 + $0x40] sm:$0xff] }
 0xe9a   : > { %11540 = vmatprep.subr.bf16.mxu1 %v11539_v60  ;;  %v8264_v2 = vld [vmem:[%s13567_s8 + $0xc0] sm:$0xff]  ;;  %v8281_v60 = vld [vmem:[%s13567_s8 + $0x148] sm:$0xff] }
 0xe9b   : > { %v11561_v16 = vpack.c.bf16 %v8264_v2, %v8248_v19  ;;  %v11643_v19 = vpack.c.bf16 %v8427_v44, %v8411_v58  ;;  %v8426_v2 = vld [vmem:[%s13567_s8 + $0x5d0] sm:$0xff] }
 0xe9c   : > { %11478 = vmatpush1.bf16.msra.mxu0 %v11477_v17  ;;  %v11563_v17 = vpack.c.bf16 %v8297_v25, %v8281_v60  ;;  %v8459_v60 = vld [vmem:[%s13567_s8 + $0x6d8] sm:$0xff] }
 0xe9d   : > { %11542 = vmatpush1.bf16.msra.mxu1 %v11541_v37  ;;  %11480 = vmatprep.subr.bf16.mxu0 %v11479_v47  ;;  %v8280_v37 = vld [vmem:[%s13567_s8 + $0x140] sm:$0xff] }
 0xe9e   : > { %11544 = vmatprep.subr.bf16.mxu1 %v11543_v5  ;;  %v8296_v47 = vld [vmem:[%s13567_s8 + $0x1c0] sm:$0xff]  ;;  %v8313_v5 = vld [vmem:[%s13567_s8 + $0x248] sm:$0xff] }
 0xe9f   : > { %v11565_v51 = vpack.c.bf16 %v8296_v47, %v8280_v37  ;;  %v11647_v37 = vpack.c.bf16 %v8459_v60, %v8443_v29  ;;  %v8458_v47 = vld [vmem:[%s13567_s8 + $0x6d0] sm:$0xff] }
 0xea0   : > { %11482 = vmatpush1.bf16.msra.mxu0 %v11481_v30  ;;  %v11567_v30 = vpack.c.bf16 %v8329_v34, %v8313_v5  ;;  %v8491_v5 = vld [vmem:[%s13567_s8 + $0x7d8] sm:$0xff] }
 0xea1   : > { %11546 = vmatpush1.bf16.msra.mxu1 %v11545_v1  ;;  %11484 = vmatprep.subr.bf16.mxu0 %v11483_v13  ;;  %v8312_v1 = vld [vmem:[%s13567_s8 + $0x240] sm:$0xff] }
 0xea2   : > { %11548 = vmatprep.subr.bf16.mxu1 %v11547_v63  ;;  %v8328_v13 = vld [vmem:[%s13567_s8 + $0x2c0] sm:$0xff]  ;;  %v8345_v63 = vld [vmem:[%s13567_s8 + $0x348] sm:$0xff] }
 0xea3   : > { %v11569_v43 = vpack.c.bf16 %v8328_v13, %v8312_v1  ;;  %v11571_v8 = vpack.c.bf16 %v8361_v24, %v8345_v63  ;;  %v11651_v1 = vpack.c.bf16 %v8491_v5, %v8475_v48  ;;  %v8490_v13 = vld [vmem:[%s13567_s8 + $0x7d0] sm:$0xff]  ;;  %v8523_v63 = vld [vmem:[%s13567_s8 + $0x8d8] sm:$0xff] }
 0xea4   : > { %11486 = vmatpush1.bf16.msra.mxu0 %v11485_v12  ;;  %v8344_v12 = vld [vmem:[%s13567_s8 + $0x340] sm:$0xff] }
 0xea5   : > { %11550 = vmatpush1.bf16.msra.mxu1 %v11549_v0  ;;  %11488 = vmatprep.subr.bf16.mxu0 %v11487_v35  ;;  %v8360_v0 = vld [vmem:[%s13567_s8 + $0x3c0] sm:$0xff]  ;;  %v8346_v35 = vld [vmem:[%s13567_s8 + $0x350] sm:$0xff] }
 0xea6   : > { %11552 = vmatprep.subr.bf16.mxu1 %v11551_v54  ;;  %v8393_v54 = vld [vmem:[%s13567_s8 + $0x4c8] sm:$0xff]  ;;  %v11573_v14 = vpack.c.bf16 %v8360_v0, %v8344_v12  ;;  %v11637_v56 = vpack.c.bf16 %v8362_v7, %v8346_v35  ;;  %v11655_v12 = vpack.c.bf16 %v8523_v63, %v8507_v9  ;;  %v8522_v0 = vld [vmem:[%s13567_s8 + $0x8d0] sm:$0xff]  ;;  %v8539_v7 = vld [vmem:[%s13567_s8 + $0x958] sm:$0xff] }
 0xea7   : > { %v11575_v42 = vpack.c.bf16 %v8393_v54, %v8377_v45  ;;  %v8537_v35 = vld [vmem:[%s13567_s8 + $0x948] sm:$0xff]  ;;  %v8555_v45 = vld [vmem:[%s13567_s8 + $0x9d8] sm:$0xff] }
 0xea8   : > { %11490 = vmatpush1.bf16.msra.mxu0 %v11489_v27  ;;  %v8376_v27 = vld [vmem:[%s13567_s8 + $0x440] sm:$0xff] }
 0xea9   : > { %11554 = vmatpush1.bf16.msra.mxu1 %v11553_v40  ;;  %11492 = vmatprep.subr.bf16.mxu0 %v11491_v39  ;;  %v8392_v40 = vld [vmem:[%s13567_s8 + $0x4c0] sm:$0xff]  ;;  %v8378_v39 = vld [vmem:[%s13567_s8 + $0x450] sm:$0xff] }
 0xeaa   : > { %11556 = vmatprep.subr.bf16.mxu1 %v11555_v59  ;;  %v8425_v59 = vld [vmem:[%s13567_s8 + $0x5c8] sm:$0xff]  ;;  %v11577_v31 = vpack.c.bf16 %v8392_v40, %v8376_v27  ;;  %v11641_v62 = vpack.c.bf16 %v8394_v10, %v8378_v39  ;;  %v11659_v27 = vpack.c.bf16 %v8555_v45, %v8539_v7  ;;  %v8554_v40 = vld [vmem:[%s13567_s8 + $0x9d0] sm:$0xff]  ;;  %v8571_v10 = vld [vmem:[%s13567_s8 + $0xa58] sm:$0xff] }
 0xeab   : > { %v11579_v46 = vpack.c.bf16 %v8425_v59, %v8409_v52  ;;  %v8569_v39 = vld [vmem:[%s13567_s8 + $0xa48] sm:$0xff]  ;;  %v8587_v52 = vld [vmem:[%s13567_s8 + $0xad8] sm:$0xff] }
 0xeac   : > { %11494 = vmatpush1.bf16.msra.mxu0 %v11493_v15  ;;  %v8408_v15 = vld [vmem:[%s13567_s8 + $0x540] sm:$0xff] }
 0xead   : > { %11558 = vmatpush1.bf16.msra.mxu1 %v11557_v23  ;;  %11560 = vmatprep.subr.bf16.mxu0 %v11559_v50  ;;  %v8424_v23 = vld [vmem:[%s13567_s8 + $0x5c0] sm:$0xff]  ;;  %v8410_v50 = vld [vmem:[%s13567_s8 + $0x550] sm:$0xff] }
 0xeae   : > { %11624 = vmatprep.subr.bf16.mxu1 %v11623_v26  ;;  %v8457_v26 = vld [vmem:[%s13567_s8 + $0x6c8] sm:$0xff]  ;;  %v11581_v25 = vpack.c.bf16 %v8424_v23, %v8408_v15  ;;  %v11645_v20 = vpack.c.bf16 %v8426_v2, %v8410_v50  ;;  %v11663_v15 = vpack.c.bf16 %v8587_v52, %v8571_v10  ;;  %v8586_v23 = vld [vmem:[%s13567_s8 + $0xad0] sm:$0xff]  ;;  %v8603_v2 = vld [vmem:[%s13567_s8 + $0xb58] sm:$0xff] }
 0xeaf   : > { %8962 = vmatmul.mubr.f32.vlgmr.msra.gmra.mrb[2].mxu0 %v15641_v22  ;;  %v11583_v61 = vpack.c.bf16 %v8457_v26, %v8441_v33  ;;  %v8601_v50 = vld [vmem:[%s13567_s8 + $0xb48] sm:$0xff]  ;;  %v8619_v33 = vld [vmem:[%s13567_s8 + $0xbd8] sm:$0xff] }
 0xeb0   : > { %9033 = vmatmul.mubr.f32.vlgmr.msra.gmra.mrb[2].mxu1 %v15641_v22  ;;  %11562 = vmatpush1.bf16.msra.mxu0 %v11561_v16  ;;  %v8347_v22 = vld [vmem:[%s13567_s8 + $0x358] sm:$0xff]  ;;  %v8440_v16 = vld [vmem:[%s13567_s8 + $0x640] sm:$0xff] }
 0xeb1   : > { %11626 = vmatpush1.bf16.msra.mxu1 %v11625_v21  ;;  %11564 = vmatprep.subr.bf16.mxu0 %v11563_v17  ;;  %v11635_v3 = vpack.c.bf16 %v8363_v49, %v8347_v22  ;;  %v8456_v21 = vld [vmem:[%s13567_s8 + $0x6c0] sm:$0xff]  ;;  %v8442_v17 = vld [vmem:[%s13567_s8 + $0x650] sm:$0xff] }
 0xeb2   : > { %11628 = vmatprep.subr.bf16.mxu1 %v11627_v36  ;;  %9103 = vmatprep.mubr.f32.mxu0 %v15647_v38  ;;  %v8489_v36 = vld [vmem:[%s13567_s8 + $0x7c8] sm:$0xff]  ;;  %v11585_v34 = vpack.c.bf16 %v8456_v21, %v8440_v16  ;;  %v11649_v55 = vpack.c.bf16 %v8458_v47, %v8442_v17  ;;  %v11667_v16 = vpack.c.bf16 %v8619_v33, %v8603_v2  ;;  %v8618_v21 = vld [vmem:[%s13567_s8 + $0xbd0] sm:$0xff]  ;;  %v8635_v47 = vld [vmem:[%s13567_s8 + $0xc58] sm:$0xff] }
 0xeb3   : > { %9174 = vmatprep.mubr.f32.mxu1 %v15647_v38  ;;  %v11587_v53 = vpack.c.bf16 %v8489_v36, %v8473_v18  ;;  %v8633_v17 = vld [vmem:[%s13567_s8 + $0xc48] sm:$0xff]  ;;  %v8651_v18 = vld [vmem:[%s13567_s8 + $0xcd8] sm:$0xff] }
 0xeb4   : > { %11566 = vmatpush1.bf16.msra.mxu0 %v11565_v51  ;;  %v8472_v51 = vld [vmem:[%s13567_s8 + $0x740] sm:$0xff] }
 0xeb5   : > { %11630 = vmatpush1.bf16.msra.mxu1 %v11629_v57  ;;  %11568 = vmatprep.subr.bf16.mxu0 %v11567_v30  ;;  %v8488_v57 = vld [vmem:[%s13567_s8 + $0x7c0] sm:$0xff]  ;;  %v8474_v30 = vld [vmem:[%s13567_s8 + $0x750] sm:$0xff] }
 0xeb6   : > { %11632 = vmatprep.subr.bf16.mxu1 %v11631_v4  ;;  %v8521_v4 = vld [vmem:[%s13567_s8 + $0x8c8] sm:$0xff]  ;;  %v11589_v24 = vpack.c.bf16 %v8488_v57, %v8472_v51  ;;  %v11653_v22 = vpack.c.bf16 %v8490_v13, %v8474_v30  ;;  %v11671_v51 = vpack.c.bf16 %v8651_v18, %v8635_v47  ;;  %v8650_v57 = vld [vmem:[%s13567_s8 + $0xcd0] sm:$0xff]  ;;  %v8667_v13 = vld [vmem:[%s13567_s8 + $0xd58] sm:$0xff] }
 0xeb7   : > { %v11591_v49 = vpack.c.bf16 %v8521_v4, %v8505_v11  ;;  %v8665_v30 = vld [vmem:[%s13567_s8 + $0xd48] sm:$0xff]  ;;  %v8683_v11 = vld [vmem:[%s13567_s8 + $0xdd8] sm:$0xff] }
 0xeb8   : > { %11570 = vmatpush1.bf16.msra.mxu0 %v11569_v43  ;;  %v8504_v43 = vld [vmem:[%s13567_s8 + $0x840] sm:$0xff] }
 0xeb9   : > { %11634 = vmatpush1.bf16.msra.mxu1 %v11633_v41  ;;  %11572 = vmatprep.subr.bf16.mxu0 %v11571_v8  ;;  %v8520_v41 = vld [vmem:[%s13567_s8 + $0x8c0] sm:$0xff]  ;;  %v8506_v8 = vld [vmem:[%s13567_s8 + $0x850] sm:$0xff] }
 0xeba   : > { %11636 = vmatprep.subr.bf16.mxu1 %v11635_v3  ;;  %v8553_v3 = vld [vmem:[%s13567_s8 + $0x9c8] sm:$0xff]  ;;  %v11593_v54 = vpack.c.bf16 %v8520_v41, %v8504_v43  ;;  %v11657_v28 = vpack.c.bf16 %v8522_v0, %v8506_v8  ;;  %v11675_v43 = vpack.c.bf16 %v8683_v11, %v8667_v13  ;;  %v8682_v41 = vld [vmem:[%s13567_s8 + $0xdd0] sm:$0xff]  ;;  %v8699_v0 = vld [vmem:[%s13567_s8 + $0xe58] sm:$0xff] }
 0xebb   : > { %v11595_v6 = vpack.c.bf16 %v8553_v3, %v8537_v35  ;;  %v8697_v8 = vld [vmem:[%s13567_s8 + $0xe48] sm:$0xff]  ;;  %v8715_v35 = vld [vmem:[%s13567_s8 + $0xed8] sm:$0xff] }
 0xebc   : > { %11574 = vmatpush1.bf16.msra.mxu0 %v11573_v14  ;;  %v8536_v14 = vld [vmem:[%s13567_s8 + $0x940] sm:$0xff] }
 0xebd   : > { %11638 = vmatpush1.bf16.msra.mxu1 %v11637_v56  ;;  %11576 = vmatprep.subr.bf16.mxu0 %v11575_v42  ;;  %v8552_v56 = vld [vmem:[%s13567_s8 + $0x9c0] sm:$0xff]  ;;  %v8538_v42 = vld [vmem:[%s13567_s8 + $0x950] sm:$0xff] }
 0xebe   : > { %11640 = vmatprep.subr.bf16.mxu1 %v11639_v32  ;;  %v8585_v32 = vld [vmem:[%s13567_s8 + $0xac8] sm:$0xff]  ;;  %v11597_v59 = vpack.c.bf16 %v8552_v56, %v8536_v14  ;;  %v11661_v58 = vpack.c.bf16 %v8554_v40, %v8538_v42  ;;  %v11679_v14 = vpack.c.bf16 %v8715_v35, %v8699_v0  ;;  %v8714_v56 = vld [vmem:[%s13567_s8 + $0xed0] sm:$0xff]  ;;  %v8731_v40 = vld [vmem:[%s13567_s8 + $0xf58] sm:$0xff] }
 0xebf   : > { %v11599_v44 = vpack.c.bf16 %v8585_v32, %v8569_v39  ;;  %v8729_v42 = vld [vmem:[%s13567_s8 + $0xf48] sm:$0xff]  ;;  %v8747_v39 = vld [vmem:[%s13567_s8 + $0xfd8] sm:$0xff] }
 0xec0   : > { %11578 = vmatpush1.bf16.msra.mxu0 %v11577_v31  ;;  %v8568_v31 = vld [vmem:[%s13567_s8 + $0xa40] sm:$0xff] }
 0xec1   : > { %11642 = vmatpush1.bf16.msra.mxu1 %v11641_v62  ;;  %11580 = vmatprep.subr.bf16.mxu0 %v11579_v46  ;;  %v8584_v62 = vld [vmem:[%s13567_s8 + $0xac0] sm:$0xff]  ;;  %v8570_v46 = vld [vmem:[%s13567_s8 + $0xa50] sm:$0xff] }
 0xec2   : > { %11644 = vmatprep.subr.bf16.mxu1 %v11643_v19  ;;  %v8617_v19 = vld [vmem:[%s13567_s8 + $0xbc8] sm:$0xff]  ;;  %v11601_v26 = vpack.c.bf16 %v8584_v62, %v8568_v31  ;;  %v11665_v29 = vpack.c.bf16 %v8586_v23, %v8570_v46  ;;  %v11683_v31 = vpack.c.bf16 %v8747_v39, %v8731_v40  ;;  %v8746_v62 = vld [vmem:[%s13567_s8 + $0xfd0] sm:$0xff]  ;;  %v8255_v23 = vld [vmem:[%s13567_s8 + $0x78] sm:$0xff] }
 0xec3   : > { %v11603_v60 = vpack.c.bf16 %v8617_v19, %v8601_v50  ;;  %v8253_v46 = vld [vmem:[%s13567_s8 + $0x68] sm:$0xff]  ;;  %v8271_v50 = vld [vmem:[%s13567_s8 + $0xf8] sm:$0xff] }
 0xec4   : > { %11582 = vmatpush1.bf16.msra.mxu0 %v11581_v25  ;;  %v8600_v25 = vld [vmem:[%s13567_s8 + $0xb40] sm:$0xff] }
 0xec5   : > { %11646 = vmatpush1.bf16.msra.mxu1 %v11645_v20  ;;  %11584 = vmatprep.subr.bf16.mxu0 %v11583_v61  ;;  %v8616_v20 = vld [vmem:[%s13567_s8 + $0xbc0] sm:$0xff]  ;;  %v8602_v61 = vld [vmem:[%s13567_s8 + $0xb50] sm:$0xff] }
 0xec6   : > { %11648 = vmatprep.subr.bf16.mxu1 %v11647_v37  ;;  %v8649_v37 = vld [vmem:[%s13567_s8 + $0xcc8] sm:$0xff]  ;;  %v11605_v36 = vpack.c.bf16 %v8616_v20, %v8600_v25  ;;  %v11669_v48 = vpack.c.bf16 %v8618_v21, %v8602_v61  ;;  %v11751_v25 = vpack.c.bf16 %v8271_v50, %v8255_v23  ;;  %v8270_v20 = vld [vmem:[%s13567_s8 + $0xf0] sm:$0xff]  ;;  %v8287_v21 = vld [vmem:[%s13567_s8 + $0x178] sm:$0xff] }
 0xec7   : > { %v11607_v5 = vpack.c.bf16 %v8649_v37, %v8633_v17  ;;  %v8285_v61 = vld [vmem:[%s13567_s8 + $0x168] sm:$0xff]  ;;  %v8303_v17 = vld [vmem:[%s13567_s8 + $0x1f8] sm:$0xff] }
 0xec8   : > { %11586 = vmatpush1.bf16.msra.mxu0 %v11585_v34  ;;  %v8632_v34 = vld [vmem:[%s13567_s8 + $0xc40] sm:$0xff] }
 0xec9   : > { %11650 = vmatpush1.bf16.msra.mxu1 %v11649_v55  ;;  %11588 = vmatprep.subr.bf16.mxu0 %v11587_v53  ;;  %v8648_v55 = vld [vmem:[%s13567_s8 + $0xcc0] sm:$0xff]  ;;  %v8634_v53 = vld [vmem:[%s13567_s8 + $0xc50] sm:$0xff] }
 0xeca   : > { %11652 = vmatprep.subr.bf16.mxu1 %v11651_v1  ;;  %v8681_v1 = vld [vmem:[%s13567_s8 + $0xdc8] sm:$0xff]  ;;  %v11609_v4 = vpack.c.bf16 %v8648_v55, %v8632_v34  ;;  %v11673_v9 = vpack.c.bf16 %v8650_v57, %v8634_v53  ;;  %v11755_v34 = vpack.c.bf16 %v8303_v17, %v8287_v21  ;;  %v8302_v55 = vld [vmem:[%s13567_s8 + $0x1f0] sm:$0xff]  ;;  %v15961_v57 = vld [vmem:[#allocation2] sm:$0xff] }
 0xecb   : > { %v11611_v63 = vpack.c.bf16 %v8681_v1, %v8665_v30  ;;  %v8317_v53 = vld [vmem:[%s13567_s8 + $0x268] sm:$0xff]  ;;  %v8319_v30 = vld [vmem:[%s13567_s8 + $0x278] sm:$0xff] }
 0xecc   : > { %11590 = vmatpush1.bf16.msra.mxu0 %v11589_v24  ;;  %v8664_v24 = vld [vmem:[%s13567_s8 + $0xd40] sm:$0xff]  ;;  %v8335_v1 = vld [vmem:[%s13567_s8 + $0x2f8] sm:$0xff] }
 0xecd   : > { %11654 = vmatpush1.bf16.msra.mxu1 %v11653_v22  ;;  %11592 = vmatprep.subr.bf16.mxu0 %v11591_v49  ;;  %v8680_v22 = vld [vmem:[%s13567_s8 + $0xdc0] sm:$0xff]  ;;  %v8666_v49 = vld [vmem:[%s13567_s8 + $0xd50] sm:$0xff] }
 0xece   : > { %11656 = vmatprep.subr.bf16.mxu1 %v11655_v12  ;;  %v8713_v12 = vld [vmem:[%s13567_s8 + $0xec8] sm:$0xff]  ;;  %v11613_v3 = vpack.c.bf16 %v8680_v22, %v8664_v24  ;;  %v11677_v7 = vpack.c.bf16 %v8682_v41, %v8666_v49  ;;  %v8318_v24 = vld [vmem:[%s13567_s8 + $0x270] sm:$0xff]  ;;  %v11759_v22 = vpack.c.bf16 %v8335_v1, %v8319_v30 }
 0xecf   : > { %v11615_v45 = vpack.c.bf16 %v8713_v12, %v8697_v8  ;;  %v8334_v49 = vld [vmem:[%s13567_s8 + $0x2f0] sm:$0xff]  ;;  %v8365_v41 = vld [vmem:[%s13567_s8 + $0x3e8] sm:$0xff]  ;;  %v8351_v8 = vld [vmem:[%s13567_s8 + $0x378] sm:$0xff] }
 0xed0   : > { %11594 = vmatpush1.bf16.msra.mxu0 %v11593_v54  ;;  %v8696_v54 = vld [vmem:[%s13567_s8 + $0xe40] sm:$0xff]  ;;  %v8367_v12 = vld [vmem:[%s13567_s8 + $0x3f8] sm:$0xff]  ;;  %v11761_v35 = vpack.c.bf16 %v8334_v49, %v8318_v24  ;;  %v8509_v24 = vld [vmem:[%s13567_s8 + $0x868] sm:$0xff] }
 0xed1   : > { %11658 = vmatpush1.bf16.msra.mxu1 %v11657_v28  ;;  %11596 = vmatprep.subr.bf16.mxu0 %v11595_v6  ;;  %v8712_v28 = vld [vmem:[%s13567_s8 + $0xec0] sm:$0xff]  ;;  %v8698_v6 = vld [vmem:[%s13567_s8 + $0xe50] sm:$0xff]  ;;  %v8511_v49 = vld [vmem:[%s13567_s8 + $0x878] sm:$0xff] }
 0xed2   : > { %11660 = vmatprep.subr.bf16.mxu1 %v11659_v27  ;;  %v8745_v27 = vld [vmem:[%s13567_s8 + $0xfc8] sm:$0xff]  ;;  %v11617_v32 = vpack.c.bf16 %v8712_v28, %v8696_v54  ;;  %v11681_v10 = vpack.c.bf16 %v8714_v56, %v8698_v6  ;;  %v8350_v54 = vld [vmem:[%s13567_s8 + $0x370] sm:$0xff]  ;;  %v11763_v28 = vpack.c.bf16 %v8367_v12, %v8351_v8  ;;  %v8383_v56 = vld [vmem:[%s13567_s8 + $0x478] sm:$0xff] }
 0xed3   : > { %v11619_v52 = vpack.c.bf16 %v8745_v27, %v8729_v42  ;;  %v8366_v6 = vld [vmem:[%s13567_s8 + $0x3f0] sm:$0xff]  ;;  %v8399_v42 = vld [vmem:[%s13567_s8 + $0x4f8] sm:$0xff] }
 0xed4   : > { %11598 = vmatpush1.bf16.msra.mxu0 %v11597_v59  ;;  %v8728_v59 = vld [vmem:[%s13567_s8 + $0xf40] sm:$0xff]  ;;  %v11765_v40 = vpack.c.bf16 %v8366_v6, %v8350_v54  ;;  %v8541_v54 = vld [vmem:[%s13567_s8 + $0x968] sm:$0xff]  ;;  %v8543_v6 = vld [vmem:[%s13567_s8 + $0x978] sm:$0xff] }
 0xed5   : > { %11662 = vmatpush1.bf16.msra.mxu1 %v11661_v58  ;;  %11600 = vmatprep.subr.bf16.mxu0 %v11599_v44  ;;  %v8744_v58 = vld [vmem:[%s13567_s8 + $0xfc0] sm:$0xff]  ;;  %v8730_v44 = vld [vmem:[%s13567_s8 + $0xf50] sm:$0xff] }
 0xed6   : > { %11664 = vmatprep.subr.bf16.mxu1 %v11663_v15  ;;  %v8269_v15 = vld [vmem:[%s13567_s8 + $0xe8] sm:$0xff]  ;;  %v11621_v19 = vpack.c.bf16 %v8744_v58, %v8728_v59  ;;  %v11685_v2 = vpack.c.bf16 %v8746_v62, %v8730_v44  ;;  %v11767_v59 = vpack.c.bf16 %v8399_v42, %v8383_v56  ;;  %v8398_v58 = vld [vmem:[%s13567_s8 + $0x4f0] sm:$0xff]  ;;  %v8415_v62 = vld [vmem:[%s13567_s8 + $0x578] sm:$0xff] }
 0xed7   : > { %v11687_v33 = vpack.c.bf16 %v8269_v15, %v8253_v46  ;;  %v8413_v44 = vld [vmem:[%s13567_s8 + $0x568] sm:$0xff]  ;;  %v8431_v46 = vld [vmem:[%s13567_s8 + $0x5f8] sm:$0xff] }
 0xed8   : > { %11602 = vmatpush1.bf16.msra.mxu0 %v11601_v26  ;;  %v8252_v26 = vld [vmem:[%s13567_s8 + $0x60] sm:$0xff] }
 0xed9   : > { %11666 = vmatpush1.bf16.msra.mxu1 %v11665_v29  ;;  %11604 = vmatprep.subr.bf16.mxu0 %v11603_v60  ;;  %v8268_v29 = vld [vmem:[%s13567_s8 + $0xe0] sm:$0xff]  ;;  %v8254_v60 = vld [vmem:[%s13567_s8 + $0x70] sm:$0xff] }
 0xeda   : > { %11668 = vmatprep.subr.bf16.mxu1 %v11667_v16  ;;  %v8301_v16 = vld [vmem:[%s13567_s8 + $0x1e8] sm:$0xff]  ;;  %v11689_v37 = vpack.c.bf16 %v8268_v29, %v8252_v26  ;;  %v11753_v47 = vpack.c.bf16 %v8270_v20, %v8254_v60  ;;  %v11771_v26 = vpack.c.bf16 %v8431_v46, %v8415_v62  ;;  %v8430_v29 = vld [vmem:[%s13567_s8 + $0x5f0] sm:$0xff]  ;;  %v8447_v20 = vld [vmem:[%s13567_s8 + $0x678] sm:$0xff] }
 0xedb   : > { %v11691_v18 = vpack.c.bf16 %v8301_v16, %v8285_v61  ;;  %v8445_v60 = vld [vmem:[%s13567_s8 + $0x668] sm:$0xff]  ;;  %v8463_v61 = vld [vmem:[%s13567_s8 + $0x6f8] sm:$0xff] }
 0xedc   : > { %11606 = vmatpush1.bf16.msra.mxu0 %v11605_v36  ;;  %v8284_v36 = vld [vmem:[%s13567_s8 + $0x160] sm:$0xff] }
 0xedd   : > { %11670 = vmatpush1.bf16.msra.mxu1 %v11669_v48  ;;  %11608 = vmatprep.subr.bf16.mxu0 %v11607_v5  ;;  %v8300_v48 = vld [vmem:[%s13567_s8 + $0x1e0] sm:$0xff]  ;;  %v8286_v5 = vld [vmem:[%s13567_s8 + $0x170] sm:$0xff] }
 0xede   : > { %11672 = vmatprep.subr.bf16.mxu1 %v11671_v51  ;;  %v8333_v51 = vld [vmem:[%s13567_s8 + $0x2e8] sm:$0xff]  ;;  %v11693_v13 = vpack.c.bf16 %v8300_v48, %v8284_v36  ;;  %v11757_v11 = vpack.c.bf16 %v8302_v55, %v8286_v5  ;;  %v11775_v36 = vpack.c.bf16 %v8463_v61, %v8447_v20  ;;  %v8462_v48 = vld [vmem:[%s13567_s8 + $0x6f0] sm:$0xff]  ;;  %v8479_v55 = vld [vmem:[%s13567_s8 + $0x778] sm:$0xff] }
 0xedf   : > { %v8477_v5 = vld [vmem:[%s13567_s8 + $0x768] sm:$0xff] }
 0xee0   : > { %11610 = vmatpush1.bf16.msra.mxu0 %v11609_v4  ;;  %v11695_v4 = vpack.c.bf16 %v8333_v51, %v8317_v53  ;;  %v8495_v53 = vld [vmem:[%s13567_s8 + $0x7f8] sm:$0xff] }
 0xee1   : > { %11674 = vmatpush1.bf16.msra.mxu1 %v11673_v9  ;;  %11612 = vmatprep.subr.bf16.mxu0 %v11611_v63  ;;  %v8316_v9 = vld [vmem:[%s13567_s8 + $0x260] sm:$0xff] }
 0xee2   : > { %11676 = vmatprep.subr.bf16.mxu1 %v11675_v43  ;;  %v8332_v63 = vld [vmem:[%s13567_s8 + $0x2e0] sm:$0xff]  ;;  %v8349_v43 = vld [vmem:[%s13567_s8 + $0x368] sm:$0xff] }
 0xee3   : > { %v11697_v0 = vpack.c.bf16 %v8332_v63, %v8316_v9  ;;  %v11779_v9 = vpack.c.bf16 %v8495_v53, %v8479_v55  ;;  %v8494_v63 = vld [vmem:[%s13567_s8 + $0x7f0] sm:$0xff] }
 0xee4   : > { %11614 = vmatpush1.bf16.msra.mxu0 %v11613_v3  ;;  %v11699_v3 = vpack.c.bf16 %v8365_v41, %v8349_v43  ;;  %v8527_v43 = vld [vmem:[%s13567_s8 + $0x8f8] sm:$0xff] }
 0xee5   : > { %11678 = vmatpush1.bf16.msra.mxu1 %v11677_v7  ;;  %11616 = vmatprep.subr.bf16.mxu0 %v11615_v45  ;;  %v8348_v7 = vld [vmem:[%s13567_s8 + $0x360] sm:$0xff] }
 0xee6   : > { %11680 = vmatprep.subr.bf16.mxu1 %v11679_v14  ;;  %v8364_v45 = vld [vmem:[%s13567_s8 + $0x3e0] sm:$0xff]  ;;  %v8381_v14 = vld [vmem:[%s13567_s8 + $0x468] sm:$0xff] }
 0xee7   : > { %v11701_v27 = vpack.c.bf16 %v8364_v45, %v8348_v7  ;;  %v11783_v7 = vpack.c.bf16 %v8527_v43, %v8511_v49  ;;  %v8526_v45 = vld [vmem:[%s13567_s8 + $0x8f0] sm:$0xff] }
 0xee8   : > { %11618 = vmatpush1.bf16.msra.mxu0 %v11617_v32  ;;  %v8380_v32 = vld [vmem:[%s13567_s8 + $0x460] sm:$0xff] }
 0xee9   : > { %11682 = vmatpush1.bf16.msra.mxu1 %v11681_v10  ;;  %11620 = vmatprep.subr.bf16.mxu0 %v11619_v52  ;;  %v8396_v10 = vld [vmem:[%s13567_s8 + $0x4e0] sm:$0xff]  ;;  %v8382_v52 = vld [vmem:[%s13567_s8 + $0x470] sm:$0xff] }
 0xeea   : > { %11684 = vmatprep.subr.bf16.mxu1 %v11683_v31  ;;  %v8429_v31 = vld [vmem:[%s13567_s8 + $0x5e8] sm:$0xff]  ;;  %v11705_v15 = vpack.c.bf16 %v8396_v10, %v8380_v32  ;;  %v11769_v23 = vpack.c.bf16 %v8398_v58, %v8382_v52  ;;  %v8558_v10 = vld [vmem:[%s13567_s8 + $0x9f0] sm:$0xff]  ;;  %v8575_v58 = vld [vmem:[%s13567_s8 + $0xa78] sm:$0xff] }
 0xeeb   : > { %v11707_v50 = vpack.c.bf16 %v8429_v31, %v8413_v44  ;;  %v8573_v52 = vld [vmem:[%s13567_s8 + $0xa68] sm:$0xff]  ;;  %v8591_v44 = vld [vmem:[%s13567_s8 + $0xaf8] sm:$0xff] }
 0xeec   : > { %11622 = vmatpush1.bf16.msra.mxu0 %v11621_v19  ;;  %v8412_v19 = vld [vmem:[%s13567_s8 + $0x560] sm:$0xff] }
 0xeed   : > { %11686 = vmatpush1.bf16.msra.mxu1 %v11685_v2  ;;  %11688 = vmatprep.subr.bf16.mxu0 %v11687_v33  ;;  %v8428_v2 = vld [vmem:[%s13567_s8 + $0x5e0] sm:$0xff]  ;;  %v8414_v33 = vld [vmem:[%s13567_s8 + $0x570] sm:$0xff] }
 0xeee   : > { %11752 = vmatprep.subr.bf16.mxu1 %v11751_v25  ;;  %v8461_v25 = vld [vmem:[%s13567_s8 + $0x6e8] sm:$0xff]  ;;  %v11709_v16 = vpack.c.bf16 %v8428_v2, %v8412_v19  ;;  %v11773_v21 = vpack.c.bf16 %v8430_v29, %v8414_v33  ;;  %v11791_v19 = vpack.c.bf16 %v8591_v44, %v8575_v58  ;;  %v8590_v2 = vld [vmem:[%s13567_s8 + $0xaf0] sm:$0xff]  ;;  %v8607_v29 = vld [vmem:[%s13567_s8 + $0xb78] sm:$0xff] }
 0xeef   : > { %9104 = vmatmul.mubr.f32.vlgmr.msra.gmra.mrb[4].mxu0 %v15961_v57  ;;  %v11711_v17 = vpack.c.bf16 %v8461_v25, %v8445_v60  ;;  %v8605_v33 = vld [vmem:[%s13567_s8 + $0xb68] sm:$0xff]  ;;  %v8623_v60 = vld [vmem:[%s13567_s8 + $0xbf8] sm:$0xff] }
 0xef0   : > { %9175 = vmatmul.mubr.f32.vlgmr.msra.gmra.mrb[4].mxu1 %v15961_v57  ;;  %11690 = vmatpush1.bf16.msra.mxu0 %v11689_v37  ;;  %v8444_v37 = vld [vmem:[%s13567_s8 + $0x660] sm:$0xff] }
 0xef1   : > { %11754 = vmatpush1.bf16.msra.mxu1 %v11753_v47  ;;  %11692 = vmatprep.subr.bf16.mxu0 %v11691_v18  ;;  %v8460_v47 = vld [vmem:[%s13567_s8 + $0x6e0] sm:$0xff]  ;;  %v8446_v18 = vld [vmem:[%s13567_s8 + $0x670] sm:$0xff] }
 0xef2   : > { %11756 = vmatprep.subr.bf16.mxu1 %v11755_v34  ;;  %9245 = vmatprep.mubr.f32.mxu0 %v15647_v38  ;;  %v8493_v34 = vld [vmem:[%s13567_s8 + $0x7e8] sm:$0xff]  ;;  %v11713_v51 = vpack.c.bf16 %v8460_v47, %v8444_v37  ;;  %v11777_v30 = vpack.c.bf16 %v8462_v48, %v8446_v18  ;;  %v11795_v37 = vpack.c.bf16 %v8623_v60, %v8607_v29  ;;  %v8622_v47 = vld [vmem:[%s13567_s8 + $0xbf0] sm:$0xff]  ;;  %v8639_v48 = vld [vmem:[%s13567_s8 + $0xc78] sm:$0xff] }
 0xef3   : > { %9316 = vmatprep.mubr.f32.mxu1 %v15647_v38  ;;  %v8397_v38 = vld [vmem:[%s13567_s8 + $0x4e8] sm:$0xff]  ;;  %v11715_v1 = vpack.c.bf16 %v8493_v34, %v8477_v5  ;;  %v8655_v5 = vld [vmem:[%s13567_s8 + $0xcf8] sm:$0xff] }
 0xef4   : > { %11694 = vmatpush1.bf16.msra.mxu0 %v11693_v13  ;;  %v11703_v39 = vpack.c.bf16 %v8397_v38, %v8381_v14  ;;  %v8476_v13 = vld [vmem:[%s13567_s8 + $0x760] sm:$0xff]  ;;  %v8559_v14 = vld [vmem:[%s13567_s8 + $0x9f8] sm:$0xff]  ;;  %v8637_v18 = vld [vmem:[%s13567_s8 + $0xc68] sm:$0xff] }
 0xef5   : > { %11758 = vmatpush1.bf16.msra.mxu1 %v11757_v11  ;;  %11696 = vmatprep.subr.bf16.mxu0 %v11695_v4  ;;  %v8492_v11 = vld [vmem:[%s13567_s8 + $0x7e0] sm:$0xff]  ;;  %v8478_v4 = vld [vmem:[%s13567_s8 + $0x770] sm:$0xff]  ;;  %v11787_v32 = vpack.c.bf16 %v8559_v14, %v8543_v6 }
 0xef6   : > { %11760 = vmatprep.subr.bf16.mxu1 %v11759_v22  ;;  %v8525_v22 = vld [vmem:[%s13567_s8 + $0x8e8] sm:$0xff]  ;;  %v11717_v41 = vpack.c.bf16 %v8492_v11, %v8476_v13  ;;  %v11781_v8 = vpack.c.bf16 %v8494_v63, %v8478_v4  ;;  %v11799_v13 = vpack.c.bf16 %v8655_v5, %v8639_v48  ;;  %v8654_v11 = vld [vmem:[%s13567_s8 + $0xcf0] sm:$0xff]  ;;  %v8671_v63 = vld [vmem:[%s13567_s8 + $0xd78] sm:$0xff] }
 0xef7   : > { %v11719_v12 = vpack.c.bf16 %v8525_v22, %v8509_v24  ;;  %v8669_v4 = vld [vmem:[%s13567_s8 + $0xd68] sm:$0xff]  ;;  %v8687_v24 = vld [vmem:[%s13567_s8 + $0xdf8] sm:$0xff] }
 0xef8   : > { %11698 = vmatpush1.bf16.msra.mxu0 %v11697_v0  ;;  %v8508_v0 = vld [vmem:[%s13567_s8 + $0x860] sm:$0xff] }
 0xef9   : > { %11762 = vmatpush1.bf16.msra.mxu1 %v11761_v35  ;;  %11700 = vmatprep.subr.bf16.mxu0 %v11699_v3  ;;  %v8524_v35 = vld [vmem:[%s13567_s8 + $0x8e0] sm:$0xff]  ;;  %v8510_v3 = vld [vmem:[%s13567_s8 + $0x870] sm:$0xff] }
 0xefa   : > { %11764 = vmatprep.subr.bf16.mxu1 %v11763_v28  ;;  %v8557_v28 = vld [vmem:[%s13567_s8 + $0x9e8] sm:$0xff]  ;;  %v11721_v38 = vpack.c.bf16 %v8524_v35, %v8508_v0  ;;  %v11785_v56 = vpack.c.bf16 %v8526_v45, %v8510_v3  ;;  %v11803_v0 = vpack.c.bf16 %v8687_v24, %v8671_v63  ;;  %v8686_v35 = vld [vmem:[%s13567_s8 + $0xdf0] sm:$0xff]  ;;  %v8703_v45 = vld [vmem:[%s13567_s8 + $0xe78] sm:$0xff] }
 0xefb   : > { %v11723_v42 = vpack.c.bf16 %v8557_v28, %v8541_v54  ;;  %v8701_v3 = vld [vmem:[%s13567_s8 + $0xe68] sm:$0xff]  ;;  %v8719_v54 = vld [vmem:[%s13567_s8 + $0xef8] sm:$0xff] }
 0xefc   : > { %11702 = vmatpush1.bf16.msra.mxu0 %v11701_v27  ;;  %v8540_v27 = vld [vmem:[%s13567_s8 + $0x960] sm:$0xff] }
 0xefd   : > { %11766 = vmatpush1.bf16.msra.mxu1 %v11765_v40  ;;  %11704 = vmatprep.subr.bf16.mxu0 %v11703_v39  ;;  %v8556_v40 = vld [vmem:[%s13567_s8 + $0x9e0] sm:$0xff]  ;;  %v8542_v39 = vld [vmem:[%s13567_s8 + $0x970] sm:$0xff] }
 0xefe   : > { %11768 = vmatprep.subr.bf16.mxu1 %v11767_v59  ;;  %v8589_v59 = vld [vmem:[%s13567_s8 + $0xae8] sm:$0xff]  ;;  %v11725_v31 = vpack.c.bf16 %v8556_v40, %v8540_v27  ;;  %v11789_v62 = vpack.c.bf16 %v8558_v10, %v8542_v39  ;;  %v11807_v27 = vpack.c.bf16 %v8719_v54, %v8703_v45  ;;  %v8718_v40 = vld [vmem:[%s13567_s8 + $0xef0] sm:$0xff]  ;;  %v8735_v10 = vld [vmem:[%s13567_s8 + $0xf78] sm:$0xff] }
 0xeff   : > { %v11727_v46 = vpack.c.bf16 %v8589_v59, %v8573_v52  ;;  %v8733_v39 = vld [vmem:[%s13567_s8 + $0xf68] sm:$0xff]  ;;  %v8751_v52 = vld [vmem:[%s13567_s8 + $0xff8] sm:$0xff] }
 0xf00   : > { %11706 = vmatpush1.bf16.msra.mxu0 %v11705_v15  ;;  %v8572_v15 = vld [vmem:[%s13567_s8 + $0xa60] sm:$0xff] }
 0xf01   : > { %11770 = vmatpush1.bf16.msra.mxu1 %v11769_v23  ;;  %11708 = vmatprep.subr.bf16.mxu0 %v11707_v50  ;;  %v8588_v23 = vld [vmem:[%s13567_s8 + $0xae0] sm:$0xff]  ;;  %v8574_v50 = vld [vmem:[%s13567_s8 + $0xa70] sm:$0xff] }
 0xf02   : > { %11772 = vmatprep.subr.bf16.mxu1 %v11771_v26  ;;  %v8621_v26 = vld [vmem:[%s13567_s8 + $0xbe8] sm:$0xff]  ;;  %v11729_v25 = vpack.c.bf16 %v8588_v23, %v8572_v15  ;;  %v11793_v20 = vpack.c.bf16 %v8590_v2, %v8574_v50  ;;  %v8734_v15 = vld [vmem:[%s13567_s8 + $0xf70] sm:$0xff] }
 0xf03   : > { %v11731_v61 = vpack.c.bf16 %v8621_v26, %v8605_v33  ;;  %v8750_v23 = vld [vmem:[%s13567_s8 + $0xff0] sm:$0xff] }
 0xf04   : > { %11710 = vmatpush1.bf16.msra.mxu0 %v11709_v16  ;;  %v8604_v16 = vld [vmem:[%s13567_s8 + $0xb60] sm:$0xff] }
 0xf05   : > { %11774 = vmatpush1.bf16.msra.mxu1 %v11773_v21  ;;  %11712 = vmatprep.subr.bf16.mxu0 %v11711_v17  ;;  %v8620_v21 = vld [vmem:[%s13567_s8 + $0xbe0] sm:$0xff]  ;;  %v8606_v17 = vld [vmem:[%s13567_s8 + $0xb70] sm:$0xff] }
 0xf06   : > { %11776 = vmatprep.subr.bf16.mxu1 %v11775_v36  ;;  %v8653_v36 = vld [vmem:[%s13567_s8 + $0xce8] sm:$0xff]  ;;  %v11733_v34 = vpack.c.bf16 %v8620_v21, %v8604_v16  ;;  %v11797_v55 = vpack.c.bf16 %v8622_v47, %v8606_v17 }
 0xf07   : > { %v11735_v53 = vpack.c.bf16 %v8653_v36, %v8637_v18 }
 0xf08   : > { %11714 = vmatpush1.bf16.msra.mxu0 %v11713_v51  ;;  %v8636_v51 = vld [vmem:[%s13567_s8 + $0xc60] sm:$0xff] }
 0xf09   : > { %11778 = vmatpush1.bf16.msra.mxu1 %v11777_v30  ;;  %11716 = vmatprep.subr.bf16.mxu0 %v11715_v1  ;;  %v8652_v30 = vld [vmem:[%s13567_s8 + $0xce0] sm:$0xff]  ;;  %v8638_v1 = vld [vmem:[%s13567_s8 + $0xc70] sm:$0xff] }
 0xf0a   : > { %11780 = vmatprep.subr.bf16.mxu1 %v11779_v9  ;;  %v8685_v9 = vld [vmem:[%s13567_s8 + $0xde8] sm:$0xff]  ;;  %v11737_v22 = vpack.c.bf16 %v8652_v30, %v8636_v51  ;;  %v11801_v49 = vpack.c.bf16 %v8654_v11, %v8638_v1 }
 0xf0b   : > { %v11739_v43 = vpack.c.bf16 %v8685_v9, %v8669_v4 }
 0xf0c   : > { %11718 = vmatpush1.bf16.msra.mxu0 %v11717_v41  ;;  %v8668_v41 = vld [vmem:[%s13567_s8 + $0xd60] sm:$0xff] }
 0xf0d   : > { %11782 = vmatpush1.bf16.msra.mxu1 %v11781_v8  ;;  %11720 = vmatprep.subr.bf16.mxu0 %v11719_v12  ;;  %v8684_v8 = vld [vmem:[%s13567_s8 + $0xde0] sm:$0xff]  ;;  %v8670_v12 = vld [vmem:[%s13567_s8 + $0xd70] sm:$0xff] }
 0xf0e   : > { %11784 = vmatprep.subr.bf16.mxu1 %v11783_v7  ;;  %v8717_v7 = vld [vmem:[%s13567_s8 + $0xee8] sm:$0xff]  ;;  %v11741_v28 = vpack.c.bf16 %v8684_v8, %v8668_v41  ;;  %v11805_v6 = vpack.c.bf16 %v8686_v35, %v8670_v12 }
 0xf0f   : > { %v11743_v14 = vpack.c.bf16 %v8717_v7, %v8701_v3 }
 0xf10   : > { %11722 = vmatpush1.bf16.msra.mxu0 %v11721_v38  ;;  %v8700_v38 = vld [vmem:[%s13567_s8 + $0xe60] sm:$0xff] }
 0xf11   : > { %11786 = vmatpush1.bf16.msra.mxu1 %v11785_v56  ;;  %11724 = vmatprep.subr.bf16.mxu0 %v11723_v42  ;;  %v8716_v56 = vld [vmem:[%s13567_s8 + $0xee0] sm:$0xff]  ;;  %v8702_v42 = vld [vmem:[%s13567_s8 + $0xe70] sm:$0xff] }
 0xf12   : > { %11788 = vmatprep.subr.bf16.mxu1 %v11787_v32  ;;  %v8749_v32 = vld [vmem:[%s13567_s8 + $0xfe8] sm:$0xff]  ;;  %v11745_v59 = vpack.c.bf16 %v8716_v56, %v8700_v38  ;;  %v11809_v58 = vpack.c.bf16 %v8718_v40, %v8702_v42 }
 0xf13   : > { %v11747_v44 = vpack.c.bf16 %v8749_v32, %v8733_v39 }
 0xf14   : > { %11726 = vmatpush1.bf16.msra.mxu0 %v11725_v31  ;;  %v8732_v31 = vld [vmem:[%s13567_s8 + $0xf60] sm:$0xff] }
 0xf15   : > { %11790 = vmatpush1.bf16.msra.mxu1 %v11789_v62  ;;  %11728 = vmatprep.subr.bf16.mxu0 %v11727_v46  ;;  %v8748_v62 = vld [vmem:[%s13567_s8 + $0xfe0] sm:$0xff]  ;;  %v11811_v46 = vpack.c.bf16 %v8751_v52, %v8735_v10 }
 0xf16   : > { %11792 = vmatprep.subr.bf16.mxu1 %v11791_v19  ;;  %v11749_v50 = vpack.c.bf16 %v8748_v62, %v8732_v31  ;;  %v11813_v19 = vpack.c.bf16 %v8750_v23, %v8734_v15 }
 0xf18   : > { %11730 = vmatpush1.bf16.msra.mxu0 %v11729_v25 }
 0xf19   : > { %11794 = vmatpush1.bf16.msra.mxu1 %v11793_v20  ;;  %11732 = vmatprep.subr.bf16.mxu0 %v11731_v61 }
 0xf1a   : > { %11796 = vmatprep.subr.bf16.mxu1 %v11795_v37 }
 0xf1c   : > { %11734 = vmatpush1.bf16.msra.mxu0 %v11733_v34 }
 0xf1d   : > { %11798 = vmatpush1.bf16.msra.mxu1 %v11797_v55  ;;  %11736 = vmatprep.subr.bf16.mxu0 %v11735_v53 }
 0xf1e   : > { %11800 = vmatprep.subr.bf16.mxu1 %v11799_v13 }
 0xf20   : > { %11738 = vmatpush1.bf16.msra.mxu0 %v11737_v22 }
 0xf21   : > { %11802 = vmatpush1.bf16.msra.mxu1 %v11801_v49  ;;  %11740 = vmatprep.subr.bf16.mxu0 %v11739_v43 }
 0xf22   : > { %11804 = vmatprep.subr.bf16.mxu1 %v11803_v0 }
 0xf24   : > { %11742 = vmatpush1.bf16.msra.mxu0 %v11741_v28 }
 0xf25   : > { %11806 = vmatpush1.bf16.msra.mxu1 %v11805_v6  ;;  %11744 = vmatprep.subr.bf16.mxu0 %v11743_v14 }
 0xf26   : > { %11808 = vmatprep.subr.bf16.mxu1 %v11807_v27 }
 0xf28   : > { %11746 = vmatpush1.bf16.msra.mxu0 %v11745_v59 }
 0xf29   : > { %11810 = vmatpush1.bf16.msra.mxu1 %v11809_v58  ;;  %11748 = vmatprep.subr.bf16.mxu0 %v11747_v44 }
 0xf2a   : > { %11812 = vmatprep.subr.bf16.mxu1 %v11811_v46 }
 0xf2c   : > { %11750 = vmatpush1.bf16.msra.mxu0 %v11749_v50 }
 0xf2d   : > { %11814 = vmatpush1.bf16.msra.mxu1 %v11813_v19 }
 0xf2f   : > { %9246 = vmatmul.mubr.f32.vlgmr.msra.gmra.mrb[6].mxu0 %v15961_v57 }
 0xf30   : > { %9317 = vmatmul.mubr.f32.vlgmr.msra.gmra.mrb[6].mxu1 %v15961_v57 }
 0xf42   : > { %v8821_v2 = vpop.f32.mrb[0].mxu0 }
 0xf43   : > { %v8892_v33 = vpop.f32.mrb[0].mxu1  ;;  %v8823_v26 = vpop.f32.mrb[1].mxu0 }
 0xf44   : > { %v9339_v29 = vcombine.low %v8821_v2, %v8823_v26  ;;  %v8894_v60 = vpop.f32.mrb[1].mxu1 }
 0xf45   : > { %v9340_v25 = vcombine.low %v8892_v33, %v8894_v60 }
 0xf46   : > { %9355 = vst [vmem:[%s13565_s5] sm:$0xff] %v9339_v29 }
 0xf47   : > { %9356 = vst [vmem:[%s13565_s5 + $0x8] sm:$0xff] %v9340_v25 }
 0xf82   : > { %v8963_v20 = vpop.f32.mrb[2].mxu0 }
 0xf83   : > { %v9034_v61 = vpop.f32.mrb[2].mxu1  ;;  %v8965_v16 = vpop.f32.mrb[3].mxu0 }
 0xf84   : > { %v9341_v21 = vcombine.low %v8963_v20, %v8965_v16  ;;  %v9036_v17 = vpop.f32.mrb[3].mxu1 }
 0xf85   : > { %v9342_v37 = vcombine.low %v9034_v61, %v9036_v17 }
 0xf86   : > { %9357 = vst [vmem:[%s13565_s5 + $0x10] sm:$0xff] %v9341_v21 }
 0xf87   : > { %9358 = vst [vmem:[%s13565_s5 + $0x18] sm:$0xff] %v9342_v37 }
 0xfc2   : > { %v9105_v57 = vpop.f32.mrb[4].mxu0 }
 0xfc3   : > { %v9176_v47 = vpop.f32.mrb[4].mxu1  ;;  %v9107_v18 = vpop.f32.mrb[5].mxu0 }
 0xfc4   : > { %v9343_v36 = vcombine.low %v9105_v57, %v9107_v18  ;;  %v9178_v48 = vpop.f32.mrb[5].mxu1 }
 0xfc5   : > { %v9344_v5 = vcombine.low %v9176_v47, %v9178_v48 }
 0xfc6   : > { %9359 = vst [vmem:[%s13565_s5 + $0x20] sm:$0xff] %v9343_v36 }
 0xfc7   : > { %9360 = vst [vmem:[%s13565_s5 + $0x28] sm:$0xff] %v9344_v5 }
0x1002   : > { %v9247_v34 = vpop.f32.mrb[6].mxu0 }
0x1003   : > { %v9318_v55 = vpop.f32.mrb[6].mxu1  ;;  %v9249_v53 = vpop.f32.mrb[7].mxu0 }
0x1004   : > { %v9345_v51 = vcombine.low %v9247_v34, %v9249_v53  ;;  %v9320_v30 = vpop.f32.mrb[7].mxu1 }
0x1005   : > { %v9346_v1 = vcombine.low %v9318_v55, %v9320_v30 }
0x1006   : > { %9361 = vst [vmem:[%s13565_s5 + $0x30] sm:$0xff] %v9345_v51 }
0x1007   : > { %9362 = vst [vmem:[%s13565_s5 + $0x38] sm:$0xff] %v9346_v1 }
0x1008 PF: > { %s16329_s8 = sld [smem:[#allocation8_spill]]  ;;  %s16331_s5 = sld [smem:[#allocation11_spill]] }
0x1009   : > { %s16332_s9 = sld [smem:[#allocation6_spill]]  ;;  %s16333_s30 = sld [smem:[#allocation7_spill]] }
0x100a   : > { %s16334_s3 = sld [smem:[#allocation9_spill]]  ;;  %s16335_s6 = sld [smem:[#allocation10_spill]] }
0x100e   : > { %s38_s10 = sadd.s32 1, %s16329_s8   ;;  %s16330_s8 = sld [smem:[#allocation5_spill]] }
0x100f   : > { %p35_p13 = scmp.ge.s32.totalorder %s38_s10, 6  }
0x1011   :  { %37 = sbr.rel (!%p35_p13) target bundleno = 22 (0x16), region = 215 }

</bundles_post_ra>
